<compile_context>
chip_gen: v6e
topology: v6e:2x2x1
jax: 0.10.0
libtpu: 0.0.40
codegen_flags: <defaults>
</compile_context>

<pallas_src>
import functools

import jax
import jax.numpy as jnp
from jax.experimental import pallas as pl
from jax.experimental.pallas import tpu as pltpu

EPS = 1e-5
LANE = 128     # channel padding target (lane width)


# ------------------------------- small helpers ------------------------------ #

def _round_up(n, m):
    return ((n + m - 1) // m) * m


def _pad_axis(a, axis, target):
    pad = target - a.shape[axis]
    if pad == 0:
        return a
    widths = [(0, 0)] * a.ndim
    widths[axis] = (0, pad)
    return jnp.pad(a, widths)


def _geometry(H, W):
    """Row-padded flat layout geometry.

    Image pixel (h, w) lives at flat row  base + h*Wr + w  (Wr = W+1); the single
    zero column at the end of each row is the shared left/right conv halo, the
    [0, base) front band and the [base+L, flat) tail band are the top/bottom halos.
    """
    Wr = W + 1
    L = H * Wr
    base = _round_up(Wr + 1, 8)                    # 8-aligned, >= Wr+1 front guard
    flat = _round_up(base + (H + 1) * Wr + 1, 8)   # covers all shifted-tap reads
    return Wr, L, base, flat


# ------------------------------ in-kernel helpers --------------------------- #

def _conv3x3_flat(src_ref, w_ref, base, Wr, L):
    """3x3 'SAME' conv in the row-padded flat layout via 9 shifted matmuls.

    src_ref : 2-D (flat, Cin) bf16 ref; guard/halo rows hold zeros.
    w_ref   : (3, 3, Cin, Cout) bf16 weight ref (resident).
    returns : (L, Cout) f32; the per-row halo-column positions hold garbage that
              downstream consumers mask / slice out.
    """
    cout = w_ref.shape[-1]
    acc = jnp.zeros((L, cout), jnp.float32)
    for dh in range(3):
        for dw in range(3):
            s = base + (dh - 1) * Wr + (dw - 1)          # static Python offset
            acc = acc + jnp.dot(src_ref[pl.ds(s, L), :], w_ref[dh, dw],
                                preferred_element_type=jnp.float32)
    return acc


def _masked_stats(v, mask, inv_count):
    """Per-channel (sum, centered M2) over the valid (mask==1) rows of v."""
    vm = v * mask
    s = jnp.sum(vm, axis=0, keepdims=True)               # (1, C)
    mean = s * inv_count
    d = (v - mean) * mask
    m2 = jnp.sum(d * d, axis=0, keepdims=True)           # (1, C)
    return jnp.concatenate([s, m2], axis=0)              # (2, C)


# ---------------------------------- kernels --------------------------------- #

def _pass1_kernel(x_ref, w1_ref, ws_ref, mask_ref,
                  c1_ref, sc_ref, st1_ref, sts_ref,
                  *, base, Wr, L, inv_count):
    # conv1 (3x3) + shortcut 1x1 conv (computed once, reused in pass 3) + stats
    mask = mask_ref[...]                                   # (L, 1) f32
    c1 = _conv3x3_flat(x_ref, w1_ref, base, Wr, L)         # (L, Co) f32
    c1_ref[...] = c1.astype(jnp.bfloat16)
    st1_ref[...] = _masked_stats(c1, mask, inv_count)
    sc = jnp.dot(x_ref[pl.ds(base, L), :], ws_ref[...],
                 preferred_element_type=jnp.float32)       # (L, Co) f32
    sc_ref[...] = sc.astype(jnp.bfloat16)
    sts_ref[...] = _masked_stats(sc, mask, inv_count)


def _pass2_kernel(c1_ref, w2_ref, scale1_ref, shift1_ref, mask_ref, a1_ref,
                  c2_ref, st2_ref, pad_ref,
                  *, base, Wr, L, tail, inv_count):
    # BN1 (folded scale/shift) + PReLU1 + conv2 (3x3) + stats
    mask = mask_ref[...]
    y = c1_ref[...].astype(jnp.float32) * scale1_ref[...] + shift1_ref[...]
    a1 = a1_ref[0, 0]                                      # SMEM scalar slope
    y = jnp.where(y >= 0, y, a1 * y) * mask                # mask re-zeros halo cols
    # cheap per-step guard-band zeroing (keeps the grid axis safely "parallel")
    pad_ref[pl.ds(0, base), :] = jnp.zeros((base, pad_ref.shape[-1]), jnp.bfloat16)
    pad_ref[pl.ds(base + L, tail), :] = jnp.zeros((tail, pad_ref.shape[-1]), jnp.bfloat16)
    pad_ref[pl.ds(base, L), :] = y.astype(jnp.bfloat16)    # one contiguous aligned store
    c2 = _conv3x3_flat(pad_ref, w2_ref, base, Wr, L)
    c2_ref[...] = c2.astype(jnp.bfloat16)
    st2_ref[...] = _masked_stats(c2, mask, inv_count)


def _pass3_kernel(c2_ref, sc_ref, scale2_ref, shift2_ref, scale_s_ref, shift_s_ref,
                  ao_ref, out_ref):
    # BN2 + shortcut BN + add + final PReLU (shortcut matmul reused from pass 1)
    y = (c2_ref[...].astype(jnp.float32) * scale2_ref[...] + shift2_ref[...]
         + sc_ref[...].astype(jnp.float32) * scale_s_ref[...] + shift_s_ref[...])
    ao = ao_ref[0, 0]
    out_ref[...] = jnp.where(y >= 0, y, ao * y)


# --------------------------------- wrapper ---------------------------------- #

def _fold_bn(stats, gamma, beta, n_tile, n_tiles):
    """Combine per-tile (sum, M2) partials (Chan) and fold BN into (scale, shift)."""
    sums = stats[:, 0, :]                                  # (N, C)
    m2s = stats[:, 1, :]                                   # (N, C)
    count = float(n_tile * n_tiles)
    total = jnp.sum(sums, axis=0)
    gmean = total / count
    tmean = sums / float(n_tile)
    m2 = jnp.sum(m2s, axis=0) + float(n_tile) * jnp.sum((tmean - gmean[None, :]) ** 2, axis=0)
    var = m2 / count                                       # biased variance (BN training)
    inv = jax.lax.rsqrt(var + EPS)
    scale = gamma * inv
    shift = beta - gmean * scale
    return scale.reshape(1, -1), shift.reshape(1, -1)


def _vmem_params(in_bytes, out_bytes, scratch_bytes=0):
    # size the scoped VMEM limit from the actual per-step footprint (double-buffered
    # blocks + scratch) with headroom; NOTE v7x physical VMEM is 64 MiB.
    need = 2 * (in_bytes + out_bytes) + scratch_bytes
    limit = int(need * 1.25) + (4 << 20)
    limit = max(24 << 20, min(limit, 96 << 20))
    return pltpu.CompilerParams(dimension_semantics=("parallel",),
                                vmem_limit_bytes=limit)


def residual_block(x_nchw, p):
    """Forward pass equivalent to ResidualBlock(in_channels != out_channels)."""
    # TODO(synk): identity-shortcut branch (in_channels == out_channels) not
    # implemented; only the 1x1-conv projection shortcut path is covered.
    N, Cin, H, W = x_nchw.shape
    Cout = p["w1"].shape[-1]
    Ci = _round_up(Cin, LANE)
    Co = _round_up(Cout, LANE)
    Wr, L, base, flat = _geometry(H, W)
    tail = flat - base - L
    hw = H * W
    inv_count = 1.0 / hw

    # ---- layout glue (XLA side): NCHW -> row-padded flat NHWC, lane-padded, bf16
    x = jnp.transpose(x_nchw, (0, 2, 3, 1)).astype(jnp.float32)
    x = _pad_axis(x, 3, Ci)                                # (N, H, W, Ci)
    x = jnp.pad(x, ((0, 0), (0, 0), (0, 1), (0, 0)))       # shared zero halo column
    x_flat = x.reshape(N, L, Ci)
    x_flat = jnp.pad(x_flat, ((0, 0), (base, tail), (0, 0))).astype(jnp.bfloat16)

    # valid-position mask in the flat output domain (0 at the per-row halo column)
    mask = ((jnp.arange(L) % Wr) < W).astype(jnp.float32).reshape(L, 1)

    # weights: HWIO, channel-padded to lane width, bf16 for the MXU
    w1 = _pad_axis(_pad_axis(p["w1"].astype(jnp.float32), 2, Ci), 3, Co).astype(jnp.bfloat16)
    w2 = _pad_axis(_pad_axis(p["w2"].astype(jnp.float32), 2, Co), 3, Co).astype(jnp.bfloat16)
    ws = _pad_axis(_pad_axis(p["ws"].astype(jnp.float32), 0, Ci), 1, Co).astype(jnp.bfloat16)

    # gamma/beta zero-padded -> folded scale/shift are exactly 0 in the pad lanes,
    # so pad lanes stay 0 through BN / PReLU (required for the final channel slice).
    g1 = _pad_axis(p["g1"].reshape(-1).astype(jnp.float32), 0, Co)
    be1 = _pad_axis(p["be1"].reshape(-1).astype(jnp.float32), 0, Co)
    g2 = _pad_axis(p["g2"].reshape(-1).astype(jnp.float32), 0, Co)
    be2 = _pad_axis(p["be2"].reshape(-1).astype(jnp.float32), 0, Co)
    gs = _pad_axis(p["gs"].reshape(-1).astype(jnp.float32), 0, Co)
    bes = _pad_axis(p["bes"].reshape(-1).astype(jnp.float32), 0, Co)
    a1 = p["a1"].reshape(1, 1).astype(jnp.float32)
    ao = p["ao"].reshape(1, 1).astype(jnp.float32)
    # conv biases (b1, b2, bs) intentionally dropped: training-mode BN's mean
    # subtraction cancels a per-channel pre-BN bias exactly.

    smem_scalar = pl.BlockSpec(memory_space=pltpu.MemorySpace.SMEM)
    vec_spec = lambda: pl.BlockSpec((1, Co), lambda n: (0, 0))

    # -------- pass 1: conv1 + shortcut 1x1 conv + centered stats --------
    p1_in = flat * Ci * 2 + 9 * Ci * Co * 2 + Ci * Co * 2 + L * 4
    p1_out = 2 * L * Co * 2 + 2 * 2 * Co * 4
    c1, sc, st1, sts = pl.pallas_call(
        functools.partial(_pass1_kernel, base=base, Wr=Wr, L=L, inv_count=inv_count),
        grid=(N,),
        in_specs=[
            pl.BlockSpec((None, flat, Ci), lambda n: (n, 0, 0)),
            pl.BlockSpec((3, 3, Ci, Co), lambda n: (0, 0, 0, 0)),
            pl.BlockSpec((Ci, Co), lambda n: (0, 0)),
            pl.BlockSpec((L, 1), lambda n: (0, 0)),
        ],
        out_specs=[
            pl.BlockSpec((None, L, Co), lambda n: (n, 0, 0)),
            pl.BlockSpec((None, L, Co), lambda n: (n, 0, 0)),
            pl.BlockSpec((None, 2, Co), lambda n: (n, 0, 0)),
            pl.BlockSpec((None, 2, Co), lambda n: (n, 0, 0)),
        ],
        out_shape=[
            jax.ShapeDtypeStruct((N, L, Co), jnp.bfloat16),
            jax.ShapeDtypeStruct((N, L, Co), jnp.bfloat16),
            jax.ShapeDtypeStruct((N, 2, Co), jnp.float32),
            jax.ShapeDtypeStruct((N, 2, Co), jnp.float32),
        ],
        compiler_params=_vmem_params(p1_in, p1_out),
        cost_estimate=pl.CostEstimate(
            flops=int(2 * N * L * Ci * Co * 10), transcendentals=0,
            bytes_accessed=int(N * (p1_in + p1_out))),
    )(x_flat, w1, ws, mask)

    scale1, shift1 = _fold_bn(st1, g1, be1, hw, N)

    # -------- pass 2: BN1 + PReLU1 + conv2 + centered stats --------
    p2_in = L * Co * 2 + 9 * Co * Co * 2 + 2 * Co * 4 + L * 4
    p2_out = L * Co * 2 + 2 * Co * 4
    p2_scratch = flat * Co * 2
    c2, st2 = pl.pallas_call(
        functools.partial(_pass2_kernel, base=base, Wr=Wr, L=L, tail=tail,
                          inv_count=inv_count),
        grid=(N,),
        in_specs=[
            pl.BlockSpec((None, L, Co), lambda n: (n, 0, 0)),
            pl.BlockSpec((3, 3, Co, Co), lambda n: (0, 0, 0, 0)),
            vec_spec(),
            vec_spec(),
            pl.BlockSpec((L, 1), lambda n: (0, 0)),
            smem_scalar,
        ],
        out_specs=[
            pl.BlockSpec((None, L, Co), lambda n: (n, 0, 0)),
            pl.BlockSpec((None, 2, Co), lambda n: (n, 0, 0)),
        ],
        out_shape=[
            jax.ShapeDtypeStruct((N, L, Co), jnp.bfloat16),
            jax.ShapeDtypeStruct((N, 2, Co), jnp.float32),
        ],
        scratch_shapes=[pltpu.VMEM((flat, Co), jnp.bfloat16)],
        compiler_params=_vmem_params(p2_in, p2_out, p2_scratch),
        cost_estimate=pl.CostEstimate(
            flops=int(2 * N * L * Co * Co * 9), transcendentals=0,
            bytes_accessed=int(N * (p2_in + p2_out))),
    )(c1, w2, scale1, shift1, mask, a1)

    scale2, shift2 = _fold_bn(st2, g2, be2, hw, N)
    scale_s, shift_s = _fold_bn(sts, gs, bes, hw, N)

    # -------- pass 3: BN2 + shortcut BN + add + final PReLU --------
    p3_in = 2 * L * Co * 2 + 4 * Co * 4
    p3_out = L * Co * 4
    out_flat = pl.pallas_call(
        _pass3_kernel,
        grid=(N,),
        in_specs=[
            pl.BlockSpec((None, L, Co), lambda n: (n, 0, 0)),
            pl.BlockSpec((None, L, Co), lambda n: (n, 0, 0)),
            vec_spec(), vec_spec(), vec_spec(), vec_spec(),
            smem_scalar,
        ],
        out_specs=pl.BlockSpec((None, L, Co), lambda n: (n, 0, 0)),
        out_shape=jax.ShapeDtypeStruct((N, L, Co), jnp.float32),
        compiler_params=_vmem_params(p3_in, p3_out),
        cost_estimate=pl.CostEstimate(
            flops=int(8 * N * L * Co), transcendentals=0,
            bytes_accessed=int(N * (p3_in + p3_out))),
    )(c2, sc, scale2, shift2, scale_s, shift_s, ao)

    out = out_flat.reshape(N, H, Wr, Co)[:, :, :W, :Cout]
    return jnp.transpose(out, (0, 3, 1, 2))                # NCHW


# -------------------------------- reference --------------------------------- #

def _ref_forward(x_nchw, p):
    x = jnp.transpose(x_nchw, (0, 2, 3, 1)).astype(jnp.float32)

    def conv(y, w, b):
        z = jax.lax.conv_general_dilated(
            y, w, window_strides=(1, 1), padding="SAME",
            dimension_numbers=("NHWC", "HWIO", "NHWC"))
        return z + b.reshape(1, 1, 1, -1)

    def bn(y, g, bta):
        m = jnp.mean(y, axis=(0, 1, 2), keepdims=True)
        v = jnp.mean((y - m) ** 2, axis=(0, 1, 2), keepdims=True)
        return (y - m) / jnp.sqrt(v + EPS) * g.reshape(1, 1, 1, -1) \
            + bta.reshape(1, 1, 1, -1)

    def prelu(y, a):
        return jnp.where(y >= 0, y, a.reshape(()) * y)

    y1 = prelu(bn(conv(x, p["w1"], p["b1"]), p["g1"], p["be1"]), p["a1"])
    y2 = bn(conv(y1, p["w2"], p["b2"]), p["g2"], p["be2"])
    sc = bn(jnp.einsum("nhwc,co->nhwo", x, p["ws"]) + p["bs"].reshape(1, 1, 1, -1),
            p["gs"], p["bes"])
    out = prelu(y2 + sc, p["ao"])
    return jnp.transpose(out, (0, 3, 1, 2))


# ----------------------------------- main ------------------------------------ #

if __name__ == "__main__":
    N, Cin, H, W = 2, 4, 16, 16
    Cout = 8

    key = jax.random.PRNGKey(0)
    ks = jax.random.split(key, 13)

    params = {
        "w1": 0.1 * jax.random.normal(ks[0], (3, 3, Cin, Cout), jnp.float32),
        "b1": 0.05 * jax.random.normal(ks[1], (1, Cout), jnp.float32),
        "g1": 1.0 + 0.1 * jax.random.normal(ks[2], (1, Cout), jnp.float32),
        "be1": 0.1 * jax.random.normal(ks[3], (1, Cout), jnp.float32),
        "a1": jnp.full((1, 1), 0.25, jnp.float32),
        "w2": 0.1 * jax.random.normal(ks[4], (3, 3, Cout, Cout), jnp.float32),
        "b2": 0.05 * jax.random.normal(ks[5], (1, Cout), jnp.float32),
        "g2": 1.0 + 0.1 * jax.random.normal(ks[6], (1, Cout), jnp.float32),
        "be2": 0.1 * jax.random.normal(ks[7], (1, Cout), jnp.float32),
        "ws": 0.1 * jax.random.normal(ks[8], (Cin, Cout), jnp.float32),
        "bs": 0.05 * jax.random.normal(ks[9], (1, Cout), jnp.float32),
        "gs": 1.0 + 0.1 * jax.random.normal(ks[10], (1, Cout), jnp.float32),
        "bes": 0.1 * jax.random.normal(ks[11], (1, Cout), jnp.float32),
        "ao": jnp.full((1, 1), 0.25, jnp.float32),
    }

    x = jax.random.normal(ks[12], (N, Cin, H, W), jnp.float32)

    out = jax.block_until_ready(jax.jit(residual_block)(x, params))
    ref = jax.block_until_ready(_ref_forward(x, params))

    assert out.shape == (N, Cout, H, W)
    max_err = float(jnp.max(jnp.abs(out - ref)))
    assert jnp.allclose(out, ref, rtol=3e-2, atol=3e-2), \
        f"mismatch vs reference (max abs err {max_err})"
    print("KERNEL_OK")
</pallas_src>

<mosaic_0001>
module attributes {stable_mosaic.version = 11 : i64} {
  func.func @_pass1_kernel(%arg0: i32, %arg1: memref<1x320x128xbf16, #tpu.memory_space<vmem>>, %arg2: memref<3x3x128x128xbf16, #tpu.memory_space<vmem>>, %arg3: memref<128x128xbf16, #tpu.memory_space<vmem>>, %arg4: memref<272x1xf32, #tpu.memory_space<vmem>>, %arg5: memref<1x272x128xbf16, #tpu.memory_space<vmem>>, %arg6: memref<1x272x128xbf16, #tpu.memory_space<vmem>>, %arg7: memref<1x2x128xf32, #tpu.memory_space<vmem>>, %arg8: memref<1x2x128xf32, #tpu.memory_space<vmem>>) attributes {dimension_semantics = [#tpu.dimension_semantics<parallel>], iteration_bounds = array<i64: 2>, scalar_prefetch = 0 : i64, scratch_operands = 0 : i64, tpu.core_type = #tpu.core_type<tc>, window_params = [{transform_indices = @transform_0, window_bounds = array<i64: 1, 320, 128>}, {pipeline_mode = #tpu.pipeline_mode<synchronous>, transform_indices = @transform_1, window_bounds = array<i64: 3, 3, 128, 128>}, {pipeline_mode = #tpu.pipeline_mode<synchronous>, transform_indices = @transform_2, window_bounds = array<i64: 128, 128>}, {pipeline_mode = #tpu.pipeline_mode<synchronous>, transform_indices = @transform_3, window_bounds = array<i64: 272, 1>}, {transform_indices = @transform_4, window_bounds = array<i64: 1, 272, 128>}, {transform_indices = @transform_5, window_bounds = array<i64: 1, 272, 128>}, {transform_indices = @transform_6, window_bounds = array<i64: 1, 2, 128>}, {transform_indices = @transform_7, window_bounds = array<i64: 1, 2, 128>}]} {
    %c0 = arith.constant 0 : index
    %c0_0 = arith.constant 0 : index
    %0 = vector.load %arg4[%c0, %c0_0] : memref<272x1xf32, #tpu.memory_space<vmem>>, vector<272x1xf32>
    %cst = arith.constant 0.000000e+00 : f32
    %1 = vector.broadcast %cst : f32 to vector<272x128xf32>
    %c0_1 = arith.constant 0 : index
    %c6 = arith.constant 6 : index
    %c0_2 = arith.constant 0 : index
    %2 = vector.load %arg1[%c0_1, %c6, %c0_2] : memref<1x320x128xbf16, #tpu.memory_space<vmem>>, vector<1x272x128xbf16>
    %3 = vector.shape_cast %2 : vector<1x272x128xbf16> to vector<272x128xbf16>
    %c0_3 = arith.constant 0 : index
    %c0_4 = arith.constant 0 : index
    %c0_5 = arith.constant 0 : index
    %c0_6 = arith.constant 0 : index
    %4 = vector.load %arg2[%c0_3, %c0_4, %c0_5, %c0_6] : memref<3x3x128x128xbf16, #tpu.memory_space<vmem>>, vector<1x1x128x128xbf16>
    %5 = vector.shape_cast %4 : vector<1x1x128x128xbf16> to vector<128x128xbf16>
    %cst_7 = arith.constant dense<0.000000e+00> : vector<272x128xf32>
    %6 = tpu.matmul %3, %5, %cst_7 {dimension_numbers = #tpu.dot_dimension_numbers<[1], [0], [0], [1], [0, 0, 1, 1], [], []>} : vector<272x128xbf16>, vector<128x128xbf16>, vector<272x128xf32> -> vector<272x128xf32>
    %7 = arith.addf %1, %6 : vector<272x128xf32>
    %c0_8 = arith.constant 0 : index
    %c7 = arith.constant 7 : index
    %c0_9 = arith.constant 0 : index
    %8 = vector.load %arg1[%c0_8, %c7, %c0_9] : memref<1x320x128xbf16, #tpu.memory_space<vmem>>, vector<1x272x128xbf16>
    %9 = vector.shape_cast %8 : vector<1x272x128xbf16> to vector<272x128xbf16>
    %c0_10 = arith.constant 0 : index
    %c1 = arith.constant 1 : index
    %c0_11 = arith.constant 0 : index
    %c0_12 = arith.constant 0 : index
    %10 = vector.load %arg2[%c0_10, %c1, %c0_11, %c0_12] : memref<3x3x128x128xbf16, #tpu.memory_space<vmem>>, vector<1x1x128x128xbf16>
    %11 = vector.shape_cast %10 : vector<1x1x128x128xbf16> to vector<128x128xbf16>
    %cst_13 = arith.constant dense<0.000000e+00> : vector<272x128xf32>
    %12 = tpu.matmul %9, %11, %cst_13 {dimension_numbers = #tpu.dot_dimension_numbers<[1], [0], [0], [1], [0, 0, 1, 1], [], []>} : vector<272x128xbf16>, vector<128x128xbf16>, vector<272x128xf32> -> vector<272x128xf32>
    %13 = arith.addf %7, %12 : vector<272x128xf32>
    %c0_14 = arith.constant 0 : index
    %c8 = arith.constant 8 : index
    %c0_15 = arith.constant 0 : index
    %14 = vector.load %arg1[%c0_14, %c8, %c0_15] : memref<1x320x128xbf16, #tpu.memory_space<vmem>>, vector<1x272x128xbf16>
    %15 = vector.shape_cast %14 : vector<1x272x128xbf16> to vector<272x128xbf16>
    %c0_16 = arith.constant 0 : index
    %c2 = arith.constant 2 : index
    %c0_17 = arith.constant 0 : index
    %c0_18 = arith.constant 0 : index
    %16 = vector.load %arg2[%c0_16, %c2, %c0_17, %c0_18] : memref<3x3x128x128xbf16, #tpu.memory_space<vmem>>, vector<1x1x128x128xbf16>
    %17 = vector.shape_cast %16 : vector<1x1x128x128xbf16> to vector<128x128xbf16>
    %cst_19 = arith.constant dense<0.000000e+00> : vector<272x128xf32>
    %18 = tpu.matmul %15, %17, %cst_19 {dimension_numbers = #tpu.dot_dimension_numbers<[1], [0], [0], [1], [0, 0, 1, 1], [], []>} : vector<272x128xbf16>, vector<128x128xbf16>, vector<272x128xf32> -> vector<272x128xf32>
    %19 = arith.addf %13, %18 : vector<272x128xf32>
    %c0_20 = arith.constant 0 : index
    %c23 = arith.constant 23 : index
    %c0_21 = arith.constant 0 : index
    %20 = vector.load %arg1[%c0_20, %c23, %c0_21] : memref<1x320x128xbf16, #tpu.memory_space<vmem>>, vector<1x272x128xbf16>
    %21 = vector.shape_cast %20 : vector<1x272x128xbf16> to vector<272x128xbf16>
    %c1_22 = arith.constant 1 : index
    %c0_23 = arith.constant 0 : index
    %c0_24 = arith.constant 0 : index
    %c0_25 = arith.constant 0 : index
    %22 = vector.load %arg2[%c1_22, %c0_23, %c0_24, %c0_25] : memref<3x3x128x128xbf16, #tpu.memory_space<vmem>>, vector<1x1x128x128xbf16>
    %23 = vector.shape_cast %22 : vector<1x1x128x128xbf16> to vector<128x128xbf16>
    %cst_26 = arith.constant dense<0.000000e+00> : vector<272x128xf32>
    %24 = tpu.matmul %21, %23, %cst_26 {dimension_numbers = #tpu.dot_dimension_numbers<[1], [0], [0], [1], [0, 0, 1, 1], [], []>} : vector<272x128xbf16>, vector<128x128xbf16>, vector<272x128xf32> -> vector<272x128xf32>
    %25 = arith.addf %19, %24 : vector<272x128xf32>
    %c0_27 = arith.constant 0 : index
    %c24 = arith.constant 24 : index
    %c0_28 = arith.constant 0 : index
    %26 = vector.load %arg1[%c0_27, %c24, %c0_28] : memref<1x320x128xbf16, #tpu.memory_space<vmem>>, vector<1x272x128xbf16>
    %27 = vector.shape_cast %26 : vector<1x272x128xbf16> to vector<272x128xbf16>
    %c1_29 = arith.constant 1 : index
    %c1_30 = arith.constant 1 : index
    %c0_31 = arith.constant 0 : index
    %c0_32 = arith.constant 0 : index
    %28 = vector.load %arg2[%c1_29, %c1_30, %c0_31, %c0_32] : memref<3x3x128x128xbf16, #tpu.memory_space<vmem>>, vector<1x1x128x128xbf16>
    %29 = vector.shape_cast %28 : vector<1x1x128x128xbf16> to vector<128x128xbf16>
    %cst_33 = arith.constant dense<0.000000e+00> : vector<272x128xf32>
    %30 = tpu.matmul %27, %29, %cst_33 {dimension_numbers = #tpu.dot_dimension_numbers<[1], [0], [0], [1], [0, 0, 1, 1], [], []>} : vector<272x128xbf16>, vector<128x128xbf16>, vector<272x128xf32> -> vector<272x128xf32>
    %31 = arith.addf %25, %30 : vector<272x128xf32>
    %c0_34 = arith.constant 0 : index
    %c25 = arith.constant 25 : index
    %c0_35 = arith.constant 0 : index
    %32 = vector.load %arg1[%c0_34, %c25, %c0_35] : memref<1x320x128xbf16, #tpu.memory_space<vmem>>, vector<1x272x128xbf16>
    %33 = vector.shape_cast %32 : vector<1x272x128xbf16> to vector<272x128xbf16>
    %c1_36 = arith.constant 1 : index
    %c2_37 = arith.constant 2 : index
    %c0_38 = arith.constant 0 : index
    %c0_39 = arith.constant 0 : index
    %34 = vector.load %arg2[%c1_36, %c2_37, %c0_38, %c0_39] : memref<3x3x128x128xbf16, #tpu.memory_space<vmem>>, vector<1x1x128x128xbf16>
    %35 = vector.shape_cast %34 : vector<1x1x128x128xbf16> to vector<128x128xbf16>
    %cst_40 = arith.constant dense<0.000000e+00> : vector<272x128xf32>
    %36 = tpu.matmul %33, %35, %cst_40 {dimension_numbers = #tpu.dot_dimension_numbers<[1], [0], [0], [1], [0, 0, 1, 1], [], []>} : vector<272x128xbf16>, vector<128x128xbf16>, vector<272x128xf32> -> vector<272x128xf32>
    %37 = arith.addf %31, %36 : vector<272x128xf32>
    %c0_41 = arith.constant 0 : index
    %c40 = arith.constant 40 : index
    %c0_42 = arith.constant 0 : index
    %38 = vector.load %arg1[%c0_41, %c40, %c0_42] : memref<1x320x128xbf16, #tpu.memory_space<vmem>>, vector<1x272x128xbf16>
    %39 = vector.shape_cast %38 : vector<1x272x128xbf16> to vector<272x128xbf16>
    %c2_43 = arith.constant 2 : index
    %c0_44 = arith.constant 0 : index
    %c0_45 = arith.constant 0 : index
    %c0_46 = arith.constant 0 : index
    %40 = vector.load %arg2[%c2_43, %c0_44, %c0_45, %c0_46] : memref<3x3x128x128xbf16, #tpu.memory_space<vmem>>, vector<1x1x128x128xbf16>
    %41 = vector.shape_cast %40 : vector<1x1x128x128xbf16> to vector<128x128xbf16>
    %cst_47 = arith.constant dense<0.000000e+00> : vector<272x128xf32>
    %42 = tpu.matmul %39, %41, %cst_47 {dimension_numbers = #tpu.dot_dimension_numbers<[1], [0], [0], [1], [0, 0, 1, 1], [], []>} : vector<272x128xbf16>, vector<128x128xbf16>, vector<272x128xf32> -> vector<272x128xf32>
    %43 = arith.addf %37, %42 : vector<272x128xf32>
    %c0_48 = arith.constant 0 : index
    %c41 = arith.constant 41 : index
    %c0_49 = arith.constant 0 : index
    %44 = vector.load %arg1[%c0_48, %c41, %c0_49] : memref<1x320x128xbf16, #tpu.memory_space<vmem>>, vector<1x272x128xbf16>
    %45 = vector.shape_cast %44 : vector<1x272x128xbf16> to vector<272x128xbf16>
    %c2_50 = arith.constant 2 : index
    %c1_51 = arith.constant 1 : index
    %c0_52 = arith.constant 0 : index
    %c0_53 = arith.constant 0 : index
    %46 = vector.load %arg2[%c2_50, %c1_51, %c0_52, %c0_53] : memref<3x3x128x128xbf16, #tpu.memory_space<vmem>>, vector<1x1x128x128xbf16>
    %47 = vector.shape_cast %46 : vector<1x1x128x128xbf16> to vector<128x128xbf16>
    %cst_54 = arith.constant dense<0.000000e+00> : vector<272x128xf32>
    %48 = tpu.matmul %45, %47, %cst_54 {dimension_numbers = #tpu.dot_dimension_numbers<[1], [0], [0], [1], [0, 0, 1, 1], [], []>} : vector<272x128xbf16>, vector<128x128xbf16>, vector<272x128xf32> -> vector<272x128xf32>
    %49 = arith.addf %43, %48 : vector<272x128xf32>
    %c0_55 = arith.constant 0 : index
    %c42 = arith.constant 42 : index
    %c0_56 = arith.constant 0 : index
    %50 = vector.load %arg1[%c0_55, %c42, %c0_56] : memref<1x320x128xbf16, #tpu.memory_space<vmem>>, vector<1x272x128xbf16>
    %51 = vector.shape_cast %50 : vector<1x272x128xbf16> to vector<272x128xbf16>
    %c2_57 = arith.constant 2 : index
    %c2_58 = arith.constant 2 : index
    %c0_59 = arith.constant 0 : index
    %c0_60 = arith.constant 0 : index
    %52 = vector.load %arg2[%c2_57, %c2_58, %c0_59, %c0_60] : memref<3x3x128x128xbf16, #tpu.memory_space<vmem>>, vector<1x1x128x128xbf16>
    %53 = vector.shape_cast %52 : vector<1x1x128x128xbf16> to vector<128x128xbf16>
    %cst_61 = arith.constant dense<0.000000e+00> : vector<272x128xf32>
    %54 = tpu.matmul %51, %53, %cst_61 {dimension_numbers = #tpu.dot_dimension_numbers<[1], [0], [0], [1], [0, 0, 1, 1], [], []>} : vector<272x128xbf16>, vector<128x128xbf16>, vector<272x128xf32> -> vector<272x128xf32>
    %55 = arith.addf %49, %54 : vector<272x128xf32>
    %56 = arith.truncf %55 : vector<272x128xf32> to vector<272x128xbf16>
    %c0_62 = arith.constant 0 : index
    %c0_63 = arith.constant 0 : index
    %c0_64 = arith.constant 0 : index
    %57 = vector.load %arg5[%c0_62, %c0_63, %c0_64] : memref<1x272x128xbf16, #tpu.memory_space<vmem>>, vector<1x272x128xbf16>
    %58 = vector.shape_cast %57 : vector<1x272x128xbf16> to vector<272x128xbf16>
    %59 = vector.shape_cast %56 : vector<272x128xbf16> to vector<1x272x128xbf16>
    tpu.vector_store %arg5[%c0_62, %c0_63, %c0_64], %59 {strides = array<i32>} : memref<1x272x128xbf16, #tpu.memory_space<vmem>>, vector<1x272x128xbf16>,
    %60 = vector.broadcast %0 : vector<272x1xf32> to vector<272x128xf32>
    %61 = arith.mulf %55, %60 : vector<272x128xf32>
    %cst_65 = arith.constant dense<0.000000e+00> : vector<128xf32>
    %62 = vector.multi_reduction <add>, %61, %cst_65 [0] : vector<272x128xf32> to vector<128xf32>
    %63 = vector.shape_cast %62 : vector<128xf32> to vector<1x128xf32>
    %cst_66 = arith.constant 3.906250e-03 : f32
    %64 = vector.broadcast %cst_66 : f32 to vector<1x128xf32>
    %65 = arith.mulf %63, %64 : vector<1x128xf32>
    %66 = vector.broadcast %65 : vector<1x128xf32> to vector<272x128xf32>
    %67 = arith.subf %55, %66 : vector<272x128xf32>
    %68 = vector.broadcast %0 : vector<272x1xf32> to vector<272x128xf32>
    %69 = arith.mulf %67, %68 : vector<272x128xf32>
    %70 = arith.mulf %69, %69 : vector<272x128xf32>
    %cst_67 = arith.constant dense<0.000000e+00> : vector<128xf32>
    %71 = vector.multi_reduction <add>, %70, %cst_67 [0] : vector<272x128xf32> to vector<128xf32>
    %72 = vector.shape_cast %71 : vector<128xf32> to vector<1x128xf32>
    %73 = tpu.concatenate %63, %72 in 0 : vector<1x128xf32>, vector<1x128xf32> -> vector<2x128xf32>
    %c0_68 = arith.constant 0 : index
    %c0_69 = arith.constant 0 : index
    %c0_70 = arith.constant 0 : index
    %74 = vector.load %arg7[%c0_68, %c0_69, %c0_70] : memref<1x2x128xf32, #tpu.memory_space<vmem>>, vector<1x2x128xf32>
    %75 = vector.shape_cast %74 : vector<1x2x128xf32> to vector<2x128xf32>
    %76 = vector.shape_cast %73 : vector<2x128xf32> to vector<1x2x128xf32>
    tpu.vector_store %arg7[%c0_68, %c0_69, %c0_70], %76 {strides = array<i32>} : memref<1x2x128xf32, #tpu.memory_space<vmem>>, vector<1x2x128xf32>,
    %c0_71 = arith.constant 0 : index
    %c24_72 = arith.constant 24 : index
    %c0_73 = arith.constant 0 : index
    %77 = vector.load %arg1[%c0_71, %c24_72, %c0_73] : memref<1x320x128xbf16, #tpu.memory_space<vmem>>, vector<1x272x128xbf16>
    %78 = vector.shape_cast %77 : vector<1x272x128xbf16> to vector<272x128xbf16>
    %c0_74 = arith.constant 0 : index
    %c0_75 = arith.constant 0 : index
    %79 = vector.load %arg3[%c0_74, %c0_75] : memref<128x128xbf16, #tpu.memory_space<vmem>>, vector<128x128xbf16>
    %cst_76 = arith.constant dense<0.000000e+00> : vector<272x128xf32>
    %80 = tpu.matmul %78, %79, %cst_76 {dimension_numbers = #tpu.dot_dimension_numbers<[1], [0], [0], [1], [0, 0, 1, 1], [], []>} : vector<272x128xbf16>, vector<128x128xbf16>, vector<272x128xf32> -> vector<272x128xf32>
    %81 = arith.truncf %80 : vector<272x128xf32> to vector<272x128xbf16>
    %c0_77 = arith.constant 0 : index
    %c0_78 = arith.constant 0 : index
    %c0_79 = arith.constant 0 : index
    %82 = vector.load %arg6[%c0_77, %c0_78, %c0_79] : memref<1x272x128xbf16, #tpu.memory_space<vmem>>, vector<1x272x128xbf16>
    %83 = vector.shape_cast %82 : vector<1x272x128xbf16> to vector<272x128xbf16>
    %84 = vector.shape_cast %81 : vector<272x128xbf16> to vector<1x272x128xbf16>
    tpu.vector_store %arg6[%c0_77, %c0_78, %c0_79], %84 {strides = array<i32>} : memref<1x272x128xbf16, #tpu.memory_space<vmem>>, vector<1x272x128xbf16>,
    %85 = vector.broadcast %0 : vector<272x1xf32> to vector<272x128xf32>
    %86 = arith.mulf %80, %85 : vector<272x128xf32>
    %cst_80 = arith.constant dense<0.000000e+00> : vector<128xf32>
    %87 = vector.multi_reduction <add>, %86, %cst_80 [0] : vector<272x128xf32> to vector<128xf32>
    %88 = vector.shape_cast %87 : vector<128xf32> to vector<1x128xf32>
    %cst_81 = arith.constant 3.906250e-03 : f32
    %89 = vector.broadcast %cst_81 : f32 to vector<1x128xf32>
    %90 = arith.mulf %88, %89 : vector<1x128xf32>
    %91 = vector.broadcast %90 : vector<1x128xf32> to vector<272x128xf32>
    %92 = arith.subf %80, %91 : vector<272x128xf32>
    %93 = vector.broadcast %0 : vector<272x1xf32> to vector<272x128xf32>
    %94 = arith.mulf %92, %93 : vector<272x128xf32>
    %95 = arith.mulf %94, %94 : vector<272x128xf32>
    %cst_82 = arith.constant dense<0.000000e+00> : vector<128xf32>
    %96 = vector.multi_reduction <add>, %95, %cst_82 [0] : vector<272x128xf32> to vector<128xf32>
    %97 = vector.shape_cast %96 : vector<128xf32> to vector<1x128xf32>
    %98 = tpu.concatenate %88, %97 in 0 : vector<1x128xf32>, vector<1x128xf32> -> vector<2x128xf32>
    %c0_83 = arith.constant 0 : index
    %c0_84 = arith.constant 0 : index
    %c0_85 = arith.constant 0 : index
    %99 = vector.load %arg8[%c0_83, %c0_84, %c0_85] : memref<1x2x128xf32, #tpu.memory_space<vmem>>, vector<1x2x128xf32>
    %100 = vector.shape_cast %99 : vector<1x2x128xf32> to vector<2x128xf32>
    %101 = vector.shape_cast %98 : vector<2x128xf32> to vector<1x2x128xf32>
    tpu.vector_store %arg8[%c0_83, %c0_84, %c0_85], %101 {strides = array<i32>} : memref<1x2x128xf32, #tpu.memory_space<vmem>>, vector<1x2x128xf32>,
    return
  }
  func.func @transform_0(%arg0: i32) -> (i32, i32, i32) {
    %c0_i32 = arith.constant 0 : i32
    %c0_i32_0 = arith.constant 0 : i32
    %c0_i32_1 = arith.constant 0 : i32
    return %arg0, %c0_i32, %c0_i32_0 : i32, i32, i32
  }
  func.func @transform_1(%arg0: i32) -> (i32, i32, i32, i32) {
    %c0_i32 = arith.constant 0 : i32
    %c0_i32_0 = arith.constant 0 : i32
    %c0_i32_1 = arith.constant 0 : i32
    %c0_i32_2 = arith.constant 0 : i32
    %c0_i32_3 = arith.constant 0 : i32
    return %c0_i32, %c0_i32_0, %c0_i32_1, %c0_i32_2 : i32, i32, i32, i32
  }
  func.func @transform_2(%arg0: i32) -> (i32, i32) {
    %c0_i32 = arith.constant 0 : i32
    %c0_i32_0 = arith.constant 0 : i32
    %c0_i32_1 = arith.constant 0 : i32
    return %c0_i32, %c0_i32_0 : i32, i32
  }
  func.func @transform_3(%arg0: i32) -> (i32, i32) {
    %c0_i32 = arith.constant 0 : i32
    %c0_i32_0 = arith.constant 0 : i32
    %c0_i32_1 = arith.constant 0 : i32
    return %c0_i32, %c0_i32_0 : i32, i32
  }
  func.func @transform_4(%arg0: i32) -> (i32, i32, i32) {
    %c0_i32 = arith.constant 0 : i32
    %c0_i32_0 = arith.constant 0 : i32
    %c0_i32_1 = arith.constant 0 : i32
    return %arg0, %c0_i32, %c0_i32_0 : i32, i32, i32
  }
  func.func @transform_5(%arg0: i32) -> (i32, i32, i32) {
    %c0_i32 = arith.constant 0 : i32
    %c0_i32_0 = arith.constant 0 : i32
    %c0_i32_1 = arith.constant 0 : i32
    return %arg0, %c0_i32, %c0_i32_0 : i32, i32, i32
  }
  func.func @transform_6(%arg0: i32) -> (i32, i32, i32) {
    %c0_i32 = arith.constant 0 : i32
    %c0_i32_0 = arith.constant 0 : i32
    %c0_i32_1 = arith.constant 0 : i32
    return %arg0, %c0_i32, %c0_i32_0 : i32, i32, i32
  }
  func.func @transform_7(%arg0: i32) -> (i32, i32, i32) {
    %c0_i32 = arith.constant 0 : i32
    %c0_i32_0 = arith.constant 0 : i32
    %c0_i32_1 = arith.constant 0 : i32
    return %arg0, %c0_i32, %c0_i32_0 : i32, i32, i32
  }
}

module attributes {stable_mosaic.version = 11 : i64} {
  func.func @_pass2_kernel(%arg0: i32, %arg1: memref<1x272x128xbf16, #tpu.memory_space<vmem>>, %arg2: memref<3x3x128x128xbf16, #tpu.memory_space<vmem>>, %arg3: memref<1x128xf32, #tpu.memory_space<vmem>>, %arg4: memref<1x128xf32, #tpu.memory_space<vmem>>, %arg5: memref<272x1xf32, #tpu.memory_space<vmem>>, %arg6: memref<1x1xf32, #tpu.memory_space<smem>>, %arg7: memref<1x272x128xbf16, #tpu.memory_space<vmem>>, %arg8: memref<1x2x128xf32, #tpu.memory_space<vmem>>, %arg9: memref<320x128xbf16, #tpu.memory_space<vmem>>) attributes {dimension_semantics = [#tpu.dimension_semantics<parallel>], iteration_bounds = array<i64: 2>, scalar_prefetch = 0 : i64, scratch_operands = 1 : i64, tpu.core_type = #tpu.core_type<tc>, window_params = [{transform_indices = @transform_0, window_bounds = array<i64: 1, 272, 128>}, {pipeline_mode = #tpu.pipeline_mode<synchronous>, transform_indices = @transform_1, window_bounds = array<i64: 3, 3, 128, 128>}, {pipeline_mode = #tpu.pipeline_mode<synchronous>, transform_indices = @transform_2, window_bounds = array<i64: 1, 128>}, {pipeline_mode = #tpu.pipeline_mode<synchronous>, transform_indices = @transform_3, window_bounds = array<i64: 1, 128>}, {pipeline_mode = #tpu.pipeline_mode<synchronous>, transform_indices = @transform_4, window_bounds = array<i64: 272, 1>}, {transform_indices = @transform_5, window_bounds = array<i64: 1, 1>}, {transform_indices = @transform_6, window_bounds = array<i64: 1, 272, 128>}, {transform_indices = @transform_7, window_bounds = array<i64: 1, 2, 128>}]} {
    %c0 = arith.constant 0 : index
    %c0_0 = arith.constant 0 : index
    %0 = vector.load %arg5[%c0, %c0_0] : memref<272x1xf32, #tpu.memory_space<vmem>>, vector<272x1xf32>
    %c0_1 = arith.constant 0 : index
    %c0_2 = arith.constant 0 : index
    %c0_3 = arith.constant 0 : index
    %1 = vector.load %arg1[%c0_1, %c0_2, %c0_3] : memref<1x272x128xbf16, #tpu.memory_space<vmem>>, vector<1x272x128xbf16>
    %2 = vector.shape_cast %1 : vector<1x272x128xbf16> to vector<272x128xbf16>
    %3 = arith.extf %2 : vector<272x128xbf16> to vector<272x128xf32>
    %c0_4 = arith.constant 0 : index
    %c0_5 = arith.constant 0 : index
    %4 = vector.load %arg3[%c0_4, %c0_5] : memref<1x128xf32, #tpu.memory_space<vmem>>, vector<1x128xf32>
    %5 = vector.broadcast %4 : vector<1x128xf32> to vector<272x128xf32>
    %6 = arith.mulf %3, %5 : vector<272x128xf32>
    %c0_6 = arith.constant 0 : index
    %c0_7 = arith.constant 0 : index
    %7 = vector.load %arg4[%c0_6, %c0_7] : memref<1x128xf32, #tpu.memory_space<vmem>>, vector<1x128xf32>
    %8 = vector.broadcast %7 : vector<1x128xf32> to vector<272x128xf32>
    %9 = arith.addf %6, %8 : vector<272x128xf32>
    %c0_8 = arith.constant 0 : index
    %c0_9 = arith.constant 0 : index
    %10 = memref.load %arg6[%c0_8, %c0_9] : memref<1x1xf32, #tpu.memory_space<smem>>
    %cst = arith.constant 0.000000e+00 : f32
    %11 = vector.broadcast %cst : f32 to vector<272x128xf32>
    %12 = arith.cmpf oge, %9, %11 : vector<272x128xf32>
    %13 = vector.broadcast %10 : f32 to vector<272x128xf32>
    %14 = arith.mulf %13, %9 : vector<272x128xf32>
    %15 = arith.select %12, %9, %14 : vector<272x128xi1>, vector<272x128xf32>
    %16 = vector.broadcast %0 : vector<272x1xf32> to vector<272x128xf32>
    %17 = arith.mulf %15, %16 : vector<272x128xf32>
    %cst_10 = arith.constant 0.000000e+00 : bf16
    %18 = vector.broadcast %cst_10 : bf16 to vector<24x128xbf16>
    %c0_11 = arith.constant 0 : index
    %c0_12 = arith.constant 0 : index
    %19 = vector.load %arg9[%c0_11, %c0_12] : memref<320x128xbf16, #tpu.memory_space<vmem>>, vector<24x128xbf16>
    tpu.vector_store %arg9[%c0_11, %c0_12], %18 {strides = array<i32>} : memref<320x128xbf16, #tpu.memory_space<vmem>>, vector<24x128xbf16>,
    %cst_13 = arith.constant 0.000000e+00 : bf16
    %20 = vector.broadcast %cst_13 : bf16 to vector<24x128xbf16>
    %c296 = arith.constant 296 : index
    %c0_14 = arith.constant 0 : index
    %21 = vector.load %arg9[%c296, %c0_14] : memref<320x128xbf16, #tpu.memory_space<vmem>>, vector<24x128xbf16>
    tpu.vector_store %arg9[%c296, %c0_14], %20 {strides = array<i32>} : memref<320x128xbf16, #tpu.memory_space<vmem>>, vector<24x128xbf16>,
    %22 = arith.truncf %17 : vector<272x128xf32> to vector<272x128xbf16>
    %c24 = arith.constant 24 : index
    %c0_15 = arith.constant 0 : index
    %23 = vector.load %arg9[%c24, %c0_15] : memref<320x128xbf16, #tpu.memory_space<vmem>>, vector<272x128xbf16>
    tpu.vector_store %arg9[%c24, %c0_15], %22 {strides = array<i32>} : memref<320x128xbf16, #tpu.memory_space<vmem>>, vector<272x128xbf16>,
    %cst_16 = arith.constant 0.000000e+00 : f32
    %24 = vector.broadcast %cst_16 : f32 to vector<272x128xf32>
    %c6 = arith.constant 6 : index
    %c0_17 = arith.constant 0 : index
    %25 = vector.load %arg9[%c6, %c0_17] : memref<320x128xbf16, #tpu.memory_space<vmem>>, vector<272x128xbf16>
    %c0_18 = arith.constant 0 : index
    %c0_19 = arith.constant 0 : index
    %c0_20 = arith.constant 0 : index
    %c0_21 = arith.constant 0 : index
    %26 = vector.load %arg2[%c0_18, %c0_19, %c0_20, %c0_21] : memref<3x3x128x128xbf16, #tpu.memory_space<vmem>>, vector<1x1x128x128xbf16>
    %27 = vector.shape_cast %26 : vector<1x1x128x128xbf16> to vector<128x128xbf16>
    %cst_22 = arith.constant dense<0.000000e+00> : vector<272x128xf32>
    %28 = tpu.matmul %25, %27, %cst_22 {dimension_numbers = #tpu.dot_dimension_numbers<[1], [0], [0], [1], [0, 0, 1, 1], [], []>} : vector<272x128xbf16>, vector<128x128xbf16>, vector<272x128xf32> -> vector<272x128xf32>
    %29 = arith.addf %24, %28 : vector<272x128xf32>
    %c7 = arith.constant 7 : index
    %c0_23 = arith.constant 0 : index
    %30 = vector.load %arg9[%c7, %c0_23] : memref<320x128xbf16, #tpu.memory_space<vmem>>, vector<272x128xbf16>
    %c0_24 = arith.constant 0 : index
    %c1 = arith.constant 1 : index
    %c0_25 = arith.constant 0 : index
    %c0_26 = arith.constant 0 : index
    %31 = vector.load %arg2[%c0_24, %c1, %c0_25, %c0_26] : memref<3x3x128x128xbf16, #tpu.memory_space<vmem>>, vector<1x1x128x128xbf16>
    %32 = vector.shape_cast %31 : vector<1x1x128x128xbf16> to vector<128x128xbf16>
    %cst_27 = arith.constant dense<0.000000e+00> : vector<272x128xf32>
    %33 = tpu.matmul %30, %32, %cst_27 {dimension_numbers = #tpu.dot_dimension_numbers<[1], [0], [0], [1], [0, 0, 1, 1], [], []>} : vector<272x128xbf16>, vector<128x128xbf16>, vector<272x128xf32> -> vector<272x128xf32>
    %34 = arith.addf %29, %33 : vector<272x128xf32>
    %c8 = arith.constant 8 : index
    %c0_28 = arith.constant 0 : index
    %35 = vector.load %arg9[%c8, %c0_28] : memref<320x128xbf16, #tpu.memory_space<vmem>>, vector<272x128xbf16>
    %c0_29 = arith.constant 0 : index
    %c2 = arith.constant 2 : index
    %c0_30 = arith.constant 0 : index
    %c0_31 = arith.constant 0 : index
    %36 = vector.load %arg2[%c0_29, %c2, %c0_30, %c0_31] : memref<3x3x128x128xbf16, #tpu.memory_space<vmem>>, vector<1x1x128x128xbf16>
    %37 = vector.shape_cast %36 : vector<1x1x128x128xbf16> to vector<128x128xbf16>
    %cst_32 = arith.constant dense<0.000000e+00> : vector<272x128xf32>
    %38 = tpu.matmul %35, %37, %cst_32 {dimension_numbers = #tpu.dot_dimension_numbers<[1], [0], [0], [1], [0, 0, 1, 1], [], []>} : vector<272x128xbf16>, vector<128x128xbf16>, vector<272x128xf32> -> vector<272x128xf32>
    %39 = arith.addf %34, %38 : vector<272x128xf32>
    %c23 = arith.constant 23 : index
    %c0_33 = arith.constant 0 : index
    %40 = vector.load %arg9[%c23, %c0_33] : memref<320x128xbf16, #tpu.memory_space<vmem>>, vector<272x128xbf16>
    %c1_34 = arith.constant 1 : index
    %c0_35 = arith.constant 0 : index
    %c0_36 = arith.constant 0 : index
    %c0_37 = arith.constant 0 : index
    %41 = vector.load %arg2[%c1_34, %c0_35, %c0_36, %c0_37] : memref<3x3x128x128xbf16, #tpu.memory_space<vmem>>, vector<1x1x128x128xbf16>
    %42 = vector.shape_cast %41 : vector<1x1x128x128xbf16> to vector<128x128xbf16>
    %cst_38 = arith.constant dense<0.000000e+00> : vector<272x128xf32>
    %43 = tpu.matmul %40, %42, %cst_38 {dimension_numbers = #tpu.dot_dimension_numbers<[1], [0], [0], [1], [0, 0, 1, 1], [], []>} : vector<272x128xbf16>, vector<128x128xbf16>, vector<272x128xf32> -> vector<272x128xf32>
    %44 = arith.addf %39, %43 : vector<272x128xf32>
    %c24_39 = arith.constant 24 : index
    %c0_40 = arith.constant 0 : index
    %45 = vector.load %arg9[%c24_39, %c0_40] : memref<320x128xbf16, #tpu.memory_space<vmem>>, vector<272x128xbf16>
    %c1_41 = arith.constant 1 : index
    %c1_42 = arith.constant 1 : index
    %c0_43 = arith.constant 0 : index
    %c0_44 = arith.constant 0 : index
    %46 = vector.load %arg2[%c1_41, %c1_42, %c0_43, %c0_44] : memref<3x3x128x128xbf16, #tpu.memory_space<vmem>>, vector<1x1x128x128xbf16>
    %47 = vector.shape_cast %46 : vector<1x1x128x128xbf16> to vector<128x128xbf16>
    %cst_45 = arith.constant dense<0.000000e+00> : vector<272x128xf32>
    %48 = tpu.matmul %45, %47, %cst_45 {dimension_numbers = #tpu.dot_dimension_numbers<[1], [0], [0], [1], [0, 0, 1, 1], [], []>} : vector<272x128xbf16>, vector<128x128xbf16>, vector<272x128xf32> -> vector<272x128xf32>
    %49 = arith.addf %44, %48 : vector<272x128xf32>
    %c25 = arith.constant 25 : index
    %c0_46 = arith.constant 0 : index
    %50 = vector.load %arg9[%c25, %c0_46] : memref<320x128xbf16, #tpu.memory_space<vmem>>, vector<272x128xbf16>
    %c1_47 = arith.constant 1 : index
    %c2_48 = arith.constant 2 : index
    %c0_49 = arith.constant 0 : index
    %c0_50 = arith.constant 0 : index
    %51 = vector.load %arg2[%c1_47, %c2_48, %c0_49, %c0_50] : memref<3x3x128x128xbf16, #tpu.memory_space<vmem>>, vector<1x1x128x128xbf16>
    %52 = vector.shape_cast %51 : vector<1x1x128x128xbf16> to vector<128x128xbf16>
    %cst_51 = arith.constant dense<0.000000e+00> : vector<272x128xf32>
    %53 = tpu.matmul %50, %52, %cst_51 {dimension_numbers = #tpu.dot_dimension_numbers<[1], [0], [0], [1], [0, 0, 1, 1], [], []>} : vector<272x128xbf16>, vector<128x128xbf16>, vector<272x128xf32> -> vector<272x128xf32>
    %54 = arith.addf %49, %53 : vector<272x128xf32>
    %c40 = arith.constant 40 : index
    %c0_52 = arith.constant 0 : index
    %55 = vector.load %arg9[%c40, %c0_52] : memref<320x128xbf16, #tpu.memory_space<vmem>>, vector<272x128xbf16>
    %c2_53 = arith.constant 2 : index
    %c0_54 = arith.constant 0 : index
    %c0_55 = arith.constant 0 : index
    %c0_56 = arith.constant 0 : index
    %56 = vector.load %arg2[%c2_53, %c0_54, %c0_55, %c0_56] : memref<3x3x128x128xbf16, #tpu.memory_space<vmem>>, vector<1x1x128x128xbf16>
    %57 = vector.shape_cast %56 : vector<1x1x128x128xbf16> to vector<128x128xbf16>
    %cst_57 = arith.constant dense<0.000000e+00> : vector<272x128xf32>
    %58 = tpu.matmul %55, %57, %cst_57 {dimension_numbers = #tpu.dot_dimension_numbers<[1], [0], [0], [1], [0, 0, 1, 1], [], []>} : vector<272x128xbf16>, vector<128x128xbf16>, vector<272x128xf32> -> vector<272x128xf32>
    %59 = arith.addf %54, %58 : vector<272x128xf32>
    %c41 = arith.constant 41 : index
    %c0_58 = arith.constant 0 : index
    %60 = vector.load %arg9[%c41, %c0_58] : memref<320x128xbf16, #tpu.memory_space<vmem>>, vector<272x128xbf16>
    %c2_59 = arith.constant 2 : index
    %c1_60 = arith.constant 1 : index
    %c0_61 = arith.constant 0 : index
    %c0_62 = arith.constant 0 : index
    %61 = vector.load %arg2[%c2_59, %c1_60, %c0_61, %c0_62] : memref<3x3x128x128xbf16, #tpu.memory_space<vmem>>, vector<1x1x128x128xbf16>
    %62 = vector.shape_cast %61 : vector<1x1x128x128xbf16> to vector<128x128xbf16>
    %cst_63 = arith.constant dense<0.000000e+00> : vector<272x128xf32>
    %63 = tpu.matmul %60, %62, %cst_63 {dimension_numbers = #tpu.dot_dimension_numbers<[1], [0], [0], [1], [0, 0, 1, 1], [], []>} : vector<272x128xbf16>, vector<128x128xbf16>, vector<272x128xf32> -> vector<272x128xf32>
    %64 = arith.addf %59, %63 : vector<272x128xf32>
    %c42 = arith.constant 42 : index
    %c0_64 = arith.constant 0 : index
    %65 = vector.load %arg9[%c42, %c0_64] : memref<320x128xbf16, #tpu.memory_space<vmem>>, vector<272x128xbf16>
    %c2_65 = arith.constant 2 : index
    %c2_66 = arith.constant 2 : index
    %c0_67 = arith.constant 0 : index
    %c0_68 = arith.constant 0 : index
    %66 = vector.load %arg2[%c2_65, %c2_66, %c0_67, %c0_68] : memref<3x3x128x128xbf16, #tpu.memory_space<vmem>>, vector<1x1x128x128xbf16>
    %67 = vector.shape_cast %66 : vector<1x1x128x128xbf16> to vector<128x128xbf16>
    %cst_69 = arith.constant dense<0.000000e+00> : vector<272x128xf32>
    %68 = tpu.matmul %65, %67, %cst_69 {dimension_numbers = #tpu.dot_dimension_numbers<[1], [0], [0], [1], [0, 0, 1, 1], [], []>} : vector<272x128xbf16>, vector<128x128xbf16>, vector<272x128xf32> -> vector<272x128xf32>
    %69 = arith.addf %64, %68 : vector<272x128xf32>
    %70 = arith.truncf %69 : vector<272x128xf32> to vector<272x128xbf16>
    %c0_70 = arith.constant 0 : index
    %c0_71 = arith.constant 0 : index
    %c0_72 = arith.constant 0 : index
    %71 = vector.load %arg7[%c0_70, %c0_71, %c0_72] : memref<1x272x128xbf16, #tpu.memory_space<vmem>>, vector<1x272x128xbf16>
    %72 = vector.shape_cast %71 : vector<1x272x128xbf16> to vector<272x128xbf16>
    %73 = vector.shape_cast %70 : vector<272x128xbf16> to vector<1x272x128xbf16>
    tpu.vector_store %arg7[%c0_70, %c0_71, %c0_72], %73 {strides = array<i32>} : memref<1x272x128xbf16, #tpu.memory_space<vmem>>, vector<1x272x128xbf16>,
    %74 = vector.broadcast %0 : vector<272x1xf32> to vector<272x128xf32>
    %75 = arith.mulf %69, %74 : vector<272x128xf32>
    %cst_73 = arith.constant dense<0.000000e+00> : vector<128xf32>
    %76 = vector.multi_reduction <add>, %75, %cst_73 [0] : vector<272x128xf32> to vector<128xf32>
    %77 = vector.shape_cast %76 : vector<128xf32> to vector<1x128xf32>
    %cst_74 = arith.constant 3.906250e-03 : f32
    %78 = vector.broadcast %cst_74 : f32 to vector<1x128xf32>
    %79 = arith.mulf %77, %78 : vector<1x128xf32>
    %80 = vector.broadcast %79 : vector<1x128xf32> to vector<272x128xf32>
    %81 = arith.subf %69, %80 : vector<272x128xf32>
    %82 = vector.broadcast %0 : vector<272x1xf32> to vector<272x128xf32>
    %83 = arith.mulf %81, %82 : vector<272x128xf32>
    %84 = arith.mulf %83, %83 : vector<272x128xf32>
    %cst_75 = arith.constant dense<0.000000e+00> : vector<128xf32>
    %85 = vector.multi_reduction <add>, %84, %cst_75 [0] : vector<272x128xf32> to vector<128xf32>
    %86 = vector.shape_cast %85 : vector<128xf32> to vector<1x128xf32>
    %87 = tpu.concatenate %77, %86 in 0 : vector<1x128xf32>, vector<1x128xf32> -> vector<2x128xf32>
    %c0_76 = arith.constant 0 : index
    %c0_77 = arith.constant 0 : index
    %c0_78 = arith.constant 0 : index
    %88 = vector.load %arg8[%c0_76, %c0_77, %c0_78] : memref<1x2x128xf32, #tpu.memory_space<vmem>>, vector<1x2x128xf32>
    %89 = vector.shape_cast %88 : vector<1x2x128xf32> to vector<2x128xf32>
    %90 = vector.shape_cast %87 : vector<2x128xf32> to vector<1x2x128xf32>
    tpu.vector_store %arg8[%c0_76, %c0_77, %c0_78], %90 {strides = array<i32>} : memref<1x2x128xf32, #tpu.memory_space<vmem>>, vector<1x2x128xf32>,
    return
  }
  func.func @transform_0(%arg0: i32) -> (i32, i32, i32) {
    %c0_i32 = arith.constant 0 : i32
    %c0_i32_0 = arith.constant 0 : i32
    %c0_i32_1 = arith.constant 0 : i32
    return %arg0, %c0_i32, %c0_i32_0 : i32, i32, i32
  }
  func.func @transform_1(%arg0: i32) -> (i32, i32, i32, i32) {
    %c0_i32 = arith.constant 0 : i32
    %c0_i32_0 = arith.constant 0 : i32
    %c0_i32_1 = arith.constant 0 : i32
    %c0_i32_2 = arith.constant 0 : i32
    %c0_i32_3 = arith.constant 0 : i32
    return %c0_i32, %c0_i32_0, %c0_i32_1, %c0_i32_2 : i32, i32, i32, i32
  }
  func.func @transform_2(%arg0: i32) -> (i32, i32) {
    %c0_i32 = arith.constant 0 : i32
    %c0_i32_0 = arith.constant 0 : i32
    %c0_i32_1 = arith.constant 0 : i32
    return %c0_i32, %c0_i32_0 : i32, i32
  }
  func.func @transform_3(%arg0: i32) -> (i32, i32) {
    %c0_i32 = arith.constant 0 : i32
    %c0_i32_0 = arith.constant 0 : i32
    %c0_i32_1 = arith.constant 0 : i32
    return %c0_i32, %c0_i32_0 : i32, i32
  }
  func.func @transform_4(%arg0: i32) -> (i32, i32) {
    %c0_i32 = arith.constant 0 : i32
    %c0_i32_0 = arith.constant 0 : i32
    %c0_i32_1 = arith.constant 0 : i32
    return %c0_i32, %c0_i32_0 : i32, i32
  }
  func.func @transform_5(%arg0: i32) -> (i32, i32) {
    %c0_i32 = arith.constant 0 : i32
    %c0_i32_0 = arith.constant 0 : i32
    %c0_i32_1 = arith.constant 0 : i32
    return %c0_i32, %c0_i32_0 : i32, i32
  }
  func.func @transform_6(%arg0: i32) -> (i32, i32, i32) {
    %c0_i32 = arith.constant 0 : i32
    %c0_i32_0 = arith.constant 0 : i32
    %c0_i32_1 = arith.constant 0 : i32
    return %arg0, %c0_i32, %c0_i32_0 : i32, i32, i32
  }
  func.func @transform_7(%arg0: i32) -> (i32, i32, i32) {
    %c0_i32 = arith.constant 0 : i32
    %c0_i32_0 = arith.constant 0 : i32
    %c0_i32_1 = arith.constant 0 : i32
    return %arg0, %c0_i32, %c0_i32_0 : i32, i32, i32
  }
}

module attributes {stable_mosaic.version = 11 : i64} {
  func.func @_pass3_kernel(%arg0: i32, %arg1: memref<1x272x128xbf16, #tpu.memory_space<vmem>>, %arg2: memref<1x272x128xbf16, #tpu.memory_space<vmem>>, %arg3: memref<1x128xf32, #tpu.memory_space<vmem>>, %arg4: memref<1x128xf32, #tpu.memory_space<vmem>>, %arg5: memref<1x128xf32, #tpu.memory_space<vmem>>, %arg6: memref<1x128xf32, #tpu.memory_space<vmem>>, %arg7: memref<1x1xf32, #tpu.memory_space<smem>>, %arg8: memref<1x272x128xf32, #tpu.memory_space<vmem>>) attributes {dimension_semantics = [#tpu.dimension_semantics<parallel>], iteration_bounds = array<i64: 2>, scalar_prefetch = 0 : i64, scratch_operands = 0 : i64, tpu.core_type = #tpu.core_type<tc>, window_params = [{transform_indices = @transform_0, window_bounds = array<i64: 1, 272, 128>}, {transform_indices = @transform_1, window_bounds = array<i64: 1, 272, 128>}, {pipeline_mode = #tpu.pipeline_mode<synchronous>, transform_indices = @transform_2, window_bounds = array<i64: 1, 128>}, {pipeline_mode = #tpu.pipeline_mode<synchronous>, transform_indices = @transform_3, window_bounds = array<i64: 1, 128>}, {pipeline_mode = #tpu.pipeline_mode<synchronous>, transform_indices = @transform_4, window_bounds = array<i64: 1, 128>}, {pipeline_mode = #tpu.pipeline_mode<synchronous>, transform_indices = @transform_5, window_bounds = array<i64: 1, 128>}, {transform_indices = @transform_6, window_bounds = array<i64: 1, 1>}, {transform_indices = @transform_7, window_bounds = array<i64: 1, 272, 128>}]} {
    %c0 = arith.constant 0 : index
    %c0_0 = arith.constant 0 : index
    %c0_1 = arith.constant 0 : index
    %0 = vector.load %arg1[%c0, %c0_0, %c0_1] : memref<1x272x128xbf16, #tpu.memory_space<vmem>>, vector<1x272x128xbf16>
    %1 = vector.shape_cast %0 : vector<1x272x128xbf16> to vector<272x128xbf16>
    %2 = arith.extf %1 : vector<272x128xbf16> to vector<272x128xf32>
    %c0_2 = arith.constant 0 : index
    %c0_3 = arith.constant 0 : index
    %3 = vector.load %arg3[%c0_2, %c0_3] : memref<1x128xf32, #tpu.memory_space<vmem>>, vector<1x128xf32>
    %4 = vector.broadcast %3 : vector<1x128xf32> to vector<272x128xf32>
    %5 = arith.mulf %2, %4 : vector<272x128xf32>
    %c0_4 = arith.constant 0 : index
    %c0_5 = arith.constant 0 : index
    %6 = vector.load %arg4[%c0_4, %c0_5] : memref<1x128xf32, #tpu.memory_space<vmem>>, vector<1x128xf32>
    %7 = vector.broadcast %6 : vector<1x128xf32> to vector<272x128xf32>
    %8 = arith.addf %5, %7 : vector<272x128xf32>
    %c0_6 = arith.constant 0 : index
    %c0_7 = arith.constant 0 : index
    %c0_8 = arith.constant 0 : index
    %9 = vector.load %arg2[%c0_6, %c0_7, %c0_8] : memref<1x272x128xbf16, #tpu.memory_space<vmem>>, vector<1x272x128xbf16>
    %10 = vector.shape_cast %9 : vector<1x272x128xbf16> to vector<272x128xbf16>
    %11 = arith.extf %10 : vector<272x128xbf16> to vector<272x128xf32>
    %c0_9 = arith.constant 0 : index
    %c0_10 = arith.constant 0 : index
    %12 = vector.load %arg5[%c0_9, %c0_10] : memref<1x128xf32, #tpu.memory_space<vmem>>, vector<1x128xf32>
    %13 = vector.broadcast %12 : vector<1x128xf32> to vector<272x128xf32>
    %14 = arith.mulf %11, %13 : vector<272x128xf32>
    %15 = arith.addf %8, %14 : vector<272x128xf32>
    %c0_11 = arith.constant 0 : index
    %c0_12 = arith.constant 0 : index
    %16 = vector.load %arg6[%c0_11, %c0_12] : memref<1x128xf32, #tpu.memory_space<vmem>>, vector<1x128xf32>
    %17 = vector.broadcast %16 : vector<1x128xf32> to vector<272x128xf32>
    %18 = arith.addf %15, %17 : vector<272x128xf32>
    %c0_13 = arith.constant 0 : index
    %c0_14 = arith.constant 0 : index
    %19 = memref.load %arg7[%c0_13, %c0_14] : memref<1x1xf32, #tpu.memory_space<smem>>
    %cst = arith.constant 0.000000e+00 : f32
    %20 = vector.broadcast %cst : f32 to vector<272x128xf32>
    %21 = arith.cmpf oge, %18, %20 : vector<272x128xf32>
    %22 = vector.broadcast %19 : f32 to vector<272x128xf32>
    %23 = arith.mulf %22, %18 : vector<272x128xf32>
    %24 = arith.select %21, %18, %23 : vector<272x128xi1>, vector<272x128xf32>
    %c0_15 = arith.constant 0 : index
    %c0_16 = arith.constant 0 : index
    %c0_17 = arith.constant 0 : index
    %25 = vector.load %arg8[%c0_15, %c0_16, %c0_17] : memref<1x272x128xf32, #tpu.memory_space<vmem>>, vector<1x272x128xf32>
    %26 = vector.shape_cast %25 : vector<1x272x128xf32> to vector<272x128xf32>
    %27 = vector.shape_cast %24 : vector<272x128xf32> to vector<1x272x128xf32>
    tpu.vector_store %arg8[%c0_15, %c0_16, %c0_17], %27 {strides = array<i32>} : memref<1x272x128xf32, #tpu.memory_space<vmem>>, vector<1x272x128xf32>,
    return
  }
  func.func @transform_0(%arg0: i32) -> (i32, i32, i32) {
    %c0_i32 = arith.constant 0 : i32
    %c0_i32_0 = arith.constant 0 : i32
    %c0_i32_1 = arith.constant 0 : i32
    return %arg0, %c0_i32, %c0_i32_0 : i32, i32, i32
  }
  func.func @transform_1(%arg0: i32) -> (i32, i32, i32) {
    %c0_i32 = arith.constant 0 : i32
    %c0_i32_0 = arith.constant 0 : i32
    %c0_i32_1 = arith.constant 0 : i32
    return %arg0, %c0_i32, %c0_i32_0 : i32, i32, i32
  }
  func.func @transform_2(%arg0: i32) -> (i32, i32) {
    %c0_i32 = arith.constant 0 : i32
    %c0_i32_0 = arith.constant 0 : i32
    %c0_i32_1 = arith.constant 0 : i32
    return %c0_i32, %c0_i32_0 : i32, i32
  }
  func.func @transform_3(%arg0: i32) -> (i32, i32) {
    %c0_i32 = arith.constant 0 : i32
    %c0_i32_0 = arith.constant 0 : i32
    %c0_i32_1 = arith.constant 0 : i32
    return %c0_i32, %c0_i32_0 : i32, i32
  }
  func.func @transform_4(%arg0: i32) -> (i32, i32) {
    %c0_i32 = arith.constant 0 : i32
    %c0_i32_0 = arith.constant 0 : i32
    %c0_i32_1 = arith.constant 0 : i32
    return %c0_i32, %c0_i32_0 : i32, i32
  }
  func.func @transform_5(%arg0: i32) -> (i32, i32) {
    %c0_i32 = arith.constant 0 : i32
    %c0_i32_0 = arith.constant 0 : i32
    %c0_i32_1 = arith.constant 0 : i32
    return %c0_i32, %c0_i32_0 : i32, i32
  }
  func.func @transform_6(%arg0: i32) -> (i32, i32) {
    %c0_i32 = arith.constant 0 : i32
    %c0_i32_0 = arith.constant 0 : i32
    %c0_i32_1 = arith.constant 0 : i32
    return %c0_i32, %c0_i32_0 : i32, i32
  }
  func.func @transform_7(%arg0: i32) -> (i32, i32, i32) {
    %c0_i32 = arith.constant 0 : i32
    %c0_i32_0 = arith.constant 0 : i32
    %c0_i32_1 = arith.constant 0 : i32
    return %arg0, %c0_i32, %c0_i32_0 : i32, i32, i32
  }
}

</mosaic_0001>

<bundles_post_ra>
// kernel: residual_block.5
= control target key start
LH: loop header
LB: loop body
LE: loop exit
PB: predicated region body
PF: predicated region fallthrough
CT: control target
= control target key end

     0   :  { %s1082_s26 = smov 0   ;;  %s1372_s0 = inlined_call_operand.vmem [shape: bf16[2,272,128], index: 0, kind: input, shape index: {}]   ;;  %s1373_s1 = inlined_call_operand.vmem [shape: bf16[2,272,128], index: 1, kind: input, shape index: {}]   ;;  %s1374_s2 = inlined_call_operand.vmem [shape: f32[1,128], index: 2, kind: input, shape index: {}]   ;;  %s1375_s3 = inlined_call_operand.vmem [shape: f32[1,128], index: 3, kind: input, shape index: {}]   ;;  %s1376_s4 = inlined_call_operand.vmem [shape: f32[1,128], index: 4, kind: input, shape index: {}]   ;;  %s1377_s5 = inlined_call_operand.vmem [shape: f32[1,128], index: 5, kind: input, shape index: {}]   ;;  %s1378_s6 = inlined_call_operand.<no memory space> [shape: f32[1,1], index: 6, kind: input, shape index: {}]   ;;  %s1379_s7 = inlined_call_operand.vmem [shape: f32[2,272,128], index: 7, kind: output, shape index: {}]  }
   0x1   :  { %12 = sst [smem:[#allocation2]] %s1378_s6 }
   0x2 LB: > { %s839_s27 = sadd.s32 4294967295, %s1037_s26   ;;  %p843_p0 = scmp.ge.s32.totalorder %s1037_s26, 1  ;;  %s1037_s26 = sphi %s1082_s26, %s18_s26  }
   0x3   : > { %p248_p1 = scmp.lt.s32.totalorder %s1037_s26, 3 }
   0x5   : > { %p249_p2 = pnand %p843_p0, %p248_p1 }
   0x6   : > { %p285_p3 = scmp.lt.s32.totalorder (!%p249_p2), %s839_s27, 1  ;;  %s634_s28 = sld [smem:[#allocation2]] (!%p249_p2) }
   0x7   : > { %252 = sbr.rel (%p249_p2) target bundleno = 110 (0x6e), region = 48 }
   0xc   : > { %s1381_s27 = smov (!%p285_p3, %s839_s27), 1  ;;  %v1106_v0 = vld [vmem:[%s1374_s2] ss:$0 sm:$0xff]  ;;  %v1115_v4 = vstv %s634_s28 }
   0xd   : > { %s1021_s6 = smul.u32 136, %s1381_s27  ;;  %v1111_v1 = vld [vmem:[%s1376_s4] ss:$0 sm:$0xff] }
   0xe   : > { %v1122_v11 = vld [vmem:[%s1375_s3] ss:$0 sm:$0xff]  ;;  %s1022_s20 = smul.u32 272, %s1381_s27 }
   0xf   : > { %s1096_s8 = scalar_lea.vmem %s1372_s0, %s1021_s6  ;;  %s1101_s11 = scalar_lea.vmem %s1373_s1, %s1021_s6  ;;  %v1139_v30 = vld [vmem:[%s1377_s5] ss:$0 sm:$0xff] }
  0x10   : > { %v854_v2 = vld [vmem:[%s1096_s8] sm:$0xff]   ;;  %v989_v5 = vld [vmem:[%s1096_s8 + $0x8] sm:$0xff]   ;;  %v990_v16 = vld [vmem:[%s1096_s8 + $0x10] sm:$0xff]   ;;  %s1159_s23 = scalar_lea.vmem %s1379_s7, %s1022_s20 }
  0x11   : > { %v922_v3 = vld [vmem:[%s1101_s11] sm:$0xff]   ;;  %v855_v6 = vunpack.c.l.bf16 %v854_v2  ;;  %v856_v8 = vunpack.c.h.bf16 %v854_v2  ;;  %v1005_v10 = vld [vmem:[%s1101_s11 + $0x8] sm:$0xff]   ;;  %v859_v12 = vunpack.c.l.bf16 %v989_v5  ;;  %v860_v14 = vunpack.c.h.bf16 %v989_v5  ;;  %v1006_v17 = vld [vmem:[%s1101_s11 + $0x10] sm:$0xff]  }
  0x12   : > { %v923_v7 = vunpack.c.l.bf16 %v922_v3  ;;  %v924_v9 = vunpack.c.h.bf16 %v922_v3  ;;  %v927_v13 = vunpack.c.l.bf16 %v1005_v10  ;;  %v928_v15 = vunpack.c.h.bf16 %v1005_v10  ;;  %v991_v35 = vld [vmem:[%s1096_s8 + $0x18] sm:$0xff]   ;;  %v992_v61 = vld [vmem:[%s1096_s8 + $0x20] sm:$0xff]  }
  0x13   : > { %v375_v18 = vmul.f32 %v855_v6, %v1106_v0  ;;  %v376_v20 = vmul.f32 %v856_v8, %v1106_v0  ;;  %v377_v22 = vmul.f32 %v859_v12, %v1106_v0  ;;  %v378_v24 = vmul.f32 %v860_v14, %v1106_v0  ;;  %v1007_v40 = vld [vmem:[%s1101_s11 + $0x18] sm:$0xff]   ;;  %v1008_v62 = vld [vmem:[%s1101_s11 + $0x20] sm:$0xff]  }
  0x14   : > { %v525_v19 = vmul.f32 %v923_v7, %v1111_v1  ;;  %v526_v21 = vmul.f32 %v924_v9, %v1111_v1  ;;  %v527_v23 = vmul.f32 %v927_v13, %v1111_v1  ;;  %v528_v25 = vmul.f32 %v928_v15, %v1111_v1 }
  0x15   : > { %v416_v26 = vadd.f32 %v1122_v11, %v375_v18  ;;  %v417_v27 = vadd.f32 %v1122_v11, %v376_v20  ;;  %v863_v28 = vunpack.c.l.bf16 %v990_v16  ;;  %v931_v29 = vunpack.c.l.bf16 %v1006_v17 }
  0x16   : > { %v418_v31 = vadd.f32 %v1122_v11, %v377_v22  ;;  %v419_v32 = vadd.f32 %v1122_v11, %v378_v24  ;;  %v864_v33 = vunpack.c.h.bf16 %v990_v16  ;;  %v932_v34 = vunpack.c.h.bf16 %v1006_v17  ;;  %v1009_v22 = vld [vmem:[%s1101_s11 + $0x28] sm:$0xff]  }
  0x17   : > { %v559_v36 = vadd.f32 %v525_v19, %v416_v26  ;;  %v560_v37 = vadd.f32 %v526_v21, %v417_v27  ;;  %v379_v38 = vmul.f32 %v863_v28, %v1106_v0  ;;  %v529_v39 = vmul.f32 %v931_v29, %v1111_v1  ;;  %v993_v21 = vld [vmem:[%s1096_s8 + $0x28] sm:$0xff]  }
  0x18   : > { %v561_v41 = vadd.f32 %v527_v23, %v418_v31  ;;  %v562_v42 = vadd.f32 %v528_v25, %v419_v32  ;;  %v380_v43 = vmul.f32 %v864_v33, %v1106_v0  ;;  %v530_v44 = vmul.f32 %v932_v34, %v1111_v1 }
  0x19   : > { %v600_v45 = vadd.f32 %v1139_v30, %v559_v36  ;;  %v601_v46 = vadd.f32 %v1139_v30, %v560_v37  ;;  %v420_v47 = vadd.f32 %v1122_v11, %v379_v38  ;;  %v867_v48 = vunpack.c.l.bf16 %v991_v35 }
  0x1a   : > { %v602_v49 = vadd.f32 %v1139_v30, %v561_v41  ;;  %v603_v50 = vadd.f32 %v1139_v30, %v562_v42  ;;  %v421_v51 = vadd.f32 %v1122_v11, %v380_v43  ;;  %v935_v52 = vunpack.c.l.bf16 %v1007_v40 }
  0x1b   : > { %vm635_vm0 = vcmp.ge.f32.partialorder %v600_v45, 0.0  ;;  %v670_v53 = vmul.f32 %v1115_v4, %v600_v45  ;;  %vm636_vm1 = vcmp.ge.f32.partialorder %v601_v46, 0.0  ;;  %v671_v54 = vmul.f32 %v1115_v4, %v601_v46 }
  0x1c   : > { %vm637_vm2 = vcmp.ge.f32.partialorder %v602_v49, 0.0  ;;  %v672_v55 = vmul.f32 %v1115_v4, %v602_v49  ;;  %vm638_vm3 = vcmp.ge.f32.partialorder %v603_v50, 0.0  ;;  %v673_v56 = vmul.f32 %v1115_v4, %v603_v50 }
  0x1d   : > { %v704_v57 = vsel %vm635_vm0, %v600_v45, %v670_v53  ;;  %v705_v58 = vsel %vm636_vm1, %v601_v46, %v671_v54  ;;  %v563_v59 = vadd.f32 %v529_v39, %v420_v47  ;;  %v564_v60 = vadd.f32 %v530_v44, %v421_v51  ;;  %v994_v39 = vld [vmem:[%s1096_s8 + $0x30] sm:$0xff]  }
  0x1e   : > { %738 = vst [vmem:[%s1159_s23] sm:$0xff] %v704_v57  ;;  %739 = vst [vmem:[%s1159_s23 + $0x8] sm:$0xff] %v705_v58  ;;  %v706_v63 = vsel %vm637_vm2, %v602_v49, %v672_v55  ;;  %v707_v2 = vsel %vm638_vm3, %v603_v50, %v673_v56  ;;  %v381_v3 = vmul.f32 %v867_v48, %v1106_v0  ;;  %v868_v8 = vunpack.c.h.bf16 %v991_v35 }
  0x1f   : > { %v531_v5 = vmul.f32 %v935_v52, %v1111_v1  ;;  %740 = vst [vmem:[%s1159_s23 + $0x10] sm:$0xff] %v706_v63  ;;  %741 = vst [vmem:[%s1159_s23 + $0x18] sm:$0xff] %v707_v2  ;;  %v604_v6 = vadd.f32 %v1139_v30, %v563_v59  ;;  %v605_v7 = vadd.f32 %v1139_v30, %v564_v60  ;;  %v936_v9 = vunpack.c.h.bf16 %v1007_v40  ;;  %v1010_v52 = vld [vmem:[%s1101_s11 + $0x30] sm:$0xff]  }
  0x20   : > { %v422_v10 = vadd.f32 %v1122_v11, %v381_v3  ;;  %v871_v12 = vunpack.c.l.bf16 %v992_v61  ;;  %v939_v13 = vunpack.c.l.bf16 %v1008_v62  ;;  %v872_v14 = vunpack.c.h.bf16 %v992_v61 }
  0x21   : > { %vm639_vm4 = vcmp.ge.f32.partialorder %v604_v6, 0.0  ;;  %v674_v15 = vmul.f32 %v1115_v4, %v604_v6  ;;  %vm640_vm5 = vcmp.ge.f32.partialorder %v605_v7, 0.0  ;;  %v675_v16 = vmul.f32 %v1115_v4, %v605_v7 }
  0x22   : > { %v565_v17 = vadd.f32 %v531_v5, %v422_v10  ;;  %v382_v18 = vmul.f32 %v868_v8, %v1106_v0  ;;  %v532_v19 = vmul.f32 %v936_v9, %v1111_v1  ;;  %v383_v20 = vmul.f32 %v871_v12, %v1106_v0  ;;  %v995_v5 = vld [vmem:[%s1096_s8 + $0x38] sm:$0xff]  }
  0x23   : > { %v708_v23 = vsel %vm639_vm4, %v604_v6, %v674_v15  ;;  %v709_v24 = vsel %vm640_vm5, %v605_v7, %v675_v16  ;;  %v533_v25 = vmul.f32 %v939_v13, %v1111_v1  ;;  %v384_v26 = vmul.f32 %v872_v14, %v1106_v0  ;;  %v1011_v10 = vld [vmem:[%s1101_s11 + $0x38] sm:$0xff]  }
  0x24   : > { %742 = vst [vmem:[%s1159_s23 + $0x20] sm:$0xff] %v708_v23  ;;  %743 = vst [vmem:[%s1159_s23 + $0x28] sm:$0xff] %v709_v24  ;;  %v606_v27 = vadd.f32 %v1139_v30, %v565_v17  ;;  %v423_v28 = vadd.f32 %v1122_v11, %v382_v18  ;;  %v424_v29 = vadd.f32 %v1122_v11, %v383_v20  ;;  %v940_v31 = vunpack.c.h.bf16 %v1008_v62 }
  0x25   : > { %v425_v32 = vadd.f32 %v1122_v11, %v384_v26  ;;  %v875_v33 = vunpack.c.l.bf16 %v993_v21  ;;  %v943_v34 = vunpack.c.l.bf16 %v1009_v22  ;;  %v876_v35 = vunpack.c.h.bf16 %v993_v21 }
  0x26   : > { %vm641_vm6 = vcmp.ge.f32.partialorder %v606_v27, 0.0  ;;  %v676_v36 = vmul.f32 %v1115_v4, %v606_v27  ;;  %v566_v37 = vadd.f32 %v532_v19, %v423_v28  ;;  %v567_v38 = vadd.f32 %v533_v25, %v424_v29  ;;  %v996_v19 = vld [vmem:[%s1096_s8 + $0x40] sm:$0xff]  }
  0x27   : > { %v534_v40 = vmul.f32 %v940_v31, %v1111_v1  ;;  %v385_v41 = vmul.f32 %v875_v33, %v1106_v0  ;;  %v535_v42 = vmul.f32 %v943_v34, %v1111_v1  ;;  %v386_v43 = vmul.f32 %v876_v35, %v1106_v0 }
  0x28   : > { %v710_v44 = vsel %vm641_vm6, %v606_v27, %v676_v36  ;;  %v607_v45 = vadd.f32 %v1139_v30, %v566_v37  ;;  %v608_v46 = vadd.f32 %v1139_v30, %v567_v38  ;;  %v944_v47 = vunpack.c.h.bf16 %v1009_v22  ;;  %v1012_v27 = vld [vmem:[%s1101_s11 + $0x40] sm:$0xff]  }
  0x29   : > { %744 = vst [vmem:[%s1159_s23 + $0x30] sm:$0xff] %v710_v44  ;;  %v568_v48 = vadd.f32 %v534_v40, %v425_v32  ;;  %v426_v49 = vadd.f32 %v1122_v11, %v385_v41  ;;  %v427_v50 = vadd.f32 %v1122_v11, %v386_v43  ;;  %v879_v51 = vunpack.c.l.bf16 %v994_v39  ;;  %v997_v40 = vld [vmem:[%s1096_s8 + $0x48] sm:$0xff]  }
  0x2a   : > { %vm642_vm7 = vcmp.ge.f32.partialorder %v607_v45, 0.0  ;;  %v677_v53 = vmul.f32 %v1115_v4, %v607_v45  ;;  %vm643_vm8 = vcmp.ge.f32.partialorder %v608_v46, 0.0  ;;  %v678_v54 = vmul.f32 %v1115_v4, %v608_v46  ;;  %v1013_v44 = vld [vmem:[%s1101_s11 + $0x48] sm:$0xff]  }
  0x2b   : > { %v609_v55 = vadd.f32 %v1139_v30, %v568_v48  ;;  %v569_v56 = vadd.f32 %v535_v42, %v426_v49  ;;  %v536_v57 = vmul.f32 %v944_v47, %v1111_v1  ;;  %v387_v58 = vmul.f32 %v879_v51, %v1106_v0 }
  0x2c   : > { %v711_v59 = vsel %vm642_vm7, %v607_v45, %v677_v53  ;;  %v712_v60 = vsel %vm643_vm8, %v608_v46, %v678_v54  ;;  %v947_v61 = vunpack.c.l.bf16 %v1010_v52  ;;  %v880_v62 = vunpack.c.h.bf16 %v994_v39 }
  0x2d   : > { %745 = vst [vmem:[%s1159_s23 + $0x38] sm:$0xff] %v711_v59  ;;  %746 = vst [vmem:[%s1159_s23 + $0x40] sm:$0xff] %v712_v60  ;;  %vm644_vm9 = vcmp.ge.f32.partialorder %v609_v55, 0.0  ;;  %v679_v63 = vmul.f32 %v1115_v4, %v609_v55  ;;  %v610_v2 = vadd.f32 %v1139_v30, %v569_v56  ;;  %v570_v3 = vadd.f32 %v536_v57, %v427_v50 }
  0x2e   : > { %v428_v6 = vadd.f32 %v1122_v11, %v387_v58  ;;  %v537_v7 = vmul.f32 %v947_v61, %v1111_v1  ;;  %v388_v8 = vmul.f32 %v880_v62, %v1106_v0  ;;  %v948_v9 = vunpack.c.h.bf16 %v1010_v52 }
  0x2f   : > { %v713_v12 = vsel %vm644_vm9, %v609_v55, %v679_v63  ;;  %vm645_vm10 = vcmp.ge.f32.partialorder %v610_v2, 0.0  ;;  %v680_v13 = vmul.f32 %v1115_v4, %v610_v2  ;;  %v611_v14 = vadd.f32 %v1139_v30, %v570_v3 }
  0x30   : > { %747 = vst [vmem:[%s1159_s23 + $0x48] sm:$0xff] %v713_v12  ;;  %v571_v15 = vadd.f32 %v537_v7, %v428_v6  ;;  %v429_v16 = vadd.f32 %v1122_v11, %v388_v8  ;;  %v538_v17 = vmul.f32 %v948_v9, %v1111_v1  ;;  %v883_v18 = vunpack.c.l.bf16 %v995_v5  ;;  %v998_v7 = vld [vmem:[%s1096_s8 + $0x50] sm:$0xff]  }
  0x31   : > { %v714_v20 = vsel %vm645_vm10, %v610_v2, %v680_v13  ;;  %vm646_vm11 = vcmp.ge.f32.partialorder %v611_v14, 0.0  ;;  %v681_v21 = vmul.f32 %v1115_v4, %v611_v14  ;;  %v951_v22 = vunpack.c.l.bf16 %v1011_v10  ;;  %v1014_v8 = vld [vmem:[%s1101_s11 + $0x50] sm:$0xff]  }
  0x32   : > { %748 = vst [vmem:[%s1159_s23 + $0x50] sm:$0xff] %v714_v20  ;;  %v612_v23 = vadd.f32 %v1139_v30, %v571_v15  ;;  %v572_v24 = vadd.f32 %v538_v17, %v429_v16  ;;  %v389_v25 = vmul.f32 %v883_v18, %v1106_v0  ;;  %v884_v26 = vunpack.c.h.bf16 %v995_v5  ;;  %v999_v16 = vld [vmem:[%s1096_s8 + $0x58] sm:$0xff]  }
  0x33   : > { %v715_v28 = vsel %vm646_vm11, %v611_v14, %v681_v21  ;;  %v539_v29 = vmul.f32 %v951_v22, %v1111_v1  ;;  %v952_v31 = vunpack.c.h.bf16 %v1011_v10  ;;  %v887_v32 = vunpack.c.l.bf16 %v996_v19 }
  0x34   : > { %749 = vst [vmem:[%s1159_s23 + $0x58] sm:$0xff] %v715_v28  ;;  %vm647_vm12 = vcmp.ge.f32.partialorder %v612_v23, 0.0  ;;  %v682_v33 = vmul.f32 %v1115_v4, %v612_v23  ;;  %v613_v34 = vadd.f32 %v1139_v30, %v572_v24  ;;  %v430_v35 = vadd.f32 %v1122_v11, %v389_v25 }
  0x35   : > { %v390_v36 = vmul.f32 %v884_v26, %v1106_v0  ;;  %v540_v37 = vmul.f32 %v952_v31, %v1111_v1  ;;  %v391_v38 = vmul.f32 %v887_v32, %v1106_v0  ;;  %v955_v39 = vunpack.c.l.bf16 %v1012_v27 }
  0x36   : > { %v716_v41 = vsel %vm647_vm12, %v612_v23, %v682_v33  ;;  %vm648_vm13 = vcmp.ge.f32.partialorder %v613_v34, 0.0  ;;  %v683_v42 = vmul.f32 %v1115_v4, %v613_v34  ;;  %v573_v43 = vadd.f32 %v539_v29, %v430_v35  ;;  %v1015_v29 = vld [vmem:[%s1101_s11 + $0x58] sm:$0xff]  }
  0x37   : > { %750 = vst [vmem:[%s1159_s23 + $0x60] sm:$0xff] %v716_v41  ;;  %v431_v45 = vadd.f32 %v1122_v11, %v390_v36  ;;  %v432_v46 = vadd.f32 %v1122_v11, %v391_v38  ;;  %v541_v47 = vmul.f32 %v955_v39, %v1111_v1  ;;  %v888_v48 = vunpack.c.h.bf16 %v996_v19 }
  0x38   : > { %v717_v49 = vsel %vm648_vm13, %v613_v34, %v683_v42  ;;  %v614_v50 = vadd.f32 %v1139_v30, %v573_v43  ;;  %v956_v51 = vunpack.c.h.bf16 %v1012_v27  ;;  %v891_v52 = vunpack.c.l.bf16 %v997_v40 }
  0x39   : > { %751 = vst [vmem:[%s1159_s23 + $0x68] sm:$0xff] %v717_v49  ;;  %v574_v53 = vadd.f32 %v540_v37, %v431_v45  ;;  %v575_v54 = vadd.f32 %v541_v47, %v432_v46  ;;  %v392_v55 = vmul.f32 %v888_v48, %v1106_v0  ;;  %v959_v56 = vunpack.c.l.bf16 %v1013_v44  ;;  %v1000_v37 = vld [vmem:[%s1096_s8 + $0x60] sm:$0xff]  }
  0x3a   : > { %vm649_vm14 = vcmp.ge.f32.partialorder %v614_v50, 0.0  ;;  %v684_v57 = vmul.f32 %v1115_v4, %v614_v50  ;;  %v542_v58 = vmul.f32 %v956_v51, %v1111_v1  ;;  %v393_v59 = vmul.f32 %v891_v52, %v1106_v0 }
  0x3b   : > { %v615_v60 = vadd.f32 %v1139_v30, %v574_v53  ;;  %v616_v61 = vadd.f32 %v1139_v30, %v575_v54  ;;  %v433_v62 = vadd.f32 %v1122_v11, %v392_v55  ;;  %v543_v63 = vmul.f32 %v959_v56, %v1111_v1  ;;  %v1016_v53 = vld [vmem:[%s1101_s11 + $0x60] sm:$0xff]  }
  0x3c   : > { %v718_v2 = vsel %vm649_vm14, %v614_v50, %v684_v57  ;;  %v434_v3 = vadd.f32 %v1122_v11, %v393_v59  ;;  %v892_v5 = vunpack.c.h.bf16 %v997_v40  ;;  %v960_v6 = vunpack.c.h.bf16 %v1013_v44 }
  0x3d   : > { %752 = vst [vmem:[%s1159_s23 + $0x70] sm:$0xff] %v718_v2  ;;  %vm650_vm15 = vcmp.ge.f32.partialorder %v615_v60, 0.0  ;;  %v685_v9 = vmul.f32 %v1115_v4, %v615_v60  ;;  %vm651_vm0 = vcmp.ge.f32.partialorder %v616_v61, 0.0  ;;  %v686_v10 = vmul.f32 %v1115_v4, %v616_v61 }
  0x3e   : > { %v576_v12 = vadd.f32 %v542_v58, %v433_v62  ;;  %v577_v13 = vadd.f32 %v543_v63, %v434_v3  ;;  %v394_v14 = vmul.f32 %v892_v5, %v1106_v0  ;;  %v544_v15 = vmul.f32 %v960_v6, %v1111_v1  ;;  %v1001_v3 = vld [vmem:[%s1096_s8 + $0x68] sm:$0xff]  }
  0x3f   : > { %v719_v17 = vsel %vm650_vm15, %v615_v60, %v685_v9  ;;  %v720_v18 = vsel %vm651_vm0, %v616_v61, %v686_v10  ;;  %v895_v19 = vunpack.c.l.bf16 %v998_v7  ;;  %v963_v20 = vunpack.c.l.bf16 %v1014_v8 }
  0x40   : > { %753 = vst [vmem:[%s1159_s23 + $0x78] sm:$0xff] %v719_v17  ;;  %754 = vst [vmem:[%s1159_s23 + $0x80] sm:$0xff] %v720_v18  ;;  %v617_v21 = vadd.f32 %v1139_v30, %v576_v12  ;;  %v618_v22 = vadd.f32 %v1139_v30, %v577_v13  ;;  %v435_v23 = vadd.f32 %v1122_v11, %v394_v14  ;;  %v896_v24 = vunpack.c.h.bf16 %v998_v7 }
  0x41   : > { %v395_v25 = vmul.f32 %v895_v19, %v1106_v0  ;;  %v545_v26 = vmul.f32 %v963_v20, %v1111_v1  ;;  %v964_v27 = vunpack.c.h.bf16 %v1014_v8  ;;  %v899_v28 = vunpack.c.l.bf16 %v999_v16  ;;  %v1017_v8 = vld [vmem:[%s1101_s11 + $0x68] sm:$0xff]  }
  0x42   : > { %vm652_vm1 = vcmp.ge.f32.partialorder %v617_v21, 0.0  ;;  %v687_v31 = vmul.f32 %v1115_v4, %v617_v21  ;;  %vm653_vm2 = vcmp.ge.f32.partialorder %v618_v22, 0.0  ;;  %v688_v32 = vmul.f32 %v1115_v4, %v618_v22 }
  0x43   : > { %v578_v33 = vadd.f32 %v544_v15, %v435_v23  ;;  %v436_v34 = vadd.f32 %v1122_v11, %v395_v25  ;;  %v396_v35 = vmul.f32 %v896_v24, %v1106_v0  ;;  %v546_v36 = vmul.f32 %v964_v27, %v1111_v1  ;;  %v1002_v25 = vld [vmem:[%s1096_s8 + $0x70] sm:$0xff]  }
  0x44   : > { %v721_v38 = vsel %vm652_vm1, %v617_v21, %v687_v31  ;;  %v722_v39 = vsel %vm653_vm2, %v618_v22, %v688_v32  ;;  %v397_v40 = vmul.f32 %v899_v28, %v1106_v0  ;;  %v967_v41 = vunpack.c.l.bf16 %v1015_v29 }
  0x45   : > { %755 = vst [vmem:[%s1159_s23 + $0x88] sm:$0xff] %v721_v38  ;;  %756 = vst [vmem:[%s1159_s23 + $0x90] sm:$0xff] %v722_v39  ;;  %v619_v42 = vadd.f32 %v1139_v30, %v578_v33  ;;  %v579_v43 = vadd.f32 %v545_v26, %v436_v34  ;;  %v437_v44 = vadd.f32 %v1122_v11, %v396_v35  ;;  %v900_v45 = vunpack.c.h.bf16 %v999_v16  ;;  %v1018_v34 = vld [vmem:[%s1101_s11 + $0x70] sm:$0xff]  }
  0x46   : > { %v438_v46 = vadd.f32 %v1122_v11, %v397_v40  ;;  %v547_v47 = vmul.f32 %v967_v41, %v1111_v1  ;;  %v968_v48 = vunpack.c.h.bf16 %v1015_v29  ;;  %v903_v49 = vunpack.c.l.bf16 %v1000_v37 }
  0x47   : > { %vm654_vm3 = vcmp.ge.f32.partialorder %v619_v42, 0.0  ;;  %v689_v50 = vmul.f32 %v1115_v4, %v619_v42  ;;  %v620_v51 = vadd.f32 %v1139_v30, %v579_v43  ;;  %v580_v52 = vadd.f32 %v546_v36, %v437_v44 }
  0x48   : > { %v581_v54 = vadd.f32 %v547_v47, %v438_v46  ;;  %v398_v55 = vmul.f32 %v900_v45, %v1106_v0  ;;  %v548_v56 = vmul.f32 %v968_v48, %v1111_v1  ;;  %v399_v57 = vmul.f32 %v903_v49, %v1106_v0  ;;  %v1003_v49 = vld [vmem:[%s1096_s8 + $0x78] sm:$0xff]  }
  0x49   : > { %v723_v58 = vsel %vm654_vm3, %v619_v42, %v689_v50  ;;  %vm655_vm4 = vcmp.ge.f32.partialorder %v620_v51, 0.0  ;;  %v690_v59 = vmul.f32 %v1115_v4, %v620_v51  ;;  %v621_v60 = vadd.f32 %v1139_v30, %v580_v52 }
  0x4a   : > { %757 = vst [vmem:[%s1159_s23 + $0x98] sm:$0xff] %v723_v58  ;;  %v622_v61 = vadd.f32 %v1139_v30, %v581_v54  ;;  %v439_v62 = vadd.f32 %v1122_v11, %v398_v55  ;;  %v440_v63 = vadd.f32 %v1122_v11, %v399_v57  ;;  %v971_v2 = vunpack.c.l.bf16 %v1016_v53  ;;  %v1019_v54 = vld [vmem:[%s1101_s11 + $0x78] sm:$0xff]  }
  0x4b   : > { %v724_v5 = vsel %vm655_vm4, %v620_v51, %v690_v59  ;;  %vm656_vm5 = vcmp.ge.f32.partialorder %v621_v60, 0.0  ;;  %v691_v6 = vmul.f32 %v1115_v4, %v621_v60  ;;  %v904_v7 = vunpack.c.h.bf16 %v1000_v37 }
  0x4c   : > { %758 = vst [vmem:[%s1159_s23 + $0xa0] sm:$0xff] %v724_v5  ;;  %vm657_vm6 = vcmp.ge.f32.partialorder %v622_v61, 0.0  ;;  %v692_v9 = vmul.f32 %v1115_v4, %v622_v61  ;;  %v582_v10 = vadd.f32 %v548_v56, %v439_v62  ;;  %v549_v12 = vmul.f32 %v971_v2, %v1111_v1  ;;  %v1004_v62 = vld [vmem:[%s1096_s8 + $0x80] sm:$0xff]  }
  0x4d   : > { %v725_v13 = vsel %vm656_vm5, %v621_v60, %v691_v6  ;;  %v400_v14 = vmul.f32 %v904_v7, %v1106_v0  ;;  %v972_v15 = vunpack.c.h.bf16 %v1016_v53  ;;  %v907_v16 = vunpack.c.l.bf16 %v1001_v3 }
  0x4e   : > { %759 = vst [vmem:[%s1159_s23 + $0xa8] sm:$0xff] %v725_v13  ;;  %v726_v17 = vsel %vm657_vm6, %v622_v61, %v692_v9  ;;  %v623_v18 = vadd.f32 %v1139_v30, %v582_v10  ;;  %v583_v19 = vadd.f32 %v549_v12, %v440_v63  ;;  %v975_v20 = vunpack.c.l.bf16 %v1017_v8  ;;  %v1020_v9 = vld [vmem:[%s1101_s11 + $0x80] sm:$0xff]  }
  0x4f   : > { %760 = vst [vmem:[%s1159_s23 + $0xb0] sm:$0xff] %v726_v17  ;;  %v441_v21 = vadd.f32 %v1122_v11, %v400_v14  ;;  %v550_v22 = vmul.f32 %v972_v15, %v1111_v1  ;;  %v401_v23 = vmul.f32 %v907_v16, %v1106_v0  ;;  %v908_v24 = vunpack.c.h.bf16 %v1001_v3 }
  0x50   : > { %vm658_vm7 = vcmp.ge.f32.partialorder %v623_v18, 0.0  ;;  %v693_v26 = vmul.f32 %v1115_v4, %v623_v18  ;;  %v624_v27 = vadd.f32 %v1139_v30, %v583_v19  ;;  %v551_v28 = vmul.f32 %v975_v20, %v1111_v1 }
  0x51   : > { %v584_v29 = vadd.f32 %v550_v22, %v441_v21  ;;  %v442_v31 = vadd.f32 %v1122_v11, %v401_v23  ;;  %v402_v32 = vmul.f32 %v908_v24, %v1106_v0  ;;  %v976_v33 = vunpack.c.h.bf16 %v1017_v8 }
  0x52   : > { %v727_v35 = vsel %vm658_vm7, %v623_v18, %v693_v26  ;;  %vm659_vm8 = vcmp.ge.f32.partialorder %v624_v27, 0.0  ;;  %v694_v36 = vmul.f32 %v1115_v4, %v624_v27  ;;  %v911_v37 = vunpack.c.l.bf16 %v1002_v25 }
  0x53   : > { %761 = vst [vmem:[%s1159_s23 + $0xb8] sm:$0xff] %v727_v35  ;;  %v625_v38 = vadd.f32 %v1139_v30, %v584_v29  ;;  %v585_v39 = vadd.f32 %v551_v28, %v442_v31  ;;  %v443_v40 = vadd.f32 %v1122_v11, %v402_v32  ;;  %v552_v41 = vmul.f32 %v976_v33, %v1111_v1 }
  0x54   : > { %v728_v42 = vsel %vm659_vm8, %v624_v27, %v694_v36  ;;  %v403_v43 = vmul.f32 %v911_v37, %v1106_v0  ;;  %v979_v44 = vunpack.c.l.bf16 %v1018_v34  ;;  %v912_v45 = vunpack.c.h.bf16 %v1002_v25 }
  0x55   : > { %762 = vst [vmem:[%s1159_s23 + $0xc0] sm:$0xff] %v728_v42  ;;  %vm660_vm9 = vcmp.ge.f32.partialorder %v625_v38, 0.0  ;;  %v695_v46 = vmul.f32 %v1115_v4, %v625_v38  ;;  %v626_v47 = vadd.f32 %v1139_v30, %v585_v39  ;;  %v586_v48 = vadd.f32 %v552_v41, %v443_v40 }
  0x56   : > { %v444_v50 = vadd.f32 %v1122_v11, %v403_v43  ;;  %v553_v51 = vmul.f32 %v979_v44, %v1111_v1  ;;  %v404_v52 = vmul.f32 %v912_v45, %v1106_v0  ;;  %v980_v53 = vunpack.c.h.bf16 %v1018_v34 }
  0x57   : > { %v729_v55 = vsel %vm660_vm9, %v625_v38, %v695_v46  ;;  %vm661_vm10 = vcmp.ge.f32.partialorder %v626_v47, 0.0  ;;  %v696_v56 = vmul.f32 %v1115_v4, %v626_v47  ;;  %v627_v57 = vadd.f32 %v1139_v30, %v586_v48 }
  0x58   : > { %763 = vst [vmem:[%s1159_s23 + $0xc8] sm:$0xff] %v729_v55  ;;  %v587_v58 = vadd.f32 %v553_v51, %v444_v50  ;;  %v445_v59 = vadd.f32 %v1122_v11, %v404_v52  ;;  %v554_v60 = vmul.f32 %v980_v53, %v1111_v1  ;;  %v915_v61 = vunpack.c.l.bf16 %v1003_v49 }
  0x59   : > { %v730_v63 = vsel %vm661_vm10, %v626_v47, %v696_v56  ;;  %vm662_vm11 = vcmp.ge.f32.partialorder %v627_v57, 0.0  ;;  %v697_v2 = vmul.f32 %v1115_v4, %v627_v57  ;;  %v983_v3 = vunpack.c.l.bf16 %v1019_v54 }
  0x5a   : > { %764 = vst [vmem:[%s1159_s23 + $0xd0] sm:$0xff] %v730_v63  ;;  %v628_v5 = vadd.f32 %v1139_v30, %v587_v58  ;;  %v588_v6 = vadd.f32 %v554_v60, %v445_v59  ;;  %v405_v7 = vmul.f32 %v915_v61, %v1106_v0  ;;  %v916_v8 = vunpack.c.h.bf16 %v1003_v49 }
  0x5b   : > { %v731_v10 = vsel %vm662_vm11, %v627_v57, %v697_v2  ;;  %v555_v12 = vmul.f32 %v983_v3, %v1111_v1  ;;  %v984_v13 = vunpack.c.h.bf16 %v1019_v54  ;;  %v919_v14 = vunpack.c.l.bf16 %v1004_v62 }
  0x5c   : > { %765 = vst [vmem:[%s1159_s23 + $0xd8] sm:$0xff] %v731_v10  ;;  %vm663_vm12 = vcmp.ge.f32.partialorder %v628_v5, 0.0  ;;  %v698_v15 = vmul.f32 %v1115_v4, %v628_v5  ;;  %v629_v16 = vadd.f32 %v1139_v30, %v588_v6  ;;  %v446_v17 = vadd.f32 %v1122_v11, %v405_v7 }
  0x5d   : > { %v406_v18 = vmul.f32 %v916_v8, %v1106_v0  ;;  %v556_v19 = vmul.f32 %v984_v13, %v1111_v1  ;;  %v407_v20 = vmul.f32 %v919_v14, %v1106_v0  ;;  %v987_v21 = vunpack.c.l.bf16 %v1020_v9 }
  0x5e   : > { %v732_v22 = vsel %vm663_vm12, %v628_v5, %v698_v15  ;;  %vm664_vm13 = vcmp.ge.f32.partialorder %v629_v16, 0.0  ;;  %v699_v23 = vmul.f32 %v1115_v4, %v629_v16  ;;  %v589_v24 = vadd.f32 %v555_v12, %v446_v17 }
  0x5f   : > { %766 = vst [vmem:[%s1159_s23 + $0xe0] sm:$0xff] %v732_v22  ;;  %v447_v25 = vadd.f32 %v1122_v11, %v406_v18  ;;  %v448_v26 = vadd.f32 %v1122_v11, %v407_v20  ;;  %v557_v27 = vmul.f32 %v987_v21, %v1111_v1  ;;  %v920_v28 = vunpack.c.h.bf16 %v1004_v62 }
  0x60   : > { %v733_v29 = vsel %vm664_vm13, %v629_v16, %v699_v23  ;;  %v630_v31 = vadd.f32 %v1139_v30, %v589_v24  ;;  %v988_v32 = vunpack.c.h.bf16 %v1020_v9 }
  0x61   : > { %767 = vst [vmem:[%s1159_s23 + $0xe8] sm:$0xff] %v733_v29  ;;  %v590_v33 = vadd.f32 %v556_v19, %v447_v25  ;;  %v591_v34 = vadd.f32 %v557_v27, %v448_v26  ;;  %v408_v35 = vmul.f32 %v920_v28, %v1106_v0 }
  0x62   : > { %vm665_vm14 = vcmp.ge.f32.partialorder %v630_v31, 0.0  ;;  %v700_v36 = vmul.f32 %v1115_v4, %v630_v31  ;;  %v558_v37 = vmul.f32 %v988_v32, %v1111_v1 }
  0x63   : > { %v631_v38 = vadd.f32 %v1139_v30, %v590_v33  ;;  %v632_v39 = vadd.f32 %v1139_v30, %v591_v34  ;;  %v449_v40 = vadd.f32 %v1122_v11, %v408_v35 }
  0x64   : > { %v734_v41 = vsel %vm665_vm14, %v630_v31, %v700_v36 }
  0x65   : > { %768 = vst [vmem:[%s1159_s23 + $0xf0] sm:$0xff] %v734_v41  ;;  %vm666_vm15 = vcmp.ge.f32.partialorder %v631_v38, 0.0  ;;  %v701_v42 = vmul.f32 %v1115_v4, %v631_v38  ;;  %vm667_vm0 = vcmp.ge.f32.partialorder %v632_v39, 0.0  ;;  %v702_v0 = vmul.f32 %v1115_v4, %v632_v39 }
  0x66   : > { %v592_v43 = vadd.f32 %v558_v37, %v449_v40 }
  0x67   : > { %v735_v44 = vsel %vm666_vm15, %v631_v38, %v701_v42  ;;  %v736_v45 = vsel %vm667_vm0, %v632_v39, %v702_v0 }
  0x68   : > { %769 = vst [vmem:[%s1159_s23 + $0xf8] sm:$0xff] %v735_v44  ;;  %770 = vst [vmem:[%s1159_s23 + $0x100] sm:$0xff] %v736_v45  ;;  %v633_v1 = vadd.f32 %v1139_v30, %v592_v43 }
  0x6a   : > { %vm668_vm1 = vcmp.ge.f32.partialorder %v633_v1, 0.0  ;;  %v703_v46 = vmul.f32 %v1115_v4, %v633_v1 }
  0x6c   : > { %v737_v11 = vsel %vm668_vm1, %v633_v1, %v703_v46 }
  0x6d   : > { %771 = vst [vmem:[%s1159_s23 + $0x108] sm:$0xff] %v737_v11 }
  0x6e PF: > { %s18_s26 = sadd.s32 1, %s1037_s26  }
  0x6f   : > { %p15_p4 = scmp.ge.s32.totalorder %s18_s26, 4  }
  0x71   :  { %17 = sbr.rel (!%p15_p4) target bundleno = 2 (0x2), region = 81 }

// kernel: residual_block.4
= control target key start
LH: loop header
LB: loop body
LE: loop exit
PB: predicated region body
PF: predicated region fallthrough
CT: control target
= control target key end

     0   :  { %s7274_s26 = smov 0   ;;  %s9833_s0 = inlined_call_operand.vmem [shape: bf16[2,272,128], index: 0, kind: input, shape index: {}]   ;;  %s9834_s1 = inlined_call_operand.vmem [shape: bf16[3,3,128,128], index: 1, kind: input, shape index: {}]   ;;  %s9835_s2 = inlined_call_operand.vmem [shape: f32[1,128], index: 2, kind: input, shape index: {}]   ;;  %s9836_s3 = inlined_call_operand.vmem [shape: f32[1,128], index: 3, kind: input, shape index: {}]   ;;  %s9837_s4 = inlined_call_operand.vmem [shape: f32[272,1], index: 4, kind: input, shape index: {}]   ;;  %s9838_s5 = inlined_call_operand.<no memory space> [shape: f32[1,1], index: 5, kind: input, shape index: {}]   ;;  %s9839_s6 = inlined_call_operand.vmem [shape: bf16[2,272,128], index: 6, kind: output, shape index: {0}]   ;;  %s9840_s7 = inlined_call_operand.vmem [shape: f32[2,2,128], index: 7, kind: output, shape index: {1}]  }
   0x1   :  { %13 = sst [smem:[#allocation3]] %s9838_s5 }
   0x2 LB: > { %s5259_s27 = sadd.s32 4294967295, %s7226_s26   ;;  %p5263_p0 = scmp.ge.s32.totalorder %s7226_s26, 1  ;;  %s7226_s26 = sphi %s7274_s26, %s19_s26  }
   0x3   : > { %p241_p1 = scmp.lt.s32.totalorder %s7226_s26, 3 }
   0x5   : > { %p242_p2 = pnand %p5263_p0, %p241_p1 }
   0x7   : > { %245 = sbr.rel (%p242_p2) target bundleno = 1077 (0x435), region = 44 }
   0xc   : > { %v308_v0 = vld [vmem:[%s9837_s4 + $0x80] sm:$0xff]  ;;  %v7228_v2 = vmov 0   ;;  %v309_v3 = vld [vmem:[%s9837_s4 + $0x88] sm:$0xff]  ;;  %v307_v4 = vld [vmem:[%s9837_s4 + $0x78] sm:$0xff]  ;;  %v9841_v5 = vmov 0.0   ;;  %vm7230_vm0 = vmmov 0  }
   0xd   : > { %v292_v1 = vld [vmem:[%s9837_s4] sm:$0xff]  ;;  %7023 = vset.pattern.permute.xlu1 %v7228_v2  ;;  %784 = vst [vmem:[#allocation2] sm:$0xf] %v7228_v2  ;;  %785 = vst [vmem:[#allocation2 + $0x4] sm:$0xf] %v7228_v2  ;;  %7022 = vset.pattern.permute.xlu0 %v7228_v2  ;;  %v293_v6 = vld [vmem:[%s9837_s4 + $0x8] sm:$0xff] }
   0xe   : > { %786 = vst [vmem:[#allocation2 + $0x8] sm:$0xf] %v7228_v2  ;;  %787 = vst [vmem:[#allocation2 + $0x94] sm:$0xf] %v7228_v2  ;;  %662 = vperm.xlu1 %7023, %v308_v0   ;;  %582 = vperm.xlu0 %7022, %v292_v1   ;;  %v310_v7 = vld [vmem:[%s9837_s4 + $0x90] sm:$0xff]  ;;  %v311_v8 = vld [vmem:[%s9837_s4 + $0x98] sm:$0xff] }
   0xf   : > { %788 = vst [vmem:[#allocation2 + $0x98] sm:$0xf] %v7228_v2  ;;  %789 = vst [vmem:[#allocation2 + $0x9c] sm:$0xf] %v7228_v2  ;;  %6238 = vmatprep.subr.bf16.mxu0 %v9841_v5  ;;  %6994 = vmatprep.subr.bf16.mxu1 %v9841_v5  ;;  %v294_v9 = vld [vmem:[%s9837_s4 + $0x10] sm:$0xff]  ;;  %v7024_v10 = vld [vmem:[%s9834_s1 + $0x78] sm:$0xff]  }
  0x10   : > { %v295_v11 = vld [vmem:[%s9837_s4 + $0x18] sm:$0xff]  ;;  %v312_v12 = vld [vmem:[%s9837_s4 + $0xa0] sm:$0xff]  ;;  %6239 = vmatpush3.bf16.msra.mxu0 %v7024_v10  ;;  %v7025_v13 = vld [vmem:[%s9834_s1 + $0x70] sm:$0xff]   ;;  %7002 = vmatpush3.bf16.msra.mxu1 %v7024_v10  ;;  %p277_p3 = scmp.lt.s32.totalorder %s5259_s27, 1  ;;  %s476_s13 = sld [smem:[#allocation3]] }
  0x11   : > { %6240 = vmatprep.subr.bf16.mxu0 %v9841_v5  ;;  %6995 = vmatprep.subr.bf16.mxu1 %v9841_v5  ;;  %v313_v14 = vld [vmem:[%s9837_s4 + $0xa8] sm:$0xff]  ;;  %v296_v15 = vld [vmem:[%s9837_s4 + $0x20] sm:$0xff]  ;;  %v314_v18 = vld [vmem:[%s9837_s4 + $0xb0] sm:$0xff] }
  0x12   : > { %667 = vperm.xlu1 %7023, %v309_v3   ;;  %657 = vperm.xlu0 %7022, %v307_v4   ;;  %v7026_v16 = vld [vmem:[%s9834_s1 + $0x68] sm:$0xff]   ;;  %v7027_v19 = vld [vmem:[%s9834_s1 + $0x60] sm:$0xff]   ;;  %v315_v20 = vld [vmem:[%s9837_s4 + $0xb8] sm:$0xff]  ;;  %s10060_s27 = smov (!%p277_p3, %s5259_s27), 1 }
  0x13   : > { %6254 = vmatprep.mubr.msk.bf16.mxu0 %vm7230_vm0, %v9841_v5  ;;  %v297_v17 = vld [vmem:[%s9837_s4 + $0x28] sm:$0xff]  ;;  %6290 = vmatprep.mubr.msk.bf16.mxu1 %vm7230_vm0, %v9841_v5  ;;  %v298_v21 = vld [vmem:[%s9837_s4 + $0x30] sm:$0xff]  ;;  %v7028_v22 = vld [vmem:[%s9834_s1 + $0x58] sm:$0xff]   ;;  %s7010_s10 = smul.u32 136, %s10060_s27 }
  0x14   : > { %6241 = vmatpush3.bf16.msra.mxu0 %v7025_v13  ;;  %7003 = vmatpush3.bf16.msra.mxu1 %v7025_v13  ;;  %v299_v23 = vld [vmem:[%s9837_s4 + $0x38] sm:$0xff]  ;;  %v316_v24 = vld [vmem:[%s9837_s4 + $0xc0] sm:$0xff]  ;;  %v7029_v25 = vld [vmem:[%s9834_s1 + $0x50] sm:$0xff]  }
  0x15   : > { %6242 = vmatprep.subr.bf16.mxu0 %v9841_v5  ;;  %6996 = vmatprep.subr.bf16.mxu1 %v9841_v5  ;;  %v317_v26 = vld [vmem:[%s9837_s4 + $0xc8] sm:$0xff]  ;;  %v300_v27 = vld [vmem:[%s9837_s4 + $0x40] sm:$0xff]  ;;  %v318_v30 = vld [vmem:[%s9837_s4 + $0xd0] sm:$0xff]  ;;  %s7430_s18 = scalar_lea.vmem %s9833_s0, %s7010_s10  ;;  %s9498_s14 = scalar_lea.vmem %s9839_s6, %s7010_s10 }
  0x16   : > { %587 = vperm.xlu1 %7023, %v293_v6   ;;  %672 = vperm.xlu0 %7022, %v310_v7   ;;  %v7030_v28 = vld [vmem:[%s9834_s1 + $0x48] sm:$0xff]   ;;  %v7031_v31 = vld [vmem:[%s9834_s1 + $0x40] sm:$0xff]   ;;  %v319_v32 = vld [vmem:[%s9837_s4 + $0xd8] sm:$0xff]  ;;  %v7462_v54 = vstv %s476_s13  ;;  %s5266_s10 = sshll.u32 %s10060_s27, 1 }
  0x17   : > { %v301_v29 = vld [vmem:[%s9837_s4 + $0x48] sm:$0xff]  ;;  %v302_v33 = vld [vmem:[%s9837_s4 + $0x50] sm:$0xff]  ;;  %v303_v34 = vld [vmem:[%s9837_s4 + $0x58] sm:$0xff]  ;;  %s290_s17 = scalar_lea.vmem %s9840_s7, %s5266_s10 }
  0x18   : > { %6243 = vmatpush3.bf16.msra.mxu0 %v7026_v16  ;;  %7004 = vmatpush3.bf16.msra.mxu1 %v7026_v16  ;;  %v320_v35 = vld [vmem:[%s9837_s4 + $0xe0] sm:$0xff]  ;;  %v321_v36 = vld [vmem:[%s9837_s4 + $0xe8] sm:$0xff]  ;;  %v322_v39 = vld [vmem:[%s9837_s4 + $0xf0] sm:$0xff] }
  0x19   : > { %6244 = vmatprep.subr.bf16.mxu0 %v9841_v5  ;;  %6997 = vmatprep.subr.bf16.mxu1 %v9841_v5  ;;  %v304_v37 = vld [vmem:[%s9837_s4 + $0x60] sm:$0xff]  ;;  %v305_v38 = vld [vmem:[%s9837_s4 + $0x68] sm:$0xff]  ;;  %v7433_v40 = vld [vmem:[%s7430_s18 + $0x78] sm:$0xff]  }
  0x1a   : > { %677 = vperm.xlu1 %7023, %v311_v8   ;;  %592 = vperm.xlu0 %7022, %v294_v9   ;;  %v323_v41 = vld [vmem:[%s9837_s4 + $0xf8] sm:$0xff]  ;;  %v306_v42 = vld [vmem:[%s9837_s4 + $0x70] sm:$0xff]  ;;  %v5980_v43 = vld [vmem:[%s7430_s18 + $0x80] sm:$0xff]   ;;  %v5795_v44 = vunpack.c.h.bf16 %v7433_v40 }
  0x1b   : > { %v325_v45 = vld [vmem:[%s9837_s4 + $0x108] sm:$0xff]  ;;  %v7449_v46 = vld [vmem:[%s9835_s2] ss:$0 sm:$0xff]  ;;  %v5799_v49 = vunpack.c.h.bf16 %v5980_v43  ;;  %v5798_v53 = vunpack.c.l.bf16 %v5980_v43  ;;  %v7479_v2 = vld [vmem:[%s7430_s18 + $0x38] sm:$0xff]  }
  0x1c   : > { %6245 = vmatpush3.bf16.msra.mxu0 %v7027_v19  ;;  %7005 = vmatpush3.bf16.msra.mxu1 %v7027_v19  ;;  %v324_v47 = vld [vmem:[%s9837_s4 + $0x100] sm:$0xff]  ;;  %v432_v48 = vmul.f32 %v5795_v44, %v7449_v46  ;;  %v7483_v4 = vld [vmem:[#allocation2 + $0x8] sm:$0xf]  ;;  %v5763_v10 = vunpack.c.h.bf16 %v7479_v2 }
  0x1d   : > { %6246 = vmatprep.subr.bf16.mxu0 %v9841_v5  ;;  %6998 = vmatprep.subr.bf16.mxu1 %v9841_v5  ;;  %v7458_v50 = vld [vmem:[%s9836_s3] ss:$0 sm:$0xff]  ;;  %v434_v52 = vmul.f32 %v5799_v49, %v7449_v46  ;;  %v433_v57 = vmul.f32 %v5798_v53, %v7449_v46  ;;  %v7481_v3 = vld [vmem:[#allocation2 + $0x4] sm:$0xf] }
  0x1e   : > { %597 = vperm.xlu1 %7023, %v295_v11   ;;  %682 = vperm.xlu0 %7022, %v312_v12   ;;  %v473_v51 = vadd.f32 %v7458_v50, %v432_v48  ;;  %v5972_v0 = vld [vmem:[%s7430_s18 + $0x40] sm:$0xff]   ;;  %v5973_v11 = vld [vmem:[%s7430_s18 + $0x48] sm:$0xff]  }
  0x1f   : > { %v475_v56 = vadd.f32 %v7458_v50, %v434_v52  ;;  %v474_v60 = vadd.f32 %v7458_v50, %v433_v57  ;;  %v5733_v1 = vld [vmem:[%s7430_s18] sm:$0xff]   ;;  %v5766_v6 = vunpack.c.l.bf16 %v5972_v0  ;;  %v5767_v9 = vunpack.c.h.bf16 %v5972_v0 }
  0x20   : > { %6247 = vmatpush3.bf16.msra.mxu0 %v7028_v22  ;;  %7006 = vmatpush3.bf16.msra.mxu1 %v7028_v22  ;;  %vm508_vm1 = vcmp.ge.f32.partialorder %v473_v51, 0.0  ;;  %v543_v55 = vmul.f32 %v7462_v54, %v473_v51  ;;  %v5734_v7 = vunpack.c.l.bf16 %v5733_v1  ;;  %v5771_v19 = vunpack.c.h.bf16 %v5973_v11 }
  0x21   : > { %6248 = vmatprep.subr.bf16.mxu0 %v9841_v5  ;;  %6999 = vmatprep.subr.bf16.mxu1 %v9841_v5  ;;  %vm510_vm2 = vcmp.ge.f32.partialorder %v475_v56, 0.0  ;;  %v545_v59 = vmul.f32 %v7462_v54, %v475_v56  ;;  %vm509_vm3 = vcmp.ge.f32.partialorder %v474_v60, 0.0  ;;  %v544_v62 = vmul.f32 %v7462_v54, %v474_v60 }
  0x22   : > { %687 = vperm.xlu1 %7023, %v313_v14   ;;  %602 = vperm.xlu0 %7022, %v296_v15   ;;  %v7467_v58 = vsel %vm508_vm1, %v473_v51, %v543_v55  ;;  %v417_v12 = vmul.f32 %v5766_v6, %v7449_v46  ;;  %v401_v13 = vmul.f32 %v5734_v7, %v7449_v46  ;;  %v5735_v14 = vunpack.c.h.bf16 %v5733_v1  ;;  %v5965_v15 = vld [vmem:[%s7430_s18 + $0x8] sm:$0xff]  }
  0x23   : > { %v7471_v61 = vsel %vm510_vm2, %v475_v56, %v545_v59  ;;  %v7474_v63 = vsel %vm509_vm3, %v474_v60, %v544_v62  ;;  %v418_v16 = vmul.f32 %v5767_v9, %v7449_v46 }
  0x24   : > { %6249 = vmatpush3.bf16.msra.mxu0 %v7029_v25  ;;  %7007 = vmatpush3.bf16.msra.mxu1 %v7029_v25  ;;  %v442_v22 = vadd.f32 %v7458_v50, %v401_v13 }
  0x25   : > { %6250 = vmatprep.subr.bf16.mxu0 %v9841_v5  ;;  %7000 = vmatprep.subr.bf16.mxu1 %v9841_v5 }
  0x26   : > { %607 = vperm.xlu1 %7023, %v297_v17   ;;  %692 = vperm.xlu0 %7022, %v314_v18   ;;  %v5770_v17 = vunpack.c.l.bf16 %v5973_v11  ;;  %v416_v18 = vmul.f32 %v5763_v10, %v7449_v46  ;;  %vm477_vm5 = vcmp.ge.f32.partialorder %v442_v22, 0.0  ;;  %v5967_v10 = vld [vmem:[%s7430_s18 + $0x18] sm:$0xff]  }
  0x28   : > { %6251 = vmatpush3.bf16.msra.mxu0 %v7030_v28  ;;  %7008 = vmatpush3.bf16.msra.mxu1 %v7030_v28  ;;  %v419_v25 = vmul.f32 %v5770_v17, %v7449_v46  ;;  %v420_v28 = vmul.f32 %v5771_v19, %v7449_v46  ;;  %v5976_v19 = vld [vmem:[%s7430_s18 + $0x60] sm:$0xff]  }
  0x29   : > { %6252 = vmatprep.subr.bf16.mxu0 %v9841_v5  ;;  %7001 = vmatprep.subr.bf16.mxu1 %v9841_v5 }
  0x2a   : > { %697 = vperm.xlu1 %7023, %v315_v20   ;;  %612 = vperm.xlu0 %7022, %v298_v21   ;;  %v5738_v20 = vunpack.c.l.bf16 %v5965_v15  ;;  %v458_v21 = vadd.f32 %v7458_v50, %v417_v12 }
  0x2c   : > { %6253 = vmatpush3.bf16.msra.mxu0 %v7031_v31  ;;  %7009 = vmatpush3.bf16.msra.mxu1 %v7031_v31  ;;  %v528_v31 = vmul.f32 %v7462_v54, %v458_v21  ;;  %vm493_vm4 = vcmp.ge.f32.partialorder %v458_v21, 0.0 }
  0x2d   : > { %6406 = vmatprep.subr.bf16.mxu0 %v9841_v5  ;;  %6322 = vmatprep.subr.bf16.mxu1 %v9841_v5 }
  0x2e   : > { %617 = vperm.xlu1 %7023, %v299_v23   ;;  %702 = vperm.xlu0 %7022, %v316_v24   ;;  %v402_v23 = vmul.f32 %v5735_v14, %v7449_v46  ;;  %v459_v24 = vadd.f32 %v7458_v50, %v418_v16  ;;  %v7514_v48 = vsel %vm493_vm4, %v458_v21, %v528_v31 }
  0x30   : > { %vm494_vm6 = vcmp.ge.f32.partialorder %v459_v24, 0.0 }
  0x32   : > { %707 = vperm.xlu1 %7023, %v317_v26   ;;  %622 = vperm.xlu0 %7022, %v300_v27   ;;  %v5974_v26 = vld [vmem:[%s7430_s18 + $0x50] sm:$0xff]   ;;  %v457_v27 = vadd.f32 %v7458_v50, %v416_v18 }
  0x34   : > { %vm492_vm7 = vcmp.ge.f32.partialorder %v457_v27, 0.0 }
  0x36   : > { %627 = vperm.xlu1 %7023, %v301_v29   ;;  %712 = vperm.xlu0 %7022, %v318_v30   ;;  %v403_v29 = vmul.f32 %v5738_v20, %v7449_v46  ;;  %v5739_v30 = vunpack.c.h.bf16 %v5965_v15 }
  0x38   : > { %v444_v43 = vadd.f32 %v7458_v50, %v403_v29  ;;  %v404_v44 = vmul.f32 %v5739_v30, %v7449_v46  ;;  %v5782_v29 = vunpack.c.l.bf16 %v5976_v19  ;;  %v5968_v30 = vld [vmem:[%s7430_s18 + $0x20] sm:$0xff]  }
  0x3a   : > { %717 = vperm.xlu1 %7023, %v319_v32   ;;  %632 = vperm.xlu0 %7022, %v302_v33   ;;  %v512_v32 = vmul.f32 %v7462_v54, %v442_v22  ;;  %v443_v33 = vadd.f32 %v7458_v50, %v402_v23  ;;  %v514_v62 = vmul.f32 %v7462_v54, %v444_v43  ;;  %vm479_vm11 = vcmp.ge.f32.partialorder %v444_v43, 0.0 }
  0x3b   : > { %v445_v0 = vadd.f32 %v7458_v50, %v404_v44  ;;  %v5751_v44 = vunpack.c.h.bf16 %v5968_v30 }
  0x3c   : > { %v7516_v49 = vsel %vm477_vm5, %v442_v22, %v512_v32  ;;  %vm478_vm8 = vcmp.ge.f32.partialorder %v443_v33, 0.0  ;;  %v513_v53 = vmul.f32 %v7462_v54, %v443_v33  ;;  %v7549_v20 = vsel %vm479_vm11, %v444_v43, %v514_v62 }
  0x3d   : > { %vm480_vm12 = vcmp.ge.f32.partialorder %v445_v0, 0.0  ;;  %v5746_v22 = vunpack.c.l.bf16 %v5967_v10  ;;  %v515_v23 = vmul.f32 %v7462_v54, %v445_v0  ;;  %v425_v43 = vmul.f32 %v5782_v29, %v7449_v46 }
  0x3e   : > { %637 = vperm.xlu1 %7023, %v303_v34   ;;  %722 = vperm.xlu0 %7022, %v320_v35   ;;  %v5774_v34 = vunpack.c.l.bf16 %v5974_v26  ;;  %v5966_v35 = vld [vmem:[%s7430_s18 + $0x10] sm:$0xff]   ;;  %v7539_v12 = vsel %vm478_vm8, %v443_v33, %v513_v53 }
  0x3f   : > { %v5743_v52 = vunpack.c.h.bf16 %v5966_v35 }
  0x40   : > { %v421_v51 = vmul.f32 %v5774_v34, %v7449_v46  ;;  %v5977_v34 = vld [vmem:[%s7430_s18 + $0x68] sm:$0xff]  }
  0x41   : > { %v406_v9 = vmul.f32 %v5743_v52, %v7449_v46 }
  0x42   : > { %727 = vperm.xlu1 %7023, %v321_v36   ;;  %642 = vperm.xlu0 %7022, %v304_v37   ;;  %v460_v36 = vadd.f32 %v7458_v50, %v419_v25  ;;  %v529_v37 = vmul.f32 %v7462_v54, %v459_v24  ;;  %v462_v7 = vadd.f32 %v7458_v50, %v421_v51 }
  0x43   : > { %v447_v25 = vadd.f32 %v7458_v50, %v406_v9 }
  0x44   : > { %v530_v55 = vmul.f32 %v7462_v54, %v460_v36  ;;  %vm495_vm9 = vcmp.ge.f32.partialorder %v460_v36, 0.0  ;;  %v7530_v6 = vsel %vm494_vm6, %v459_v24, %v529_v37  ;;  %vm497_vm13 = vcmp.ge.f32.partialorder %v462_v7, 0.0 }
  0x45   : > { %v5783_v37 = vunpack.c.h.bf16 %v5976_v19  ;;  %vm482_vm1 = vcmp.ge.f32.partialorder %v447_v25, 0.0 }
  0x46   : > { %647 = vperm.xlu1 %7023, %v305_v38   ;;  %732 = vperm.xlu0 %7022, %v322_v39   ;;  %v461_v38 = vadd.f32 %v7458_v50, %v420_v28  ;;  %v5775_v39 = vunpack.c.h.bf16 %v5974_v26  ;;  %v7541_v13 = vsel %vm495_vm9, %v460_v36, %v530_v55  ;;  %v532_v26 = vmul.f32 %v7462_v54, %v462_v7 }
  0x47   : > { %v5747_v28 = vunpack.c.h.bf16 %v5967_v10  ;;  %v407_v36 = vmul.f32 %v5746_v22, %v7449_v46  ;;  %vm1516_vm9 = vcmask 1044480  }
  0x48   : > { %v531_v57 = vmul.f32 %v7462_v54, %v461_v38  ;;  %v422_v59 = vmul.f32 %v5775_v39, %v7449_v46  ;;  %vm496_vm10 = vcmp.ge.f32.partialorder %v461_v38, 0.0  ;;  %v517_v39 = vmul.f32 %v7462_v54, %v447_v25 }
  0x49   : > { %v7574_v51 = vsel %vm497_vm13, %v462_v7, %v532_v26  ;;  %v5969_v7 = vld [vmem:[%s7430_s18 + $0x28] sm:$0xff]  }
  0x4a   : > { %737 = vperm.xlu1 %7023, %v323_v41   ;;  %652 = vperm.xlu0 %7022, %v306_v42   ;;  %v960_v41 = vld [vmem:[#allocation2] sm:$0x8]  ;;  %v527_v42 = vmul.f32 %v7462_v54, %v457_v27  ;;  %v7544_v15 = vsel %vm496_vm10, %v461_v38, %v531_v57  ;;  %v463_v16 = vadd.f32 %v7458_v50, %v422_v59 }
  0x4b   : > { %v7522_v56 = vcombine.low %v960_v41, %v7481_v3  ;;  %v5750_v41 = vunpack.c.l.bf16 %v5968_v30  ;;  %v448_v57 = vadd.f32 %v7458_v50, %v407_v36  ;;  %v426_v59 = vmul.f32 %v5783_v37, %v7449_v46  ;;  %v7624_v37 = vld [vmem:[%s7430_s18 + $0x70] sm:$0xff]  }
  0x4c   : > { %v7536_v11 = vsel %vm492_vm7, %v457_v27, %v527_v42  ;;  %vm498_vm14 = vcmp.ge.f32.partialorder %v463_v16, 0.0  ;;  %v533_v31 = vmul.f32 %v7462_v54, %v463_v16  ;;  %v408_v42 = vmul.f32 %v5747_v28, %v7449_v46 }
  0x4d   : > { %v1119_v14 = vshrl.u32 %v7522_v56, 16  ;;  %v1122_v24 = vshll.u32 %v7522_v56, 16  ;;  %vm483_vm4 = vcmp.ge.f32.partialorder %v448_v57, 0.0  ;;  %v518_v29 = vmul.f32 %v7462_v54, %v448_v57 }
  0x4e   : > { %747 = vperm.xlu1 %7023, %v325_v45   ;;  %742 = vperm.xlu0 %7022, %v324_v47   ;;  %v5742_v45 = vunpack.c.l.bf16 %v5966_v35  ;;  %v5975_v47 = vld [vmem:[%s7430_s18 + $0x58] sm:$0xff]   ;;  %v7579_v55 = vsel %vm498_vm14, %v463_v16, %v533_v31  ;;  %v466_v16 = vadd.f32 %v7458_v50, %v425_v43 }
  0x4f   : > { %v5778_v60 = vunpack.c.l.bf16 %v5975_v47  ;;  %v5779_v18 = vunpack.c.h.bf16 %v5975_v47  ;;  %v7556_v27 = vrot.slane %v1119_v14, 3  ;;  %v7565_v38 = vrot.slane %v1122_v24, 4 }
  0x50   : > { %v405_v1 = vmul.f32 %v5742_v45, %v7449_v46  ;;  %v5786_v45 = vunpack.c.l.bf16 %v5977_v34  ;;  %v7571_v47 = vsel %vm480_vm12, %v445_v0, %v515_v23  ;;  %v7589_v0 = vsel %vm482_vm1, %v447_v25, %v517_v39 }
  0x51   : > { %v423_v17 = vmul.f32 %v5778_v60, %v7449_v46  ;;  %v424_v33 = vmul.f32 %v5779_v18, %v7449_v46  ;;  %v449_v14 = vadd.f32 %v7458_v50, %v408_v42  ;;  %v467_v23 = vadd.f32 %v7458_v50, %v426_v59 }
  0x52   : > { %v446_v21 = vadd.f32 %v7458_v50, %v405_v1  ;;  %v409_v1 = vmul.f32 %v5750_v41, %v7449_v46  ;;  %v427_v18 = vmul.f32 %v5786_v45, %v7449_v46  ;;  %v5787_v24 = vunpack.c.h.bf16 %v5977_v34 }
  0x53   : > { %v464_v32 = vadd.f32 %v7458_v50, %v423_v17  ;;  %v465_v53 = vadd.f32 %v7458_v50, %v424_v33  ;;  %v410_v17 = vmul.f32 %v5751_v44, %v7449_v46  ;;  %v5754_v25 = vunpack.c.l.bf16 %v5969_v7 }
  0x54   : > { %vm481_vm15 = vcmp.ge.f32.partialorder %v446_v21, 0.0  ;;  %v516_v35 = vmul.f32 %v7462_v54, %v446_v21  ;;  %v450_v30 = vadd.f32 %v7458_v50, %v409_v1  ;;  %vm484_vm5 = vcmp.ge.f32.partialorder %v449_v14, 0.0 }
  0x55   : > { %v534_v52 = vmul.f32 %v7462_v54, %v464_v32  ;;  %vm499_vm2 = vcmp.ge.f32.partialorder %v464_v32, 0.0  ;;  %vm500_vm3 = vcmp.ge.f32.partialorder %v465_v53, 0.0  ;;  %v535_v22 = vmul.f32 %v7462_v54, %v465_v53 }
  0x56   : > { %v7584_v60 = vsel %vm481_vm15, %v446_v21, %v516_v35  ;;  %v468_v33 = vadd.f32 %v7458_v50, %v427_v18  ;;  %v5755_v34 = vunpack.c.h.bf16 %v5969_v7  ;;  %v519_v36 = vmul.f32 %v7462_v54, %v449_v14 }
  0x57   : > { %v7603_v21 = vsel %vm499_vm2, %v464_v32, %v534_v52  ;;  %v451_v32 = vadd.f32 %v7458_v50, %v410_v17  ;;  %vm501_vm6 = vcmp.ge.f32.partialorder %v466_v16, 0.0  ;;  %v536_v39 = vmul.f32 %v7462_v54, %v466_v16 }
  0x58   : > { %vm502_vm7 = vcmp.ge.f32.partialorder %v467_v23, 0.0  ;;  %v428_v41 = vmul.f32 %v5787_v24, %v7449_v46  ;;  %v411_v42 = vmul.f32 %v5754_v25, %v7449_v46  ;;  %v537_v44 = vmul.f32 %v7462_v54, %v467_v23 }
  0x59   : > { %vm485_vm8 = vcmp.ge.f32.partialorder %v450_v30, 0.0  ;;  %v538_v59 = vmul.f32 %v7462_v54, %v468_v33  ;;  %v412_v1 = vmul.f32 %v5755_v34, %v7449_v46  ;;  %v5790_v7 = vunpack.c.l.bf16 %v7624_v37 }
  0x5a   : > { %vm486_vm10 = vcmp.ge.f32.partialorder %v451_v32, 0.0  ;;  %vm503_vm11 = vcmp.ge.f32.partialorder %v468_v33, 0.0  ;;  %vm1117_vm12 = vsmask.f32 4352  ;;  %v469_v24 = vadd.f32 %v7458_v50, %v428_v41  ;;  %v7682_v41 = vld [vmem:[%s7430_s18 + $0x30] sm:$0xff]  }
  0x5b   : > { %v452_v25 = vadd.f32 %v7458_v50, %v411_v42 }
  0x5c   : > { %vm504_vm13 = vcmp.ge.f32.partialorder %v469_v24, 0.0 }
  0x5d   : > { %v522_v42 = vmul.f32 %v7462_v54, %v452_v25  ;;  %vm487_vm14 = vcmp.ge.f32.partialorder %v452_v25, 0.0 }
  0x89   : > { %v7593_v9 = vpop.permute.xlu1 %662  ;;  %v7595_v10 = vpop.permute.xlu0 %582 }
  0x8a   : > { %9921 = vst [vmem:[#allocation4_spill] sm:$0xff] %v7593_v9  ;;  %9922 = vst [vmem:[#allocation5_spill] sm:$0xff] %v7595_v10  ;;  %v750_v19 = vmul.f32 %v7595_v10, %v7516_v49  ;;  %v766_v26 = vmul.f32 %v7593_v9, %v7514_v48  ;;  %v7620_v48 = vsel %vm500_vm3, %v465_v53, %v535_v22  ;;  %v7037_v9 = vld [vmem:[%s9834_s1 + $0x38] sm:$0xff]  }
  0x8b   : > { %v521_v53 = vmul.f32 %v7462_v54, %v451_v32  ;;  %v7647_v22 = vsel %vm484_vm5, %v449_v14, %v519_v36  ;;  %v453_v36 = vadd.f32 %v7458_v50, %v412_v1 }
  0x8c   : > { %v5664_v28 = vpack.c.bf16 %v750_v19, %v750_v19  ;;  %v7644_v19 = vsel %vm483_vm4, %v448_v57, %v518_v29 }
  0x8d   : > { %v7611_v49 = vpop.permute.xlu1 %667  ;;  %v7613_v31 = vpop.permute.xlu0 %657  ;;  %v7666_v34 = vsel %vm486_vm10, %v451_v32, %v521_v53  ;;  %v5791_v32 = vunpack.c.h.bf16 %v7624_v37  ;;  %vm488_vm15 = vcmp.ge.f32.partialorder %v453_v36, 0.0 }
  0x8e   : > { %9923 = vst [vmem:[#allocation6_spill] sm:$0xff] %v7611_v49  ;;  %9924 = vst [vmem:[#allocation7_spill] sm:$0xff] %v7613_v31  ;;  %v765_v35 = vmul.f32 %v7613_v31, %v7536_v11  ;;  %v520_v11 = vmul.f32 %v7462_v54, %v450_v30  ;;  %v767_v17 = vmul.f32 %v7611_v49, %v7530_v6 }
  0x8f   : > { %926 = vst [vmem:[#allocation2 + $0xc] sm:$0xf] %v5664_v28  ;;  %v7652_v6 = vsel %vm501_vm6, %v466_v16, %v536_v39  ;;  %v429_v16 = vmul.f32 %v5790_v7, %v7449_v46  ;;  %v523_v7 = vmul.f32 %v7462_v54, %v453_v36  ;;  %v430_v5 = vmul.f32 %v5791_v32, %v7449_v46 }
  0x90   : > { %v5838_v43 = vpack.c.bf16 %v766_v26, %v765_v35  ;;  %v7658_v28 = vsel %vm485_vm8, %v450_v30, %v520_v11  ;;  %v7668_v35 = vsel %vm503_vm11, %v468_v33, %v538_v59  ;;  %v539_v33 = vmul.f32 %v7462_v54, %v469_v24 }
  0x91   : > { %v7631_v45 = vpop.permute.xlu1 %587  ;;  %v7633_v52 = vpop.permute.xlu0 %672  ;;  %v7709_v8 = vadd.f32 %v7458_v50, %v429_v16  ;;  %v7726_v16 = vsel %vm487_vm14, %v452_v25, %v522_v42  ;;  %v9933_v42 = vor.u32 %v7565_v38, %v7556_v27  ;;  %v9934_v38 = vmov 0.0  }
  0x92   : > { %9925 = vst [vmem:[#allocation8_spill] sm:$0xff] %v7631_v45  ;;  %9926 = vst [vmem:[#allocation9_spill] sm:$0xff] %v7633_v52  ;;  %v768_v18 = vmul.f32 %v7633_v52, %v7541_v13  ;;  %v7655_v13 = vsel %vm502_vm7, %v467_v23, %v537_v44  ;;  %v751_v23 = vmul.f32 %v7631_v45, %v7539_v12  ;;  %vm3099_vm7 = vsmask.f32 7424 }
  0x93   : > { %5988 = vst [vmem:[#allocation2 + $0x48] sm:$0xff] %v5838_v43   ;;  %v1517_v43 = vrot.slane %v7522_v56, 3  ;;  %v5758_v56 = vunpack.c.l.bf16 %v7682_v41  ;;  %vm505_vm1 = vcmp.ge.f32.partialorder %v7709_v8, 0.0  ;;  %vm4481_vm8 = vcmask 1046528  }
  0x94   : > { %v5843_v26 = vpack.c.bf16 %v768_v18, %v767_v17 }
  0x95   : > { %v7660_v57 = vpop.permute.xlu1 %677  ;;  %v7662_v29 = vpop.permute.xlu0 %592 }
  0x96   : > { %9927 = vst [vmem:[#allocation10_spill] sm:$0xff] %v7660_v57  ;;  %9928 = vst [vmem:[#allocation11_spill] sm:$0xff] %v7662_v29  ;;  %v7664_v14 = vld [vmem:[#allocation2 + $0xc] sm:$0xf]  ;;  %v752_v30 = vmul.f32 %v7662_v29, %v7549_v20  ;;  %v769_v17 = vmul.f32 %v7660_v57, %v7544_v15  ;;  %v7754_v57 = vsel %vm488_vm15, %v453_v36, %v523_v7 }
  0x97   : > { %5989 = vst [vmem:[#allocation2 + $0x50] sm:$0xff] %v5843_v26   ;;  %v7678_v39 = vcombine.low %v7483_v4, %v7664_v14 }
  0x98   : > { %v5803_v12 = vpack.c.bf16 %v752_v30, %v751_v23 }
  0x99   : > { %v1127_v44 = vshrl.u32 %v7678_v39, 16  ;;  %v1130_v20 = vshll.u32 %v7678_v39, 16  ;;  %v9845_v11 = vrot.slane %v7678_v39, 3  ;;  %v7690_v53 = vpop.permute.xlu1 %597  ;;  %v7692_v59 = vpop.permute.xlu0 %682 }
  0x9a   : > { %9929 = vst [vmem:[#allocation12_spill] sm:$0xff] %v7690_v53  ;;  %9930 = vst [vmem:[#allocation13_spill] sm:$0xff] %v7692_v59  ;;  %v7694_v37 = vld [vmem:[#allocation2 + $0x48] sm:$0xf]  ;;  %v7696_v1 = vld [vmem:[#allocation2 + $0x4c] sm:$0xf]  ;;  %v770_v18 = vmul.f32 %v7692_v59, %v7574_v51  ;;  %v753_v25 = vmul.f32 %v7690_v53, %v7571_v47 }
  0x9b   : > { %5981 = vst [vmem:[#allocation2 + $0x10] sm:$0xff] %v5803_v12   ;;  %v1129_v26 = vrot.slane %v1127_v44, 3  ;;  %v1132_v23 = vrot.slane %v1130_v20, 4  ;;  %v7706_v30 = vcombine.low %v7694_v37, %v7696_v1  ;;  %v7715_v62 = vsel %vm1516_vm9, %v1517_v43, %v9845_v11  ;;  %v7034_v51 = vld [vmem:[%s9834_s1 + $0xb8] sm:$0xff]  }
  0x9c   : > { %v5848_v15 = vpack.c.bf16 %v770_v18, %v769_v17  ;;  %v7723_v44 = vsel %vm504_vm13, %v469_v24, %v539_v33  ;;  %v5759_v24 = vunpack.c.h.bf16 %v7682_v41  ;;  %v9944_v53 = vrot.slane %v7678_v39, 3 }
  0x9d   : > { %v7717_v12 = vor.u32 %v1132_v23, %v1129_v26  ;;  %v7728_v20 = vpop.permute.xlu1 %687  ;;  %v7730_v32 = vpop.permute.xlu0 %602  ;;  %v1199_v17 = vshrl.u32 %v7706_v30, 16  ;;  %v1202_v18 = vshll.u32 %v7706_v30, 16  ;;  %v413_v26 = vmul.f32 %v5758_v56, %v7449_v46 }
  0x9e   : > { %9931 = vst [vmem:[#allocation14_spill] sm:$0xff] %v7728_v20  ;;  %9932 = vst [vmem:[#allocation15_spill] sm:$0xff] %v7730_v32  ;;  %v7732_v59 = vld [vmem:[#allocation2 + $0x50] sm:$0xf]  ;;  %v7734_v43 = vld [vmem:[#allocation2 + $0x54] sm:$0xf]  ;;  %v754_v33 = vmul.f32 %v7730_v32, %v7584_v60  ;;  %v771_v47 = vmul.f32 %v7728_v20, %v7579_v55  ;;  %v7813_v20 = vmul.f32 %v5759_v24, %v7449_v46  ;;  %v5794_v24 = vunpack.c.l.bf16 %v7433_v40 }
  0x9f   : > { %5990 = vst [vmem:[#allocation2 + $0x58] sm:$0xff] %v5848_v15   ;;  %v1134_v23 = vsel %vm1117_vm12, %v9933_v42, %v7717_v12  ;;  %v7751_v11 = vcombine.low %v7732_v59, %v7734_v43  ;;  %v1201_v56 = vrot.slane %v1199_v17, 3  ;;  %v1204_v41 = vrot.slane %v1202_v18, 4  ;;  %v7039_v17 = vld [vmem:[%s9834_s1 + $0xb0] sm:$0xff]  }
  0xa0   : > { %6255 = vmatmul.mubr.bf16.vlgmr.msra.gmra.mxu0 %v1134_v23  ;;  %v5808_v60 = vpack.c.bf16 %v754_v33, %v753_v25  ;;  %v540_v25 = vmul.f32 %v7462_v54, %v7709_v8  ;;  %v7779_v33 = vadd.f32 %v7458_v50, %v430_v5  ;;  %v9862_v23 = vrot.slane %v7706_v30, 3 }
  0xa1   : > { %6407 = vmatpush3.bf16.msra.mxu0 %v7034_v51  ;;  %v1208_v15 = vshrl.u32 %v7751_v11, 16  ;;  %v1211_v27 = vshll.u32 %v7751_v11, 16  ;;  %6258 = vmatprep.mubr.msk.bf16.mxu0 %vm7230_vm0, %v9934_v38  ;;  %v7766_v36 = vpop.permute.xlu1 %607  ;;  %v7768_v7 = vpop.permute.xlu0 %692  ;;  %v7794_v5 = vadd.f32 %v7458_v50, %v413_v26  ;;  %v7043_v26 = vld [vmem:[%s9834_s1 + $0xa8] sm:$0xff]  }
  0xa2   : > { %9935 = vst [vmem:[#allocation16_spill] sm:$0xff] %v7766_v36  ;;  %9936 = vst [vmem:[#allocation17_spill] sm:$0xff] %v7768_v7  ;;  %v7770_v42 = vld [vmem:[#allocation2 + $0x10] sm:$0xf]  ;;  %v7772_v51 = vld [vmem:[#allocation2 + $0x14] sm:$0xf]  ;;  %6408 = vmatprep.subr.bf16.mxu0 %v9934_v38  ;;  %v772_v18 = vmul.f32 %v7768_v7, %v7603_v21 }
  0xa3   : > { %5982 = vst [vmem:[#allocation2 + $0x18] sm:$0xff] %v5808_v60   ;;  %v1210_v52 = vrot.slane %v1208_v15, 3  ;;  %v1213_v49 = vrot.slane %v1211_v27, 4  ;;  %v7791_v31 = vcombine.low %v7770_v42, %v7772_v51  ;;  %v9937_v60 = vrot.slane %v7751_v11, 3 }
  0xa4   : > { %v5853_v15 = vpack.c.bf16 %v772_v18, %v771_v47  ;;  %v7805_v27 = vor.u32 %v1204_v41, %v1201_v56  ;;  %v755_v41 = vmul.f32 %v7766_v36, %v7589_v0  ;;  %vm506_vm2 = vcmp.ge.f32.partialorder %v7779_v33, 0.0 }
  0xa5   : > { %v7803_v21 = vsel %vm1516_vm9, %v9862_v23, %v9937_v60  ;;  %v7807_v7 = vor.u32 %v1213_v49, %v1210_v52  ;;  %6409 = vmatpush3.bf16.msra.mxu0 %v7039_v17  ;;  %v7815_v55 = vpop.permute.xlu1 %697  ;;  %v7817_v32 = vpop.permute.xlu0 %612  ;;  %v1136_v60 = vshrl.u32 %v7791_v31, 16  ;;  %v1139_v47 = vshll.u32 %v7791_v31, 16 }
  0xa6   : > { %9938 = vst [vmem:[#allocation18_spill] sm:$0xff] %v7815_v55  ;;  %9939 = vst [vmem:[#allocation19_spill] sm:$0xff] %v7817_v32  ;;  %v7821_v56 = vld [vmem:[#allocation2 + $0x58] sm:$0xf]  ;;  %v7823_v49 = vld [vmem:[#allocation2 + $0x5c] sm:$0xf]  ;;  %6410 = vmatprep.subr.bf16.mxu0 %v9934_v38  ;;  %v7829_v52 = vsel %vm505_vm1, %v7709_v8, %v540_v25  ;;  %v756_v17 = vmul.f32 %v7817_v32, %v7644_v19  ;;  %v5762_v36 = vunpack.c.l.bf16 %v7479_v2 }
  0xa7   : > { %9940 = vst [vmem:[#allocation20_spill] sm:$0xff] %v7823_v49  ;;  %5991 = vst [vmem:[#allocation2 + $0x60] sm:$0xff] %v5853_v15   ;;  %v1215_v18 = vsel %vm1117_vm12, %v7805_v27, %v7807_v7  ;;  %v7841_v23 = vcombine.low %v7821_v56, %v7823_v49  ;;  %v1138_v8 = vrot.slane %v1136_v60, 3  ;;  %v1141_v40 = vrot.slane %v1139_v47, 4  ;;  %v7047_v2 = vld [vmem:[%s9834_s1 + $0xa0] sm:$0xff]  }
  0xa8   : > { %6291 = vmatmul.mubr.bf16.vlgmr.msra.gmra.mxu1 %v1215_v18  ;;  %v5813_v15 = vpack.c.bf16 %v756_v17, %v755_v41  ;;  %v7041_v18 = vld [vmem:[%s9834_s1 + $0x30] sm:$0xff]   ;;  %v541_v17 = vmul.f32 %v7462_v54, %v7779_v33  ;;  %v9943_v60 = vrot.slane %v7791_v31, 3  ;;  %vm489_vm3 = vcmp.ge.f32.partialorder %v7794_v5, 0.0 }
  0xa9   : > { %6323 = vmatpush3.bf16.msra.mxu1 %v7037_v9  ;;  %6294 = vmatprep.mubr.msk.bf16.mxu1 %vm7230_vm0, %v9934_v38  ;;  %v1217_v19 = vshrl.u32 %v7841_v23, 16  ;;  %v1220_v32 = vshll.u32 %v7841_v23, 16  ;;  %v7855_v47 = vpop.permute.xlu1 %617  ;;  %v7857_v25 = vpop.permute.xlu0 %702  ;;  %v7859_v0 = vor.u32 %v1141_v40, %v1138_v8  ;;  %v773_v8 = vmul.f32 %v7815_v55, %v7620_v48 }
  0xaa   : > { %9941 = vst [vmem:[#allocation21_spill] sm:$0xff] %v7855_v47  ;;  %9942 = vst [vmem:[#allocation22_spill] sm:$0xff] %v7857_v25  ;;  %6324 = vmatprep.subr.bf16.mxu1 %v9934_v38  ;;  %v7862_v9 = vld [vmem:[#allocation2 + $0x18] sm:$0xf]  ;;  %v7864_v41 = vld [vmem:[#allocation2 + $0x1c] sm:$0xf]  ;;  %6411 = vmatpush3.bf16.msra.mxu0 %v7043_v26  ;;  %v7874_v29 = vsel %vm1516_vm9, %v9944_v53, %v9943_v60  ;;  %v774_v40 = vmul.f32 %v7857_v25, %v7652_v6 }
  0xab   : > { %5983 = vst [vmem:[#allocation2 + $0x20] sm:$0xff] %v5813_v15   ;;  %v1219_v26 = vrot.slane %v1217_v19, 3  ;;  %v1222_v10 = vrot.slane %v1220_v32, 4  ;;  %6412 = vmatprep.subr.bf16.mxu0 %v9934_v38  ;;  %v1143_v39 = vsel %vm1117_vm12, %v7717_v12, %v7859_v0  ;;  %v7889_v53 = vcombine.low %v7862_v9, %v7864_v41  ;;  %v7045_v12 = vld [vmem:[%s9834_s1 + $0x28] sm:$0xff]  }
  0xac   : > { %v9945_v6 = vrot.slane %v7841_v23, 3  ;;  %v9946_v32 = vrot.slane %v7751_v11, 3  ;;  %v5858_v19 = vpack.c.bf16 %v774_v40, %v773_v8  ;;  %6259 = vmatmul.mubr.bf16.gmra.mxu0 %v1143_v39  ;;  %v524_v48 = vmul.f32 %v7462_v54, %v7794_v5 }
  0xad   : > { %v7900_v60 = vor.u32 %v1222_v10, %v1219_v26  ;;  %6325 = vmatpush3.bf16.msra.mxu1 %v7041_v18  ;;  %v7908_v25 = vpop.permute.xlu1 %707  ;;  %v7910_v11 = vpop.permute.xlu0 %622  ;;  %6262 = vmatprep.mubr.msk.bf16.mxu0 %vm7230_vm0, %v9934_v38  ;;  %v1145_v10 = vshrl.u32 %v7889_v53, 16  ;;  %v1148_v18 = vshll.u32 %v7889_v53, 16  ;;  %v7923_v26 = vadd.f32 %v7458_v50, %v7813_v20  ;;  %v7052_v20 = vld [vmem:[%s9834_s1 + $0x98] sm:$0xff]  }
  0xae   : > { %v7898_v15 = vsel %vm1516_vm9, %v9946_v32, %v9945_v6  ;;  %9947 = vst [vmem:[#allocation23_spill] sm:$0xff] %v7908_v25  ;;  %9948 = vst [vmem:[#allocation24_spill] sm:$0xff] %v7910_v11  ;;  %v7916_v8 = vld [vmem:[#allocation2 + $0x60] sm:$0xf]  ;;  %v7918_v40 = vld [vmem:[#allocation2 + $0x64] sm:$0xf]  ;;  %6326 = vmatprep.subr.bf16.mxu1 %v9934_v38  ;;  %v431_v39 = vmul.f32 %v5794_v24, %v7449_v46  ;;  %v757_v6 = vmul.f32 %v7855_v47, %v7647_v22 }
  0xaf   : > { %9949 = vst [vmem:[#allocation25_spill] sm:$0xff] %v7916_v8  ;;  %5992 = vst [vmem:[#allocation2 + $0x68] sm:$0xff] %v5858_v19   ;;  %v758_v32 = vmul.f32 %v7910_v11, %v7658_v28  ;;  %v1224_v55 = vsel %vm1117_vm12, %v7807_v7, %v7900_v60  ;;  %v7935_v45 = vcombine.low %v7916_v8, %v7918_v40  ;;  %6413 = vmatpush3.bf16.msra.mxu0 %v7047_v2 }
  0xb0   : > { %6295 = vmatmul.mubr.bf16.gmra.mxu1 %v1224_v55  ;;  %v1147_v24 = vrot.slane %v1145_v10, 3  ;;  %v1150_v22 = vrot.slane %v1148_v18, 4  ;;  %6414 = vmatprep.subr.bf16.mxu0 %v9934_v38  ;;  %v7049_v55 = vld [vmem:[%s9834_s1 + $0x20] sm:$0xff]   ;;  %v415_v47 = vmul.f32 %v5762_v36, %v7449_v46  ;;  %v9952_v10 = vrot.slane %v7889_v53, 3  ;;  %v7056_v46 = vld [vmem:[%s9834_s1 + $0x90] sm:$0xff]  }
  0xb1   : > { %v5818_v7 = vpack.c.bf16 %v758_v32, %v757_v6  ;;  %6298 = vmatprep.mubr.msk.bf16.mxu1 %vm7230_vm0, %v9934_v38  ;;  %v1226_v2 = vshrl.u32 %v7935_v45, 16  ;;  %v1229_v11 = vshll.u32 %v7935_v45, 16  ;;  %6327 = vmatpush3.bf16.msra.mxu1 %v7045_v12  ;;  %v7952_v18 = vpop.permute.xlu1 %627  ;;  %v7954_v28 = vpop.permute.xlu0 %712  ;;  %v7965_v12 = vsel %vm506_vm2, %v7779_v33, %v541_v17 }
  0xb2   : > { %9950 = vst [vmem:[#allocation26_spill] sm:$0xff] %v7952_v18  ;;  %9951 = vst [vmem:[#allocation27_spill] sm:$0xff] %v7954_v28  ;;  %v7956_v19 = vor.u32 %v1150_v22, %v1147_v24  ;;  %v7958_v6 = vld [vmem:[#allocation2 + $0x20] sm:$0xf]  ;;  %v7960_v32 = vld [vmem:[#allocation2 + $0x24] sm:$0xf]  ;;  %6328 = vmatprep.subr.bf16.mxu1 %v9934_v38  ;;  %v775_v22 = vmul.f32 %v7908_v25, %v7655_v13  ;;  %v776_v49 = vmul.f32 %v7954_v28, %v7668_v35 }
  0xb3   : > { %v9953_v8 = vrot.slane %v7791_v31, 3  ;;  %5984 = vst [vmem:[#allocation2 + $0x28] sm:$0xff] %v5818_v7   ;;  %v1228_v33 = vrot.slane %v1226_v2, 3  ;;  %v1231_v17 = vrot.slane %v1229_v11, 4  ;;  %6415 = vmatpush3.bf16.msra.mxu0 %v7052_v20  ;;  %v7988_v36 = vcombine.low %v7958_v6, %v7960_v32  ;;  %v7053_v2 = vld [vmem:[%s9834_s1 + $0x18] sm:$0xff]  }
  0xb4   : > { %v1152_v31 = vsel %vm1117_vm12, %v7859_v0, %v7956_v19  ;;  %6416 = vmatprep.subr.bf16.mxu0 %v9934_v38  ;;  %v9954_v35 = vrot.slane %v7935_v45, 3  ;;  %v9955_v11 = vrot.slane %v7841_v23, 3  ;;  %v5863_v20 = vpack.c.bf16 %v776_v49, %v775_v22 }
  0xb5   : > { %v7974_v24 = vsel %vm1516_vm9, %v9953_v8, %v9952_v10  ;;  %6263 = vmatmul.mubr.bf16.gmra.mxu0 %v1152_v31  ;;  %v8000_v7 = vor.u32 %v1231_v17, %v1228_v33  ;;  %v8005_v0 = vsel %vm489_vm3, %v7794_v5, %v524_v48  ;;  %6329 = vmatpush3.bf16.msra.mxu1 %v7049_v55  ;;  %v8010_v10 = vpop.permute.xlu1 %717  ;;  %v8012_v23 = vpop.permute.xlu0 %632  ;;  %v1154_v49 = vshrl.u32 %v7988_v36, 16 }
  0xb6   : > { %v7998_v8 = vsel %vm1516_vm9, %v9955_v11, %v9954_v35  ;;  %9956 = vst [vmem:[#allocation28_spill] sm:$0xff] %v8010_v10  ;;  %9957 = vst [vmem:[#allocation29_spill] sm:$0xff] %v8012_v23  ;;  %6266 = vmatprep.mubr.msk.bf16.mxu0 %vm7230_vm0, %v9934_v38  ;;  %v1157_v22 = vshll.u32 %v7988_v36, 16  ;;  %v8018_v33 = vld [vmem:[#allocation2 + $0x68] sm:$0xf]  ;;  %v472_v48 = vadd.f32 %v7458_v50, %v431_v39  ;;  %6330 = vmatprep.subr.bf16.mxu1 %v9934_v38 }
  0xb7   : > { %v8020_v5 = vld [vmem:[#allocation2 + $0x6c] sm:$0xf]  ;;  %v8024_v55 = vadd.f32 %v7458_v50, %v415_v47  ;;  %v759_v17 = vmul.f32 %v7952_v18, %v7666_v34  ;;  %5993 = vst [vmem:[#allocation2 + $0x70] sm:$0xff] %v5863_v20   ;;  %v760_v31 = vmul.f32 %v8012_v23, %v7726_v16  ;;  %v1233_v35 = vsel %vm1117_vm12, %v7900_v60, %v8000_v7  ;;  %v7065_v18 = vld [vmem:[%s9834_s1 + $0x80] sm:$0xff]  }
  0xb8   : > { %v8036_v11 = vcombine.low %v8018_v33, %v8020_v5  ;;  %vm490_vm4 = vcmp.ge.f32.partialorder %v7923_v26, 0.0  ;;  %6417 = vmatpush3.bf16.msra.mxu0 %v7056_v46  ;;  %v7061_v50 = vld [vmem:[%s9834_s1 + $0x88] sm:$0xff]   ;;  %6299 = vmatmul.mubr.bf16.gmra.mxu1 %v1233_v35  ;;  %v1156_v34 = vrot.slane %v1154_v49, 3  ;;  %v1159_v47 = vrot.slane %v1157_v22, 4  ;;  %v7057_v49 = vld [vmem:[%s9834_s1 + $0x10] sm:$0xff]  }
  0xb9   : > { %6418 = vmatprep.subr.bf16.mxu0 %v9934_v38  ;;  %v5823_v39 = vpack.c.bf16 %v760_v31, %v759_v17  ;;  %6302 = vmatprep.mubr.msk.bf16.mxu1 %vm7230_vm0, %v9934_v38  ;;  %v8054_v35 = vpop.permute.xlu1 %637  ;;  %v8056_v13 = vpop.permute.xlu0 %722  ;;  %vm507_vm5 = vcmp.ge.f32.partialorder %v472_v48, 0.0  ;;  %v542_v17 = vmul.f32 %v7462_v54, %v472_v48  ;;  %v9961_v28 = vrot.slane %v7889_v53, 3 }
  0xba   : > { %v1235_v46 = vshrl.u32 %v8036_v11, 16  ;;  %v1238_v20 = vshll.u32 %v8036_v11, 16  ;;  %6331 = vmatpush3.bf16.msra.mxu1 %v7053_v2  ;;  %9958 = vst [vmem:[#allocation30_spill] sm:$0xff] %v8054_v35  ;;  %9959 = vst [vmem:[#allocation31_spill] sm:$0xff] %v8056_v13  ;;  %v8058_v60 = vor.u32 %v1159_v47, %v1156_v34  ;;  %v8061_v31 = vld [vmem:[#allocation2 + $0x28] sm:$0xf]  ;;  %v777_v34 = vmul.f32 %v8010_v10, %v7723_v44 }
  0xbb   : > { %v8063_v16 = vld [vmem:[#allocation2 + $0x2c] sm:$0xf]  ;;  %6332 = vmatprep.subr.bf16.mxu1 %v9934_v38  ;;  %v9960_v2 = vrot.slane %v7988_v36, 3  ;;  %5985 = vst [vmem:[#allocation2 + $0x30] sm:$0xff] %v5823_v39   ;;  %v778_v47 = vmul.f32 %v8056_v13, %v7829_v52  ;;  %v9962_v52 = vrot.slane %v8036_v11, 3  ;;  %vm491_vm6 = vcmp.ge.f32.partialorder %v8024_v55, 0.0 }
  0xbc   : > { %v1237_v25 = vrot.slane %v1235_v46, 3  ;;  %v1240_v23 = vrot.slane %v1238_v20, 4  ;;  %6419 = vmatpush3.bf16.msra.mxu0 %v7061_v50  ;;  %v1161_v53 = vsel %vm1117_vm12, %v7956_v19, %v8058_v60  ;;  %v9963_v50 = vrot.slane %v7935_v45, 3 }
  0xbd   : > { %v8071_v22 = vsel %vm1516_vm9, %v9961_v28, %v9960_v2  ;;  %v8085_v28 = vcombine.low %v8061_v31, %v8063_v16  ;;  %6420 = vmatprep.subr.bf16.mxu0 %v9934_v38  ;;  %v5868_v46 = vpack.c.bf16 %v778_v47, %v777_v34  ;;  %6267 = vmatmul.mubr.bf16.gmra.mxu0 %v1161_v53  ;;  %v7060_v2 = vld [vmem:[%s9834_s1 + $0x8] sm:$0xff]   ;;  %v8105_v44 = vpop.permute.xlu1 %727  ;;  %v8107_v45 = vpop.permute.xlu0 %642 }
  0xbe   : > { %v8095_v39 = vsel %vm1516_vm9, %v9963_v50, %v9962_v52  ;;  %v8097_v20 = vor.u32 %v1240_v23, %v1237_v25  ;;  %v525_v19 = vmul.f32 %v7462_v54, %v7923_v26  ;;  %6333 = vmatpush3.bf16.msra.mxu1 %v7057_v49  ;;  %9964 = vst [vmem:[#allocation32_spill] sm:$0xff] %v8105_v44  ;;  %9965 = vst [vmem:[#allocation33_spill] sm:$0xff] %v8107_v45  ;;  %v8116_v34 = vld [vmem:[#allocation2 + $0x70] sm:$0xf]  ;;  %v8118_v47 = vld [vmem:[#allocation2 + $0x74] sm:$0xf] }
  0xbf   : > { %v576_v52 = vsel %vm507_vm5, %v472_v48, %v542_v17  ;;  %6270 = vmatprep.mubr.msk.bf16.mxu0 %vm7230_vm0, %v9934_v38  ;;  %v1163_v25 = vshrl.u32 %v8085_v28, 16  ;;  %v1166_v23 = vshll.u32 %v8085_v28, 16  ;;  %v526_v49 = vmul.f32 %v7462_v54, %v8024_v55  ;;  %9966 = vst [vmem:[#allocation34_spill] sm:$0xff] %v8118_v47  ;;  %6334 = vmatprep.subr.bf16.mxu1 %v9934_v38 }
  0xc0   : > { %v761_v53 = vmul.f32 %v8054_v35, %v7754_v57  ;;  %5994 = vst [vmem:[#allocation2 + $0x78] sm:$0xff] %v5868_v46   ;;  %v762_v48 = vmul.f32 %v8107_v45, %v8005_v0  ;;  %v1242_v17 = vsel %vm1117_vm12, %v8000_v7, %v8097_v20  ;;  %v8130_v54 = vcombine.low %v8116_v34, %v8118_v47 }
  0xc1   : > { %6421 = vmatpush3.bf16.msra.mxu0 %v7065_v18  ;;  %6303 = vmatmul.mubr.bf16.gmra.mxu1 %v1242_v17  ;;  %v1165_v50 = vrot.slane %v1163_v25, 3  ;;  %v1168_v13 = vrot.slane %v1166_v23, 4  ;;  %v1526_v57 = vrot.slane %v8085_v28, 3  ;;  %v7064_v18 = vld [vmem:[%s9834_s1] sm:$0xff]   ;;  %v8144_v23 = vpop.permute.xlu1 %647  ;;  %v559_v28 = vsel %vm490_vm4, %v7923_v26, %v525_v19 }
  0xc2   : > { %6574 = vmatprep.subr.bf16.mxu0 %v9934_v38  ;;  %v5828_v0 = vpack.c.bf16 %v762_v48, %v761_v53  ;;  %6306 = vmatprep.mubr.msk.bf16.mxu1 %vm7230_vm0, %v9934_v38  ;;  %v1244_v7 = vshrl.u32 %v8130_v54, 16  ;;  %v1247_v10 = vshll.u32 %v8130_v54, 16  ;;  %v1544_v25 = vrot.slane %v8130_v54, 3  ;;  %9967 = vst [vmem:[#allocation35_spill] sm:$0xff] %v8144_v23  ;;  %v8149_v53 = vpop.permute.xlu0 %732  ;;  %v8156_v46 = vld [vmem:[#allocation2 + $0x34] sm:$0xf] }
  0xc3   : > { %6335 = vmatpush3.bf16.msra.mxu1 %v7060_v2  ;;  %9968 = vst [vmem:[#allocation36_spill] sm:$0xff] %v8149_v53  ;;  %v1169_v48 = vor.u32 %v1168_v13, %v1165_v50  ;;  %v560_v17 = vsel %vm491_vm6, %v8024_v55, %v526_v49  ;;  %v8154_v2 = vld [vmem:[#allocation2 + $0x30] sm:$0xf]  ;;  %v9969_v54 = vrot.slane %v7988_v36, 3  ;;  %v779_v26 = vmul.f32 %v8105_v44, %v7965_v12 }
  0xc4   : > { %6336 = vmatprep.subr.bf16.mxu1 %v9934_v38  ;;  %5986 = vst [vmem:[#allocation2 + $0x38] sm:$0xff] %v5828_v0   ;;  %v780_v13 = vmul.f32 %v8149_v53, %v576_v52  ;;  %v1246_v19 = vrot.slane %v1244_v7, 3  ;;  %v1249_v50 = vrot.slane %v1247_v10, 4  ;;  %v8171_v49 = vcombine.low %v8154_v2, %v8156_v46 }
  0xc5   : > { %v8162_v45 = vsel %vm1516_vm9, %v9969_v54, %v1526_v57  ;;  %v1170_v55 = vsel %vm1117_vm12, %v8058_v60, %v1169_v48  ;;  %v9970_v54 = vrot.slane %v8036_v11, 3  ;;  %v8180_v10 = vpop.permute.xlu1 %737 }
  0xc6   : > { %v5873_v12 = vpack.c.bf16 %v780_v13, %v779_v26  ;;  %6271 = vmatmul.mubr.bf16.gmra.mxu0 %v1170_v55  ;;  %v1250_v52 = vor.u32 %v1249_v50, %v1246_v19  ;;  %9971 = vst [vmem:[#allocation37_spill] sm:$0xff] %v8180_v10  ;;  %v8182_v0 = vpop.permute.xlu0 %652  ;;  %v1172_v60 = vshrl.u32 %v8171_v49, 16  ;;  %v1175_v7 = vshll.u32 %v8171_v49, 16 }
  0xc7   : > { %v8178_v35 = vsel %vm1516_vm9, %v9970_v54, %v1544_v25  ;;  %6337 = vmatpush3.bf16.msra.mxu1 %v7064_v18  ;;  %9972 = vst [vmem:[#allocation38_spill] sm:$0xff] %v8182_v0  ;;  %6274 = vmatprep.mubr.msk.bf16.mxu0 %vm7230_vm0, %v9934_v38  ;;  %v8188_v36 = vld [vmem:[#allocation2 + $0x78] sm:$0xf]  ;;  %v8190_v11 = vld [vmem:[#allocation2 + $0x7c] sm:$0xf]  ;;  %v763_v26 = vmul.f32 %v8144_v23, %v559_v28  ;;  %v1528_v54 = vrot.slane %v8171_v49, 3 }
  0xc8   : > { %9973 = vst [vmem:[#allocation39_spill] sm:$0xff] %v8188_v36  ;;  %9974 = vst [vmem:[#allocation40_spill] sm:$0xff] %v8190_v11  ;;  %6490 = vmatprep.subr.bf16.mxu1 %v9934_v38  ;;  %v764_v18 = vmul.f32 %v8182_v0, %v560_v17  ;;  %v1251_v13 = vsel %vm1117_vm12, %v8097_v20, %v1250_v52  ;;  %v5334_v19 = vcombine.low %v8188_v36, %v8190_v11 }
  0xc9   : > { %5995 = vst [vmem:[#allocation2 + $0x80] sm:$0xff] %v5873_v12   ;;  %6307 = vmatmul.mubr.bf16.gmra.mxu1 %v1251_v13  ;;  %v1174_v50 = vrot.slane %v1172_v60, 3  ;;  %v1177_v55 = vrot.slane %v1175_v7, 4  ;;  %v781_v20 = vmul.f32 %v8180_v10, %v7467_v58  ;;  %v8206_v0 = vpop.permute.xlu1 %747 }
  0xca   : > { %v5833_v44 = vpack.c.bf16 %v764_v18, %v763_v26  ;;  %6310 = vmatprep.mubr.msk.bf16.mxu1 %vm7230_vm0, %v9934_v38  ;;  %v1253_v28 = vshrl.u32 %v5334_v19, 16  ;;  %v1256_v17 = vshll.u32 %v5334_v19, 16  ;;  %v1546_v12 = vrot.slane %v5334_v19, 3  ;;  %9975 = vst [vmem:[#allocation41_spill] sm:$0xff] %v8206_v0  ;;  %v8208_v13 = vpop.permute.xlu0 %742 }
  0xcb   : > { %9976 = vst [vmem:[#allocation42_spill] sm:$0xff] %v8208_v13  ;;  %v1178_v60 = vor.u32 %v1177_v55, %v1174_v50  ;;  %v8210_v7 = vld [vmem:[#allocation2 + $0x38] sm:$0xf]  ;;  %v8212_v49 = vld [vmem:[#allocation2 + $0x3c] sm:$0xf]  ;;  %v8215_v26 = vsel %vm1516_vm9, %v1526_v57, %v1528_v54  ;;  %v783_v18 = vmul.f32 %v8206_v0, %v7471_v61  ;;  %v782_v19 = vmul.f32 %v8208_v13, %v7474_v63 }
  0xcc   : > { %5987 = vst [vmem:[#allocation2 + $0x40] sm:$0xff] %v5833_v44   ;;  %v1255_v58 = vrot.slane %v1253_v28, 3  ;;  %v1258_v53 = vrot.slane %v1256_v17, 4  ;;  %v5326_v50 = vcombine.low %v8210_v7, %v8212_v49  ;;  %v8227_v57 = vsel %vm1516_vm9, %v1544_v25, %v1546_v12 }
  0xcd   : > { %v1179_v10 = vsel %vm1117_vm12, %v1169_v48, %v1178_v60  ;;  %v5697_v44 = vpack.c.bf16 %v783_v18, %v783_v18  ;;  %v5878_v23 = vpack.c.bf16 %v782_v19, %v781_v20 }
  0xce   : > { %6275 = vmatmul.mubr.bf16.gmra.mxu0 %v1179_v10  ;;  %v1259_v61 = vor.u32 %v1258_v53, %v1255_v58  ;;  %v1181_v63 = vshrl.u32 %v5326_v50, 16  ;;  %v1184_v28 = vshll.u32 %v5326_v50, 16  ;;  %v1530_v18 = vrot.slane %v5326_v50, 3 }
  0xcf   : > { %6278 = vmatprep.mubr.msk.bf16.mxu0 %vm7230_vm0, %v9934_v38  ;;  %959 = vst [vmem:[#allocation2 + $0x90] sm:$0xf] %v5697_v44  ;;  %5996 = vst [vmem:[#allocation2 + $0x88] sm:$0xff] %v5878_v23  }
  0xd0   : > { %v8231_v17 = vld [vmem:[#allocation2 + $0x80] sm:$0xf]  ;;  %v8233_v48 = vld [vmem:[#allocation2 + $0x84] sm:$0xf]  ;;  %v1260_v55 = vsel %vm1117_vm12, %v1250_v52, %v1259_v61  ;;  %v1183_v10 = vrot.slane %v1181_v63, 3  ;;  %v1186_v20 = vrot.slane %v1184_v28, 4  ;;  %v8243_v44 = vsel %vm1516_vm9, %v1528_v54, %v1530_v18 }
  0xd1   : > { %9977 = vst [vmem:[#allocation43_spill] sm:$0xff] %v8231_v17  ;;  %v5335_v25 = vcombine.low %v8231_v17, %v8233_v48  ;;  %6311 = vmatmul.mubr.bf16.gmra.mxu1 %v1260_v55 }
  0xd2   : > { %6314 = vmatprep.mubr.msk.bf16.mxu1 %vm7230_vm0, %v9934_v38  ;;  %v1187_v52 = vor.u32 %v1186_v20, %v1183_v10 }
  0xd3   : > { %v1262_v19 = vshrl.u32 %v5335_v25, 16  ;;  %v1265_v58 = vshll.u32 %v5335_v25, 16  ;;  %v1548_v23 = vrot.slane %v5335_v25, 3  ;;  %v8245_v0 = vld [vmem:[#allocation2 + $0x40] sm:$0xf] }
  0xd4   : > { %v8247_v13 = vld [vmem:[#allocation2 + $0x44] sm:$0xf]  ;;  %v1188_v28 = vsel %vm1117_vm12, %v1178_v60, %v1187_v52 }
  0xd5   : > { %v1264_v50 = vrot.slane %v1262_v19, 3  ;;  %v1267_v36 = vrot.slane %v1265_v58, 4  ;;  %v5327_v55 = vcombine.low %v8245_v0, %v8247_v13  ;;  %v8257_v25 = vsel %vm1516_vm9, %v1546_v12, %v1548_v23 }
  0xd6   : > { %9978 = vst [vmem:[#allocation44_spill] sm:$0xff] %v8257_v25  ;;  %6279 = vmatmul.mubr.bf16.gmra.mxu0 %v1188_v28  ;;  %v8261_v58 = vld [vmem:[#allocation2 + $0x88] sm:$0xf] }
  0xd7   : > { %v1268_v10 = vor.u32 %v1267_v36, %v1264_v50  ;;  %v1190_v20 = vshrl.u32 %v5327_v55, 16  ;;  %v1193_v53 = vshll.u32 %v5327_v55, 16  ;;  %v1532_v19 = vrot.slane %v5327_v55, 3  ;;  %6282 = vmatprep.mubr.msk.bf16.mxu0 %vm7230_vm0, %v9934_v38  ;;  %v7097_v11 = vld [vmem:[#allocation2 + $0x88] ss:$0 sps:$4 sm:$0x77]  }
  0xd8   : > { %v5336_v54 = vcombine.low %v8261_v58, %v8261_v58  ;;  %v9979_v36 = vrot.slane %v7706_v30, 3  ;;  %v5386_v55 = vcombine.low %v8233_v48, %v8261_v58  ;;  %v7107_v58 = vld [vmem:[%s9834_s1 + $0x170] sm:$0xff]  }
  0xd9   : > { %v1269_v63 = vsel %vm1117_vm12, %v1259_v61, %v1268_v10  ;;  %v1192_v17 = vrot.slane %v1190_v20, 3  ;;  %v1195_v60 = vrot.slane %v1193_v53, 4  ;;  %v8267_v12 = vsel %vm1516_vm9, %v1530_v18, %v1532_v19 }
  0xda   : > { %6315 = vmatmul.mubr.bf16.gmra.mxu1 %v1269_v63  ;;  %v8272_v50 = vsel %vm1516_vm9, %v1532_v19, %v9979_v36  ;;  %v1271_v61 = vshrl.u32 %v5336_v54, 16  ;;  %v1274_v53 = vshll.u32 %v5336_v54, 16  ;;  %v1550_v20 = vrot.slane %v7097_v11, 3  ;;  %v7080_v19 = vld [vmem:[%s9834_s1 + $0x120] sm:$0xff]   ;;  %v7087_v36 = vld [vmem:[%s9834_s1 + $0x110] sm:$0xff]  }
  0xdb   : > { %v1196_v28 = vor.u32 %v1195_v60, %v1192_v17  ;;  %6318 = vmatprep.mubr.msk.bf16.mxu1 %vm7230_vm0, %v9934_v38  ;;  %v9980_v54 = vcombine.low %v7481_v3, %v7483_v4  ;;  %v7079_v3 = vld [vmem:[%s9834_s1 + $0xe0] sm:$0xff]   ;;  %v7076_v4 = vld [vmem:[%s9834_s1 + $0x128] sm:$0xff]  }
  0xdc   : > { %v1273_v25 = vrot.slane %v1271_v61, 3  ;;  %v1276_v18 = vrot.slane %v1274_v53, 4  ;;  %v8280_v47 = vsel %vm1516_vm9, %v1548_v23, %v1550_v20  ;;  %v7066_v23 = vld [vmem:[%s9834_s1 + $0xf8] sm:$0xff]   ;;  %v7090_v60 = vld [vmem:[%s9834_s1 + $0xc8] sm:$0xff]  }
  0xdd   : > { %v1197_v63 = vsel %vm1117_vm12, %v1187_v52, %v1196_v28  ;;  %v1206_v11 = vsel %vm1117_vm12, %v1196_v28, %v7805_v27  ;;  %v7070_v52 = vld [vmem:[%s9834_s1 + $0xf0] sm:$0xff]   ;;  %v7068_v27 = vld [vmem:[%s9834_s1 + $0x138] sm:$0xff]   ;;  %v7095_v28 = vld [vmem:[%s9834_s1 + $0x100] sm:$0xff]  }
  0xde   : > { %6283 = vmatmul.mubr.bf16.gmra.mxu0 %v1197_v63  ;;  %v1277_v30 = vor.u32 %v1276_v18, %v1273_v25  ;;  %v7072_v25 = vld [vmem:[%s9834_s1 + $0x130] sm:$0xff]  }
  0xdf   : > { %6286 = vmatprep.mubr.msk.bf16.mxu0 %vm7230_vm0, %v9934_v38 }
  0xe0   : > { %v1278_v17 = vsel %vm1117_vm12, %v1268_v10, %v1277_v30  ;;  %v7082_v10 = vld [vmem:[%s9834_s1 + $0xd8] sm:$0xff]  }
  0xe2   : > { %6319 = vmatmul.mubr.bf16.gmra.mxu1 %v1278_v17 }
  0xe3   : > { %6338 = vmatprep.mubr.msk.bf16.mxu1 %vm7230_vm0, %v9934_v38 }
  0xe6   : > { %6287 = vmatmul.mubr.bf16.gmra.mxu0 %v1206_v11 }
  0xe7   : > { %6422 = vmatprep.mubr.msk.bf16.mxu0 %vm7230_vm0, %v9934_v38 }
  0xea   : > { %6339 = vmatmul.mubr.bf16.vlgmr.msra.gmra.mxu1 %v7715_v62  ;;  %v7075_v62 = vld [vmem:[%s9834_s1 + $0xe8] sm:$0xff]  }
  0xeb   : > { %6491 = vmatpush3.bf16.msra.mxu1 %v7066_v23  ;;  %6342 = vmatprep.mubr.msk.bf16.mxu1 %vm7230_vm0, %v9934_v38 }
  0xec   : > { %6492 = vmatprep.subr.bf16.mxu1 %v9934_v38 }
  0xee   : > { %6423 = vmatmul.mubr.bf16.vlgmr.msra.gmra.mxu0 %v9980_v54 }
  0xef   : > { %6493 = vmatpush3.bf16.msra.mxu1 %v7070_v52  ;;  %6575 = vmatpush3.bf16.msra.mxu0 %v7068_v27 }
  0xf0   : > { %6426 = vmatprep.mubr.msk.bf16.mxu0 %vm7230_vm0, %v9934_v38  ;;  %6576 = vmatprep.subr.bf16.mxu0 %v9934_v38 }
  0xf1   : > { %6494 = vmatprep.subr.bf16.mxu1 %v9934_v38 }
  0xf2   : > { %6343 = vmatmul.mubr.bf16.gmra.mxu1 %v7874_v29  ;;  %v9981_v29 = vcombine.low %v7664_v14, %v7770_v42  ;;  %v7086_v14 = vld [vmem:[%s9834_s1 + $0xd0] sm:$0xff]   ;;  %v7083_v42 = vld [vmem:[%s9834_s1 + $0x118] sm:$0xff]  }
  0xf3   : > { %6346 = vmatprep.mubr.msk.bf16.mxu1 %vm7230_vm0, %v9934_v38  ;;  %6495 = vmatpush3.bf16.msra.mxu1 %v7075_v62 }
  0xf4   : > { %6577 = vmatpush3.bf16.msra.mxu0 %v7072_v25  ;;  %6496 = vmatprep.subr.bf16.mxu1 %v9934_v38 }
  0xf5   : > { %6578 = vmatprep.subr.bf16.mxu0 %v9934_v38 }
  0xf6   : > { %6427 = vmatmul.mubr.bf16.gmra.mxu0 %v9981_v29  ;;  %v8508_v29 = vld [vmem:[#allocation2 + $0x24] sm:$0xf] }
  0xf7   : > { %6497 = vmatpush3.bf16.msra.mxu1 %v7079_v3  ;;  %6430 = vmatprep.mubr.msk.bf16.mxu0 %vm7230_vm0, %v9934_v38 }
  0xf8   : > { %6579 = vmatpush3.bf16.msra.mxu0 %v7076_v4  ;;  %6498 = vmatprep.subr.bf16.mxu1 %v9934_v38  ;;  %v8506_v4 = vld [vmem:[#allocation2 + $0x20] sm:$0xf] }
  0xf9   : > { %6580 = vmatprep.subr.bf16.mxu0 %v9934_v38 }
  0xfa   : > { %6347 = vmatmul.mubr.bf16.gmra.mxu1 %v7974_v24  ;;  %v9982_v24 = vcombine.low %v7772_v51, %v7862_v9  ;;  %v7094_v51 = vld [vmem:[%s9834_s1 + $0xc0] sm:$0xff]   ;;  %v7091_v9 = vld [vmem:[%s9834_s1 + $0x108] sm:$0xff]  }
  0xfb   : > { %6350 = vmatprep.mubr.msk.bf16.mxu1 %vm7230_vm0, %v9934_v38  ;;  %6499 = vmatpush3.bf16.msra.mxu1 %v7082_v10 }
  0xfc   : > { %6581 = vmatpush3.bf16.msra.mxu0 %v7080_v19  ;;  %6500 = vmatprep.subr.bf16.mxu1 %v9934_v38  ;;  %v7101_v19 = vld [vmem:[%s9834_s1 + $0x178] sm:$0xff]  }
  0xfd   : > { %6582 = vmatprep.subr.bf16.mxu0 %v9934_v38 }
  0xfe   : > { %6431 = vmatmul.mubr.bf16.gmra.mxu0 %v9982_v24 }
  0xff   : > { %6501 = vmatpush3.bf16.msra.mxu1 %v7086_v14  ;;  %6434 = vmatprep.mubr.msk.bf16.mxu0 %vm7230_vm0, %v9934_v38 }
 0x100   : > { %6583 = vmatpush3.bf16.msra.mxu0 %v7083_v42  ;;  %6502 = vmatprep.subr.bf16.mxu1 %v9934_v38 }
 0x101   : > { %6584 = vmatprep.subr.bf16.mxu0 %v9934_v38 }
 0x102   : > { %6351 = vmatmul.mubr.bf16.gmra.mxu1 %v8071_v22  ;;  %v9983_v22 = vcombine.low %v7864_v41, %v7958_v6  ;;  %v9984_v41 = vcombine.low %v7960_v32, %v8061_v31  ;;  %v9985_v6 = vcombine.low %v8063_v16, %v8154_v2  ;;  %v9986_v32 = vcombine.low %v8156_v46, %v8210_v7  ;;  %v9999_v2 = vld [vmem:[#allocation44_spill] sm:$0xff] }
 0x103   : > { %6354 = vmatprep.mubr.msk.bf16.mxu1 %vm7230_vm0, %v9934_v38  ;;  %6503 = vmatpush3.bf16.msra.mxu1 %v7090_v60  ;;  %v9987_v16 = vcombine.low %v8212_v49, %v8245_v0  ;;  %v9988_v31 = vcombine.low %v8247_v13, %v7694_v37  ;;  %v9990_v37 = vcombine.low %v7734_v43, %v7821_v56 }
 0x104   : > { %6585 = vmatpush3.bf16.msra.mxu0 %v7087_v36  ;;  %6504 = vmatprep.subr.bf16.mxu1 %v9934_v38  ;;  %v9994_v43 = vcombine.low %v7918_v40, %v8018_v33  ;;  %v9995_v56 = vcombine.low %v8020_v5, %v8116_v34  ;;  %v8472_v40 = vld [vmem:[#allocation2 + $0x14] sm:$0xf]  ;;  %v9997_v33 = vld [vmem:[#allocation39_spill] sm:$0xff]  ;;  %v2088_v5 = vld [vmem:[#allocation2 + $0x8] sm:$0x8] }
 0x105   : > { %6586 = vmatprep.subr.bf16.mxu0 %v9934_v38 }
 0x106   : > { %6435 = vmatmul.mubr.bf16.gmra.mxu0 %v9983_v22  ;;  %v7103_v22 = vld [vmem:[%s9834_s1 + $0x1b8] sm:$0xff]  }
 0x107   : > { %6505 = vmatpush3.bf16.msra.mxu1 %v7094_v51  ;;  %6438 = vmatprep.mubr.msk.bf16.mxu0 %vm7230_vm0, %v9934_v38  ;;  %v5414_v51 = vcombine.low %v8506_v4, %v8508_v29 }
 0x108   : > { %6587 = vmatpush3.bf16.msra.mxu0 %v7091_v9  ;;  %6658 = vmatprep.subr.bf16.mxu1 %v9934_v38 }
 0x109   : > { %6588 = vmatprep.subr.bf16.mxu0 %v9934_v38 }
 0x10a   : > { %6355 = vmatmul.mubr.bf16.gmra.mxu1 %v8162_v45  ;;  %v9989_v45 = vcombine.low %v7696_v1, %v7732_v59  ;;  %v9991_v59 = vld [vmem:[#allocation20_spill] sm:$0xff]  ;;  %v9992_v1 = vld [vmem:[#allocation25_spill] sm:$0xff] }
 0x10b   : > { %6358 = vmatprep.mubr.msk.bf16.mxu1 %vm7230_vm0, %v9934_v38 }
 0x10c   : > { %6589 = vmatpush3.bf16.msra.mxu0 %v7095_v28 }
 0x10d   : > { %6742 = vmatprep.subr.bf16.mxu0 %v9934_v38 }
 0x10e   : > { %6439 = vmatmul.mubr.bf16.gmra.mxu0 %v9984_v41 }
 0x10f   : > { %6442 = vmatprep.mubr.msk.bf16.mxu0 %vm7230_vm0, %v9934_v38 }
 0x112   : > { %6359 = vmatmul.mubr.bf16.gmra.mxu1 %v8215_v26 }
 0x113   : > { %6362 = vmatprep.mubr.msk.bf16.mxu1 %vm7230_vm0, %v9934_v38 }
 0x116   : > { %6443 = vmatmul.mubr.bf16.gmra.mxu0 %v9985_v6 }
 0x117   : > { %6446 = vmatprep.mubr.msk.bf16.mxu0 %vm7230_vm0, %v9934_v38 }
 0x11a   : > { %6363 = vmatmul.mubr.bf16.gmra.mxu1 %v8243_v44  ;;  %v8490_v44 = vld [vmem:[#allocation2 + $0x1c] sm:$0xf] }
 0x11b   : > { %6366 = vmatprep.mubr.msk.bf16.mxu1 %vm7230_vm0, %v9934_v38 }
 0x11e   : > { %6447 = vmatmul.mubr.bf16.gmra.mxu0 %v9986_v32  ;;  %v2255_v32 = vshrl.u32 %v5414_v51, 16 }
 0x11f   : > { %6450 = vmatprep.mubr.msk.bf16.mxu0 %vm7230_vm0, %v9934_v38 }
 0x122   : > { %6367 = vmatmul.mubr.bf16.gmra.mxu1 %v8267_v12  ;;  %v10000_v12 = vld [vmem:[#allocation40_spill] sm:$0xff] }
 0x123   : > { %6370 = vmatprep.mubr.msk.bf16.mxu1 %vm7230_vm0, %v9934_v38 }
 0x126   : > { %6451 = vmatmul.mubr.bf16.gmra.mxu0 %v9987_v16  ;;  %v2258_v16 = vshll.u32 %v5414_v51, 16 }
 0x127   : > { %6454 = vmatprep.mubr.msk.bf16.mxu0 %vm7230_vm0, %v9934_v38 }
 0x12a   : > { %6371 = vmatmul.mubr.bf16.gmra.mxu1 %v8272_v50  ;;  %v10001_v50 = vld [vmem:[#allocation43_spill] sm:$0xff] }
 0x12b   : > { %6374 = vmatprep.mubr.msk.bf16.mxu1 %vm7230_vm0, %v9934_v38  ;;  %v10002_v61 = vcombine.low %v10000_v12, %v10001_v50 }
 0x12e   : > { %6455 = vmatmul.mubr.bf16.gmra.mxu0 %v9988_v31 }
 0x12f   : > { %6458 = vmatprep.mubr.msk.bf16.mxu0 %vm7230_vm0, %v9934_v38 }
 0x132   : > { %6375 = vmatmul.mubr.bf16.gmra.mxu1 %v7803_v21  ;;  %v9993_v21 = vcombine.low %v9991_v59, %v9992_v1  ;;  %v7114_v1 = vld [vmem:[%s9834_s1 + $0x168] sm:$0xff]  }
 0x133   : > { %6378 = vmatprep.mubr.msk.bf16.mxu1 %vm7230_vm0, %v9934_v38 }
 0x136   : > { %6459 = vmatmul.mubr.bf16.gmra.mxu0 %v9989_v45  ;;  %v8539_v45 = vld [vmem:[#allocation2 + $0x28] sm:$0xf] }
 0x137   : > { %6462 = vmatprep.mubr.msk.bf16.mxu0 %vm7230_vm0, %v9934_v38 }
 0x13a   : > { %6379 = vmatmul.mubr.bf16.gmra.mxu1 %v7898_v15  ;;  %v8470_v15 = vld [vmem:[#allocation2 + $0x10] sm:$0xf] }
 0x13b   : > { %6382 = vmatprep.mubr.msk.bf16.mxu1 %vm7230_vm0, %v9934_v38  ;;  %v5412_v34 = vcombine.low %v8470_v15, %v8472_v40 }
 0x13d   : > { %v2237_v7 = vshrl.u32 %v5412_v34, 16  ;;  %v2240_v49 = vshll.u32 %v5412_v34, 16  ;;  %v7120_v34 = vld [vmem:[%s9834_s1 + $0x160] sm:$0xff]  }
 0x13e   : > { %6463 = vmatmul.mubr.bf16.gmra.mxu0 %v9990_v37  ;;  %v8541_v37 = vld [vmem:[#allocation2 + $0x2c] sm:$0xf] }
 0x13f   : > { %6466 = vmatprep.mubr.msk.bf16.mxu0 %vm7230_vm0, %v9934_v38  ;;  %v2239_v18 = vrot.slane %v2237_v7, 3  ;;  %v2242_v30 = vrot.slane %v2240_v49, 4 }
 0x141   : > { %v2243_v54 = vor.u32 %v2242_v30, %v2239_v18  ;;  %v7126_v18 = vld [vmem:[%s9834_s1 + $0x158] sm:$0xff]  }
 0x142   : > { %6383 = vmatmul.mubr.bf16.gmra.mxu1 %v7998_v8  ;;  %v9996_v8 = vld [vmem:[#allocation34_spill] sm:$0xff] }
 0x143   : > { %6386 = vmatprep.mubr.msk.bf16.mxu1 %vm7230_vm0, %v9934_v38 }
 0x146   : > { %6467 = vmatmul.mubr.bf16.gmra.mxu0 %v9993_v21 }
 0x147   : > { %6470 = vmatprep.mubr.msk.bf16.mxu0 %vm7230_vm0, %v9934_v38 }
 0x14a   : > { %6387 = vmatmul.mubr.bf16.gmra.mxu1 %v8095_v39  ;;  %v2089_v39 = vld [vmem:[#allocation2 + $0xc] sm:$0xf] }
 0x14b   : > { %6390 = vmatprep.mubr.msk.bf16.mxu1 %vm7230_vm0, %v9934_v38  ;;  %v5411_v0 = vcombine.low %v2088_v5, %v2089_v39  ;;  %v5453_v41 = vcombine.low %v2089_v39, %v8470_v15 }
 0x14d   : > { %v2229_v53 = vshrl.u32 %v5411_v0, 16  ;;  %v2232_v20 = vshll.u32 %v5411_v0, 16  ;;  %v7115_v0 = vld [vmem:[%s9834_s1 + $0x1a8] sm:$0xff]  }
 0x14e   : > { %6471 = vmatmul.mubr.bf16.gmra.mxu0 %v9994_v43  ;;  %v7109_v43 = vld [vmem:[%s9834_s1 + $0x1b0] sm:$0xff]  }
 0x14f   : > { %6474 = vmatprep.mubr.msk.bf16.mxu0 %vm7230_vm0, %v9934_v38  ;;  %v2231_v23 = vrot.slane %v2229_v53, 3  ;;  %v2234_v52 = vrot.slane %v2232_v20, 4  ;;  %v8576_v53 = vld [vmem:[#allocation2 + $0x30] sm:$0xf]  ;;  %v8578_v20 = vld [vmem:[#allocation2 + $0x34] sm:$0xf] }
 0x152   : > { %6391 = vmatmul.mubr.bf16.gmra.mxu1 %v8178_v35  ;;  %v9998_v35 = vcombine.low %v9996_v8, %v9997_v33  ;;  %v2257_v8 = vrot.slane %v2255_v32, 3  ;;  %v2260_v33 = vrot.slane %v2258_v16, 4 }
 0x153   : > { %6394 = vmatprep.mubr.msk.bf16.mxu1 %vm7230_vm0, %v9934_v38 }
 0x154   : > { %v2261_v49 = vor.u32 %v2260_v33, %v2257_v8  ;;  %v7140_v8 = vld [vmem:[%s9834_s1 + $0x188] sm:$0xff]  }
 0x156   : > { %6475 = vmatmul.mubr.bf16.gmra.mxu0 %v9995_v56 }
 0x157   : > { %6478 = vmatprep.mubr.msk.bf16.mxu0 %vm7230_vm0, %v9934_v38 }
 0x15a   : > { %6395 = vmatmul.mubr.bf16.gmra.mxu1 %v8227_v57  ;;  %v8488_v57 = vld [vmem:[#allocation2 + $0x18] sm:$0xf] }
 0x15b   : > { %6398 = vmatprep.mubr.msk.bf16.mxu1 %vm7230_vm0, %v9934_v38  ;;  %v5413_v17 = vcombine.low %v8488_v57, %v8490_v44  ;;  %v5454_v7 = vcombine.low %v8472_v40, %v8488_v57  ;;  %v7121_v57 = vld [vmem:[%s9834_s1 + $0x1a0] sm:$0xff]  }
 0x15d   : > { %v2246_v62 = vshrl.u32 %v5413_v17, 16  ;;  %v2249_v25 = vshll.u32 %v5413_v17, 16 }
 0x15e   : > { %6479 = vmatmul.mubr.bf16.gmra.mxu0 %v9998_v35  ;;  %v5415_v35 = vcombine.low %v8539_v45, %v8541_v37 }
 0x15f   : > { %6482 = vmatprep.mubr.msk.bf16.mxu0 %vm7230_vm0, %v9934_v38  ;;  %v2248_v60 = vrot.slane %v2246_v62, 3  ;;  %v2251_v36 = vrot.slane %v2249_v25, 4  ;;  %v7132_v25 = vld [vmem:[%s9834_s1 + $0x150] sm:$0xff]  }
 0x160   : > { %v8481_v46 = vpop.f32.mrf.mxu0  ;;  %v2264_v12 = vshrl.u32 %v5415_v35, 16  ;;  %v2267_v50 = vshll.u32 %v5415_v35, 16  ;;  %v5456_v35 = vcombine.low %v8508_v29, %v8539_v45  ;;  %v7146_v29 = vld [vmem:[%s9834_s1 + $0x180] sm:$0xff]  }
 0x161   : > { %v2252_v6 = vor.u32 %v2251_v36, %v2248_v60 }
 0x162   : > { %6399 = vmatmul.mubr.bf16.gmra.mxu1 %v9999_v2  ;;  %v6256_v13 = vpop.f32.mrf.mxu0 }
 0x163   : > { %6402 = vmatprep.mubr.msk.bf16.mxu1 %vm7230_vm0, %v9934_v38  ;;  %v2253_v15 = vsel %vm1117_vm12, %v2243_v54, %v2252_v6  ;;  %v2262_v17 = vsel %vm1117_vm12, %v2252_v6, %v2261_v49 }
 0x164   : > { %v8486_v26 = vpop.f32.mrf.mxu0 }
 0x166   : > { %6483 = vmatmul.mubr.bf16.gmra.mxu0 %v10002_v61  ;;  %v6257_v63 = vpop.f32.mrf.mxu0 }
 0x167   : > { %6486 = vmatprep.mubr.msk.bf16.mxu0 %vm7230_vm0, %v9934_v38 }
 0x168   : > { %v8499_v11 = vpop.f32.mrf.mxu1 }
 0x16a   : > { %6403 = vmatmul.mubr.bf16.gmra.mxu1 %v8280_v47  ;;  %v6292_v27 = vpop.f32.mrf.mxu1  ;;  %v2235_v47 = vor.u32 %v2234_v52, %v2231_v23  ;;  %v2266_v23 = vrot.slane %v2264_v12, 3  ;;  %v2269_v52 = vrot.slane %v2267_v50, 4 }
 0x16b   : > { %6506 = vmatprep.mubr.msk.bf16.mxu1 %vm7230_vm0, %v9934_v38  ;;  %v5416_v27 = vcombine.low %v8576_v53, %v8578_v20 }
 0x16c   : > { %v8504_v3 = vpop.f32.mrf.mxu1  ;;  %v8510_v10 = vpop.f32.mrf.mxu0  ;;  %v2244_v24 = vsel %vm1117_vm12, %v2235_v47, %v2243_v54 }
 0x16d   : > { %v2273_v60 = vshrl.u32 %v5416_v27, 16  ;;  %v2276_v36 = vshll.u32 %v5416_v27, 16 }
 0x16e   : > { %6487 = vmatmul.mubr.bf16.gmra.mxu0 %v5386_v55  ;;  %v6293_v14 = vpop.f32.mrf.mxu1  ;;  %v6260_v42 = vpop.f32.mrf.mxu0 }
 0x16f   : > { %6590 = vmatprep.mubr.msk.bf16.mxu0 %vm7230_vm0, %v9934_v38  ;;  %v5455_v42 = vcombine.low %v8490_v44, %v8506_v4  ;;  %v7134_v4 = vld [vmem:[%s9834_s1 + $0x190] sm:$0xff]   ;;  %v2275_v32 = vrot.slane %v2273_v60, 3  ;;  %v2278_v16 = vrot.slane %v2276_v36, 4  ;;  %v8681_v36 = vld [vmem:[#allocation2 + $0x48] sm:$0xf] }
 0x170   : > { %v8523_v9 = vpop.f32.mrf.mxu1  ;;  %v8525_v48 = vpop.f32.mrf.mxu0 }
 0x172   : > { %6507 = vmatmul.mubr.bf16.vlgmr.msra.gmra.mxu1 %v2244_v24  ;;  %v6296_v55 = vpop.f32.mrf.mxu1  ;;  %v6261_v28 = vpop.f32.mrf.mxu0  ;;  %v2270_v24 = vor.u32 %v2269_v52, %v2266_v23 }
 0x173   : > { %6659 = vmatpush3.bf16.msra.mxu1 %v7101_v19  ;;  %6510 = vmatprep.mubr.msk.bf16.mxu1 %vm7230_vm0, %v9934_v38  ;;  %v7128_v19 = vld [vmem:[%s9834_s1 + $0x198] sm:$0xff]   ;;  %v7139_v28 = vld [vmem:[%s9834_s1 + $0x148] sm:$0xff]  }
 0x174   : > { %6660 = vmatprep.subr.bf16.mxu1 %v9934_v38  ;;  %v8537_v31 = vpop.f32.mrf.mxu1  ;;  %v8615_v55 = vld [vmem:[#allocation2 + $0x3c] sm:$0xf]  ;;  %v2271_v6 = vsel %vm1117_vm12, %v2261_v49, %v2270_v24  ;;  %v8652_v49 = vld [vmem:[#allocation2 + $0x44] sm:$0xf] }
 0x175   : > { %v8543_v59 = vpop.f32.mrf.mxu0 }
 0x176   : > { %6591 = vmatmul.mubr.bf16.vlgmr.msra.gmra.mxu0 %v5453_v41  ;;  %v6297_v21 = vpop.f32.mrf.mxu1 }
 0x177   : > { %6661 = vmatpush3.bf16.msra.mxu1 %v7107_v58  ;;  %6743 = vmatpush3.bf16.msra.mxu0 %v7103_v22  ;;  %v6264_v56 = vpop.f32.mrf.mxu0  ;;  %v8613_v58 = vld [vmem:[#allocation2 + $0x38] sm:$0xf] }
 0x178   : > { %6594 = vmatprep.mubr.msk.bf16.mxu0 %vm7230_vm0, %v9934_v38  ;;  %6744 = vmatprep.subr.bf16.mxu0 %v9934_v38  ;;  %v8558_v5 = vpop.f32.mrf.mxu1  ;;  %v7145_v56 = vld [vmem:[%s9834_s1 + $0x140] sm:$0xff]  }
 0x179   : > { %6662 = vmatprep.subr.bf16.mxu1 %v9934_v38  ;;  %v8560_v39 = vpop.f32.mrf.mxu0 }
 0x17a   : > { %6511 = vmatmul.mubr.bf16.gmra.mxu1 %v2253_v15  ;;  %v6300_v2 = vpop.f32.mrf.mxu1 }
 0x17b   : > { %6514 = vmatprep.mubr.msk.bf16.mxu1 %vm7230_vm0, %v9934_v38  ;;  %6663 = vmatpush3.bf16.msra.mxu1 %v7114_v1  ;;  %v6265_v13 = vpop.f32.mrf.mxu0  ;;  %v5417_v1 = vcombine.low %v8613_v58, %v8615_v55 }
 0x17c   : > { %6745 = vmatpush3.bf16.msra.mxu0 %v7109_v43  ;;  %6664 = vmatprep.subr.bf16.mxu1 %v9934_v38  ;;  %v8574_v61 = vpop.f32.mrf.mxu1 }
 0x17d   : > { %6746 = vmatprep.subr.bf16.mxu0 %v9934_v38  ;;  %v8580_v63 = vpop.f32.mrf.mxu0  ;;  %v2282_v2 = vshrl.u32 %v5417_v1, 16 }
 0x17e   : > { %6595 = vmatmul.mubr.bf16.gmra.mxu0 %v5454_v7  ;;  %v6301_v40 = vpop.f32.mrf.mxu1  ;;  %v8650_v7 = vld [vmem:[#allocation2 + $0x40] sm:$0xf] }
 0x17f   : > { %6665 = vmatpush3.bf16.msra.mxu1 %v7120_v34  ;;  %6598 = vmatprep.mubr.msk.bf16.mxu0 %vm7230_vm0, %v9934_v38  ;;  %v6268_v30 = vpop.f32.mrf.mxu0  ;;  %v2279_v34 = vor.u32 %v2278_v16, %v2275_v32  ;;  %v2284_v40 = vrot.slane %v2282_v2, 3 }
 0x180   : > { %6747 = vmatpush3.bf16.msra.mxu0 %v7115_v0  ;;  %6666 = vmatprep.subr.bf16.mxu1 %v9934_v38  ;;  %v2285_v0 = vshll.u32 %v5417_v1, 16  ;;  %v5418_v30 = vcombine.low %v8650_v7, %v8652_v49 }
 0x181   : > { %6748 = vmatprep.subr.bf16.mxu0 %v9934_v38  ;;  %v8595_v54 = vpop.f32.mrf.mxu1  ;;  %v8597_v62 = vpop.f32.mrf.mxu0 }
 0x182   : > { %6515 = vmatmul.mubr.bf16.gmra.mxu1 %v2262_v17 }
 0x183   : > { %6518 = vmatprep.mubr.msk.bf16.mxu1 %vm7230_vm0, %v9934_v38  ;;  %6667 = vmatpush3.bf16.msra.mxu1 %v7126_v18  ;;  %v6304_v47 = vpop.f32.mrf.mxu1  ;;  %v6269_v14 = vpop.f32.mrf.mxu0  ;;  %v2280_v18 = vsel %vm1117_vm12, %v2270_v24, %v2279_v34 }
 0x184   : > { %6749 = vmatpush3.bf16.msra.mxu0 %v7121_v57  ;;  %6668 = vmatprep.subr.bf16.mxu1 %v9934_v38  ;;  %v2287_v57 = vrot.slane %v2285_v0, 4  ;;  %v2294_v14 = vshll.u32 %v5418_v30, 16 }
 0x185   : > { %6750 = vmatprep.subr.bf16.mxu0 %v9934_v38  ;;  %v8611_v51 = vpop.f32.mrf.mxu1 }
 0x186   : > { %v8617_v22 = vpop.f32.mrf.mxu0  ;;  %6599 = vmatmul.mubr.bf16.gmra.mxu0 %v5455_v42  ;;  %v2288_v47 = vor.u32 %v2287_v57, %v2284_v40 }
 0x187   : > { %6669 = vmatpush3.bf16.msra.mxu1 %v7132_v25  ;;  %v6305_v44 = vpop.f32.mrf.mxu1  ;;  %6602 = vmatprep.mubr.msk.bf16.mxu0 %vm7230_vm0, %v9934_v38  ;;  %v5457_v25 = vcombine.low %v8541_v37, %v8576_v53 }
 0x188   : > { %6751 = vmatpush3.bf16.msra.mxu0 %v7128_v19  ;;  %v6272_v41 = vpop.f32.mrf.mxu0  ;;  %6670 = vmatprep.subr.bf16.mxu1 %v9934_v38  ;;  %v2291_v19 = vshrl.u32 %v5418_v30, 16  ;;  %v2289_v37 = vsel %vm1117_vm12, %v2279_v34, %v2288_v47 }
 0x189   : > { %6752 = vmatprep.subr.bf16.mxu0 %v9934_v38  ;;  %v8632_v21 = vpop.f32.mrf.mxu1 }
 0x18a   : > { %6519 = vmatmul.mubr.bf16.gmra.mxu1 %v2271_v6  ;;  %v8634_v43 = vpop.f32.mrf.mxu0  ;;  %v2293_v53 = vrot.slane %v2291_v19, 3 }
 0x18b   : > { %6522 = vmatprep.mubr.msk.bf16.mxu1 %vm7230_vm0, %v9934_v38  ;;  %6671 = vmatpush3.bf16.msra.mxu1 %v7139_v28  ;;  %v6308_v15 = vpop.f32.mrf.mxu1  ;;  %v8683_v28 = vld [vmem:[#allocation2 + $0x4c] sm:$0xf] }
 0x18c   : > { %6753 = vmatpush3.bf16.msra.mxu0 %v7134_v4  ;;  %6672 = vmatprep.subr.bf16.mxu1 %v9934_v38  ;;  %v6273_v33 = vpop.f32.mrf.mxu0  ;;  %v2296_v4 = vrot.slane %v2294_v14, 4  ;;  %v5419_v32 = vcombine.low %v8681_v36, %v8683_v28  ;;  %v8719_v14 = vld [vmem:[#allocation2 + $0x58] sm:$0xf] }
 0x18d   : > { %6754 = vmatprep.subr.bf16.mxu0 %v9934_v38  ;;  %v8648_v13 = vpop.f32.mrf.mxu1  ;;  %v8698_v33 = vld [vmem:[#allocation2 + $0x50] sm:$0xf] }
 0x18e   : > { %v8654_v12 = vpop.f32.mrf.mxu0  ;;  %6603 = vmatmul.mubr.bf16.gmra.mxu0 %v5456_v35  ;;  %v2297_v15 = vor.u32 %v2296_v4, %v2293_v53  ;;  %v8700_v35 = vld [vmem:[#allocation2 + $0x54] sm:$0xf]  ;;  %v2300_v2 = vshrl.u32 %v5419_v32, 16  ;;  %v2303_v0 = vshll.u32 %v5419_v32, 16 }
 0x18f   : > { %6673 = vmatpush3.bf16.msra.mxu1 %v7145_v56  ;;  %v6309_v50 = vpop.f32.mrf.mxu1  ;;  %6606 = vmatprep.mubr.msk.bf16.mxu0 %vm7230_vm0, %v9934_v38  ;;  %v5458_v56 = vcombine.low %v8578_v20, %v8613_v58  ;;  %v5420_v20 = vcombine.low %v8698_v33, %v8700_v35 }
 0x190   : > { %6755 = vmatpush3.bf16.msra.mxu0 %v7140_v8  ;;  %v6276_v45 = vpop.f32.mrf.mxu0  ;;  %6826 = vmatprep.subr.bf16.mxu1 %v9934_v38  ;;  %v2302_v40 = vrot.slane %v2300_v2, 3  ;;  %v2305_v57 = vrot.slane %v2303_v0, 4 }
 0x191   : > { %6756 = vmatprep.subr.bf16.mxu0 %v9934_v38  ;;  %v8666_v17 = vpop.f32.mrf.mxu1  ;;  %v2298_v45 = vsel %vm1117_vm12, %v2288_v47, %v2297_v15  ;;  %v2312_v47 = vshll.u32 %v5420_v20, 16 }
 0x192   : > { %6523 = vmatmul.mubr.bf16.gmra.mxu1 %v2280_v18  ;;  %v8668_v23 = vpop.f32.mrf.mxu0 }
 0x193   : > { %6526 = vmatprep.mubr.msk.bf16.mxu1 %vm7230_vm0, %v9934_v38  ;;  %v6312_v52 = vpop.f32.mrf.mxu1 }
 0x194   : > { %6757 = vmatpush3.bf16.msra.mxu0 %v7146_v29  ;;  %v6277_v27 = vpop.f32.mrf.mxu0 }
 0x195   : > { %6910 = vmatprep.subr.bf16.mxu0 %v9934_v38  ;;  %v8675_v42 = vpop.f32.mrf.mxu1  ;;  %v5459_v27 = vcombine.low %v8615_v55, %v8650_v7  ;;  %v2314_v7 = vrot.slane %v2312_v47, 4 }
 0x196   : > { %v8677_v24 = vpop.f32.mrf.mxu0  ;;  %6607 = vmatmul.mubr.bf16.gmra.mxu0 %v5457_v25  ;;  %v2309_v25 = vshrl.u32 %v5420_v20, 16 }
 0x197   : > { %v6313_v60 = vpop.f32.mrf.mxu1  ;;  %6610 = vmatprep.mubr.msk.bf16.mxu0 %vm7230_vm0, %v9934_v38 }
 0x198   : > { %v6280_v44 = vpop.f32.mrf.mxu0  ;;  %v8721_v60 = vld [vmem:[#allocation2 + $0x5c] sm:$0xf]  ;;  %v2311_v55 = vrot.slane %v2309_v25, 3 }
 0x19a   : > { %v8686_v41 = vpop.f32.mrf.mxu1  ;;  %6527 = vmatmul.mubr.bf16.gmra.mxu1 %v2289_v37  ;;  %v8688_v6 = vpop.f32.mrf.mxu0  ;;  %v2306_v37 = vor.u32 %v2305_v57, %v2302_v40  ;;  %v8737_v57 = vld [vmem:[#allocation2 + $0x60] sm:$0xf] }
 0x19b   : > { %6530 = vmatprep.mubr.msk.bf16.mxu1 %vm7230_vm0, %v9934_v38 }
 0x19c   : > { %v6316_v16 = vpop.f32.mrf.mxu1  ;;  %v6281_v1 = vpop.f32.mrf.mxu0  ;;  %v2307_v32 = vsel %vm1117_vm12, %v2297_v15, %v2306_v37 }
 0x19d   : > { %v5421_v16 = vcombine.low %v8719_v14, %v8721_v60 }
 0x19e   : > { %v8696_v8 = vpop.f32.mrf.mxu1  ;;  %v8702_v34 = vpop.f32.mrf.mxu0  ;;  %6611 = vmatmul.mubr.bf16.gmra.mxu0 %v5458_v56 }
 0x19f   : > { %6614 = vmatprep.mubr.msk.bf16.mxu0 %vm7230_vm0, %v9934_v38  ;;  %v2321_v15 = vshll.u32 %v5421_v16, 16 }
 0x1a0   : > { %v6317_v50 = vpop.f32.mrf.mxu1  ;;  %v6284_v29 = vpop.f32.mrf.mxu0 }
 0x1a1   : > { %v5460_v50 = vcombine.low %v8652_v49, %v8681_v36  ;;  %v2315_v29 = vor.u32 %v2314_v7, %v2311_v55 }
 0x1a2   : > { %v8709_v58 = vpop.f32.mrf.mxu1  ;;  %6531 = vmatmul.mubr.bf16.gmra.mxu1 %v2298_v45  ;;  %v8711_v18 = vpop.f32.mrf.mxu0  ;;  %v2318_v45 = vshrl.u32 %v5421_v16, 16 }
 0x1a3   : > { %6534 = vmatprep.mubr.msk.bf16.mxu1 %vm7230_vm0, %v9934_v38  ;;  %v2316_v49 = vsel %vm1117_vm12, %v2306_v37, %v2315_v29  ;;  %v5461_v37 = vcombine.low %v8683_v28, %v8698_v33 }
 0x1a4   : > { %v6320_v30 = vpop.f32.mrf.mxu1  ;;  %v6285_v52 = vpop.f32.mrf.mxu0  ;;  %v2320_v36 = vrot.slane %v2318_v45, 3 }
 0x1a5   : > { %v8739_v30 = vld [vmem:[#allocation2 + $0x64] sm:$0xf] }
 0x1a6   : > { %v8717_v19 = vpop.f32.mrf.mxu1  ;;  %v8723_v44 = vpop.f32.mrf.mxu0  ;;  %6615 = vmatmul.mubr.bf16.gmra.mxu0 %v5459_v27 }
 0x1a7   : > { %6618 = vmatprep.mubr.msk.bf16.mxu0 %vm7230_vm0, %v9934_v38 }
 0x1a8   : > { %v6321_v53 = vpop.f32.mrf.mxu1  ;;  %v6288_v4 = vpop.f32.mrf.mxu0 }
 0x1a9   : > { %v2323_v53 = vrot.slane %v2321_v15, 4 }
 0x1aa   : > { %v1651_v1 = vpop.f32.mrf.mxu1  ;;  %6535 = vmatmul.mubr.bf16.gmra.mxu1 %v2307_v32  ;;  %v8730_v56 = vpop.f32.mrf.mxu0 }
 0x1ab   : > { %6538 = vmatprep.mubr.msk.bf16.mxu1 %vm7230_vm0, %v9934_v38  ;;  %v1652_v20 = vadd.f32 %v1651_v1, %v8481_v46  ;;  %v5422_v46 = vcombine.low %v8737_v57, %v8739_v30 }
 0x1ac   : > { %v6340_v2 = vpop.f32.mrf.mxu1  ;;  %v6289_v0 = vpop.f32.mrf.mxu0 }
 0x1ad   : > { %v2324_v2 = vor.u32 %v2323_v53, %v2320_v36  ;;  %v2327_v0 = vshrl.u32 %v5422_v46, 16 }
 0x1ae   : > { %v1654_v40 = vpop.f32.mrf.mxu1  ;;  %v1919_v52 = vpop.f32.mrf.mxu0  ;;  %6619 = vmatmul.mubr.bf16.gmra.mxu0 %v5460_v50  ;;  %v2330_v50 = vshll.u32 %v5422_v46, 16 }
 0x1af   : > { %v8741_v27 = vadd.f32 %v1919_v52, %v1652_v20  ;;  %6622 = vmatprep.mubr.msk.bf16.mxu0 %vm7230_vm0, %v9934_v38  ;;  %v1655_v4 = vadd.f32 %v1654_v40, %v8486_v26  ;;  %v8756_v26 = vld [vmem:[#allocation2 + $0x68] sm:$0xf]  ;;  %v8758_v20 = vld [vmem:[#allocation2 + $0x6c] sm:$0xf]  ;;  %v2325_v28 = vsel %vm1117_vm12, %v2315_v29, %v2324_v2  ;;  %v2329_v33 = vrot.slane %v2327_v0, 3 }
 0x1b0   : > { %v6341_v25 = vpop.f32.mrf.mxu1  ;;  %v6424_v47 = vpop.f32.mrf.mxu0  ;;  %v5462_v29 = vcombine.low %v8700_v35, %v8719_v14 }
 0x1b2   : > { %v1659_v32 = vpop.f32.mrf.mxu1  ;;  %6539 = vmatmul.mubr.bf16.gmra.mxu1 %v2316_v49  ;;  %v1922_v55 = vpop.f32.mrf.mxu0  ;;  %v2332_v49 = vrot.slane %v2330_v50, 4 }
 0x1b3   : > { %6542 = vmatprep.mubr.msk.bf16.mxu1 %vm7230_vm0, %v9934_v38  ;;  %v8751_v7 = vadd.f32 %v1922_v55, %v1655_v4  ;;  %v1660_v45 = vadd.f32 %v1659_v32, %v8510_v10  ;;  %v5423_v10 = vcombine.low %v8756_v26, %v8758_v20 }
 0x1b4   : > { %v6344_v16 = vpop.f32.mrf.mxu1  ;;  %v6425_v1 = vpop.f32.mrf.mxu0 }
 0x1b5   : > { %v2333_v16 = vor.u32 %v2332_v49, %v2329_v33  ;;  %v2336_v1 = vshrl.u32 %v5423_v10, 16 }
 0x1b6   : > { %v1662_v15 = vpop.f32.mrf.mxu1  ;;  %v1927_v40 = vpop.f32.mrf.mxu0  ;;  %6623 = vmatmul.mubr.bf16.gmra.mxu0 %v5461_v37  ;;  %v2339_v37 = vshll.u32 %v5423_v10, 16 }
 0x1b7   : > { %v8760_v52 = vadd.f32 %v1927_v40, %v1660_v45  ;;  %6626 = vmatprep.mubr.msk.bf16.mxu0 %vm7230_vm0, %v9934_v38  ;;  %v1663_v36 = vadd.f32 %v1662_v15, %v8525_v48  ;;  %v8775_v48 = vld [vmem:[#allocation2 + $0x70] sm:$0xf]  ;;  %v8777_v45 = vld [vmem:[#allocation2 + $0x74] sm:$0xf]  ;;  %v2334_v35 = vsel %vm1117_vm12, %v2324_v2, %v2333_v16  ;;  %v2338_v14 = vrot.slane %v2336_v1, 3 }
 0x1b8   : > { %v6345_v25 = vpop.f32.mrf.mxu1  ;;  %v6428_v47 = vpop.f32.mrf.mxu0  ;;  %v5463_v2 = vcombine.low %v8721_v60, %v8737_v57 }
 0x1ba   : > { %v1667_v53 = vpop.f32.mrf.mxu1  ;;  %6543 = vmatmul.mubr.bf16.gmra.mxu1 %v2325_v28  ;;  %v1930_v46 = vpop.f32.mrf.mxu0  ;;  %v2341_v28 = vrot.slane %v2339_v37, 4 }
 0x1bb   : > { %6546 = vmatprep.mubr.msk.bf16.mxu1 %vm7230_vm0, %v9934_v38  ;;  %v8770_v4 = vadd.f32 %v1930_v46, %v1663_v36  ;;  %v1668_v0 = vadd.f32 %v1667_v53, %v8543_v59  ;;  %v5424_v59 = vcombine.low %v8775_v48, %v8777_v45 }
 0x1bc   : > { %v6348_v32 = vpop.f32.mrf.mxu1  ;;  %v6429_v55 = vpop.f32.mrf.mxu0 }
 0x1bd   : > { %v2342_v32 = vor.u32 %v2341_v28, %v2338_v14  ;;  %v2345_v55 = vshrl.u32 %v5424_v59, 16 }
 0x1be   : > { %v1670_v50 = vpop.f32.mrf.mxu1  ;;  %v1935_v15 = vpop.f32.mrf.mxu0  ;;  %6627 = vmatmul.mubr.bf16.gmra.mxu0 %v5462_v29  ;;  %v2348_v29 = vshll.u32 %v5424_v59, 16 }
 0x1bf   : > { %v8779_v40 = vadd.f32 %v1935_v15, %v1668_v0  ;;  %6630 = vmatprep.mubr.msk.bf16.mxu0 %vm7230_vm0, %v9934_v38  ;;  %v1671_v33 = vadd.f32 %v1670_v50, %v8560_v39  ;;  %v8794_v39 = vld [vmem:[#allocation2 + $0x78] sm:$0xf]  ;;  %v8796_v0 = vld [vmem:[#allocation2 + $0x7c] sm:$0xf]  ;;  %v2343_v60 = vsel %vm1117_vm12, %v2333_v16, %v2342_v32  ;;  %v2347_v57 = vrot.slane %v2345_v55, 3 }
 0x1c0   : > { %v6349_v25 = vpop.f32.mrf.mxu1  ;;  %v6432_v47 = vpop.f32.mrf.mxu0  ;;  %v5464_v16 = vcombine.low %v8739_v30, %v8756_v26 }
 0x1c2   : > { %v1675_v49 = vpop.f32.mrf.mxu1  ;;  %6547 = vmatmul.mubr.bf16.gmra.mxu1 %v2334_v35  ;;  %v1938_v10 = vpop.f32.mrf.mxu0  ;;  %v2350_v35 = vrot.slane %v2348_v29, 4 }
 0x1c3   : > { %6550 = vmatprep.mubr.msk.bf16.mxu1 %vm7230_vm0, %v9934_v38  ;;  %v8789_v36 = vadd.f32 %v1938_v10, %v1671_v33  ;;  %v1676_v1 = vadd.f32 %v1675_v49, %v8580_v63  ;;  %v5425_v63 = vcombine.low %v8794_v39, %v8796_v0 }
 0x1c4   : > { %v6352_v53 = vpop.f32.mrf.mxu1  ;;  %v6433_v46 = vpop.f32.mrf.mxu0 }
 0x1c5   : > { %v2351_v53 = vor.u32 %v2350_v35, %v2347_v57  ;;  %v2354_v46 = vshrl.u32 %v5425_v63, 16 }
 0x1c6   : > { %v1678_v37 = vpop.f32.mrf.mxu1  ;;  %v1943_v50 = vpop.f32.mrf.mxu0  ;;  %6631 = vmatmul.mubr.bf16.gmra.mxu0 %v5463_v2  ;;  %v2357_v2 = vshll.u32 %v5425_v63, 16 }
 0x1c7   : > { %v8798_v15 = vadd.f32 %v1943_v50, %v1676_v1  ;;  %6634 = vmatprep.mubr.msk.bf16.mxu0 %vm7230_vm0, %v9934_v38  ;;  %v1679_v14 = vadd.f32 %v1678_v37, %v8597_v62  ;;  %v8813_v62 = vld [vmem:[#allocation2 + $0x80] sm:$0xf]  ;;  %v8815_v1 = vld [vmem:[#allocation2 + $0x84] sm:$0xf]  ;;  %v2352_v30 = vsel %vm1117_vm12, %v2342_v32, %v2351_v53  ;;  %v2356_v26 = vrot.slane %v2354_v46, 3 }
 0x1c8   : > { %v6353_v25 = vpop.f32.mrf.mxu1  ;;  %v6436_v47 = vpop.f32.mrf.mxu0  ;;  %v5465_v32 = vcombine.low %v8758_v20, %v8775_v48 }
 0x1ca   : > { %v1683_v28 = vpop.f32.mrf.mxu1  ;;  %6551 = vmatmul.mubr.bf16.gmra.mxu1 %v2343_v60  ;;  %v1946_v59 = vpop.f32.mrf.mxu0  ;;  %v2359_v60 = vrot.slane %v2357_v2, 4 }
 0x1cb   : > { %6554 = vmatprep.mubr.msk.bf16.mxu1 %vm7230_vm0, %v9934_v38  ;;  %v8808_v33 = vadd.f32 %v1946_v59, %v1679_v14  ;;  %v1684_v55 = vadd.f32 %v1683_v28, %v8617_v22  ;;  %v5426_v22 = vcombine.low %v8813_v62, %v8815_v1 }
 0x1cc   : > { %v6356_v49 = vpop.f32.mrf.mxu1  ;;  %v6437_v10 = vpop.f32.mrf.mxu0 }
 0x1cd   : > { %v2360_v49 = vor.u32 %v2359_v60, %v2356_v26  ;;  %v2363_v10 = vshrl.u32 %v5426_v22, 16 }
 0x1ce   : > { %v1686_v29 = vpop.f32.mrf.mxu1  ;;  %v1951_v37 = vpop.f32.mrf.mxu0  ;;  %6635 = vmatmul.mubr.bf16.gmra.mxu0 %v5464_v16  ;;  %v2366_v16 = vshll.u32 %v5426_v22, 16 }
 0x1cf   : > { %v8817_v50 = vadd.f32 %v1951_v37, %v1684_v55  ;;  %6638 = vmatprep.mubr.msk.bf16.mxu0 %vm7230_vm0, %v9934_v38  ;;  %v1687_v57 = vadd.f32 %v1686_v29, %v8634_v43  ;;  %v8832_v43 = vld [vmem:[#allocation2 + $0x88] sm:$0xf]  ;;  %v8834_v55 = vld [vmem:[#allocation2 + $0x8c] sm:$0xf]  ;;  %v2361_v20 = vsel %vm1117_vm12, %v2351_v53, %v2360_v49  ;;  %v2365_v48 = vrot.slane %v2363_v10, 3 }
 0x1d0   : > { %v6357_v25 = vpop.f32.mrf.mxu1  ;;  %v6440_v47 = vpop.f32.mrf.mxu0  ;;  %v5466_v53 = vcombine.low %v8777_v45, %v8794_v39 }
 0x1d2   : > { %v1691_v35 = vpop.f32.mrf.mxu1  ;;  %6555 = vmatmul.mubr.bf16.gmra.mxu1 %v2352_v30  ;;  %v1954_v63 = vpop.f32.mrf.mxu0  ;;  %v2368_v30 = vrot.slane %v2366_v16, 4 }
 0x1d3   : > { %6558 = vmatprep.mubr.msk.bf16.mxu1 %vm7230_vm0, %v9934_v38  ;;  %v8827_v14 = vadd.f32 %v1954_v63, %v1687_v57  ;;  %v1692_v46 = vadd.f32 %v1691_v35, %v8654_v12  ;;  %v5427_v12 = vcombine.low %v8832_v43, %v8834_v55 }
 0x1d4   : > { %v6360_v28 = vpop.f32.mrf.mxu1  ;;  %v6441_v59 = vpop.f32.mrf.mxu0 }
 0x1d5   : > { %v2369_v28 = vor.u32 %v2368_v30, %v2365_v48  ;;  %v2372_v59 = vshrl.u32 %v5427_v12, 16 }
 0x1d6   : > { %v1694_v2 = vpop.f32.mrf.mxu1  ;;  %v1959_v29 = vpop.f32.mrf.mxu0  ;;  %6639 = vmatmul.mubr.bf16.gmra.mxu0 %v5465_v32  ;;  %v2375_v32 = vshll.u32 %v5427_v12, 16 }
 0x1d7   : > { %v8836_v37 = vadd.f32 %v1959_v29, %v1692_v46  ;;  %6642 = vmatprep.mubr.msk.bf16.mxu0 %vm7230_vm0, %v9934_v38  ;;  %v1695_v26 = vadd.f32 %v1694_v2, %v8668_v23  ;;  %v8851_v23 = vld [vmem:[#allocation2 + $0x90] sm:$0xf]  ;;  %v2374_v45 = vrot.slane %v2372_v59, 3 }
 0x1d8   : > { %v6361_v25 = vpop.f32.mrf.mxu1  ;;  %v6444_v47 = vpop.f32.mrf.mxu0  ;;  %v2377_v39 = vrot.slane %v2375_v32, 4 }
 0x1d9   : > { %v2370_v47 = vsel %vm1117_vm12, %v2360_v49, %v2369_v28  ;;  %v5467_v49 = vcombine.low %v8796_v0, %v8813_v62 }
 0x1da   : > { %v1699_v60 = vpop.f32.mrf.mxu1  ;;  %6559 = vmatmul.mubr.bf16.gmra.mxu1 %v2361_v20  ;;  %v1962_v22 = vpop.f32.mrf.mxu0  ;;  %v5428_v20 = vcombine.low %v8851_v23, %v8851_v23 }
 0x1db   : > { %6562 = vmatprep.mubr.msk.bf16.mxu1 %vm7230_vm0, %v9934_v38  ;;  %v8846_v57 = vadd.f32 %v1962_v22, %v1695_v26  ;;  %v1700_v10 = vadd.f32 %v1699_v60, %v8677_v24  ;;  %v2378_v22 = vor.u32 %v2377_v39, %v2374_v45 }
 0x1dc   : > { %v6364_v35 = vpop.f32.mrf.mxu1  ;;  %v6445_v63 = vpop.f32.mrf.mxu0 }
 0x1dd   : > { %v2381_v35 = vshrl.u32 %v5428_v20, 16  ;;  %v2384_v63 = vshll.u32 %v5428_v20, 16 }
 0x1de   : > { %v1702_v16 = vpop.f32.mrf.mxu1  ;;  %v1967_v46 = vpop.f32.mrf.mxu0  ;;  %6643 = vmatmul.mubr.bf16.gmra.mxu0 %v5466_v53 }
 0x1df   : > { %v8853_v2 = vadd.f32 %v1967_v46, %v1700_v10  ;;  %6646 = vmatprep.mubr.msk.bf16.mxu0 %vm7230_vm0, %v9934_v38  ;;  %v1703_v24 = vadd.f32 %v1702_v16, %v8688_v6  ;;  %v2379_v46 = vsel %vm1117_vm12, %v2369_v28, %v2378_v22  ;;  %v7151_v28 = vld [vmem:[#allocation2 + $0x14] sm:$0xff]  }
 0x1e0   : > { %v6365_v29 = vpop.f32.mrf.mxu1  ;;  %v6448_v25 = vpop.f32.mrf.mxu0 }
 0x1e1   : > { %v2383_v29 = vrot.slane %v2381_v35, 3  ;;  %v2386_v25 = vrot.slane %v2384_v63, 4 }
 0x1e2   : > { %v1707_v48 = vpop.f32.mrf.mxu1  ;;  %6563 = vmatmul.mubr.bf16.gmra.mxu1 %v2370_v47  ;;  %v1970_v30 = vpop.f32.mrf.mxu0 }
 0x1e3   : > { %6566 = vmatprep.mubr.msk.bf16.mxu1 %vm7230_vm0, %v9934_v38  ;;  %v8863_v12 = vadd.f32 %v1970_v30, %v1703_v24  ;;  %v1708_v53 = vadd.f32 %v1707_v48, %v8702_v34  ;;  %v7150_v34 = vld [vmem:[#allocation2 + $0xc] sm:$0xff]   ;;  %v5468_v24 = vcombine.low %v8815_v1, %v8832_v43  ;;  %v2387_v48 = vor.u32 %v2386_v25, %v2383_v29 }
 0x1e4   : > { %v6368_v26 = vpop.f32.mrf.mxu1  ;;  %v6449_v60 = vpop.f32.mrf.mxu0  ;;  %v5469_v29 = vcombine.low %v8834_v55, %v8851_v23  ;;  %v3101_v25 = vshrl.u32 %v7150_v34, 16 }
 0x1e5   : > { %v3103_v60 = vshll.u32 %v7150_v34, 16 }
 0x1e6   : > { %v1710_v59 = vpop.f32.mrf.mxu1  ;;  %v1975_v6 = vpop.f32.mrf.mxu0  ;;  %6647 = vmatmul.mubr.bf16.gmra.mxu0 %v5467_v49 }
 0x1e7   : > { %v8868_v32 = vadd.f32 %v1975_v6, %v1708_v53  ;;  %6650 = vmatprep.mubr.msk.bf16.mxu0 %vm7230_vm0, %v9934_v38  ;;  %v1711_v0 = vadd.f32 %v1710_v59, %v8711_v18  ;;  %v2388_v53 = vsel %vm1117_vm12, %v2378_v22, %v2387_v48  ;;  %v3108_v59 = vshll.u32 %v7151_v28, 16  ;;  %v8893_v22 = vld [vmem:[#allocation2 + $0x1c] sm:$0xff]  }
 0x1e8   : > { %v6369_v10 = vpop.f32.mrf.mxu1  ;;  %v6452_v16 = vpop.f32.mrf.mxu0 }
 0x1ea   : > { %v1715_v62 = vpop.f32.mrf.mxu1  ;;  %6567 = vmatmul.mubr.bf16.gmra.mxu1 %v2379_v46  ;;  %v1978_v47 = vpop.f32.mrf.mxu0 }
 0x1eb   : > { %6570 = vmatprep.mubr.msk.bf16.mxu1 %vm7230_vm0, %v9934_v38  ;;  %v8876_v45 = vadd.f32 %v1978_v47, %v1711_v0  ;;  %v1716_v30 = vadd.f32 %v1715_v62, %v8723_v44  ;;  %v3105_v44 = vrot.slane %v3103_v60, 1  ;;  %v3110_v0 = vrot.slane %v3108_v59, 1 }
 0x1ec   : > { %v6372_v39 = vpop.f32.mrf.mxu1  ;;  %v6453_v20 = vpop.f32.mrf.mxu0  ;;  %v3112_v59 = vshrl.u32 %v7151_v28, 16 }
 0x1ed   : > { %v3106_v39 = vor.u32 %v3105_v44, %v3101_v25  ;;  %v7152_v20 = vld [vmem:[%s9834_s1 + $0x1f8] sm:$0xff]  }
 0x1ee   : > { %v1718_v26 = vpop.f32.mrf.mxu1  ;;  %v1983_v18 = vpop.f32.mrf.mxu0  ;;  %6651 = vmatmul.mubr.bf16.gmra.mxu0 %v5468_v24 }
 0x1ef   : > { %v8881_v49 = vadd.f32 %v1983_v18, %v1716_v30  ;;  %6654 = vmatprep.mubr.msk.bf16.mxu0 %vm7230_vm0, %v9934_v38  ;;  %v1719_v1 = vadd.f32 %v1718_v26, %v8730_v56  ;;  %v3111_v23 = vsel %vm3099_vm7, %v3106_v39, %v3110_v0  ;;  %v7158_v18 = vld [vmem:[%s9834_s1 + $0x1f0] sm:$0xff]  }
 0x1f0   : > { %v6373_v35 = vpop.f32.mrf.mxu1  ;;  %v6456_v63 = vpop.f32.mrf.mxu0 }
 0x1f1   : > { %v7154_v63 = vld [vmem:[%s9834_s1 + $0x238] sm:$0xff]  }
 0x1f2   : > { %v1723_v43 = vpop.f32.mrf.mxu1  ;;  %6571 = vmatmul.mubr.bf16.gmra.mxu1 %v2388_v53  ;;  %v1986_v6 = vpop.f32.mrf.mxu0  ;;  %v7153_v53 = vld [vmem:[#allocation2 + $0x14] sm:$0xff]  }
 0x1f3   : > { %6674 = vmatprep.mubr.msk.bf16.mxu1 %vm7230_vm0, %v9934_v38  ;;  %v8889_v10 = vadd.f32 %v1986_v6, %v1719_v1  ;;  %v1724_v56 = vadd.f32 %v1723_v43, %v8499_v11  ;;  %v3116_v11 = vshll.u32 %v8893_v22, 16  ;;  %v8917_v43 = vld [vmem:[#allocation2 + $0x24] sm:$0xff]  }
 0x1f4   : > { %v6376_v16 = vpop.f32.mrf.mxu1  ;;  %v6457_v46 = vpop.f32.mrf.mxu0 }
 0x1f5   : > { %v3118_v1 = vrot.slane %v3116_v11, 1  ;;  %v3114_v46 = vor.u32 %v3112_v59, %v3110_v0  ;;  %v3124_v0 = vshll.u32 %v8917_v43, 16  ;;  %v7166_v11 = vld [vmem:[%s9834_s1 + $0x228] sm:$0xff]   ;;  %v7177_v59 = vld [vmem:[%s9834_s1 + $0x1d8] sm:$0xff]  }
 0x1f6   : > { %v1726_v62 = vpop.f32.mrf.mxu1  ;;  %v1991_v47 = vpop.f32.mrf.mxu0  ;;  %6655 = vmatmul.mubr.bf16.gmra.mxu0 %v5469_v29  ;;  %v7165_v29 = vld [vmem:[%s9834_s1 + $0x1e8] sm:$0xff]  }
 0x1f7   : > { %v8899_v24 = vadd.f32 %v1991_v47, %v1724_v56  ;;  %6758 = vmatprep.mubr.msk.bf16.mxu0 %vm7230_vm0, %v9934_v38  ;;  %v1727_v34 = vadd.f32 %v1726_v62, %v8504_v3  ;;  %v3119_v62 = vsel %vm3099_vm7, %v3114_v46, %v3118_v1 }
 0x1f8   : > { %v6377_v48 = vpop.f32.mrf.mxu1  ;;  %v6460_v55 = vpop.f32.mrf.mxu0 }
 0x1f9   : > { %v7171_v48 = vld [vmem:[%s9834_s1 + $0x1e0] sm:$0xff]  }
 0x1fa   : > { %v1731_v30 = vpop.f32.mrf.mxu1  ;;  %6675 = vmatmul.mubr.bf16.vlgmr.msra.gmra.mxu1 %v3111_v23  ;;  %v1994_v26 = vpop.f32.mrf.mxu0 }
 0x1fb   : > { %6827 = vmatpush3.bf16.msra.mxu1 %v7152_v20  ;;  %6678 = vmatprep.mubr.msk.bf16.mxu1 %vm7230_vm0, %v9934_v38  ;;  %v8911_v60 = vadd.f32 %v1994_v26, %v1727_v34  ;;  %v1732_v6 = vadd.f32 %v1731_v30, %v8523_v9  ;;  %v7160_v9 = vld [vmem:[%s9834_s1 + $0x230] sm:$0xff]   ;;  %v7156_v34 = vld [vmem:[#allocation2 + $0x1c] sm:$0xff]   ;;  %v3120_v30 = vshrl.u32 %v8893_v22, 16  ;;  %v3126_v26 = vrot.slane %v3124_v0, 1 }
 0x1fc   : > { %v6380_v35 = vpop.f32.mrf.mxu1  ;;  %6828 = vmatprep.subr.bf16.mxu1 %v9934_v38  ;;  %v6461_v3 = vpop.f32.mrf.mxu0  ;;  %v7179_v0 = vld [vmem:[%s9834_s1 + $0x218] sm:$0xff]  }
 0x1fe   : > { %v1734_v44 = vpop.f32.mrf.mxu1  ;;  %v1999_v16 = vpop.f32.mrf.mxu0  ;;  %6759 = vmatmul.mubr.bf16.vlgmr.msra.gmra.mxu0 %v7153_v53  ;;  %v3122_v53 = vor.u32 %v3120_v30, %v3118_v1  ;;  %v7190_v30 = vld [vmem:[%s9834_s1 + $0x1c8] sm:$0xff]  }
 0x1ff   : > { %6829 = vmatpush3.bf16.msra.mxu1 %v7158_v18  ;;  %v8923_v25 = vadd.f32 %v1999_v16, %v1732_v6  ;;  %6911 = vmatpush3.bf16.msra.mxu0 %v7154_v63  ;;  %v1735_v47 = vadd.f32 %v1734_v44, %v8537_v31  ;;  %v8947_v18 = vld [vmem:[#allocation2 + $0x2c] sm:$0xff]  }
 0x200   : > { %v6381_v56 = vpop.f32.mrf.mxu1  ;;  %6762 = vmatprep.mubr.msk.bf16.mxu0 %vm7230_vm0, %v9934_v38  ;;  %v6464_v28 = vpop.f32.mrf.mxu0  ;;  %6912 = vmatprep.subr.bf16.mxu0 %v9934_v38  ;;  %v3127_v16 = vsel %vm3099_vm7, %v3122_v53, %v3126_v26  ;;  %v3132_v1 = vshll.u32 %v8947_v18, 16 }
 0x201   : > { %6830 = vmatprep.subr.bf16.mxu1 %v9934_v38 }
 0x202   : > { %v1739_v39 = vpop.f32.mrf.mxu1  ;;  %6679 = vmatmul.mubr.bf16.gmra.mxu1 %v3119_v62  ;;  %v2002_v20 = vpop.f32.mrf.mxu0 }
 0x203   : > { %6682 = vmatprep.mubr.msk.bf16.mxu1 %vm7230_vm0, %v9934_v38  ;;  %6831 = vmatpush3.bf16.msra.mxu1 %v7165_v29  ;;  %v8940_v55 = vadd.f32 %v2002_v20, %v1735_v47  ;;  %v1740_v35 = vadd.f32 %v1739_v39, %v8558_v5  ;;  %v7172_v5 = vld [vmem:[%s9834_s1 + $0x220] sm:$0xff]   ;;  %v3128_v39 = vshrl.u32 %v8917_v43, 16  ;;  %v3134_v20 = vrot.slane %v3132_v1, 1  ;;  %v7191_v1 = vld [vmem:[%s9834_s1 + $0x208] sm:$0xff]  }
 0x204   : > { %v6384_v23 = vpop.f32.mrf.mxu1  ;;  %6913 = vmatpush3.bf16.msra.mxu0 %v7160_v9  ;;  %6832 = vmatprep.subr.bf16.mxu1 %v9934_v38  ;;  %v6465_v31 = vpop.f32.mrf.mxu0  ;;  %v7183_v9 = vld [vmem:[%s9834_s1 + $0x1d0] sm:$0xff]   ;;  %v7159_v47 = vld [vmem:[#allocation2 + $0x24] sm:$0xff]  }
 0x205   : > { %6914 = vmatprep.subr.bf16.mxu0 %v9934_v38 }
 0x206   : > { %v1742_v63 = vpop.f32.mrf.mxu1  ;;  %v2007_v3 = vpop.f32.mrf.mxu0  ;;  %6763 = vmatmul.mubr.bf16.gmra.mxu0 %v7156_v34  ;;  %v3130_v34 = vor.u32 %v3128_v39, %v3126_v26 }
 0x207   : > { %6833 = vmatpush3.bf16.msra.mxu1 %v7171_v48  ;;  %v8954_v6 = vadd.f32 %v2007_v3, %v1740_v35  ;;  %6766 = vmatprep.mubr.msk.bf16.mxu0 %vm7230_vm0, %v9934_v38  ;;  %v1743_v46 = vadd.f32 %v1742_v63, %v8574_v61  ;;  %v8978_v48 = vld [vmem:[#allocation2 + $0x34] sm:$0xff]  }
 0x208   : > { %v6385_v44 = vpop.f32.mrf.mxu1  ;;  %6915 = vmatpush3.bf16.msra.mxu0 %v7166_v11  ;;  %v6468_v22 = vpop.f32.mrf.mxu0  ;;  %6834 = vmatprep.subr.bf16.mxu1 %v9934_v38  ;;  %v3135_v3 = vsel %vm3099_vm7, %v3130_v34, %v3134_v20  ;;  %v3140_v26 = vshll.u32 %v8978_v48, 16 }
 0x209   : > { %6916 = vmatprep.subr.bf16.mxu0 %v9934_v38 }
 0x20a   : > { %v1747_v29 = vpop.f32.mrf.mxu1  ;;  %6683 = vmatmul.mubr.bf16.gmra.mxu1 %v3127_v16  ;;  %v2010_v56 = vpop.f32.mrf.mxu0 }
 0x20b   : > { %6686 = vmatprep.mubr.msk.bf16.mxu1 %vm7230_vm0, %v9934_v38  ;;  %6835 = vmatpush3.bf16.msra.mxu1 %v7177_v59  ;;  %v8971_v28 = vadd.f32 %v2010_v56, %v1743_v46  ;;  %v1748_v23 = vadd.f32 %v1747_v29, %v8595_v54  ;;  %v7185_v54 = vld [vmem:[%s9834_s1 + $0x210] sm:$0xff]   ;;  %v3136_v29 = vshrl.u32 %v8947_v18, 16  ;;  %v3142_v56 = vrot.slane %v3140_v26, 1  ;;  %v7197_v18 = vld [vmem:[%s9834_s1 + $0x200] sm:$0xff]  }
 0x20c   : > { %v6388_v62 = vpop.f32.mrf.mxu1  ;;  %6917 = vmatpush3.bf16.msra.mxu0 %v7172_v5  ;;  %6836 = vmatprep.subr.bf16.mxu1 %v9934_v38  ;;  %v6469_v61 = vpop.f32.mrf.mxu0  ;;  %v7196_v5 = vld [vmem:[%s9834_s1 + $0x1c0] sm:$0xff]   ;;  %v7162_v46 = vld [vmem:[#allocation2 + $0x2c] sm:$0xff]   ;;  %v3144_v26 = vshrl.u32 %v8978_v48, 16 }
 0x20d   : > { %6918 = vmatprep.subr.bf16.mxu0 %v9934_v38 }
 0x20e   : > { %v1750_v11 = vpop.f32.mrf.mxu1  ;;  %v2015_v31 = vpop.f32.mrf.mxu0  ;;  %6767 = vmatmul.mubr.bf16.gmra.mxu0 %v7159_v47  ;;  %v3138_v47 = vor.u32 %v3136_v29, %v3134_v20 }
 0x20f   : > { %6837 = vmatpush3.bf16.msra.mxu1 %v7183_v9  ;;  %v8985_v35 = vadd.f32 %v2015_v31, %v1748_v23  ;;  %6770 = vmatprep.mubr.msk.bf16.mxu0 %vm7230_vm0, %v9934_v38  ;;  %v1751_v53 = vadd.f32 %v1750_v11, %v8611_v51  ;;  %v7167_v9 = vld [vmem:[#allocation2 + $0x3c] sm:$0xff]  }
 0x210   : > { %v6389_v63 = vpop.f32.mrf.mxu1  ;;  %6919 = vmatpush3.bf16.msra.mxu0 %v7179_v0  ;;  %v6472_v43 = vpop.f32.mrf.mxu0  ;;  %6838 = vmatprep.subr.bf16.mxu1 %v9934_v38  ;;  %v3143_v31 = vsel %vm3099_vm7, %v3138_v47, %v3142_v56 }
 0x211   : > { %6920 = vmatprep.subr.bf16.mxu0 %v9934_v38 }
 0x212   : > { %v1755_v59 = vpop.f32.mrf.mxu1  ;;  %6687 = vmatmul.mubr.bf16.gmra.mxu1 %v3135_v3  ;;  %v2018_v44 = vpop.f32.mrf.mxu0  ;;  %v7164_v3 = vld [vmem:[#allocation2 + $0x34] sm:$0xff]  }
 0x213   : > { %6690 = vmatprep.mubr.msk.bf16.mxu1 %vm7230_vm0, %v9934_v38  ;;  %6839 = vmatpush3.bf16.msra.mxu1 %v7190_v30  ;;  %v9002_v22 = vadd.f32 %v2018_v44, %v1751_v53  ;;  %v1756_v62 = vadd.f32 %v1755_v59, %v8632_v21  ;;  %v3148_v21 = vshll.u32 %v7167_v9, 16 }
 0x214   : > { %v6392_v16 = vpop.f32.mrf.mxu1  ;;  %6921 = vmatpush3.bf16.msra.mxu0 %v7185_v54  ;;  %6840 = vmatprep.subr.bf16.mxu1 %v9934_v38  ;;  %v6473_v51 = vpop.f32.mrf.mxu0 }
 0x215   : > { %6922 = vmatprep.subr.bf16.mxu0 %v9934_v38  ;;  %v3150_v53 = vrot.slane %v3148_v21, 1  ;;  %v7169_v16 = vld [vmem:[#allocation2 + $0x44] sm:$0xff]  }
 0x216   : > { %v1758_v0 = vpop.f32.mrf.mxu1  ;;  %v2023_v61 = vpop.f32.mrf.mxu0  ;;  %6771 = vmatmul.mubr.bf16.gmra.mxu0 %v7162_v46 }
 0x217   : > { %6841 = vmatpush3.bf16.msra.mxu1 %v7196_v5  ;;  %v9011_v39 = vadd.f32 %v2023_v61, %v1756_v62  ;;  %6774 = vmatprep.mubr.msk.bf16.mxu0 %vm7230_vm0, %v9934_v38  ;;  %v1759_v20 = vadd.f32 %v1758_v0, %v8648_v13  ;;  %v3146_v13 = vor.u32 %v3144_v26, %v3142_v56  ;;  %v3156_v56 = vshll.u32 %v7169_v16, 16 }
 0x218   : > { %v6393_v23 = vpop.f32.mrf.mxu1  ;;  %6923 = vmatpush3.bf16.msra.mxu0 %v7191_v1  ;;  %v6476_v11 = vpop.f32.mrf.mxu0 }
 0x219   : > { %6924 = vmatprep.subr.bf16.mxu0 %v9934_v38  ;;  %v3151_v29 = vsel %vm3099_vm7, %v3146_v13, %v3150_v53 }
 0x21a   : > { %v1763_v34 = vpop.f32.mrf.mxu1  ;;  %6691 = vmatmul.mubr.bf16.gmra.mxu1 %v3143_v31  ;;  %v2026_v30 = vpop.f32.mrf.mxu0 }
 0x21b   : > { %6694 = vmatprep.mubr.msk.bf16.mxu1 %vm7230_vm0, %v9934_v38  ;;  %v9023_v63 = vadd.f32 %v2026_v30, %v1759_v20  ;;  %v1764_v59 = vadd.f32 %v1763_v34, %v8666_v17  ;;  %v3152_v17 = vshrl.u32 %v7167_v9, 16  ;;  %v7173_v34 = vld [vmem:[#allocation2 + $0x4c] sm:$0xff]  }
 0x21c   : > { %v6396_v54 = vpop.f32.mrf.mxu1  ;;  %6925 = vmatpush3.bf16.msra.mxu0 %v7197_v18  ;;  %v6477_v43 = vpop.f32.mrf.mxu0  ;;  %v7168_v18 = vld [vmem:[#allocation2 + $0x3c] sm:$0xff]  }
 0x21d   : > { %v3154_v11 = vor.u32 %v3152_v17, %v3150_v53 }
 0x21e   : > { %v1766_v44 = vpop.f32.mrf.mxu1  ;;  %v2031_v5 = vpop.f32.mrf.mxu0  ;;  %6775 = vmatmul.mubr.bf16.gmra.mxu0 %v7164_v3 }
 0x21f   : > { %v9027_v1 = vadd.f32 %v2031_v5, %v1764_v59  ;;  %6778 = vmatprep.mubr.msk.bf16.mxu0 %vm7230_vm0, %v9934_v38  ;;  %v1767_v62 = vadd.f32 %v1766_v44, %v8675_v42  ;;  %v3158_v42 = vrot.slane %v3156_v56, 1  ;;  %v3164_v59 = vshll.u32 %v7173_v34, 16 }
 0x220   : > { %v6397_v51 = vpop.f32.mrf.mxu1  ;;  %v6480_v46 = vpop.f32.mrf.mxu0 }
 0x221   : > { %v3159_v43 = vsel %vm3099_vm7, %v3154_v11, %v3158_v42  ;;  %v7170_v51 = vld [vmem:[#allocation2 + $0x44] sm:$0xff]  }
 0x222   : > { %v1771_v48 = vpop.f32.mrf.mxu1  ;;  %6695 = vmatmul.mubr.bf16.gmra.mxu1 %v3151_v29  ;;  %v2034_v0 = vpop.f32.mrf.mxu0  ;;  %v7175_v29 = vld [vmem:[#allocation2 + $0x54] sm:$0xff]  }
 0x223   : > { %6698 = vmatprep.mubr.msk.bf16.mxu1 %vm7230_vm0, %v9934_v38  ;;  %v9035_v61 = vadd.f32 %v2034_v0, %v1767_v62  ;;  %v1772_v31 = vadd.f32 %v1771_v48, %v8686_v41  ;;  %v3160_v41 = vshrl.u32 %v7169_v16, 16 }
 0x224   : > { %v6400_v47 = vpop.f32.mrf.mxu1  ;;  %v6481_v23 = vpop.f32.mrf.mxu0 }
 0x225   : > { %v3162_v46 = vor.u32 %v3160_v41, %v3158_v42  ;;  %v3172_v23 = vshll.u32 %v7175_v29, 16 }
 0x226   : > { %v1774_v21 = vpop.f32.mrf.mxu1  ;;  %v2039_v20 = vpop.f32.mrf.mxu0  ;;  %6779 = vmatmul.mubr.bf16.gmra.mxu0 %v7168_v18 }
 0x227   : > { %v9038_v30 = vadd.f32 %v2039_v20, %v1772_v31  ;;  %6782 = vmatprep.mubr.msk.bf16.mxu0 %vm7230_vm0, %v9934_v38  ;;  %v1775_v3 = vadd.f32 %v1774_v21, %v8696_v8  ;;  %v3166_v8 = vrot.slane %v3164_v59, 1 }
 0x228   : > { %v6401_v54 = vpop.f32.mrf.mxu1  ;;  %v6484_v9 = vpop.f32.mrf.mxu0 }
 0x229   : > { %v3167_v47 = vsel %vm3099_vm7, %v3162_v46, %v3166_v8  ;;  %v7174_v54 = vld [vmem:[#allocation2 + $0x4c] sm:$0xff]   ;;  %v3168_v9 = vshrl.u32 %v7173_v34, 16 }
 0x22a   : > { %v1779_v26 = vpop.f32.mrf.mxu1  ;;  %6699 = vmatmul.mubr.bf16.gmra.mxu1 %v3159_v43  ;;  %v2042_v53 = vpop.f32.mrf.mxu0  ;;  %v3174_v43 = vrot.slane %v3172_v23, 1 }
 0x22b   : > { %6702 = vmatprep.mubr.msk.bf16.mxu1 %vm7230_vm0, %v9934_v38  ;;  %v9046_v44 = vadd.f32 %v2042_v53, %v1775_v3  ;;  %v1780_v62 = vadd.f32 %v1779_v26, %v8709_v58  ;;  %v7178_v3 = vld [vmem:[#allocation2 + $0x5c] sm:$0xff]   ;;  %v3170_v41 = vor.u32 %v3168_v9, %v3166_v8  ;;  %v7176_v8 = vld [vmem:[#allocation2 + $0x54] sm:$0xff]  }
 0x22c   : > { %v6404_v5 = vpop.f32.mrf.mxu1  ;;  %v6485_v13 = vpop.f32.mrf.mxu0 }
 0x22d   : > { %v3175_v13 = vsel %vm3099_vm7, %v3170_v41, %v3174_v43  ;;  %v3184_v41 = vshrl.u32 %v7178_v3, 16 }
 0x22e   : > { %v1782_v48 = vpop.f32.mrf.mxu1  ;;  %v2047_v0 = vpop.f32.mrf.mxu0  ;;  %6783 = vmatmul.mubr.bf16.gmra.mxu0 %v7170_v51  ;;  %v3180_v51 = vshll.u32 %v7178_v3, 16 }
 0x22f   : > { %v9049_v17 = vadd.f32 %v2047_v0, %v1780_v62  ;;  %6786 = vmatprep.mubr.msk.bf16.mxu0 %vm7230_vm0, %v9934_v38  ;;  %v1783_v18 = vadd.f32 %v1782_v48, %v8717_v19 }
 0x230   : > { %v6405_v56 = vpop.f32.mrf.mxu1  ;;  %v6488_v16 = vpop.f32.mrf.mxu0 }
 0x231   : > { %v3176_v56 = vshrl.u32 %v7175_v29, 16  ;;  %v3182_v16 = vrot.slane %v3180_v51, 1 }
 0x232   : > { %v2488_v11 = vpop.f32.mrf.mxu1  ;;  %6703 = vmatmul.mubr.bf16.gmra.mxu1 %v3167_v47  ;;  %v2050_v31 = vpop.f32.mrf.mxu0  ;;  %v7181_v47 = vld [vmem:[#allocation2 + $0x64] sm:$0xff]  }
 0x233   : > { %v2623_v58 = vadd.f32 %v2488_v11, %v8741_v27  ;;  %6706 = vmatprep.mubr.msk.bf16.mxu1 %vm7230_vm0, %v9934_v38  ;;  %v9058_v21 = vadd.f32 %v2050_v31, %v1783_v18  ;;  %v3178_v31 = vor.u32 %v3176_v56, %v3174_v43 }
 0x234   : > { %v6508_v20 = vpop.f32.mrf.mxu1  ;;  %v6489_v42 = vpop.f32.mrf.mxu0 }
 0x235   : > { %v3183_v42 = vsel %vm3099_vm7, %v3178_v31, %v3182_v16  ;;  %v3192_v31 = vshrl.u32 %v7181_v47, 16 }
 0x236   : > { %v2491_v26 = vpop.f32.mrf.mxu1  ;;  %v2790_v19 = vpop.f32.mrf.mxu0  ;;  %6787 = vmatmul.mubr.bf16.gmra.mxu0 %v7174_v54  ;;  %v3188_v54 = vshll.u32 %v7181_v47, 16 }
 0x237   : > { %v2624_v53 = vadd.f32 %v2491_v26, %v8751_v7  ;;  %v9061_v59 = vadd.f32 %v2790_v19, %v2623_v58  ;;  %6790 = vmatprep.mubr.msk.bf16.mxu0 %vm7230_vm0, %v9934_v38  ;;  %v7180_v19 = vld [vmem:[#allocation2 + $0x5c] sm:$0xff]  }
 0x238   : > { %v6509_v27 = vpop.f32.mrf.mxu1  ;;  %v6592_v5 = vpop.f32.mrf.mxu0 }
 0x239   : > { %v3190_v27 = vrot.slane %v3188_v54, 1  ;;  %v7184_v5 = vld [vmem:[#allocation2 + $0x6c] sm:$0xff]  }
 0x23a   : > { %v2496_v46 = vpop.f32.mrf.mxu1  ;;  %6707 = vmatmul.mubr.bf16.gmra.mxu1 %v3175_v13  ;;  %v2793_v62 = vpop.f32.mrf.mxu0 }
 0x23b   : > { %v2625_v34 = vadd.f32 %v2496_v46, %v8760_v52  ;;  %6710 = vmatprep.mubr.msk.bf16.mxu1 %vm7230_vm0, %v9934_v38  ;;  %v9069_v7 = vadd.f32 %v2793_v62, %v2624_v53 }
 0x23c   : > { %v6512_v48 = vpop.f32.mrf.mxu1  ;;  %v6593_v0 = vpop.f32.mrf.mxu0 }
 0x23e   : > { %v2499_v23 = vpop.f32.mrf.mxu1  ;;  %v2798_v11 = vpop.f32.mrf.mxu0  ;;  %6791 = vmatmul.mubr.bf16.gmra.mxu0 %v7176_v8  ;;  %v3196_v8 = vshll.u32 %v7184_v5, 16 }
 0x23f   : > { %v2626_v18 = vadd.f32 %v2499_v23, %v8770_v4  ;;  %v9072_v58 = vadd.f32 %v2798_v11, %v2625_v34  ;;  %6794 = vmatprep.mubr.msk.bf16.mxu0 %vm7230_vm0, %v9934_v38  ;;  %v3186_v34 = vor.u32 %v3184_v41, %v3182_v16  ;;  %v7182_v11 = vld [vmem:[#allocation2 + $0x64] sm:$0xff]  }
 0x240   : > { %v6513_v52 = vpop.f32.mrf.mxu1  ;;  %v6596_v20 = vpop.f32.mrf.mxu0 }
 0x241   : > { %v3191_v0 = vsel %vm3099_vm7, %v3186_v34, %v3190_v27  ;;  %v3198_v52 = vrot.slane %v3196_v8, 1  ;;  %v7187_v20 = vld [vmem:[#allocation2 + $0x74] sm:$0xff]   ;;  %v3200_v34 = vshrl.u32 %v7184_v5, 16 }
 0x242   : > { %v2504_v9 = vpop.f32.mrf.mxu1  ;;  %6711 = vmatmul.mubr.bf16.gmra.mxu1 %v3183_v42  ;;  %v2801_v26 = vpop.f32.mrf.mxu0 }
 0x243   : > { %v2627_v29 = vadd.f32 %v2504_v9, %v8779_v40  ;;  %6714 = vmatprep.mubr.msk.bf16.mxu1 %vm7230_vm0, %v9934_v38  ;;  %v9080_v4 = vadd.f32 %v2801_v26, %v2626_v18 }
 0x244   : > { %v6516_v43 = vpop.f32.mrf.mxu1  ;;  %v6597_v53 = vpop.f32.mrf.mxu0 }
 0x246   : > { %v2507_v13 = vpop.f32.mrf.mxu1  ;;  %v2806_v46 = vpop.f32.mrf.mxu0  ;;  %6795 = vmatmul.mubr.bf16.gmra.mxu0 %v7180_v19  ;;  %v3204_v19 = vshll.u32 %v7187_v20, 16 }
 0x247   : > { %v2628_v51 = vadd.f32 %v2507_v13, %v8789_v36  ;;  %v9083_v62 = vadd.f32 %v2806_v46, %v2627_v29  ;;  %6798 = vmatprep.mubr.msk.bf16.mxu0 %vm7230_vm0, %v9934_v38  ;;  %v3194_v29 = vor.u32 %v3192_v31, %v3190_v27  ;;  %v7186_v46 = vld [vmem:[#allocation2 + $0x6c] sm:$0xff]  }
 0x248   : > { %v6517_v40 = vpop.f32.mrf.mxu1  ;;  %v6600_v48 = vpop.f32.mrf.mxu0 }
 0x249   : > { %v3199_v53 = vsel %vm3099_vm7, %v3194_v29, %v3198_v52  ;;  %v3206_v40 = vrot.slane %v3204_v19, 1  ;;  %v7189_v48 = vld [vmem:[#allocation2 + $0x7c] sm:$0xff]   ;;  %v3208_v29 = vshrl.u32 %v7187_v20, 16 }
 0x24a   : > { %v2512_v56 = vpop.f32.mrf.mxu1  ;;  %6715 = vmatmul.mubr.bf16.gmra.mxu1 %v3191_v0  ;;  %v2809_v23 = vpop.f32.mrf.mxu0 }
 0x24b   : > { %v2629_v3 = vadd.f32 %v2512_v56, %v8798_v15  ;;  %6718 = vmatprep.mubr.msk.bf16.mxu1 %vm7230_vm0, %v9934_v38  ;;  %v9091_v36 = vadd.f32 %v2809_v23, %v2628_v51 }
 0x24c   : > { %v6520_v16 = vpop.f32.mrf.mxu1  ;;  %v6601_v18 = vpop.f32.mrf.mxu0 }
 0x24e   : > { %v2515_v42 = vpop.f32.mrf.mxu1  ;;  %v2814_v9 = vpop.f32.mrf.mxu0  ;;  %6799 = vmatmul.mubr.bf16.gmra.mxu0 %v7182_v11  ;;  %v3212_v11 = vshll.u32 %v7189_v48, 16 }
 0x24f   : > { %v2630_v54 = vadd.f32 %v2515_v42, %v8808_v33  ;;  %v9094_v26 = vadd.f32 %v2814_v9, %v2629_v3  ;;  %6802 = vmatprep.mubr.msk.bf16.mxu0 %vm7230_vm0, %v9934_v38  ;;  %v3202_v3 = vor.u32 %v3200_v34, %v3198_v52  ;;  %v7188_v9 = vld [vmem:[#allocation2 + $0x74] sm:$0xff]  }
 0x250   : > { %v6521_v15 = vpop.f32.mrf.mxu1  ;;  %v6604_v43 = vpop.f32.mrf.mxu0 }
 0x251   : > { %v3207_v18 = vsel %vm3099_vm7, %v3202_v3, %v3206_v40  ;;  %v3214_v15 = vrot.slane %v3212_v11, 1  ;;  %v7193_v43 = vld [vmem:[#allocation2 + $0x84] sm:$0xff]   ;;  %v3216_v3 = vshrl.u32 %v7189_v48, 16 }
 0x252   : > { %v2520_v41 = vpop.f32.mrf.mxu1  ;;  %6719 = vmatmul.mubr.bf16.gmra.mxu1 %v3199_v53  ;;  %v2817_v13 = vpop.f32.mrf.mxu0 }
 0x253   : > { %v2631_v47 = vadd.f32 %v2520_v41, %v8817_v50  ;;  %6722 = vmatprep.mubr.msk.bf16.mxu1 %vm7230_vm0, %v9934_v38  ;;  %v9102_v33 = vadd.f32 %v2817_v13, %v2630_v54 }
 0x254   : > { %v6524_v27 = vpop.f32.mrf.mxu1  ;;  %v6605_v51 = vpop.f32.mrf.mxu0 }
 0x256   : > { %v2523_v0 = vpop.f32.mrf.mxu1  ;;  %v2822_v56 = vpop.f32.mrf.mxu0  ;;  %6803 = vmatmul.mubr.bf16.gmra.mxu0 %v7186_v46  ;;  %v3220_v46 = vshll.u32 %v7193_v43, 16 }
 0x257   : > { %v2632_v8 = vadd.f32 %v2523_v0, %v8827_v14  ;;  %v9105_v23 = vadd.f32 %v2822_v56, %v2631_v47  ;;  %6806 = vmatprep.mubr.msk.bf16.mxu0 %vm7230_vm0, %v9934_v38  ;;  %v3210_v47 = vor.u32 %v3208_v29, %v3206_v40  ;;  %v7192_v56 = vld [vmem:[#allocation2 + $0x7c] sm:$0xff]  }
 0x258   : > { %v6525_v50 = vpop.f32.mrf.mxu1  ;;  %v6608_v16 = vpop.f32.mrf.mxu0 }
 0x259   : > { %v3215_v51 = vsel %vm3099_vm7, %v3210_v47, %v3214_v15  ;;  %v3222_v50 = vrot.slane %v3220_v46, 1  ;;  %v7194_v47 = vld [vmem:[#allocation2 + $0x84] sm:$0xff]  }
 0x25a   : > { %v2528_v31 = vpop.f32.mrf.mxu1  ;;  %6723 = vmatmul.mubr.bf16.gmra.mxu1 %v3207_v18  ;;  %v2825_v42 = vpop.f32.mrf.mxu0 }
 0x25b   : > { %v2633_v5 = vadd.f32 %v2528_v31, %v8836_v37  ;;  %6726 = vmatprep.mubr.msk.bf16.mxu1 %vm7230_vm0, %v9934_v38  ;;  %v9113_v14 = vadd.f32 %v2825_v42, %v2632_v8  ;;  %v3218_v31 = vor.u32 %v3216_v3, %v3214_v15 }
 0x25c   : > { %v6528_v52 = vpop.f32.mrf.mxu1  ;;  %v6609_v54 = vpop.f32.mrf.mxu0 }
 0x25d   : > { %v3223_v54 = vsel %vm3099_vm7, %v3218_v31, %v3222_v50 }
 0x25e   : > { %v2531_v53 = vpop.f32.mrf.mxu1  ;;  %v2830_v41 = vpop.f32.mrf.mxu0  ;;  %6807 = vmatmul.mubr.bf16.gmra.mxu0 %v7188_v9 }
 0x25f   : > { %v2634_v19 = vadd.f32 %v2531_v53, %v8846_v57  ;;  %v9116_v13 = vadd.f32 %v2830_v41, %v2633_v5  ;;  %6810 = vmatprep.mubr.msk.bf16.mxu0 %vm7230_vm0, %v9934_v38  ;;  %v7195_v5 = vld [vmem:[#allocation2 + $0x8c] sm:$0xff]  }
 0x260   : > { %v6529_v37 = vpop.f32.mrf.mxu1  ;;  %v6612_v27 = vpop.f32.mrf.mxu0  ;;  %v3228_v15 = vshll.u32 %v7195_v5, 16 }
 0x261   : > { %v7199_v27 = vld [vmem:[#allocation2 + $0x94] ss:$0 sps:$4 sm:$0x11]  }
 0x262   : > { %v2536_v34 = vpop.f32.mrf.mxu1  ;;  %6727 = vmatmul.mubr.bf16.gmra.mxu1 %v3215_v51  ;;  %v2833_v0 = vpop.f32.mrf.mxu0 }
 0x263   : > { %v2635_v20 = vadd.f32 %v2536_v34, %v8853_v2  ;;  %6730 = vmatprep.mubr.msk.bf16.mxu1 %vm7230_vm0, %v9934_v38  ;;  %v9124_v57 = vadd.f32 %v2833_v0, %v2634_v19 }
 0x264   : > { %v6532_v40 = vpop.f32.mrf.mxu1  ;;  %v6613_v8 = vpop.f32.mrf.mxu0 }
 0x266   : > { %v2539_v16 = vpop.f32.mrf.mxu1  ;;  %v2838_v11 = vpop.f32.mrf.mxu0  ;;  %6811 = vmatmul.mubr.bf16.gmra.mxu0 %v7192_v56  ;;  %v3236_v56 = vshll.u32 %v7199_v27, 16 }
 0x267   : > { %v2636_v18 = vadd.f32 %v2539_v16, %v8863_v12  ;;  %v9127_v42 = vadd.f32 %v2838_v11, %v2635_v20  ;;  %6814 = vmatprep.mubr.msk.bf16.mxu0 %vm7230_vm0, %v9934_v38  ;;  %v3224_v12 = vshrl.u32 %v7193_v43, 16  ;;  %v3230_v20 = vrot.slane %v3228_v15, 1  ;;  %v9142_v43 = vld [vmem:[#allocation2 + $0x18] sm:$0xf] }
 0x268   : > { %v6533_v2 = vpop.f32.mrf.mxu1  ;;  %v6616_v52 = vpop.f32.mrf.mxu0 }
 0x269   : > { %v3226_v37 = vor.u32 %v3224_v12, %v3222_v50  ;;  %v3912_v50 = vld [vmem:[#allocation2 + $0x14] sm:$0xf] }
 0x26a   : > { %v2544_v9 = vpop.f32.mrf.mxu1  ;;  %6731 = vmatmul.mubr.bf16.gmra.mxu1 %v3223_v54  ;;  %v2841_v29 = vpop.f32.mrf.mxu0  ;;  %v5577_v11 = vcombine.low %v3912_v50, %v9142_v43  ;;  %v7198_v54 = vld [vmem:[#allocation2 + $0x8c] sm:$0xff]   ;;  %v9165_v50 = vld [vmem:[#allocation2 + $0x24] sm:$0xff]  }
 0x26b   : > { %v2637_v48 = vadd.f32 %v2544_v9, %v8868_v32  ;;  %6734 = vmatprep.mubr.msk.bf16.mxu1 %vm7230_vm0, %v9934_v38  ;;  %v9135_v53 = vadd.f32 %v2841_v29, %v2636_v18  ;;  %v3231_v8 = vsel %vm3099_vm7, %v3226_v37, %v3230_v20  ;;  %v3232_v18 = vshrl.u32 %v7195_v5, 16  ;;  %v9151_v29 = vld [vmem:[#allocation2 + $0x1c] sm:$0xff]  }
 0x26c   : > { %v6536_v19 = vpop.f32.mrf.mxu1  ;;  %v6617_v41 = vpop.f32.mrf.mxu0  ;;  %v4060_v27 = vshll.u32 %v9151_v29, 16 }
 0x26d   : > { %v3234_v9 = vor.u32 %v3232_v18, %v3230_v20  ;;  %v4055_v19 = vshll.u32 %v5577_v11, 16 }
 0x26e   : > { %v2547_v51 = vpop.f32.mrf.mxu1  ;;  %v2846_v34 = vpop.f32.mrf.mxu0  ;;  %6815 = vmatmul.mubr.bf16.gmra.mxu0 %v7194_v47 }
 0x26f   : > { %v2638_v46 = vadd.f32 %v2547_v51, %v8876_v45  ;;  %v9138_v32 = vadd.f32 %v2846_v34, %v2637_v48  ;;  %6818 = vmatprep.mubr.msk.bf16.mxu0 %vm7230_vm0, %v9934_v38  ;;  %v3238_v48 = vrot.slane %v3236_v56, 1  ;;  %v4057_v20 = vrot.slane %v4055_v19, 1 }
 0x270   : > { %v6537_v0 = vpop.f32.mrf.mxu1  ;;  %v6620_v40 = vpop.f32.mrf.mxu0  ;;  %v4053_v56 = vshrl.u32 %v5577_v11, 16 }
 0x271   : > { %v3239_v37 = vsel %vm3099_vm7, %v3234_v9, %v3238_v48 }
 0x272   : > { %v2552_v3 = vpop.f32.mrf.mxu1  ;;  %6735 = vmatmul.mubr.bf16.gmra.mxu1 %v3231_v8  ;;  %v2849_v16 = vpop.f32.mrf.mxu0 }
 0x273   : > { %v2639_v45 = vadd.f32 %v2552_v3, %v8881_v49  ;;  %6738 = vmatprep.mubr.msk.bf16.mxu1 %vm7230_vm0, %v9934_v38  ;;  %v9149_v31 = vadd.f32 %v2849_v16, %v2638_v46  ;;  %v4062_v3 = vrot.slane %v4060_v27, 1  ;;  %v4064_v27 = vshrl.u32 %v9151_v29, 16 }
 0x274   : > { %v6540_v2 = vpop.f32.mrf.mxu1  ;;  %v6621_v52 = vpop.f32.mrf.mxu0 }
 0x275   : > { %v4460_v2 = vld [vmem:[#allocation2 + $0x14] sm:$0xe] }
 0x276   : > { %v2555_v12 = vpop.f32.mrf.mxu1  ;;  %v2854_v49 = vpop.f32.mrf.mxu0  ;;  %6819 = vmatmul.mubr.bf16.gmra.mxu0 %v7198_v54  ;;  %v5619_v9 = vcombine.low %v4460_v2, %v9142_v43 }
 0x277   : > { %v2640_v15 = vadd.f32 %v2555_v12, %v8889_v10  ;;  %v9154_v41 = vadd.f32 %v2854_v49, %v2639_v45  ;;  %6822 = vmatprep.mubr.msk.bf16.mxu0 %vm7230_vm0, %v9934_v38  ;;  %v7200_v10 = vld [vmem:[#allocation2 + $0x94] sm:$0xff]   ;;  %v4068_v12 = vshll.u32 %v9165_v50, 16 }
 0x278   : > { %v6541_v5 = vpop.f32.mrf.mxu1  ;;  %v6624_v47 = vpop.f32.mrf.mxu0 }
 0x27a   : > { %v2560_v51 = vpop.f32.mrf.mxu1  ;;  %6739 = vmatmul.mubr.bf16.gmra.mxu1 %v3239_v37  ;;  %v2857_v34 = vpop.f32.mrf.mxu0  ;;  %v4482_v37 = vrot.slane %v5619_v9, 1 }
 0x27b   : > { %v2641_v46 = vadd.f32 %v2560_v51, %v8899_v24  ;;  %6842 = vmatprep.mubr.msk.bf16.mxu1 %vm7230_vm0, %v9934_v38  ;;  %v9163_v0 = vadd.f32 %v2857_v34, %v2640_v15  ;;  %v4058_v24 = vor.u32 %v4057_v20, %v4053_v56  ;;  %v4070_v51 = vrot.slane %v4068_v12, 1  ;;  %v9199_v12 = vld [vmem:[#allocation2 + $0x34] sm:$0xff]  }
 0x27c   : > { %v6544_v40 = vpop.f32.mrf.mxu1  ;;  %v6625_v8 = vpop.f32.mrf.mxu0 }
 0x27d   : > { %v4063_v11 = vsel %vm3099_vm7, %v4058_v24, %v4062_v3  ;;  %v4066_v40 = vor.u32 %v4064_v27, %v4062_v3  ;;  %v4485_v24 = vrot.slane %v9165_v50, 1 }
 0x27e   : > { %v2563_v45 = vpop.f32.mrf.mxu1  ;;  %v2862_v18 = vpop.f32.mrf.mxu0  ;;  %6823 = vmatmul.mubr.bf16.gmra.mxu0 %v7200_v10 }
 0x27f   : > { %v2642_v16 = vadd.f32 %v2563_v45, %v8911_v60  ;;  %v9168_v52 = vadd.f32 %v2862_v18, %v2641_v46  ;;  %6926 = vmatprep.mubr.msk.bf16.mxu0 %vm7230_vm0, %v9934_v38  ;;  %v4483_v60 = vrot.slane %v9151_v29, 1  ;;  %v9182_v46 = vld [vmem:[#allocation2 + $0x2c] sm:$0xff]   ;;  %v4071_v29 = vsel %vm3099_vm7, %v4066_v40, %v4070_v51 }
 0x280   : > { %v6545_v54 = vpop.f32.mrf.mxu1  ;;  %v6628_v48 = vpop.f32.mrf.mxu0 }
 0x281   : > { %v4484_v10 = vsel %vm4481_vm8, %v4482_v37, %v4483_v60  ;;  %v4072_v48 = vshrl.u32 %v9165_v50, 16 }
 0x282   : > { %v2568_v15 = vpop.f32.mrf.mxu1  ;;  %6843 = vmatmul.mubr.bf16.vlgmr.msra.gmra.mxu1 %v4063_v11  ;;  %v2865_v19 = vpop.f32.mrf.mxu0 }
 0x283   : > { %v2643_v49 = vadd.f32 %v2568_v15, %v8923_v25  ;;  %6846 = vmatprep.mubr.msk.bf16.mxu1 %vm7230_vm0, %v9934_v38  ;;  %v9179_v5 = vadd.f32 %v2865_v19, %v2642_v16  ;;  %v4076_v16 = vshll.u32 %v9182_v46, 16 }
 0x284   : > { %v6548_v47 = vpop.f32.mrf.mxu1  ;;  %v6629_v43 = vpop.f32.mrf.mxu0 }
 0x285   : > { %v4078_v11 = vrot.slane %v4076_v16, 1 }
 0x286   : > { %v2571_v34 = vpop.f32.mrf.mxu1  ;;  %v2870_v20 = vpop.f32.mrf.mxu0  ;;  %6927 = vmatmul.mubr.bf16.vlgmr.msra.gmra.mxu0 %v4484_v10 }
 0x287   : > { %v2644_v25 = vadd.f32 %v2571_v34, %v8940_v55  ;;  %v9186_v8 = vadd.f32 %v2870_v20, %v2643_v49  ;;  %6930 = vmatprep.mubr.msk.bf16.mxu0 %vm7230_vm0, %v9934_v38  ;;  %v4486_v49 = vsel %vm4481_vm8, %v4483_v60, %v4485_v24  ;;  %v4084_v34 = vshll.u32 %v9199_v12, 16 }
 0x288   : > { %v6549_v56 = vpop.f32.mrf.mxu1  ;;  %v6632_v45 = vpop.f32.mrf.mxu0  ;;  %v4487_v60 = vrot.slane %v9182_v46, 1 }
 0x289   : > { %v4080_v56 = vshrl.u32 %v9182_v46, 16  ;;  %v4086_v45 = vrot.slane %v4084_v34, 1 }
 0x28a   : > { %v2576_v18 = vpop.f32.mrf.mxu1  ;;  %6847 = vmatmul.mubr.bf16.gmra.mxu1 %v4071_v29  ;;  %v2873_v2 = vpop.f32.mrf.mxu0  ;;  %v9216_v29 = vld [vmem:[#allocation2 + $0x3c] sm:$0xff]  }
 0x28b   : > { %v2645_v55 = vadd.f32 %v2576_v18, %v8954_v6  ;;  %6850 = vmatprep.mubr.msk.bf16.mxu1 %vm7230_vm0, %v9934_v38  ;;  %v9196_v3 = vadd.f32 %v2873_v2, %v2644_v25  ;;  %v4074_v6 = vor.u32 %v4072_v48, %v4070_v51  ;;  %v4488_v18 = vsel %vm4481_vm8, %v4485_v24, %v4487_v60 }
 0x28c   : > { %v6552_v54 = vpop.f32.mrf.mxu1  ;;  %v6633_v9 = vpop.f32.mrf.mxu0  ;;  %v4489_v24 = vrot.slane %v9199_v12, 1 }
 0x28d   : > { %v4079_v50 = vsel %vm3099_vm7, %v4074_v6, %v4078_v11 }
 0x28e   : > { %v2579_v15 = vpop.f32.mrf.mxu1  ;;  %v2878_v47 = vpop.f32.mrf.mxu0  ;;  %6931 = vmatmul.mubr.bf16.gmra.mxu0 %v4486_v49  ;;  %v4490_v34 = vsel %vm4481_vm8, %v4487_v60, %v4489_v24  ;;  %v4491_v60 = vrot.slane %v9216_v29, 1 }
 0x28f   : > { %v2646_v19 = vadd.f32 %v2579_v15, %v8971_v28  ;;  %v9203_v37 = vadd.f32 %v2878_v47, %v2645_v55  ;;  %6934 = vmatprep.mubr.msk.bf16.mxu0 %vm7230_vm0, %v9934_v38  ;;  %v4092_v15 = vshll.u32 %v9216_v29, 16 }
 0x290   : > { %v6553_v43 = vpop.f32.mrf.mxu1  ;;  %v6636_v27 = vpop.f32.mrf.mxu0 }
 0x291   : > { %v4088_v43 = vshrl.u32 %v9199_v12, 16  ;;  %v4094_v27 = vrot.slane %v4092_v15, 1  ;;  %v4492_v15 = vsel %vm4481_vm8, %v4489_v24, %v4491_v60 }
 0x292   : > { %v2584_v10 = vpop.f32.mrf.mxu1  ;;  %6851 = vmatmul.mubr.bf16.gmra.mxu1 %v4079_v50  ;;  %v2881_v25 = vpop.f32.mrf.mxu0 }
 0x293   : > { %v2647_v28 = vadd.f32 %v2584_v10, %v8985_v35  ;;  %6854 = vmatprep.mubr.msk.bf16.mxu1 %vm7230_vm0, %v9934_v38  ;;  %v9213_v51 = vadd.f32 %v2881_v25, %v2646_v19  ;;  %v4082_v35 = vor.u32 %v4080_v56, %v4078_v11  ;;  %v4090_v25 = vor.u32 %v4088_v43, %v4086_v45 }
 0x294   : > { %v6556_v20 = vpop.f32.mrf.mxu1  ;;  %v6637_v40 = vpop.f32.mrf.mxu0 }
 0x295   : > { %v4087_v46 = vsel %vm3099_vm7, %v4082_v35, %v4086_v45  ;;  %v4095_v12 = vsel %vm3099_vm7, %v4090_v25, %v4094_v27  ;;  %v4096_v45 = vshrl.u32 %v9216_v29, 16 }
 0x296   : > { %v2587_v16 = vpop.f32.mrf.mxu1  ;;  %v2886_v2 = vpop.f32.mrf.mxu0  ;;  %6935 = vmatmul.mubr.bf16.gmra.mxu0 %v4488_v18 }
 0x297   : > { %v2648_v55 = vadd.f32 %v2587_v16, %v9002_v22  ;;  %v9220_v54 = vadd.f32 %v2886_v2, %v2647_v28  ;;  %6938 = vmatprep.mubr.msk.bf16.mxu0 %vm7230_vm0, %v9934_v38 }
 0x298   : > { %v6557_v9 = vpop.f32.mrf.mxu1  ;;  %v6640_v48 = vpop.f32.mrf.mxu0 }
 0x299   : > { %v4098_v48 = vor.u32 %v4096_v45, %v4094_v27 }
 0x29a   : > { %v2592_v49 = vpop.f32.mrf.mxu1  ;;  %6855 = vmatmul.mubr.bf16.gmra.mxu1 %v4087_v46  ;;  %v2889_v19 = vpop.f32.mrf.mxu0 }
 0x29b   : > { %v2649_v22 = vadd.f32 %v2592_v49, %v9011_v39  ;;  %6858 = vmatprep.mubr.msk.bf16.mxu1 %vm7230_vm0, %v9934_v38  ;;  %v9230_v11 = vadd.f32 %v2889_v19, %v2648_v55  ;;  %v9235_v39 = vld [vmem:[#allocation2 + $0x44] sm:$0xff]   ;;  %v9252_v19 = vld [vmem:[#allocation2 + $0x4c] sm:$0xff]  }
 0x29c   : > { %v6560_v47 = vpop.f32.mrf.mxu1  ;;  %v6641_v6 = vpop.f32.mrf.mxu0  ;;  %v4100_v55 = vshll.u32 %v9235_v39, 16  ;;  %v4493_v24 = vrot.slane %v9235_v39, 1 }
 0x29e   : > { %v2595_v50 = vpop.f32.mrf.mxu1  ;;  %v2894_v28 = vpop.f32.mrf.mxu0  ;;  %6939 = vmatmul.mubr.bf16.gmra.mxu0 %v4490_v34  ;;  %v4104_v34 = vshrl.u32 %v9235_v39, 16 }
 0x29f   : > { %v2650_v10 = vadd.f32 %v2595_v50, %v9023_v63  ;;  %v9237_v20 = vadd.f32 %v2894_v28, %v2649_v22  ;;  %6942 = vmatprep.mubr.msk.bf16.mxu0 %vm7230_vm0, %v9934_v38 }
 0x2a0   : > { %v6561_v40 = vpop.f32.mrf.mxu1  ;;  %v6644_v56 = vpop.f32.mrf.mxu0 }
 0x2a2   : > { %v2600_v16 = vpop.f32.mrf.mxu1  ;;  %6859 = vmatmul.mubr.bf16.gmra.mxu1 %v4095_v12  ;;  %v2897_v18 = vpop.f32.mrf.mxu0  ;;  %v9267_v12 = vld [vmem:[#allocation2 + $0x54] sm:$0xff]  }
 0x2a3   : > { %v2651_v63 = vadd.f32 %v2600_v16, %v9027_v1  ;;  %6862 = vmatprep.mubr.msk.bf16.mxu1 %vm7230_vm0, %v9934_v38  ;;  %v9248_v2 = vadd.f32 %v2897_v18, %v2650_v10  ;;  %v4102_v1 = vrot.slane %v4100_v55, 1  ;;  %v4108_v10 = vshll.u32 %v9252_v19, 16 }
 0x2a4   : > { %v6564_v35 = vpop.f32.mrf.mxu1  ;;  %v6645_v9 = vpop.f32.mrf.mxu0 }
 0x2a5   : > { %v4103_v43 = vsel %vm3099_vm7, %v4098_v48, %v4102_v1  ;;  %v4106_v56 = vor.u32 %v4104_v34, %v4102_v1  ;;  %v4110_v45 = vrot.slane %v4108_v10, 1  ;;  %v4116_v48 = vshll.u32 %v9267_v12, 16 }
 0x2a6   : > { %v2603_v46 = vpop.f32.mrf.mxu1  ;;  %v2902_v22 = vpop.f32.mrf.mxu0  ;;  %6943 = vmatmul.mubr.bf16.gmra.mxu0 %v4492_v15 }
 0x2a7   : > { %v2652_v49 = vadd.f32 %v2603_v46, %v9035_v61  ;;  %v9254_v47 = vadd.f32 %v2902_v22, %v2651_v63  ;;  %6946 = vmatprep.mubr.msk.bf16.mxu0 %vm7230_vm0, %v9934_v38  ;;  %v4494_v63 = vsel %vm4481_vm8, %v4491_v60, %v4493_v24  ;;  %v4111_v9 = vsel %vm3099_vm7, %v4106_v56, %v4110_v45 }
 0x2a8   : > { %v6565_v29 = vpop.f32.mrf.mxu1  ;;  %v6648_v6 = vpop.f32.mrf.mxu0  ;;  %v4495_v22 = vrot.slane %v9252_v19, 1 }
 0x2a9   : > { %v4112_v29 = vshrl.u32 %v9252_v19, 16  ;;  %v4118_v6 = vrot.slane %v4116_v48, 1 }
 0x2aa   : > { %v2608_v27 = vpop.f32.mrf.mxu1  ;;  %6863 = vmatmul.mubr.bf16.gmra.mxu1 %v4103_v43  ;;  %v2905_v50 = vpop.f32.mrf.mxu0  ;;  %v9284_v43 = vld [vmem:[#allocation2 + $0x5c] sm:$0xff]  }
 0x2ab   : > { %v2653_v61 = vadd.f32 %v2608_v27, %v9038_v30  ;;  %6866 = vmatprep.mubr.msk.bf16.mxu1 %vm7230_vm0, %v9934_v38  ;;  %v9265_v28 = vadd.f32 %v2905_v50, %v2652_v49  ;;  %v4114_v34 = vor.u32 %v4112_v29, %v4110_v45  ;;  %v4124_v56 = vshll.u32 %v9284_v43, 16 }
 0x2ac   : > { %v6568_v25 = vpop.f32.mrf.mxu1  ;;  %v6649_v40 = vpop.f32.mrf.mxu0 }
 0x2ad   : > { %v4119_v19 = vsel %vm3099_vm7, %v4114_v34, %v4118_v6 }
 0x2ae   : > { %v2611_v16 = vpop.f32.mrf.mxu1  ;;  %v2910_v18 = vpop.f32.mrf.mxu0  ;;  %6947 = vmatmul.mubr.bf16.gmra.mxu0 %v4494_v63 }
 0x2af   : > { %v2654_v30 = vadd.f32 %v2611_v16, %v9046_v44  ;;  %v9271_v55 = vadd.f32 %v2910_v18, %v2653_v61  ;;  %6950 = vmatprep.mubr.msk.bf16.mxu0 %vm7230_vm0, %v9934_v38  ;;  %v4496_v61 = vsel %vm4481_vm8, %v4493_v24, %v4495_v22  ;;  %v4497_v24 = vrot.slane %v9267_v12, 1 }
 0x2b0   : > { %v6569_v39 = vpop.f32.mrf.mxu1  ;;  %v6652_v35 = vpop.f32.mrf.mxu0 }
 0x2b1   : > { %v4120_v39 = vshrl.u32 %v9267_v12, 16  ;;  %v4126_v35 = vrot.slane %v4124_v56, 1 }
 0x2b2   : > { %v2616_v46 = vpop.f32.mrf.mxu1  ;;  %6867 = vmatmul.mubr.bf16.gmra.mxu1 %v4111_v9  ;;  %v2913_v15 = vpop.f32.mrf.mxu0  ;;  %v9301_v9 = vld [vmem:[#allocation2 + $0x64] sm:$0xff]  }
 0x2b3   : > { %v2655_v60 = vadd.f32 %v2616_v46, %v9049_v17  ;;  %6870 = vmatprep.mubr.msk.bf16.mxu1 %vm7230_vm0, %v9934_v38  ;;  %v9280_v44 = vadd.f32 %v2913_v15, %v2654_v30  ;;  %v4498_v46 = vsel %vm4481_vm8, %v4495_v22, %v4497_v24  ;;  %v4499_v22 = vrot.slane %v9284_v43, 1 }
 0x2b4   : > { %v6572_v49 = vpop.f32.mrf.mxu1  ;;  %v6653_v1 = vpop.f32.mrf.mxu0 }
 0x2b6   : > { %v2619_v27 = vpop.f32.mrf.mxu1  ;;  %v2918_v50 = vpop.f32.mrf.mxu0  ;;  %6951 = vmatmul.mubr.bf16.gmra.mxu0 %v4496_v61 }
 0x2b7   : > { %v2656_v17 = vadd.f32 %v2619_v27, %v9058_v21  ;;  %v9288_v10 = vadd.f32 %v2918_v50, %v2655_v60  ;;  %6954 = vmatprep.mubr.msk.bf16.mxu0 %vm7230_vm0, %v9934_v38  ;;  %v4132_v27 = vshll.u32 %v9301_v9, 16 }
 0x2b8   : > { %v6573_v25 = vpop.f32.mrf.mxu1  ;;  %v6656_v40 = vpop.f32.mrf.mxu0 }
 0x2b9   : > { %v4128_v25 = vshrl.u32 %v9284_v43, 16  ;;  %v4134_v40 = vrot.slane %v4132_v27, 1 }
 0x2ba   : > { %v3339_v16 = vpop.f32.mrf.mxu1  ;;  %6871 = vmatmul.mubr.bf16.gmra.mxu1 %v4119_v19  ;;  %v2921_v63 = vpop.f32.mrf.mxu0  ;;  %v9318_v19 = vld [vmem:[#allocation2 + $0x6c] sm:$0xff]  }
 0x2bb   : > { %v3474_v21 = vadd.f32 %v3339_v16, %v9061_v59  ;;  %6874 = vmatprep.mubr.msk.bf16.mxu1 %vm7230_vm0, %v9934_v38  ;;  %v9298_v30 = vadd.f32 %v2921_v63, %v2656_v17  ;;  %v4122_v59 = vor.u32 %v4120_v39, %v4118_v6  ;;  %v4500_v16 = vsel %vm4481_vm8, %v4497_v24, %v4499_v22 }
 0x2bc   : > { %v6676_v18 = vpop.f32.mrf.mxu1  ;;  %v6657_v45 = vpop.f32.mrf.mxu0  ;;  %v4501_v24 = vrot.slane %v9301_v9, 1 }
 0x2bd   : > { %v4127_v12 = vsel %vm3099_vm7, %v4122_v59, %v4126_v35 }
 0x2be   : > { %v3342_v48 = vpop.f32.mrf.mxu1  ;;  %v3743_v15 = vpop.f32.mrf.mxu0  ;;  %6955 = vmatmul.mubr.bf16.gmra.mxu0 %v4498_v46 }
 0x2bf   : > { %v3475_v60 = vadd.f32 %v3342_v48, %v9069_v7  ;;  %v9305_v49 = vadd.f32 %v3743_v15, %v3474_v21  ;;  %6958 = vmatprep.mubr.msk.bf16.mxu0 %vm7230_vm0, %v9934_v38  ;;  %v4140_v48 = vshll.u32 %v9318_v19, 16 }
 0x2c0   : > { %v6677_v1 = vpop.f32.mrf.mxu1  ;;  %v6760_v29 = vpop.f32.mrf.mxu0 }
 0x2c1   : > { %v4136_v1 = vshrl.u32 %v9301_v9, 16  ;;  %v4142_v29 = vrot.slane %v4140_v48, 1 }
 0x2c2   : > { %v3347_v61 = vpop.f32.mrf.mxu1  ;;  %6875 = vmatmul.mubr.bf16.gmra.mxu1 %v4127_v12  ;;  %v3746_v17 = vpop.f32.mrf.mxu0  ;;  %v9335_v12 = vld [vmem:[#allocation2 + $0x74] sm:$0xff]  }
 0x2c3   : > { %v3476_v7 = vadd.f32 %v3347_v61, %v9072_v58  ;;  %6878 = vmatprep.mubr.msk.bf16.mxu1 %vm7230_vm0, %v9934_v38  ;;  %v9315_v6 = vadd.f32 %v3746_v17, %v3475_v60  ;;  %v4130_v58 = vor.u32 %v4128_v25, %v4126_v35  ;;  %v4502_v61 = vsel %vm4481_vm8, %v4499_v22, %v4501_v24 }
 0x2c4   : > { %v6680_v50 = vpop.f32.mrf.mxu1  ;;  %v6761_v34 = vpop.f32.mrf.mxu0  ;;  %v4503_v22 = vrot.slane %v9318_v19, 1 }
 0x2c5   : > { %v4135_v43 = vsel %vm3099_vm7, %v4130_v58, %v4134_v40 }
 0x2c6   : > { %v3350_v56 = vpop.f32.mrf.mxu1  ;;  %v3751_v21 = vpop.f32.mrf.mxu0  ;;  %6959 = vmatmul.mubr.bf16.gmra.mxu0 %v4500_v16 }
 0x2c7   : > { %v3477_v63 = vadd.f32 %v3350_v56, %v9080_v4  ;;  %v9322_v18 = vadd.f32 %v3751_v21, %v3476_v7  ;;  %6962 = vmatprep.mubr.msk.bf16.mxu0 %vm7230_vm0, %v9934_v38  ;;  %v4148_v56 = vshll.u32 %v9335_v12, 16 }
 0x2c8   : > { %v6681_v45 = vpop.f32.mrf.mxu1  ;;  %v6764_v39 = vpop.f32.mrf.mxu0 }
 0x2c9   : > { %v4144_v45 = vshrl.u32 %v9318_v19, 16  ;;  %v4150_v39 = vrot.slane %v4148_v56, 1 }
 0x2ca   : > { %v3355_v46 = vpop.f32.mrf.mxu1  ;;  %6879 = vmatmul.mubr.bf16.gmra.mxu1 %v4135_v43  ;;  %v3754_v60 = vpop.f32.mrf.mxu0  ;;  %v9352_v43 = vld [vmem:[#allocation2 + $0x7c] sm:$0xff]  }
 0x2cb   : > { %v3478_v4 = vadd.f32 %v3355_v46, %v9083_v62  ;;  %6882 = vmatprep.mubr.msk.bf16.mxu1 %vm7230_vm0, %v9934_v38  ;;  %v9332_v35 = vadd.f32 %v3754_v60, %v3477_v63  ;;  %v4138_v62 = vor.u32 %v4136_v1, %v4134_v40  ;;  %v4504_v46 = vsel %vm4481_vm8, %v4501_v24, %v4503_v22 }
 0x2cc   : > { %v6684_v15 = vpop.f32.mrf.mxu1  ;;  %v6765_v59 = vpop.f32.mrf.mxu0  ;;  %v4505_v24 = vrot.slane %v9335_v12, 1 }
 0x2cd   : > { %v4143_v9 = vsel %vm3099_vm7, %v4138_v62, %v4142_v29 }
 0x2ce   : > { %v3358_v27 = vpop.f32.mrf.mxu1  ;;  %v3759_v17 = vpop.f32.mrf.mxu0  ;;  %6963 = vmatmul.mubr.bf16.gmra.mxu0 %v4502_v61 }
 0x2cf   : > { %v3479_v7 = vadd.f32 %v3358_v27, %v9091_v36  ;;  %v9339_v50 = vadd.f32 %v3759_v17, %v3478_v4  ;;  %6966 = vmatprep.mubr.msk.bf16.mxu0 %vm7230_vm0, %v9934_v38  ;;  %v4156_v27 = vshll.u32 %v9352_v43, 16 }
 0x2d0   : > { %v6685_v34 = vpop.f32.mrf.mxu1  ;;  %v6768_v25 = vpop.f32.mrf.mxu0 }
 0x2d1   : > { %v4152_v34 = vshrl.u32 %v9335_v12, 16  ;;  %v4158_v25 = vrot.slane %v4156_v27, 1 }
 0x2d2   : > { %v3363_v16 = vpop.f32.mrf.mxu1  ;;  %6883 = vmatmul.mubr.bf16.gmra.mxu1 %v4143_v9  ;;  %v3762_v63 = vpop.f32.mrf.mxu0  ;;  %v9369_v9 = vld [vmem:[#allocation2 + $0x84] sm:$0xff]  }
 0x2d3   : > { %v3480_v36 = vadd.f32 %v3363_v16, %v9094_v26  ;;  %6886 = vmatprep.mubr.msk.bf16.mxu1 %vm7230_vm0, %v9934_v38  ;;  %v9349_v40 = vadd.f32 %v3762_v63, %v3479_v7  ;;  %v4146_v26 = vor.u32 %v4144_v45, %v4142_v29  ;;  %v4506_v16 = vsel %vm4481_vm8, %v4503_v22, %v4505_v24 }
 0x2d4   : > { %v6688_v21 = vpop.f32.mrf.mxu1  ;;  %v6769_v58 = vpop.f32.mrf.mxu0  ;;  %v4507_v22 = vrot.slane %v9352_v43, 1 }
 0x2d5   : > { %v4151_v19 = vsel %vm3099_vm7, %v4146_v26, %v4150_v39 }
 0x2d6   : > { %v3366_v48 = vpop.f32.mrf.mxu1  ;;  %v3767_v60 = vpop.f32.mrf.mxu0  ;;  %6967 = vmatmul.mubr.bf16.gmra.mxu0 %v4504_v46  ;;  %v4508_v27 = vsel %vm4481_vm8, %v4505_v24, %v4507_v22  ;;  %v4509_v24 = vrot.slane %v9369_v9, 1 }
 0x2d7   : > { %v3481_v4 = vadd.f32 %v3366_v48, %v9102_v33  ;;  %v9356_v15 = vadd.f32 %v3767_v60, %v3480_v36  ;;  %6970 = vmatprep.mubr.msk.bf16.mxu0 %vm7230_vm0, %v9934_v38  ;;  %v4164_v48 = vshll.u32 %v9369_v9, 16 }
 0x2d8   : > { %v6689_v59 = vpop.f32.mrf.mxu1  ;;  %v6772_v1 = vpop.f32.mrf.mxu0 }
 0x2d9   : > { %v4160_v59 = vshrl.u32 %v9352_v43, 16  ;;  %v4166_v1 = vrot.slane %v4164_v48, 1  ;;  %v4510_v48 = vsel %vm4481_vm8, %v4507_v22, %v4509_v24 }
 0x2da   : > { %v3371_v61 = vpop.f32.mrf.mxu1  ;;  %6887 = vmatmul.mubr.bf16.gmra.mxu1 %v4151_v19  ;;  %v3770_v7 = vpop.f32.mrf.mxu0 }
 0x2db   : > { %v3482_v33 = vadd.f32 %v3371_v61, %v9105_v23  ;;  %6890 = vmatprep.mubr.msk.bf16.mxu1 %vm7230_vm0, %v9934_v38  ;;  %v9366_v29 = vadd.f32 %v3770_v7, %v3481_v4  ;;  %v4154_v23 = vor.u32 %v4152_v34, %v4150_v39  ;;  %v4162_v7 = vor.u32 %v4160_v59, %v4158_v25 }
 0x2dc   : > { %v6692_v17 = vpop.f32.mrf.mxu1  ;;  %v6773_v62 = vpop.f32.mrf.mxu0 }
 0x2dd   : > { %v4159_v12 = vsel %vm3099_vm7, %v4154_v23, %v4158_v25  ;;  %v4167_v43 = vsel %vm3099_vm7, %v4162_v7, %v4166_v1  ;;  %v4168_v25 = vshrl.u32 %v9369_v9, 16 }
 0x2de   : > { %v3374_v56 = vpop.f32.mrf.mxu1  ;;  %v3775_v63 = vpop.f32.mrf.mxu0  ;;  %6971 = vmatmul.mubr.bf16.gmra.mxu0 %v4506_v16 }
 0x2df   : > { %v3483_v36 = vadd.f32 %v3374_v56, %v9113_v14  ;;  %v9373_v21 = vadd.f32 %v3775_v63, %v3482_v33  ;;  %6974 = vmatprep.mubr.msk.bf16.mxu0 %vm7230_vm0, %v9934_v38 }
 0x2e0   : > { %v6693_v58 = vpop.f32.mrf.mxu1  ;;  %v6776_v45 = vpop.f32.mrf.mxu0 }
 0x2e1   : > { %v4170_v45 = vor.u32 %v4168_v25, %v4166_v1 }
 0x2e2   : > { %v3379_v46 = vpop.f32.mrf.mxu1  ;;  %6891 = vmatmul.mubr.bf16.gmra.mxu1 %v4159_v12  ;;  %v3778_v4 = vpop.f32.mrf.mxu0 }
 0x2e3   : > { %v3484_v14 = vadd.f32 %v3379_v46, %v9116_v13  ;;  %6894 = vmatprep.mubr.msk.bf16.mxu1 %vm7230_vm0, %v9934_v38  ;;  %v9383_v39 = vadd.f32 %v3778_v4, %v3483_v36  ;;  %v9388_v13 = vld [vmem:[#allocation2 + $0x8c] sm:$0xff]   ;;  %v7218_v4 = vld [vmem:[#allocation2 + $0x94] sm:$0xff]  }
 0x2e4   : > { %v6696_v60 = vpop.f32.mrf.mxu1  ;;  %v6777_v26 = vpop.f32.mrf.mxu0  ;;  %v4172_v36 = vshll.u32 %v9388_v13, 16  ;;  %v4511_v22 = vrot.slane %v9388_v13, 1 }
 0x2e6   : > { %v3382_v19 = vpop.f32.mrf.mxu1  ;;  %v3783_v33 = vpop.f32.mrf.mxu0  ;;  %6975 = vmatmul.mubr.bf16.gmra.mxu0 %v4508_v27 }
 0x2e7   : > { %v3485_v61 = vadd.f32 %v3382_v19, %v9124_v57  ;;  %v9390_v17 = vadd.f32 %v3783_v33, %v3484_v14  ;;  %6978 = vmatprep.mubr.msk.bf16.mxu0 %vm7230_vm0, %v9934_v38  ;;  %v4180_v19 = vshll.u32 %v7218_v4, 16  ;;  %v7219_v33 = vld [vmem:[#allocation2 + $0x9c] ss:$0 sps:$4 sm:$0x11]  }
 0x2e8   : > { %v6697_v62 = vpop.f32.mrf.mxu1  ;;  %v6780_v34 = vpop.f32.mrf.mxu0 }
 0x2ea   : > { %v3387_v56 = vpop.f32.mrf.mxu1  ;;  %6895 = vmatmul.mubr.bf16.gmra.mxu1 %v4167_v43  ;;  %v3786_v16 = vpop.f32.mrf.mxu0 }
 0x2eb   : > { %v3486_v57 = vadd.f32 %v3387_v56, %v9127_v42  ;;  %6898 = vmatprep.mubr.msk.bf16.mxu1 %vm7230_vm0, %v9934_v38  ;;  %v9401_v63 = vadd.f32 %v3786_v16, %v3485_v61  ;;  %v4174_v42 = vrot.slane %v4172_v36, 1  ;;  %v4176_v61 = vshrl.u32 %v9388_v13, 16 }
 0x2ec   : > { %v6700_v23 = vpop.f32.mrf.mxu1  ;;  %v6781_v58 = vpop.f32.mrf.mxu0  ;;  %v4182_v56 = vrot.slane %v4180_v19, 1  ;;  %v4512_v16 = vsel %vm4481_vm8, %v4509_v24, %v4511_v22 }
 0x2ed   : > { %v4175_v59 = vsel %vm3099_vm7, %v4170_v45, %v4174_v42  ;;  %v4178_v43 = vor.u32 %v4176_v61, %v4174_v42  ;;  %v4188_v23 = vshll.u32 %v7219_v33, 16 }
 0x2ee   : > { %v3390_v12 = vpop.f32.mrf.mxu1  ;;  %v3791_v14 = vpop.f32.mrf.mxu0  ;;  %6979 = vmatmul.mubr.bf16.gmra.mxu0 %v4510_v48 }
 0x2ef   : > { %v3487_v46 = vadd.f32 %v3390_v12, %v9135_v53  ;;  %v9405_v60 = vadd.f32 %v3791_v14, %v3486_v57  ;;  %6982 = vmatprep.mubr.msk.bf16.mxu0 %vm7230_vm0, %v9934_v38  ;;  %v4183_v12 = vsel %vm3099_vm7, %v4178_v43, %v4182_v56  ;;  %v4190_v42 = vrot.slane %v4188_v23, 1 }
 0x2f0   : > { %v6701_v26 = vpop.f32.mrf.mxu1  ;;  %v6784_v9 = vpop.f32.mrf.mxu0 }
 0x2f2   : > { %v3395_v1 = vpop.f32.mrf.mxu1  ;;  %6899 = vmatmul.mubr.bf16.gmra.mxu1 %v4175_v59  ;;  %v3794_v27 = vpop.f32.mrf.mxu0 }
 0x2f3   : > { %v3488_v53 = vadd.f32 %v3395_v1, %v9138_v32  ;;  %6902 = vmatprep.mubr.msk.bf16.mxu1 %vm7230_vm0, %v9934_v38  ;;  %v9415_v7 = vadd.f32 %v3794_v27, %v3487_v46  ;;  %v4184_v32 = vshrl.u32 %v7218_v4, 16  ;;  %v4513_v46 = vrot.slane %v7218_v4, 1 }
 0x2f4   : > { %v6704_v62 = vpop.f32.mrf.mxu1  ;;  %v6785_v34 = vpop.f32.mrf.mxu0 }
 0x2f5   : > { %v4514_v1 = vsel %vm4481_vm8, %v4511_v22, %v4513_v46  ;;  %v4515_v62 = vrot.slane %v7219_v33, 1 }
 0x2f6   : > { %v3398_v57 = vpop.f32.mrf.mxu1  ;;  %v3799_v36 = vpop.f32.mrf.mxu0  ;;  %6983 = vmatmul.mubr.bf16.gmra.mxu0 %v4512_v16 }
 0x2f7   : > { %v3489_v25 = vadd.f32 %v3398_v57, %v9149_v31  ;;  %v9419_v58 = vadd.f32 %v3799_v36, %v3488_v53  ;;  %6986 = vmatprep.mubr.msk.bf16.mxu0 %vm7230_vm0, %v9934_v38  ;;  %v4186_v31 = vor.u32 %v4184_v32, %v4182_v56  ;;  %v4516_v16 = vsel %vm4481_vm8, %v4513_v46, %v4515_v62 }
 0x2f8   : > { %v6705_v45 = vpop.f32.mrf.mxu1  ;;  %v6788_v13 = vpop.f32.mrf.mxu0 }
 0x2f9   : > { %v4191_v4 = vsel %vm3099_vm7, %v4186_v31, %v4190_v42 }
 0x2fa   : > { %v3403_v48 = vpop.f32.mrf.mxu1  ;;  %6903 = vmatmul.mubr.bf16.gmra.mxu1 %v4183_v12  ;;  %v3802_v14 = vpop.f32.mrf.mxu0 }
 0x2fb   : > { %v3490_v24 = vadd.f32 %v3403_v48, %v9154_v41  ;;  %6906 = vmatprep.mubr.msk.bf16.mxu1 %vm7230_vm0, %v9934_v38  ;;  %v9427_v26 = vadd.f32 %v3802_v14, %v3489_v25 }
 0x2fc   : > { %v6708_v9 = vpop.f32.mrf.mxu1  ;;  %v6789_v59 = vpop.f32.mrf.mxu0 }
 0x2fe   : > { %v3406_v19 = vpop.f32.mrf.mxu1  ;;  %v3807_v27 = vpop.f32.mrf.mxu0  ;;  %6987 = vmatmul.mubr.bf16.gmra.mxu0 %v4514_v1 }
 0x2ff   : > { %v3491_v53 = vadd.f32 %v3406_v19, %v9163_v0  ;;  %v9432_v41 = vadd.f32 %v3807_v27, %v3490_v24  ;;  %6990 = vmatprep.mubr.msk.bf16.mxu0 %vm7230_vm0, %v9934_v38  ;;  %vm5170_vm0 = vcmask 1040384  }
 0x300   : > { %v6709_v61 = vpop.f32.mrf.mxu1  ;;  %v6792_v34 = vpop.f32.mrf.mxu0 }
 0x302   : > { %v3411_v43 = vpop.f32.mrf.mxu1  ;;  %6907 = vmatmul.mubr.bf16.gmra.mxu1 %v4191_v4  ;;  %v3810_v57 = vpop.f32.mrf.mxu0 }
 0x303   : > { %v3492_v56 = vadd.f32 %v3411_v43, %v9168_v52  ;;  %v9437_v22 = vadd.f32 %v3810_v57, %v3491_v53 }
 0x304   : > { %v6712_v0 = vpop.f32.mrf.mxu1  ;;  %v6793_v25 = vpop.f32.mrf.mxu0 }
 0x306   : > { %v3414_v36 = vpop.f32.mrf.mxu1  ;;  %v3815_v23 = vpop.f32.mrf.mxu0  ;;  %6991 = vmatmul.mubr.bf16.gmra.mxu0 %v4516_v16 }
 0x307   : > { %v3493_v32 = vadd.f32 %v3414_v36, %v9179_v5  ;;  %v9441_v45 = vadd.f32 %v3815_v23, %v3492_v56 }
 0x308   : > { %v6713_v38 = vpop.f32.mrf.mxu1  ;;  %v6796_v33 = vpop.f32.mrf.mxu0 }
 0x30a   : > { %v3419_v13 = vpop.f32.mrf.mxu1  ;;  %v3818_v52 = vpop.f32.mrf.mxu0 }
 0x30b   : > { %v3494_v12 = vadd.f32 %v3419_v13, %v9186_v8  ;;  %v9444_v48 = vadd.f32 %v3818_v52, %v3493_v32 }
 0x30c   : > { %v6716_v24 = vpop.f32.mrf.mxu1  ;;  %v6797_v14 = vpop.f32.mrf.mxu0 }
 0x30e   : > { %v3422_v31 = vpop.f32.mrf.mxu1  ;;  %v3823_v42 = vpop.f32.mrf.mxu0 }
 0x30f   : > { %v3495_v46 = vadd.f32 %v3422_v31, %v9196_v3  ;;  %v9447_v9 = vadd.f32 %v3823_v42, %v3494_v12 }
 0x310   : > { %v6717_v5 = vpop.f32.mrf.mxu1  ;;  %v6800_v59 = vpop.f32.mrf.mxu0 }
 0x312   : > { %v3427_v19 = vpop.f32.mrf.mxu1  ;;  %v3826_v53 = vpop.f32.mrf.mxu0 }
 0x313   : > { %v3496_v1 = vadd.f32 %v3427_v19, %v9203_v37  ;;  %v9450_v27 = vadd.f32 %v3826_v53, %v3495_v46 }
 0x314   : > { %v6720_v8 = vpop.f32.mrf.mxu1  ;;  %v6801_v4 = vpop.f32.mrf.mxu0 }
 0x316   : > { %v3430_v61 = vpop.f32.mrf.mxu1  ;;  %v3831_v34 = vpop.f32.mrf.mxu0 }
 0x317   : > { %v3497_v62 = vadd.f32 %v3430_v61, %v9213_v51  ;;  %v9453_v43 = vadd.f32 %v3831_v34, %v3496_v1 }
 0x318   : > { %v6721_v3 = vpop.f32.mrf.mxu1  ;;  %v6804_v56 = vpop.f32.mrf.mxu0 }
 0x31a   : > { %v3435_v57 = vpop.f32.mrf.mxu1  ;;  %v3834_v16 = vpop.f32.mrf.mxu0 }
 0x31b   : > { %v3498_v0 = vadd.f32 %v3435_v57, %v9220_v54  ;;  %v9456_v25 = vadd.f32 %v3834_v16, %v3497_v62 }
 0x31c   : > { %v6724_v37 = vpop.f32.mrf.mxu1  ;;  %v6805_v36 = vpop.f32.mrf.mxu0 }
 0x31e   : > { %v3438_v32 = vpop.f32.mrf.mxu1  ;;  %v3839_v38 = vpop.f32.mrf.mxu0 }
 0x31f   : > { %v3499_v23 = vadd.f32 %v3438_v32, %v9230_v11  ;;  %v9459_v33 = vadd.f32 %v3839_v38, %v3498_v0 }
 0x320   : > { %v6725_v51 = vpop.f32.mrf.mxu1  ;;  %v6808_v13 = vpop.f32.mrf.mxu0 }
 0x322   : > { %v3443_v12 = vpop.f32.mrf.mxu1  ;;  %v3842_v24 = vpop.f32.mrf.mxu0 }
 0x323   : > { %v3500_v52 = vadd.f32 %v3443_v12, %v9237_v20  ;;  %v9462_v14 = vadd.f32 %v3842_v24, %v3499_v23 }
 0x324   : > { %v6728_v54 = vpop.f32.mrf.mxu1  ;;  %v6809_v31 = vpop.f32.mrf.mxu0 }
 0x326   : > { %v3446_v46 = vpop.f32.mrf.mxu1  ;;  %v3847_v5 = vpop.f32.mrf.mxu0 }
 0x327   : > { %v3501_v42 = vadd.f32 %v3446_v46, %v9248_v2  ;;  %v9465_v59 = vadd.f32 %v3847_v5, %v3500_v52 }
 0x328   : > { %v6729_v11 = vpop.f32.mrf.mxu1  ;;  %v6812_v19 = vpop.f32.mrf.mxu0 }
 0x32a   : > { %v3451_v1 = vpop.f32.mrf.mxu1  ;;  %v3850_v8 = vpop.f32.mrf.mxu0 }
 0x32b   : > { %v3502_v53 = vadd.f32 %v3451_v1, %v9254_v47  ;;  %v9468_v4 = vadd.f32 %v3850_v8, %v3501_v42 }
 0x32c   : > { %v6732_v20 = vpop.f32.mrf.mxu1  ;;  %v6813_v61 = vpop.f32.mrf.mxu0 }
 0x32e   : > { %v3454_v62 = vpop.f32.mrf.mxu1  ;;  %v3855_v3 = vpop.f32.mrf.mxu0 }
 0x32f   : > { %v3503_v34 = vadd.f32 %v3454_v62, %v9265_v28  ;;  %v9471_v56 = vadd.f32 %v3855_v3, %v3502_v53 }
 0x330   : > { %v6733_v2 = vpop.f32.mrf.mxu1  ;;  %v6816_v57 = vpop.f32.mrf.mxu0 }
 0x332   : > { %v3459_v0 = vpop.f32.mrf.mxu1  ;;  %v3858_v37 = vpop.f32.mrf.mxu0 }
 0x333   : > { %v3504_v16 = vadd.f32 %v3459_v0, %v9271_v55  ;;  %v9474_v36 = vadd.f32 %v3858_v37, %v3503_v34 }
 0x334   : > { %v6736_v47 = vpop.f32.mrf.mxu1  ;;  %v6817_v32 = vpop.f32.mrf.mxu0 }
 0x336   : > { %v3462_v23 = vpop.f32.mrf.mxu1  ;;  %v3863_v51 = vpop.f32.mrf.mxu0 }
 0x337   : > { %v3505_v38 = vadd.f32 %v3462_v23, %v9280_v44  ;;  %v9477_v13 = vadd.f32 %v3863_v51, %v3504_v16 }
 0x338   : > { %v6737_v28 = vpop.f32.mrf.mxu1  ;;  %v6820_v12 = vpop.f32.mrf.mxu0 }
 0x33a   : > { %v3467_v52 = vpop.f32.mrf.mxu1  ;;  %v3866_v54 = vpop.f32.mrf.mxu0 }
 0x33b   : > { %v3506_v24 = vadd.f32 %v3467_v52, %v9288_v10  ;;  %v9480_v31 = vadd.f32 %v3866_v54, %v3505_v38 }
 0x33c   : > { %v6740_v55 = vpop.f32.mrf.mxu1  ;;  %v6821_v46 = vpop.f32.mrf.mxu0 }
 0x33e   : > { %v3470_v42 = vpop.f32.mrf.mxu1  ;;  %v3871_v11 = vpop.f32.mrf.mxu0 }
 0x33f   : > { %v3507_v5 = vadd.f32 %v3470_v42, %v9298_v30  ;;  %v9483_v19 = vadd.f32 %v3871_v11, %v3506_v24 }
 0x340   : > { %v6741_v44 = vpop.f32.mrf.mxu1  ;;  %v6824_v1 = vpop.f32.mrf.mxu0 }
 0x342   : > { %v4291_v53 = vpop.f32.mrf.mxu1  ;;  %v3874_v8 = vpop.f32.mrf.mxu0 }
 0x343   : > { %v9485_v20 = vadd.f32 %v3874_v8, %v3507_v5  ;;  %v4426_v57 = vadd.f32 %v4291_v53, %v9305_v49 }
 0x344   : > { %v6844_v61 = vpop.f32.mrf.mxu1  ;;  %v6825_v10 = vpop.f32.mrf.mxu0 }
 0x346   : > { %v4294_v62 = vpop.f32.mrf.mxu1  ;;  %v4616_v34 = vpop.f32.mrf.mxu0 }
 0x347   : > { %v4427_v30 = vadd.f32 %v4294_v62, %v9315_v6  ;;  %v9489_v37 = vadd.f32 %v4616_v34, %v4426_v57 }
 0x348   : > { %v6845_v3 = vpop.f32.mrf.mxu1  ;;  %v6928_v2 = vpop.f32.mrf.mxu0 }
 0x34a   : > { %v4299_v0 = vpop.f32.mrf.mxu1  ;;  %v4619_v16 = vpop.f32.mrf.mxu0 }
 0x34b   : > { %v9491_v47 = vadd.f32 %v4619_v16, %v4427_v30  ;;  %v4428_v12 = vadd.f32 %v4299_v0, %v9322_v18 }
 0x34c   : > { %v6848_v32 = vpop.f32.mrf.mxu1  ;;  %v6929_v23 = vpop.f32.mrf.mxu0 }
 0x34d   : > { %v5883_v49 = vpack.c.bf16 %v9491_v47, %v9489_v37 }
 0x34e   : > { %v4302_v38 = vpop.f32.mrf.mxu1  ;;  %v4624_v6 = vpop.f32.mrf.mxu0 }
 0x34f   : > { %5884 = vst [vmem:[%s9498_s14] sm:$0xff] %v5883_v49   ;;  %v4429_v52 = vadd.f32 %v4302_v38, %v9332_v35  ;;  %v9505_v55 = vadd.f32 %v4624_v6, %v4428_v12 }
 0x350   : > { %v6849_v51 = vpop.f32.mrf.mxu1  ;;  %v6932_v28 = vpop.f32.mrf.mxu0 }
 0x352   : > { %v4307_v24 = vpop.f32.mrf.mxu1  ;;  %v4627_v54 = vpop.f32.mrf.mxu0 }
 0x353   : > { %v9507_v46 = vadd.f32 %v4627_v54, %v4429_v52  ;;  %v4430_v18 = vadd.f32 %v4307_v24, %v9339_v50 }
 0x354   : > { %v6852_v42 = vpop.f32.mrf.mxu1  ;;  %v6933_v5 = vpop.f32.mrf.mxu0 }
 0x355   : > { %v5888_v11 = vpack.c.bf16 %v9507_v46, %v9505_v55 }
 0x356   : > { %v4310_v44 = vpop.f32.mrf.mxu1  ;;  %v4632_v1 = vpop.f32.mrf.mxu0 }
 0x357   : > { %5997 = vst [vmem:[%s9498_s14 + $0x8] sm:$0xff] %v5888_v11   ;;  %v4431_v35 = vadd.f32 %v4310_v44, %v9349_v40  ;;  %v9514_v62 = vadd.f32 %v4632_v1, %v4430_v18 }
 0x358   : > { %v6853_v53 = vpop.f32.mrf.mxu1  ;;  %v6936_v8 = vpop.f32.mrf.mxu0 }
 0x35a   : > { %v4315_v61 = vpop.f32.mrf.mxu1  ;;  %v4635_v10 = vpop.f32.mrf.mxu0 }
 0x35b   : > { %v9516_v34 = vadd.f32 %v4635_v10, %v4431_v35  ;;  %v4432_v50 = vadd.f32 %v4315_v61, %v9356_v15 }
 0x35c   : > { %v6856_v3 = vpop.f32.mrf.mxu1  ;;  %v6937_v2 = vpop.f32.mrf.mxu0 }
 0x35d   : > { %v5893_v57 = vpack.c.bf16 %v9516_v34, %v9514_v62 }
 0x35e   : > { %v4318_v30 = vpop.f32.mrf.mxu1  ;;  %v4640_v0 = vpop.f32.mrf.mxu0 }
 0x35f   : > { %5998 = vst [vmem:[%s9498_s14 + $0x10] sm:$0xff] %v5893_v57   ;;  %v4433_v40 = vadd.f32 %v4318_v30, %v9366_v29  ;;  %v9523_v38 = vadd.f32 %v4640_v0, %v4432_v50 }
 0x360   : > { %v6857_v16 = vpop.f32.mrf.mxu1  ;;  %v6940_v32 = vpop.f32.mrf.mxu0 }
 0x362   : > { %v4323_v23 = vpop.f32.mrf.mxu1  ;;  %v4643_v49 = vpop.f32.mrf.mxu0 }
 0x363   : > { %v9525_v6 = vadd.f32 %v4643_v49, %v4433_v40  ;;  %v4434_v15 = vadd.f32 %v4323_v23, %v9373_v21 }
 0x364   : > { %v6860_v51 = vpop.f32.mrf.mxu1  ;;  %v6941_v28 = vpop.f32.mrf.mxu0 }
 0x365   : > { %v5898_v12 = vpack.c.bf16 %v9525_v6, %v9523_v38  ;;  %v10003_v28 = vld [vmem:[#allocation8_spill] sm:$0xff] }
 0x366   : > { %v4326_v52 = vpop.f32.mrf.mxu1  ;;  %v4648_v24 = vpop.f32.mrf.mxu0 }
 0x367   : > { %5999 = vst [vmem:[%s9498_s14 + $0x18] sm:$0xff] %v5898_v12   ;;  %v4435_v29 = vadd.f32 %v4326_v52, %v9383_v39  ;;  %v9532_v44 = vadd.f32 %v4648_v24, %v4434_v15  ;;  %v10005_v15 = vld [vmem:[#allocation11_spill] sm:$0xff] }
 0x368   : > { %v6861_v54 = vpop.f32.mrf.mxu1  ;;  %v6944_v42 = vpop.f32.mrf.mxu0 }
 0x369   : > { %v10004_v54 = vld [vmem:[#allocation5_spill] sm:$0xff] }
 0x36a   : > { %v4331_v5 = vpop.f32.mrf.mxu1  ;;  %v4651_v11 = vpop.f32.mrf.mxu0  ;;  %v4955_v42 = vmul.f32 %v9489_v37, %v10004_v54 }
 0x36b   : > { %v9534_v1 = vadd.f32 %v4651_v11, %v4435_v29  ;;  %v4436_v21 = vadd.f32 %v4331_v5, %v9390_v17  ;;  %v4956_v17 = vmul.f32 %v9491_v47, %v10003_v28  ;;  %v4957_v29 = vmul.f32 %v9505_v55, %v10005_v15 }
 0x36c   : > { %v6864_v53 = vpop.f32.mrf.mxu1  ;;  %v6945_v8 = vpop.f32.mrf.mxu0 }
 0x36d   : > { %v5903_v18 = vpack.c.bf16 %v9534_v1, %v9532_v44 }
 0x36e   : > { %v4334_v35 = vpop.f32.mrf.mxu1  ;;  %v4656_v61 = vpop.f32.mrf.mxu0 }
 0x36f   : > { %6000 = vst [vmem:[%s9498_s14 + $0x20] sm:$0xff] %v5903_v18   ;;  %v4437_v39 = vadd.f32 %v4334_v35, %v9401_v63  ;;  %v9541_v30 = vadd.f32 %v4656_v61, %v4436_v21  ;;  %v4989_v18 = vadd.f32 %v4956_v17, %v4955_v42  ;;  %v10006_v35 = vld [vmem:[#allocation12_spill] sm:$0xff]  ;;  %v10007_v21 = vld [vmem:[#allocation15_spill] sm:$0xff] }
 0x370   : > { %v6865_v10 = vpop.f32.mrf.mxu1  ;;  %v6948_v3 = vpop.f32.mrf.mxu0 }
 0x371   : > { %v4990_v3 = vadd.f32 %v4989_v18, %v4957_v29  ;;  %v10011_v18 = vld [vmem:[#allocation21_spill] sm:$0xff] }
 0x372   : > { %v4339_v2 = vpop.f32.mrf.mxu1  ;;  %v4659_v57 = vpop.f32.mrf.mxu0 }
 0x373   : > { %v9543_v0 = vadd.f32 %v4659_v57, %v4437_v39  ;;  %v4438_v63 = vadd.f32 %v4339_v2, %v9405_v60  ;;  %v4958_v60 = vmul.f32 %v9507_v46, %v10006_v35  ;;  %v4959_v39 = vmul.f32 %v9514_v62, %v10007_v21 }
 0x374   : > { %v6868_v16 = vpop.f32.mrf.mxu1  ;;  %v6949_v32 = vpop.f32.mrf.mxu0 }
 0x375   : > { %v5908_v50 = vpack.c.bf16 %v9543_v0, %v9541_v30  ;;  %v4991_v16 = vadd.f32 %v4990_v3, %v4958_v60  ;;  %v10008_v32 = vld [vmem:[#allocation16_spill] sm:$0xff]  ;;  %v4962_v60 = vmul.f32 %v9525_v6, %v10011_v18 }
 0x376   : > { %v4342_v40 = vpop.f32.mrf.mxu1  ;;  %v4664_v23 = vpop.f32.mrf.mxu0 }
 0x377   : > { %6001 = vst [vmem:[%s9498_s14 + $0x28] sm:$0xff] %v5908_v50   ;;  %v4439_v12 = vadd.f32 %v4342_v40, %v9415_v7  ;;  %v9556_v5 = vadd.f32 %v4664_v23, %v4438_v63  ;;  %v4960_v50 = vmul.f32 %v9516_v34, %v10008_v32  ;;  %v4992_v17 = vadd.f32 %v4991_v16, %v4959_v39  ;;  %v10009_v63 = vld [vmem:[#allocation19_spill] sm:$0xff] }
 0x378   : > { %v6869_v49 = vpop.f32.mrf.mxu1  ;;  %v6952_v51 = vpop.f32.mrf.mxu0 }
 0x37a   : > { %v4347_v52 = vpop.f32.mrf.mxu1  ;;  %v4667_v24 = vpop.f32.mrf.mxu0 }
 0x37b   : > { %v9558_v11 = vadd.f32 %v4667_v24, %v4439_v12  ;;  %v4440_v40 = vadd.f32 %v4347_v52, %v9419_v58  ;;  %v4961_v12 = vmul.f32 %v9523_v38, %v10009_v63 }
 0x37c   : > { %v6872_v53 = vpop.f32.mrf.mxu1  ;;  %v6953_v8 = vpop.f32.mrf.mxu0 }
 0x37d   : > { %v5913_v7 = vpack.c.bf16 %v9558_v11, %v9556_v5  ;;  %v4993_v8 = vadd.f32 %v4992_v17, %v4960_v50 }
 0x37e   : > { %v4350_v61 = vpop.f32.mrf.mxu1  ;;  %v4672_v10 = vpop.f32.mrf.mxu0 }
 0x37f   : > { %6002 = vst [vmem:[%s9498_s14 + $0x30] sm:$0xff] %v5913_v7   ;;  %v4441_v23 = vadd.f32 %v4350_v61, %v9427_v26  ;;  %v9573_v24 = vadd.f32 %v4672_v10, %v4440_v40  ;;  %v4994_v7 = vadd.f32 %v4993_v8, %v4961_v12  ;;  %v10012_v61 = vld [vmem:[#allocation24_spill] sm:$0xff] }
 0x380   : > { %v6873_v2 = vpop.f32.mrf.mxu1  ;;  %v6956_v57 = vpop.f32.mrf.mxu0  ;;  %v4963_v3 = vmul.f32 %v9532_v44, %v10012_v61 }
 0x381   : > { %v4995_v2 = vadd.f32 %v4994_v7, %v4962_v60  ;;  %v10013_v57 = vld [vmem:[#allocation26_spill] sm:$0xff] }
 0x382   : > { %v4355_v49 = vpop.f32.mrf.mxu1  ;;  %v4675_v51 = vpop.f32.mrf.mxu0  ;;  %v4964_v16 = vmul.f32 %v9534_v1, %v10013_v57  ;;  %v10018_v57 = vld [vmem:[#allocation38_spill] sm:$0xff] }
 0x383   : > { %v9575_v42 = vadd.f32 %v4675_v51, %v4441_v23  ;;  %v4442_v50 = vadd.f32 %v4355_v49, %v9432_v41  ;;  %v4996_v17 = vadd.f32 %v4995_v2, %v4963_v3  ;;  %v10016_v3 = vld [vmem:[#allocation33_spill] sm:$0xff] }
 0x384   : > { %v6876_v29 = vpop.f32.mrf.mxu1  ;;  %v6957_v53 = vpop.f32.mrf.mxu0  ;;  %v4967_v2 = vmul.f32 %v9556_v5, %v10016_v3 }
 0x385   : > { %10010 = vst [vmem:[#allocation20_spill] sm:$0xff] %v9575_v42  ;;  %v5918_v58 = vpack.c.bf16 %v9575_v42, %v9573_v24  ;;  %v10014_v29 = vld [vmem:[#allocation29_spill] sm:$0xff]  ;;  %v4997_v7 = vadd.f32 %v4996_v17, %v4964_v16 }
 0x386   : > { %v4358_v26 = vpop.f32.mrf.mxu1  ;;  %v4680_v52 = vpop.f32.mrf.mxu0  ;;  %v4965_v12 = vmul.f32 %v9541_v30, %v10014_v29 }
 0x387   : > { %6003 = vst [vmem:[%s9498_s14 + $0x38] sm:$0xff] %v5918_v58   ;;  %v4443_v40 = vadd.f32 %v4358_v26, %v9437_v22  ;;  %v9590_v53 = vadd.f32 %v4680_v52, %v4442_v50 }
 0x388   : > { %v6877_v10 = vpop.f32.mrf.mxu1  ;;  %v6960_v39 = vpop.f32.mrf.mxu0  ;;  %v4998_v26 = vadd.f32 %v4997_v7, %v4965_v12  ;;  %v4969_v12 = vmul.f32 %v9573_v24, %v10018_v57 }
 0x389   : > { %v10015_v10 = vld [vmem:[#allocation30_spill] sm:$0xff] }
 0x38a   : > { %v4363_v23 = vpop.f32.mrf.mxu1  ;;  %v4683_v51 = vpop.f32.mrf.mxu0  ;;  %v4966_v39 = vmul.f32 %v9543_v0, %v10015_v10 }
 0x38b   : > { %v9592_v8 = vadd.f32 %v4683_v51, %v4443_v40  ;;  %v10017_v51 = vld [vmem:[#allocation35_spill] sm:$0xff]  ;;  %v4444_v16 = vadd.f32 %v4363_v23, %v9441_v45 }
 0x38c   : > { %v6880_v58 = vpop.f32.mrf.mxu1  ;;  %v6961_v60 = vpop.f32.mrf.mxu0  ;;  %v4999_v40 = vadd.f32 %v4998_v26, %v4966_v39 }
 0x38d   : > { %v5923_v41 = vpack.c.bf16 %v9592_v8, %v9590_v53  ;;  %v4968_v58 = vmul.f32 %v9558_v11, %v10017_v51 }
 0x38e   : > { %v4366_v22 = vpop.f32.mrf.mxu1  ;;  %v4688_v49 = vpop.f32.mrf.mxu0  ;;  %v5000_v29 = vadd.f32 %v4999_v40, %v4967_v2  ;;  %v10020_v2 = vld [vmem:[#allocation4_spill] sm:$0xff] }
 0x38f   : > { %6004 = vst [vmem:[%s9498_s14 + $0x40] sm:$0xff] %v5923_v41   ;;  %v4445_v17 = vadd.f32 %v4366_v22, %v9444_v48  ;;  %v9607_v7 = vadd.f32 %v4688_v49, %v4444_v16  ;;  %v4971_v40 = vmul.f32 %v9590_v53, %v10020_v2 }
 0x390   : > { %v6881_v52 = vpop.f32.mrf.mxu1  ;;  %v6964_v50 = vpop.f32.mrf.mxu0  ;;  %v5001_v26 = vadd.f32 %v5000_v29, %v4968_v58 }
 0x391   : > { %v10019_v50 = vld [vmem:[#allocation7_spill] sm:$0xff] }
 0x392   : > { %v4371_v60 = vpop.f32.mrf.mxu1  ;;  %v4691_v10 = vpop.f32.mrf.mxu0  ;;  %v4970_v51 = vmul.f32 %v9575_v42, %v10019_v50  ;;  %v5002_v22 = vadd.f32 %v5001_v26, %v4969_v12  ;;  %v10022_v42 = vld [vmem:[#allocation9_spill] sm:$0xff] }
 0x393   : > { %v9609_v41 = vadd.f32 %v4691_v10, %v4445_v17  ;;  %v10021_v17 = vld [vmem:[#allocation6_spill] sm:$0xff]  ;;  %v4446_v29 = vadd.f32 %v4371_v60, %v9447_v9  ;;  %v4973_v12 = vmul.f32 %v9607_v7, %v10022_v42  ;;  %v10026_v42 = vld [vmem:[#allocation17_spill] sm:$0xff] }
 0x394   : > { %v6884_v52 = vpop.f32.mrf.mxu1  ;;  %v6965_v39 = vpop.f32.mrf.mxu0  ;;  %v5003_v10 = vadd.f32 %v5002_v22, %v4970_v51 }
 0x395   : > { %v5928_v45 = vpack.c.bf16 %v9609_v41, %v9607_v7  ;;  %v4972_v52 = vmul.f32 %v9592_v8, %v10021_v17 }
 0x396   : > { %v4374_v48 = vpop.f32.mrf.mxu1  ;;  %v4696_v23 = vpop.f32.mrf.mxu0  ;;  %v5004_v57 = vadd.f32 %v5003_v10, %v4971_v40  ;;  %v10024_v10 = vld [vmem:[#allocation13_spill] sm:$0xff] }
 0x397   : > { %6005 = vst [vmem:[%s9498_s14 + $0x48] sm:$0xff] %v5928_v45   ;;  %v4447_v58 = vadd.f32 %v4374_v48, %v9450_v27  ;;  %v9624_v26 = vadd.f32 %v4696_v23, %v4446_v29 }
 0x398   : > { %v6885_v49 = vpop.f32.mrf.mxu1  ;;  %v6968_v16 = vpop.f32.mrf.mxu0  ;;  %v5005_v22 = vadd.f32 %v5004_v57, %v4972_v52  ;;  %v10025_v52 = vld [vmem:[#allocation14_spill] sm:$0xff] }
 0x399   : > { %v10023_v16 = vld [vmem:[#allocation10_spill] sm:$0xff]  ;;  %v4975_v23 = vmul.f32 %v9624_v26, %v10024_v10 }
 0x39a   : > { %v4379_v39 = vpop.f32.mrf.mxu1  ;;  %v4699_v50 = vpop.f32.mrf.mxu0  ;;  %v4974_v17 = vmul.f32 %v9609_v41, %v10023_v16  ;;  %v5006_v40 = vadd.f32 %v5005_v22, %v4973_v12 }
 0x39b   : > { %v9626_v45 = vadd.f32 %v4699_v50, %v4447_v58  ;;  %v4448_v9 = vadd.f32 %v4379_v39, %v9453_v43 }
 0x39c   : > { %v6888_v49 = vpop.f32.mrf.mxu1  ;;  %v6969_v51 = vpop.f32.mrf.mxu0  ;;  %v5007_v57 = vadd.f32 %v5006_v40, %v4974_v17  ;;  %v10028_v40 = vld [vmem:[#allocation18_spill] sm:$0xff] }
 0x39d   : > { %v5933_v27 = vpack.c.bf16 %v9626_v45, %v9624_v26  ;;  %v4976_v49 = vmul.f32 %v9626_v45, %v10025_v52 }
 0x39e   : > { %v4382_v60 = vpop.f32.mrf.mxu1  ;;  %v4704_v48 = vpop.f32.mrf.mxu0  ;;  %v5008_v16 = vadd.f32 %v5007_v57, %v4975_v23 }
 0x39f   : > { %6006 = vst [vmem:[%s9498_s14 + $0x50] sm:$0xff] %v5933_v27   ;;  %v9636_v50 = vadd.f32 %v4704_v48, %v4448_v9  ;;  %v4449_v43 = vadd.f32 %v4382_v60, %v9456_v25 }
 0x3a0   : > { %v6889_v29 = vpop.f32.mrf.mxu1  ;;  %v6972_v58 = vpop.f32.mrf.mxu0  ;;  %v5009_v48 = vadd.f32 %v5008_v16, %v4976_v49  ;;  %v10029_v49 = vld [vmem:[#allocation22_spill] sm:$0xff] }
 0x3a1   : > { %v4977_v12 = vmul.f32 %v9636_v50, %v10026_v42 }
 0x3a2   : > { %v4387_v39 = vpop.f32.mrf.mxu1  ;;  %v4707_v51 = vpop.f32.mrf.mxu0 }
 0x3a3   : > { %v9643_v22 = vadd.f32 %v4707_v51, %v4449_v43  ;;  %v4450_v29 = vadd.f32 %v4387_v39, %v9459_v33  ;;  %v5010_v52 = vadd.f32 %v5009_v48, %v4977_v12 }
 0x3a4   : > { %v6892_v27 = vpop.f32.mrf.mxu1  ;;  %v6973_v9 = vpop.f32.mrf.mxu0 }
 0x3a5   : > { %10027 = vst [vmem:[#allocation25_spill] sm:$0xff] %v9643_v22  ;;  %v5938_v17 = vpack.c.bf16 %v9643_v22, %v9636_v50  ;;  %v4978_v58 = vmul.f32 %v9643_v22, %v10028_v40 }
 0x3a6   : > { %v4390_v25 = vpop.f32.mrf.mxu1  ;;  %v4712_v60 = vpop.f32.mrf.mxu0 }
 0x3a7   : > { %6007 = vst [vmem:[%s9498_s14 + $0x58] sm:$0xff] %v5938_v17   ;;  %v9651_v23 = vadd.f32 %v4712_v60, %v4450_v29  ;;  %v5011_v51 = vadd.f32 %v5010_v52, %v4978_v58  ;;  %v4451_v16 = vadd.f32 %v4390_v25, %v9462_v14  ;;  %v10030_v29 = vld [vmem:[#allocation23_spill] sm:$0xff] }
 0x3a8   : > { %v6893_v57 = vpop.f32.mrf.mxu1  ;;  %v6976_v43 = vpop.f32.mrf.mxu0 }
 0x3a9   : > { %v4979_v33 = vmul.f32 %v9651_v23, %v10029_v49 }
 0x3aa   : > { %v4395_v39 = vpop.f32.mrf.mxu1  ;;  %v4715_v27 = vpop.f32.mrf.mxu0 }
 0x3ab   : > { %v5012_v9 = vadd.f32 %v5011_v51, %v4979_v33  ;;  %v9656_v42 = vadd.f32 %v4715_v27, %v4451_v16  ;;  %v4452_v12 = vadd.f32 %v4395_v39, %v9465_v59 }
 0x3ac   : > { %v6896_v40 = vpop.f32.mrf.mxu1  ;;  %v6977_v22 = vpop.f32.mrf.mxu0 }
 0x3ad   : > { %v5943_v48 = vpack.c.bf16 %v9656_v42, %v9651_v23  ;;  %v4980_v52 = vmul.f32 %v9656_v42, %v10030_v29  ;;  %v10031_v22 = vld [vmem:[#allocation27_spill] sm:$0xff] }
 0x3ae   : > { %v4398_v17 = vpop.f32.mrf.mxu1  ;;  %v4720_v14 = vpop.f32.mrf.mxu0 }
 0x3af   : > { %6008 = vst [vmem:[%s9498_s14 + $0x60] sm:$0xff] %v5943_v48   ;;  %v5013_v58 = vadd.f32 %v5012_v9, %v4980_v52  ;;  %v9664_v25 = vadd.f32 %v4720_v14, %v4452_v12  ;;  %v4453_v40 = vadd.f32 %v4398_v17, %v9468_v4  ;;  %v10032_v12 = vld [vmem:[#allocation28_spill] sm:$0xff] }
 0x3b0   : > { %v6897_v60 = vpop.f32.mrf.mxu1  ;;  %v6980_v57 = vpop.f32.mrf.mxu0 }
 0x3b1   : > { %v4981_v59 = vmul.f32 %v9664_v25, %v10031_v22 }
 0x3b2   : > { %v4403_v43 = vpop.f32.mrf.mxu1  ;;  %v4723_v51 = vpop.f32.mrf.mxu0 }
 0x3b3   : > { %v5014_v16 = vadd.f32 %v5013_v58, %v4981_v59  ;;  %v9669_v33 = vadd.f32 %v4723_v51, %v4453_v40  ;;  %v4454_v48 = vadd.f32 %v4403_v43, %v9471_v56  ;;  %v10033_v59 = vld [vmem:[#allocation31_spill] sm:$0xff] }
 0x3b4   : > { %v6900_v39 = vpop.f32.mrf.mxu1  ;;  %v6981_v27 = vpop.f32.mrf.mxu0 }
 0x3b5   : > { %v5948_v9 = vpack.c.bf16 %v9669_v33, %v9664_v25  ;;  %v4982_v52 = vmul.f32 %v9669_v33, %v10032_v12 }
 0x3b6   : > { %v4406_v14 = vpop.f32.mrf.mxu1  ;;  %v4728_v4 = vpop.f32.mrf.mxu0 }
 0x3b7   : > { %6009 = vst [vmem:[%s9498_s14 + $0x68] sm:$0xff] %v5948_v9   ;;  %v5015_v17 = vadd.f32 %v5014_v16, %v4982_v52  ;;  %v9677_v60 = vadd.f32 %v4728_v4, %v4454_v48  ;;  %v4455_v40 = vadd.f32 %v4406_v14, %v9474_v36  ;;  %v10034_v48 = vld [vmem:[#allocation32_spill] sm:$0xff] }
 0x3b8   : > { %v6901_v58 = vpop.f32.mrf.mxu1  ;;  %v6984_v57 = vpop.f32.mrf.mxu0 }
 0x3b9   : > { %v4983_v56 = vmul.f32 %v9677_v60, %v10033_v59 }
 0x3ba   : > { %v4411_v43 = vpop.f32.mrf.mxu1  ;;  %v4731_v51 = vpop.f32.mrf.mxu0 }
 0x3bb   : > { %v5016_v39 = vadd.f32 %v5015_v17, %v4983_v56  ;;  %v9682_v27 = vadd.f32 %v4731_v51, %v4455_v40  ;;  %v4456_v9 = vadd.f32 %v4411_v43, %v9477_v13 }
 0x3bc   : > { %v6904_v12 = vpop.f32.mrf.mxu1  ;;  %v6985_v22 = vpop.f32.mrf.mxu0 }
 0x3bd   : > { %v5953_v16 = vpack.c.bf16 %v9682_v27, %v9677_v60  ;;  %v4984_v52 = vmul.f32 %v9682_v27, %v10034_v48  ;;  %v10035_v22 = vld [vmem:[#allocation36_spill] sm:$0xff] }
 0x3be   : > { %v4414_v4 = vpop.f32.mrf.mxu1  ;;  %v4736_v36 = vpop.f32.mrf.mxu0 }
 0x3bf   : > { %6010 = vst [vmem:[%s9498_s14 + $0x70] sm:$0xff] %v5953_v16   ;;  %v5017_v14 = vadd.f32 %v5016_v39, %v4984_v52  ;;  %v9690_v58 = vadd.f32 %v4736_v36, %v4456_v9  ;;  %v4457_v12 = vadd.f32 %v4414_v4, %v9480_v31  ;;  %v10036_v9 = vld [vmem:[#allocation37_spill] sm:$0xff] }
 0x3c0   : > { %v6905_v17 = vpop.f32.mrf.mxu1  ;;  %v6988_v57 = vpop.f32.mrf.mxu0 }
 0x3c1   : > { %v4985_v13 = vmul.f32 %v9690_v58, %v10035_v22  ;;  %v10038_v22 = vld [vmem:[#allocation41_spill] sm:$0xff] }
 0x3c2   : > { %v4419_v40 = vpop.f32.mrf.mxu1  ;;  %v4739_v56 = vpop.f32.mrf.mxu0 }
 0x3c3   : > { %v5018_v43 = vadd.f32 %v5017_v14, %v4985_v13  ;;  %v9695_v51 = vadd.f32 %v4739_v56, %v4457_v12  ;;  %v4458_v16 = vadd.f32 %v4419_v40, %v9483_v19 }
 0x3c4   : > { %v6908_v48 = vpop.f32.mrf.mxu1  ;;  %v6989_v59 = vpop.f32.mrf.mxu0 }
 0x3c5   : > { %v5958_v39 = vpack.c.bf16 %v9695_v51, %v9690_v58  ;;  %v4986_v52 = vmul.f32 %v9695_v51, %v10036_v9  ;;  %v10037_v59 = vld [vmem:[#allocation42_spill] sm:$0xff] }
 0x3c6   : > { %v4422_v31 = vpop.f32.mrf.mxu1  ;;  %v4744_v4 = vpop.f32.mrf.mxu0 }
 0x3c7   : > { %6011 = vst [vmem:[%s9498_s14 + $0x78] sm:$0xff] %v5958_v39   ;;  %v5019_v36 = vadd.f32 %v5018_v43, %v4986_v52  ;;  %v9703_v17 = vadd.f32 %v4744_v4, %v4458_v16  ;;  %v4459_v48 = vadd.f32 %v4422_v31, %v9485_v20 }
 0x3c8   : > { %v6909_v14 = vpop.f32.mrf.mxu1  ;;  %v6992_v57 = vpop.f32.mrf.mxu0 }
 0x3c9   : > { %v4987_v19 = vmul.f32 %v9703_v17, %v10037_v59 }
 0x3ca   : > { %v4747_v12 = vpop.f32.mrf.mxu0 }
 0x3cb   : > { %v5020_v13 = vadd.f32 %v5019_v36, %v4987_v19  ;;  %v9708_v40 = vadd.f32 %v4747_v12, %v4459_v48 }
 0x3cc   : > { %v6993_v56 = vpop.f32.mrf.mxu0 }
 0x3cd   : > { %v5963_v9 = vpack.c.bf16 %v9708_v40, %v9703_v17  ;;  %v4988_v43 = vmul.f32 %v9708_v40, %v10038_v22 }
 0x3cf   : > { %6012 = vst [vmem:[%s9498_s14 + $0x80] sm:$0xff] %v5963_v9   ;;  %v5021_v16 = vadd.f32 %v5020_v13, %v4988_v43 }
 0x3d1   : > { %v5022_v39 = vrot.slane %v5021_v16, 4 }
 0x3d3   : > { %v5023_v52 = vadd.f32 %v5022_v39, %v5021_v16 }
 0x3d5   : > { %v5024_v4 = vrot.slane %v5023_v52, 2 }
 0x3d7   : > { %v5025_v20 = vadd.f32 %v5024_v4, %v5023_v52 }
 0x3d9   : > { %v5026_v31 = vrot.slane %v5025_v20, 1 }
 0x3db   : > { %v9715_v14 = vadd.f32 %v5026_v31, %v5025_v20 }
 0x3dd   : > { %v9718_v36 = vmul.f32 0.00390625, %v9715_v14 }
 0x3df   : > { %v5062_v57 = vsub.f32 %v9708_v40, %v9718_v36  ;;  %v5029_v48 = vsub.f32 %v9489_v37, %v9718_v36  ;;  %v5030_v9 = vsub.f32 %v9491_v47, %v9718_v36  ;;  %v5031_v19 = vsub.f32 %v9505_v55, %v9718_v36 }
 0x3e0   : > { %v5032_v56 = vsub.f32 %v9507_v46, %v9718_v36  ;;  %v5033_v43 = vsub.f32 %v9514_v62, %v9718_v36  ;;  %v5034_v47 = vsub.f32 %v9516_v34, %v9718_v36  ;;  %v5035_v55 = vsub.f32 %v9523_v38, %v9718_v36 }
 0x3e1   : > { %v5063_v12 = vmul.f32 %v5029_v48, %v10004_v54  ;;  %v5064_v13 = vmul.f32 %v5030_v9, %v10003_v28  ;;  %v5065_v16 = vmul.f32 %v5031_v19, %v10005_v15  ;;  %v5036_v46 = vsub.f32 %v9525_v6, %v9718_v36 }
 0x3e2   : > { %v5066_v52 = vmul.f32 %v5032_v56, %v10006_v35  ;;  %v5067_v28 = vmul.f32 %v5033_v43, %v10007_v21  ;;  %v5068_v62 = vmul.f32 %v5034_v47, %v10008_v32  ;;  %v5037_v31 = vsub.f32 %v9532_v44, %v9718_v36 }
 0x3e3   : > { %v5097_v39 = vmul.f32 %v5063_v12, %v5063_v12  ;;  %v5098_v37 = vmul.f32 %v5064_v13, %v5064_v13  ;;  %v5099_v54 = vmul.f32 %v5065_v16, %v5065_v16  ;;  %v5069_v34 = vmul.f32 %v5035_v55, %v10009_v63  ;;  %v10039_v63 = vld [vmem:[#allocation26_spill] sm:$0xff] }
 0x3e4   : > { %v5100_v15 = vmul.f32 %v5066_v52, %v5066_v52  ;;  %v5101_v35 = vmul.f32 %v5067_v28, %v5067_v28  ;;  %v5038_v38 = vsub.f32 %v9534_v1, %v9718_v36  ;;  %v5070_v21 = vmul.f32 %v5036_v46, %v10011_v18  ;;  %v10040_v18 = vld [vmem:[#allocation29_spill] sm:$0xff] }
 0x3e5   : > { %v5131_v4 = vadd.f32 %v5098_v37, %v5097_v39  ;;  %v5102_v9 = vmul.f32 %v5068_v62, %v5068_v62  ;;  %v5039_v6 = vsub.f32 %v9541_v30, %v9718_v36  ;;  %v5071_v32 = vmul.f32 %v5037_v31, %v10012_v61  ;;  %v10041_v61 = vld [vmem:[#allocation30_spill] sm:$0xff] }
 0x3e6   : > { %v5103_v12 = vmul.f32 %v5069_v34, %v5069_v34  ;;  %v5040_v44 = vsub.f32 %v9543_v0, %v9718_v36  ;;  %v5072_v56 = vmul.f32 %v5038_v38, %v10039_v63  ;;  %v5104_v43 = vmul.f32 %v5070_v21, %v5070_v21  ;;  %v10046_v63 = vld [vmem:[#allocation6_spill] sm:$0xff] }
 0x3e7   : > { %v5132_v20 = vadd.f32 %v5131_v4, %v5099_v54  ;;  %v5041_v1 = vsub.f32 %v9556_v5, %v9718_v36  ;;  %v5073_v39 = vmul.f32 %v5039_v6, %v10040_v18  ;;  %v5105_v37 = vmul.f32 %v5071_v32, %v5071_v32  ;;  %v10042_v5 = vld [vmem:[#allocation20_spill] sm:$0xff] }
 0x3e8   : > { %v5042_v30 = vsub.f32 %v9558_v11, %v9718_v36  ;;  %v5074_v52 = vmul.f32 %v5040_v44, %v10041_v61  ;;  %v5106_v55 = vmul.f32 %v5072_v56, %v5072_v56  ;;  %v5043_v0 = vsub.f32 %v9573_v24, %v9718_v36 }
 0x3e9   : > { %v5133_v48 = vadd.f32 %v5132_v20, %v5100_v15  ;;  %v5075_v54 = vmul.f32 %v5041_v1, %v10016_v3  ;;  %v5107_v4 = vmul.f32 %v5073_v39, %v5073_v39  ;;  %v5044_v62 = vsub.f32 %v10042_v5, %v9718_v36  ;;  %v10043_v15 = vld [vmem:[#allocation35_spill] sm:$0xff]  ;;  %v10047_v1 = vld [vmem:[#allocation9_spill] sm:$0xff] }
 0x3ea   : > { %v5076_v20 = vmul.f32 %v5042_v30, %v10043_v15  ;;  %v5108_v31 = vmul.f32 %v5074_v52, %v5074_v52  ;;  %v5045_v11 = vsub.f32 %v9590_v53, %v9718_v36  ;;  %v5046_v24 = vsub.f32 %v9592_v8, %v9718_v36  ;;  %v10045_v3 = vld [vmem:[#allocation7_spill] sm:$0xff] }
 0x3eb   : > { %v5134_v19 = vadd.f32 %v5133_v48, %v5101_v35  ;;  %v10044_v35 = vld [vmem:[#allocation38_spill] sm:$0xff]  ;;  %v5109_v38 = vmul.f32 %v5075_v54, %v5075_v54  ;;  %v5047_v32 = vsub.f32 %v9607_v7, %v9718_v36  ;;  %v5048_v53 = vsub.f32 %v9609_v41, %v9718_v36 }
 0x3ec   : > { %v5077_v48 = vmul.f32 %v5043_v0, %v10044_v35  ;;  %v5080_v56 = vmul.f32 %v5046_v24, %v10046_v63  ;;  %v5049_v8 = vsub.f32 %v9624_v26, %v9718_v36  ;;  %v5050_v7 = vsub.f32 %v9626_v45, %v9718_v36  ;;  %v10049_v26 = vld [vmem:[#allocation25_spill] sm:$0xff]  ;;  %v10050_v54 = vld [vmem:[#allocation14_spill] sm:$0xff] }
 0x3ed   : > { %v5135_v13 = vadd.f32 %v5134_v19, %v5102_v9  ;;  %v5078_v9 = vmul.f32 %v5044_v62, %v10045_v3  ;;  %v5110_v19 = vmul.f32 %v5076_v20, %v5076_v20  ;;  %v5081_v18 = vmul.f32 %v5047_v32, %v10047_v1  ;;  %v10051_v62 = vld [vmem:[#allocation17_spill] sm:$0xff] }
 0x3ee   : > { %v5114_v30 = vmul.f32 %v5080_v56, %v5080_v56  ;;  %v5051_v41 = vsub.f32 %v9636_v50, %v9718_v36  ;;  %v5083_v52 = vmul.f32 %v5049_v8, %v10024_v10  ;;  %v5052_v0 = vsub.f32 %v10049_v26, %v9718_v36  ;;  %v10052_v10 = vld [vmem:[#allocation18_spill] sm:$0xff]  ;;  %v10056_v8 = vld [vmem:[#allocation32_spill] sm:$0xff] }
 0x3ef   : > { %v5136_v16 = vadd.f32 %v5135_v13, %v5103_v12  ;;  %v5079_v12 = vmul.f32 %v5045_v11, %v10020_v2  ;;  %v5111_v13 = vmul.f32 %v5077_v48, %v5077_v48  ;;  %v10048_v2 = vld [vmem:[#allocation10_spill] sm:$0xff]  ;;  %v5053_v45 = vsub.f32 %v9651_v23, %v9718_v36 }
 0x3f0   : > { %v5085_v15 = vmul.f32 %v5051_v41, %v10051_v62  ;;  %v5117_v20 = vmul.f32 %v5083_v52, %v5083_v52  ;;  %v5054_v50 = vsub.f32 %v9656_v42, %v9718_v36  ;;  %v5055_v48 = vsub.f32 %v9664_v25, %v9718_v36 }
 0x3f1   : > { %v5137_v47 = vadd.f32 %v5136_v16, %v5104_v43  ;;  %v5112_v43 = vmul.f32 %v5078_v9, %v5078_v9  ;;  %v5113_v39 = vmul.f32 %v5079_v12, %v5079_v12  ;;  %v5056_v23 = vsub.f32 %v9669_v33, %v9718_v36 }
 0x3f2   : > { %v5088_v3 = vmul.f32 %v5054_v50, %v10030_v29  ;;  %v5057_v42 = vsub.f32 %v9677_v60, %v9718_v36  ;;  %v5058_v25 = vsub.f32 %v9682_v27, %v9718_v36  ;;  %v5059_v33 = vsub.f32 %v9690_v58, %v9718_v36  ;;  %v10055_v29 = vld [vmem:[#allocation31_spill] sm:$0xff] }
 0x3f3   : > { %v5138_v28 = vadd.f32 %v5137_v47, %v5105_v37  ;;  %v5082_v47 = vmul.f32 %v5048_v53, %v10048_v2  ;;  %v5060_v60 = vsub.f32 %v9695_v51, %v9718_v36  ;;  %v5061_v27 = vsub.f32 %v9703_v17, %v9718_v36 }
 0x3f4   : > { %v5122_v53 = vmul.f32 %v5088_v3, %v5088_v3  ;;  %v5091_v56 = vmul.f32 %v5057_v42, %v10055_v29  ;;  %v5092_v1 = vmul.f32 %v5058_v25, %v10056_v8 }
 0x3f5   : > { %v5139_v46 = vadd.f32 %v5138_v28, %v5106_v55  ;;  %v5115_v55 = vmul.f32 %v5081_v18, %v5081_v18  ;;  %v5095_v52 = vmul.f32 %v5061_v27, %v10037_v59 }
 0x3f6   : > { %v5125_v2 = vmul.f32 %v5091_v56, %v5091_v56 }
 0x3f7   : > { %v5140_v34 = vadd.f32 %v5139_v46, %v5107_v4  ;;  %v5084_v4 = vmul.f32 %v5050_v7, %v10050_v54  ;;  %v5116_v46 = vmul.f32 %v5082_v47, %v5082_v47 }
 0x3f9   : > { %v5141_v21 = vadd.f32 %v5140_v34, %v5108_v31  ;;  %v5086_v34 = vmul.f32 %v5052_v0, %v10052_v10  ;;  %v5118_v11 = vmul.f32 %v5084_v4, %v5084_v4  ;;  %v5129_v0 = vmul.f32 %v5095_v52, %v5095_v52 }
 0x3fb   : > { %v5142_v6 = vadd.f32 %v5141_v21, %v5109_v38  ;;  %v5087_v38 = vmul.f32 %v5053_v45, %v10029_v49  ;;  %v5119_v21 = vmul.f32 %v5085_v15, %v5085_v15  ;;  %v5120_v9 = vmul.f32 %v5086_v34, %v5086_v34  ;;  %v10054_v49 = vld [vmem:[#allocation28_spill] sm:$0xff] }
 0x3fd   : > { %v5143_v44 = vadd.f32 %v5142_v6, %v5110_v19  ;;  %v10053_v6 = vld [vmem:[#allocation27_spill] sm:$0xff]  ;;  %v5121_v12 = vmul.f32 %v5087_v38, %v5087_v38 }
 0x3fe   : > { %v5089_v32 = vmul.f32 %v5055_v48, %v10053_v6 }
 0x3ff   : > { %v5144_v16 = vadd.f32 %v5143_v44, %v5111_v13  ;;  %v5090_v44 = vmul.f32 %v5056_v23, %v10054_v49 }
 0x401   : > { %v5145_v37 = vadd.f32 %v5144_v16, %v5112_v43  ;;  %v5123_v43 = vmul.f32 %v5089_v32, %v5089_v32  ;;  %v5124_v18 = vmul.f32 %v5090_v44, %v5090_v44 }
 0x403   : > { %v5146_v61 = vadd.f32 %v5145_v37, %v5113_v39  ;;  %v10057_v37 = vld [vmem:[#allocation36_spill] sm:$0xff] }
 0x404   : > { %v5093_v7 = vmul.f32 %v5059_v33, %v10057_v37 }
 0x405   : > { %v5147_v28 = vadd.f32 %v5146_v61, %v5114_v30  ;;  %v10058_v30 = vld [vmem:[#allocation37_spill] sm:$0xff]  ;;  %v5126_v61 = vmul.f32 %v5092_v1, %v5092_v1 }
 0x406   : > { %v5094_v58 = vmul.f32 %v5060_v60, %v10058_v30 }
 0x407   : > { %v5148_v5 = vadd.f32 %v5147_v28, %v5115_v55  ;;  %v5127_v55 = vmul.f32 %v5093_v7, %v5093_v7  ;;  %v5096_v28 = vmul.f32 %v5062_v57, %v10038_v22 }
 0x408   : > { %v5128_v26 = vmul.f32 %v5094_v58, %v5094_v58 }
 0x409   : > { %v5149_v31 = vadd.f32 %v5148_v5, %v5116_v46  ;;  %v5130_v4 = vmul.f32 %v5096_v28, %v5096_v28 }
 0x40b   : > { %v5150_v35 = vadd.f32 %v5149_v31, %v5117_v20 }
 0x40d   : > { %v5151_v24 = vadd.f32 %v5150_v35, %v5118_v11 }
 0x40f   : > { %v5152_v19 = vadd.f32 %v5151_v24, %v5119_v21 }
 0x411   : > { %v5153_v13 = vadd.f32 %v5152_v19, %v5120_v9 }
 0x413   : > { %v5154_v63 = vadd.f32 %v5153_v13, %v5121_v12 }
 0x415   : > { %v5155_v16 = vadd.f32 %v5154_v63, %v5122_v53 }
 0x417   : > { %v5156_v39 = vadd.f32 %v5155_v16, %v5123_v43 }
 0x419   : > { %v5157_v47 = vadd.f32 %v5156_v39, %v5124_v18 }
 0x41b   : > { %v5158_v41 = vadd.f32 %v5157_v47, %v5125_v2 }
 0x41d   : > { %v5159_v51 = vadd.f32 %v5158_v41, %v5126_v61 }
 0x41f   : > { %v5160_v17 = vadd.f32 %v5159_v51, %v5127_v55 }
 0x421   : > { %v5161_v54 = vadd.f32 %v5160_v17, %v5128_v26 }
 0x423   : > { %v5162_v46 = vadd.f32 %v5161_v54, %v5129_v0 }
 0x425   : > { %v5163_v5 = vadd.f32 %v5162_v46, %v5130_v4 }
 0x427   : > { %v5164_v45 = vrot.slane %v5163_v5, 4 }
 0x429   : > { %v5165_v62 = vadd.f32 %v5164_v45, %v5163_v5 }
 0x42b   : > { %v5166_v15 = vrot.slane %v5165_v62, 2 }
 0x42d   : > { %v5167_v20 = vadd.f32 %v5166_v15, %v5165_v62 }
 0x42f   : > { %v5168_v59 = vrot.slane %v5167_v20, 1 }
 0x431   : > { %v5169_v40 = vadd.f32 %v5168_v59, %v5167_v20 }
 0x433   : > { %v5171_v22 = vsel %vm5170_vm0, %v9715_v14, %v5169_v40 }
 0x434   : > { %5172 = vst [vmem:[%s290_s17] sm:$0x3] %v5171_v22 }
 0x435 PF: > { %s19_s26 = sadd.s32 1, %s7226_s26  }
 0x436   : > { %p16_p4 = scmp.ge.s32.totalorder %s19_s26, 4  }
 0x438   :  { %18 = sbr.rel (!%p16_p4) target bundleno = 2 (0x2), region = 94 }

// kernel: residual_block.3
= control target key start
LH: loop header
LB: loop body
LE: loop exit
PB: predicated region body
PF: predicated region fallthrough
CT: control target
= control target key end

     0   :  { %s7730_s24 = smov 0   ;;  %s10234_s0 = inlined_call_operand.vmem [shape: bf16[2,320,128], index: 0, kind: input, shape index: {}]   ;;  %s10235_s1 = inlined_call_operand.vmem [shape: bf16[3,3,128,128], index: 1, kind: input, shape index: {}]   ;;  %s10236_s2 = inlined_call_operand.vmem [shape: bf16[128,128], index: 2, kind: input, shape index: {}]   ;;  %s10237_s3 = inlined_call_operand.vmem [shape: f32[272,1], index: 3, kind: input, shape index: {}]   ;;  %s10238_s4 = inlined_call_operand.vmem [shape: bf16[2,272,128], index: 4, kind: output, shape index: {0}]   ;;  %s10239_s5 = inlined_call_operand.vmem [shape: bf16[2,272,128], index: 5, kind: output, shape index: {1}]   ;;  %s10240_s6 = inlined_call_operand.vmem [shape: f32[2,2,128], index: 6, kind: output, shape index: {2}]   ;;  %s10241_s7 = inlined_call_operand.vmem [shape: f32[2,2,128], index: 7, kind: output, shape index: {3}]  }
   0x1 LB: > { %s5636_s25 = sadd.s32 4294967295, %s7685_s24   ;;  %p5640_p0 = scmp.ge.s32.totalorder %s7685_s24, 1  ;;  %s7685_s24 = sphi %s7730_s24, %s18_s24  }
   0x2   : > { %p244_p1 = scmp.lt.s32.totalorder %s7685_s24, 3 }
   0x4   : > { %p245_p2 = pnand %p5640_p0, %p244_p1 }
   0x6   : > { %248 = sbr.rel (%p245_p2) target bundleno = 1044 (0x414), region = 36 }
   0xb   : > { %v7441_v0 = vld [vmem:[%s10235_s1 + $0x78] sm:$0xff]   ;;  %v10243_v1 = vmov 0.0   ;;  %v7443_v3 = vld [vmem:[%s10235_s1 + $0x70] sm:$0xff]   ;;  %vm7688_vm0 = vmmov 0   ;;  %p289_p3 = scmp.lt.s32.totalorder %s5636_s25, 1  ;;  %v7445_v5 = vld [vmem:[%s10235_s1 + $0x68] sm:$0xff]  }
   0xc   : > { %6586 = vmatprep.subr.bf16.mxu0 %v10243_v1  ;;  %6670 = vmatprep.subr.bf16.mxu1 %v10243_v1  ;;  %v7442_v2 = vld [vmem:[%s10235_s1 + $0x38] sm:$0xff]   ;;  %v7444_v4 = vld [vmem:[%s10235_s1 + $0x30] sm:$0xff]   ;;  %v7446_v6 = vld [vmem:[%s10235_s1 + $0x28] sm:$0xff]   ;;  %vm504_vm1 = vsmask.f32 4352  ;;  %vm903_vm2 = vcmask 1044480  }
   0xd   : > { %6587 = vmatpush3.bf16.msra.mxu0 %v7441_v0  ;;  %6602 = vmatprep.mubr.msk.bf16.mxu0 %vm7688_vm0, %v10243_v1  ;;  %s10489_s25 = smov (!%p289_p3, %s5636_s25), 1  ;;  %v7447_v7 = vld [vmem:[%s10235_s1 + $0x60] sm:$0xff]   ;;  %v7449_v9 = vld [vmem:[%s10235_s1 + $0x58] sm:$0xff]   ;;  %v7451_v16 = vld [vmem:[%s10235_s1 + $0x50] sm:$0xff]   ;;  %vm2486_vm3 = vsmask.f32 7424 }
   0xe   : > { %6671 = vmatpush3.bf16.msra.mxu1 %v7442_v2  ;;  %6588 = vmatprep.subr.bf16.mxu0 %v10243_v1  ;;  %s7426_s15 = smul.u32 160, %s10489_s25  ;;  %v7448_v8 = vld [vmem:[%s10235_s1 + $0x20] sm:$0xff]   ;;  %v7450_v10 = vld [vmem:[%s10235_s1 + $0x18] sm:$0xff]   ;;  %v7452_v18 = vld [vmem:[%s10235_s1 + $0x10] sm:$0xff]   ;;  %vm3868_vm4 = vcmask 1046528   ;;  %s5644_s20 = sshll.u32 %s10489_s25, 1 }
   0xf   : > { %6672 = vmatprep.subr.bf16.mxu1 %v10243_v1  ;;  %6686 = vmatprep.mubr.msk.bf16.mxu1 %vm7688_vm0, %v10243_v1  ;;  %v7453_v24 = vld [vmem:[%s10235_s1 + $0x48] sm:$0xff]   ;;  %v7455_v32 = vld [vmem:[%s10235_s1 + $0x40] sm:$0xff]   ;;  %v7459_v44 = vld [vmem:[%s10235_s1 + $0xb8] sm:$0xff]   ;;  %s307_s26 = scalar_lea.vmem %s10240_s6, %s5644_s20  ;;  %vm4727_vm5 = vcmask 1040384   ;;  %s311_s29 = scalar_lea.vmem %s10241_s7, %s5644_s20 }
  0x10   : > { %s7780_s22 = scalar_lea.vmem %s10234_s0, %s7426_s15  ;;  %v7454_v27 = vld [vmem:[%s10235_s1 + $0x8] sm:$0xff]   ;;  %v7456_v33 = vld [vmem:[%s10235_s1] sm:$0xff]   ;;  %v7460_v48 = vld [vmem:[%s10235_s1 + $0xf8] sm:$0xff]  }
  0x11   : > { %6589 = vmatpush3.bf16.msra.mxu0 %v7443_v3  ;;  %v347_v11 = vld [vmem:[%s7780_s22] sm:$0x8]  ;;  %v7792_v12 = vld [vmem:[%s7780_s22 + $0x4] sm:$0xf]  ;;  %v7795_v13 = vld [vmem:[%s7780_s22 + $0x8] sm:$0xf] }
  0x12   : > { %6673 = vmatpush3.bf16.msra.mxu1 %v7444_v4  ;;  %6590 = vmatprep.subr.bf16.mxu0 %v10243_v1  ;;  %v7798_v14 = vld [vmem:[%s7780_s22 + $0xc] sm:$0xf]  ;;  %v5662_v15 = vcombine.low %v347_v11, %v7792_v12  ;;  %v7816_v23 = vld [vmem:[%s7780_s22 + $0x10] sm:$0xf]  ;;  %v7822_v26 = vld [vmem:[%s7780_s22 + $0x14] sm:$0xf]  ;;  %v5713_v61 = vcombine.low %v7792_v12, %v7795_v13 }
  0x13   : > { %6674 = vmatprep.subr.bf16.mxu1 %v10243_v1  ;;  %v7806_v17 = vcombine.low %v7795_v13, %v7798_v14  ;;  %v7829_v31 = vcombine.low %v7816_v23, %v7822_v26  ;;  %v7842_v38 = vld [vmem:[%s7780_s22 + $0x18] sm:$0xf]  ;;  %v7845_v39 = vld [vmem:[%s7780_s22 + $0x1c] sm:$0xf]  ;;  %v7463_v52 = vld [vmem:[%s10235_s1 + $0xb0] sm:$0xff]  }
  0x14   : > { %v506_v19 = vshrl.u32 %v5662_v15, 16  ;;  %v509_v20 = vshll.u32 %v5662_v15, 16  ;;  %v904_v40 = vrot.slane %v5662_v15, 3  ;;  %v7852_v42 = vcombine.low %v7842_v38, %v7845_v39  ;;  %v7464_v54 = vld [vmem:[%s10235_s1 + $0xf0] sm:$0xff]   ;;  %v7876_v55 = vld [vmem:[%s7780_s22 + $0x20] sm:$0xf] }
  0x15   : > { %6591 = vmatpush3.bf16.msra.mxu0 %v7445_v5  ;;  %v514_v21 = vshrl.u32 %v7806_v17, 16  ;;  %v517_v22 = vshll.u32 %v7806_v17, 16  ;;  %v523_v36 = vshrl.u32 %v7829_v31, 16  ;;  %v526_v37 = vshll.u32 %v7829_v31, 16  ;;  %v7879_v56 = vld [vmem:[%s7780_s22 + $0x24] sm:$0xf] }
  0x16   : > { %6675 = vmatpush3.bf16.msra.mxu1 %v7446_v6  ;;  %6592 = vmatprep.subr.bf16.mxu0 %v10243_v1  ;;  %v508_v25 = vrot.slane %v506_v19, 3  ;;  %v511_v28 = vrot.slane %v509_v20, 4  ;;  %v905_v41 = vrot.slane %v7806_v17, 3  ;;  %v532_v49 = vshrl.u32 %v7852_v42, 16  ;;  %v7467_v63 = vld [vmem:[%s10235_s1 + $0xa8] sm:$0xff]   ;;  %v7476_v19 = vld [vmem:[%s10235_s1 + $0xd8] sm:$0xff]  }
  0x17   : > { %6676 = vmatprep.subr.bf16.mxu1 %v10243_v1  ;;  %v516_v29 = vrot.slane %v514_v21, 3  ;;  %v519_v30 = vrot.slane %v517_v22, 4  ;;  %v525_v45 = vrot.slane %v523_v36, 3  ;;  %v528_v46 = vrot.slane %v526_v37, 4  ;;  %v7468_v0 = vld [vmem:[%s10235_s1 + $0xe8] sm:$0xff]  }
  0x18   : > { %v512_v34 = vor.u32 %v511_v28, %v508_v25  ;;  %v906_v47 = vsel %vm903_vm2, %v904_v40, %v905_v41  ;;  %v535_v51 = vshll.u32 %v7852_v42, 16  ;;  %v907_v53 = vrot.slane %v7829_v31, 3  ;;  %v7906_v5 = vld [vmem:[%s7780_s22 + $0x28] sm:$0xf]  ;;  %v7909_v6 = vld [vmem:[%s7780_s22 + $0x2c] sm:$0xf] }
  0x19   : > { %6593 = vmatpush3.bf16.msra.mxu0 %v7447_v7  ;;  %v520_v35 = vor.u32 %v519_v30, %v516_v29  ;;  %v529_v50 = vor.u32 %v528_v46, %v525_v45  ;;  %v534_v57 = vrot.slane %v532_v49, 3  ;;  %v7888_v60 = vcombine.low %v7876_v55, %v7879_v56  ;;  %v7943_v25 = vld [vmem:[%s7780_s22 + $0x30] sm:$0xf]  ;;  %v7483_v36 = vld [vmem:[%s10235_s1 + $0x88] sm:$0xff]   ;;  %v7488_v46 = vld [vmem:[%s10235_s1 + $0x80] sm:$0xff]  }
  0x1a   : > { %6677 = vmatpush3.bf16.msra.mxu1 %v7448_v8  ;;  %6594 = vmatprep.subr.bf16.mxu0 %v10243_v1  ;;  %v537_v59 = vrot.slane %v535_v51, 4  ;;  %v908_v62 = vsel %vm903_vm2, %v905_v41, %v907_v53  ;;  %v909_v7 = vrot.slane %v7852_v42, 3  ;;  %v7471_v8 = vld [vmem:[%s10235_s1 + $0xa0] sm:$0xff]   ;;  %v5714_v20 = vcombine.low %v7798_v14, %v7816_v23  ;;  %v7479_v29 = vld [vmem:[%s10235_s1 + $0x90] sm:$0xff]   ;;  %v7485_v37 = vld [vmem:[%s10235_s1 + $0xc8] sm:$0xff]  }
  0x1b   : > { %6678 = vmatprep.subr.bf16.mxu1 %v10243_v1  ;;  %v521_v43 = vsel %vm504_vm1, %v512_v34, %v520_v35  ;;  %v530_v58 = vsel %vm504_vm1, %v520_v35, %v529_v50  ;;  %v541_v3 = vshrl.u32 %v7888_v60, 16  ;;  %v544_v4 = vshll.u32 %v7888_v60, 16  ;;  %v7481_v30 = vld [vmem:[%s10235_s1 + $0xd0] sm:$0xff]   ;;  %v7975_v42 = vld [vmem:[%s7780_s22 + $0x38] sm:$0xf]  ;;  %v7489_v49 = vld [vmem:[%s10235_s1 + $0xc0] sm:$0xff]  }
  0x1c   : > { %v538_v2 = vor.u32 %v537_v59, %v534_v57  ;;  %v910_v17 = vsel %vm903_vm2, %v907_v53, %v909_v7  ;;  %v911_v28 = vrot.slane %v7888_v60, 3  ;;  %v8181_v12 = vld [vmem:[%s7780_s22 + $0x28] sm:$0xf]  ;;  %v8184_v13 = vld [vmem:[%s7780_s22 + $0x2c] sm:$0xf]  ;;  %v7515_v14 = vld [vmem:[%s10235_s1 + $0x160] sm:$0xff]  }
  0x1d   : > { %6595 = vmatpush3.bf16.msra.mxu0 %v7449_v9  ;;  %v7472_v9 = vld [vmem:[%s10235_s1 + $0xe0] sm:$0xff]   ;;  %v543_v11 = vrot.slane %v541_v3, 3  ;;  %v546_v15 = vrot.slane %v544_v4, 4  ;;  %v5717_v4 = vcombine.low %v7879_v56, %v7906_v5 }
  0x1e   : > { %6679 = vmatpush3.bf16.msra.mxu1 %v7450_v10  ;;  %6596 = vmatprep.subr.bf16.mxu0 %v10243_v1  ;;  %v539_v10 = vsel %vm504_vm1, %v529_v50, %v538_v2  ;;  %v912_v35 = vsel %vm903_vm2, %v909_v7, %v911_v28 }
  0x1f   : > { %6680 = vmatprep.subr.bf16.mxu1 %v10243_v1  ;;  %v547_v21 = vor.u32 %v546_v15, %v543_v11  ;;  %v365_v15 = vld [vmem:[%s7780_s22 + $0x48] sm:$0xf] }
  0x21   : > { %6597 = vmatpush3.bf16.msra.mxu0 %v7451_v16  ;;  %v7925_v16 = vcombine.low %v7906_v5, %v7909_v6 }
  0x22   : > { %6681 = vmatpush3.bf16.msra.mxu1 %v7452_v18  ;;  %6598 = vmatprep.subr.bf16.mxu0 %v10243_v1  ;;  %v7475_v18 = vld [vmem:[%s10235_s1 + $0x98] sm:$0xff]  }
  0x23   : > { %6682 = vmatprep.subr.bf16.mxu1 %v10243_v1  ;;  %v550_v22 = vshrl.u32 %v7925_v16, 16  ;;  %v913_v40 = vrot.slane %v7925_v16, 3 }
  0x25   : > { %6599 = vmatpush3.bf16.msra.mxu0 %v7453_v24  ;;  %v553_v24 = vshll.u32 %v7925_v16, 16  ;;  %v914_v57 = vsel %vm903_vm2, %v911_v28, %v913_v40  ;;  %v366_v16 = vld [vmem:[%s7780_s22 + $0x4c] sm:$0xf] }
  0x26   : > { %6683 = vmatpush3.bf16.msra.mxu1 %v7454_v27  ;;  %6600 = vmatprep.subr.bf16.mxu0 %v10243_v1  ;;  %v7946_v27 = vld [vmem:[%s7780_s22 + $0x34] sm:$0xf] }
  0x27   : > { %6684 = vmatprep.subr.bf16.mxu1 %v10243_v1  ;;  %v7960_v31 = vcombine.low %v7943_v25, %v7946_v27  ;;  %v555_v34 = vrot.slane %v553_v24, 4  ;;  %v5671_v24 = vcombine.low %v365_v15, %v366_v16 }
  0x29   : > { %6601 = vmatpush3.bf16.msra.mxu0 %v7455_v32  ;;  %v548_v32 = vsel %vm504_vm1, %v538_v2, %v547_v21  ;;  %v559_v41 = vshrl.u32 %v7960_v31, 16  ;;  %v562_v45 = vshll.u32 %v7960_v31, 16  ;;  %v5716_v2 = vcombine.low %v7845_v39, %v7876_v55  ;;  %v8276_v39 = vld [vmem:[%s7780_s22 + $0x44] sm:$0xf] }
  0x2a   : > { %6685 = vmatpush3.bf16.msra.mxu1 %v7456_v33  ;;  %6754 = vmatprep.subr.bf16.mxu0 %v10243_v1  ;;  %v552_v33 = vrot.slane %v550_v22, 3  ;;  %v915_v3 = vrot.slane %v7960_v31, 3  ;;  %v5718_v22 = vcombine.low %v7909_v6, %v7943_v25  ;;  %v7541_v55 = vld [vmem:[%s10235_s1 + $0x140] sm:$0xff]  }
  0x2b   : > { %6838 = vmatprep.subr.bf16.mxu1 %v10243_v1  ;;  %v564_v53 = vrot.slane %v562_v45, 4 }
  0x2c   : > { %6603 = vmatmul.mubr.bf16.vlgmr.msra.gmra.mxu0 %v521_v43  ;;  %v7978_v43 = vld [vmem:[%s7780_s22 + $0x3c] sm:$0xf]  ;;  %v916_v11 = vsel %vm903_vm2, %v913_v40, %v915_v3  ;;  %v5719_v40 = vcombine.low %v7946_v27, %v7975_v42 }
  0x2d   : > { %6687 = vmatmul.mubr.bf16.vlgmr.msra.gmra.mxu1 %v906_v47  ;;  %6755 = vmatpush3.bf16.msra.mxu0 %v7459_v44  ;;  %v556_v44 = vor.u32 %v555_v34, %v552_v33  ;;  %v7988_v47 = vld [vmem:[%s7780_s22 + $0xc] sm:$0xf]  ;;  %v586_v33 = vshrl.u32 %v5671_v24, 16  ;;  %v589_v34 = vshll.u32 %v5671_v24, 16 }
  0x2e   : > { %6839 = vmatpush3.bf16.msra.mxu1 %v7460_v48  ;;  %6606 = vmatprep.mubr.msk.bf16.mxu0 %vm7688_vm0, %v10243_v1  ;;  %v7993_v48 = vld [vmem:[%s7780_s22 + $0x10] sm:$0xf] }
  0x2f   : > { %6690 = vmatprep.mubr.msk.bf16.mxu1 %vm7688_vm0, %v10243_v1  ;;  %6756 = vmatprep.subr.bf16.mxu0 %v10243_v1  ;;  %v557_v51 = vsel %vm504_vm1, %v547_v21, %v556_v44  ;;  %v591_v45 = vrot.slane %v589_v34, 4 }
  0x30   : > { %6840 = vmatprep.subr.bf16.mxu1 %v10243_v1 }
  0x31   : > { %6757 = vmatpush3.bf16.msra.mxu0 %v7463_v52  ;;  %v561_v52 = vrot.slane %v559_v41, 3 }
  0x32   : > { %6841 = vmatpush3.bf16.msra.mxu1 %v7464_v54  ;;  %6758 = vmatprep.subr.bf16.mxu0 %v10243_v1  ;;  %v5669_v54 = vcombine.low %v7975_v42, %v7978_v43 }
  0x33   : > { %6842 = vmatprep.subr.bf16.mxu1 %v10243_v1  ;;  %v565_v59 = vor.u32 %v564_v53, %v561_v52 }
  0x34   : > { %6607 = vmatmul.mubr.bf16.gmra.mxu0 %v530_v58  ;;  %v5715_v58 = vcombine.low %v7822_v26, %v7842_v38  ;;  %v568_v60 = vshrl.u32 %v5669_v54, 16  ;;  %v917_v21 = vrot.slane %v5669_v54, 3  ;;  %v8244_v26 = vld [vmem:[%s7780_s22 + $0x3c] sm:$0xf]  ;;  %v7529_v38 = vld [vmem:[%s10235_s1 + $0x150] sm:$0xff]  }
  0x35   : > { %6691 = vmatmul.mubr.bf16.gmra.mxu1 %v908_v62  ;;  %6610 = vmatprep.mubr.msk.bf16.mxu0 %vm7688_vm0, %v10243_v1  ;;  %v571_v62 = vshll.u32 %v5669_v54, 16  ;;  %v370_v54 = vld [vmem:[%s7780_s22 + $0x5c] sm:$0xf] }
  0x36   : > { %6694 = vmatprep.mubr.msk.bf16.mxu1 %vm7688_vm0, %v10243_v1  ;;  %6759 = vmatpush3.bf16.msra.mxu0 %v7467_v63  ;;  %v8013_v63 = vld [vmem:[%s7780_s22 + $0x40] sm:$0xf]  ;;  %v918_v31 = vsel %vm903_vm2, %v915_v3, %v917_v21 }
  0x37   : > { %6843 = vmatpush3.bf16.msra.mxu1 %v7468_v0  ;;  %6760 = vmatprep.subr.bf16.mxu0 %v10243_v1  ;;  %v364_v0 = vld [vmem:[%s7780_s22 + $0x44] sm:$0xf]  ;;  %v5720_v15 = vcombine.low %v7978_v43, %v8013_v63 }
  0x38   : > { %6844 = vmatprep.subr.bf16.mxu1 %v10243_v1  ;;  %v5670_v7 = vcombine.low %v8013_v63, %v364_v0 }
  0x3a   : > { %6761 = vmatpush3.bf16.msra.mxu0 %v7471_v8  ;;  %v566_v8 = vsel %vm504_vm1, %v556_v44, %v565_v59  ;;  %v588_v44 = vrot.slane %v586_v33, 3 }
  0x3b   : > { %6845 = vmatpush3.bf16.msra.mxu1 %v7472_v9  ;;  %6762 = vmatprep.subr.bf16.mxu0 %v10243_v1  ;;  %v570_v9 = vrot.slane %v568_v60, 3 }
  0x3c   : > { %6611 = vmatmul.mubr.bf16.gmra.mxu0 %v539_v10  ;;  %6846 = vmatprep.subr.bf16.mxu1 %v10243_v1  ;;  %v573_v10 = vrot.slane %v571_v62, 4 }
  0x3d   : > { %6695 = vmatmul.mubr.bf16.gmra.mxu1 %v910_v17  ;;  %6614 = vmatprep.mubr.msk.bf16.mxu0 %vm7688_vm0, %v10243_v1  ;;  %v577_v17 = vshrl.u32 %v5670_v7, 16 }
  0x3e   : > { %6698 = vmatprep.mubr.msk.bf16.mxu1 %vm7688_vm0, %v10243_v1  ;;  %6763 = vmatpush3.bf16.msra.mxu0 %v7475_v18  ;;  %v580_v18 = vshll.u32 %v5670_v7, 16 }
  0x3f   : > { %6847 = vmatpush3.bf16.msra.mxu1 %v7476_v19  ;;  %6764 = vmatprep.subr.bf16.mxu0 %v10243_v1  ;;  %v574_v19 = vor.u32 %v573_v10, %v570_v9  ;;  %v579_v28 = vrot.slane %v577_v17, 3 }
  0x40   : > { %6848 = vmatprep.subr.bf16.mxu1 %v10243_v1 }
  0x42   : > { %6765 = vmatpush3.bf16.msra.mxu0 %v7479_v29  ;;  %v582_v29 = vrot.slane %v580_v18, 4 }
  0x43   : > { %6849 = vmatpush3.bf16.msra.mxu1 %v7481_v30  ;;  %6766 = vmatprep.subr.bf16.mxu0 %v10243_v1  ;;  %v575_v30 = vsel %vm504_vm1, %v565_v59, %v574_v19  ;;  %v921_v59 = vrot.slane %v5671_v24, 3 }
  0x44   : > { %6615 = vmatmul.mubr.bf16.gmra.mxu0 %v548_v32  ;;  %6850 = vmatprep.subr.bf16.mxu1 %v10243_v1  ;;  %v367_v32 = vld [vmem:[%s7780_s22 + $0x50] sm:$0xf] }
  0x45   : > { %6699 = vmatmul.mubr.bf16.gmra.mxu1 %v912_v35  ;;  %6618 = vmatprep.mubr.msk.bf16.mxu0 %vm7688_vm0, %v10243_v1  ;;  %v368_v35 = vld [vmem:[%s7780_s22 + $0x54] sm:$0xf] }
  0x46   : > { %6702 = vmatprep.mubr.msk.bf16.mxu1 %vm7688_vm0, %v10243_v1  ;;  %6767 = vmatpush3.bf16.msra.mxu0 %v7483_v36  ;;  %v583_v36 = vor.u32 %v582_v29, %v579_v28  ;;  %v5672_v41 = vcombine.low %v367_v32, %v368_v35  ;;  %v373_v29 = vld [vmem:[%s7780_s22 + $0x68] sm:$0xf]  ;;  %v374_v32 = vld [vmem:[%s7780_s22 + $0x6c] sm:$0xf] }
  0x47   : > { %6851 = vmatpush3.bf16.msra.mxu1 %v7485_v37  ;;  %6768 = vmatprep.subr.bf16.mxu0 %v10243_v1  ;;  %v919_v37 = vrot.slane %v5670_v7, 3  ;;  %v5675_v35 = vcombine.low %v373_v29, %v374_v32  ;;  %v8098_v29 = vld [vmem:[%s7780_s22 + $0x84] sm:$0xf] }
  0x48   : > { %6852 = vmatprep.subr.bf16.mxu1 %v10243_v1  ;;  %v595_v52 = vshrl.u32 %v5672_v41, 16  ;;  %v598_v53 = vshll.u32 %v5672_v41, 16  ;;  %v923_v17 = vrot.slane %v5672_v41, 3 }
  0x49   : > { %v922_v7 = vsel %vm903_vm2, %v919_v37, %v921_v59 }
  0x4a   : > { %6769 = vmatpush3.bf16.msra.mxu0 %v7488_v46  ;;  %v584_v46 = vsel %vm504_vm1, %v574_v19, %v583_v36  ;;  %v597_v62 = vrot.slane %v595_v52, 3  ;;  %v600_v0 = vrot.slane %v598_v53, 4  ;;  %v924_v28 = vsel %vm903_vm2, %v921_v59, %v923_v17 }
  0x4b   : > { %6853 = vmatpush3.bf16.msra.mxu1 %v7489_v49  ;;  %6922 = vmatprep.subr.bf16.mxu0 %v10243_v1  ;;  %v920_v49 = vsel %vm903_vm2, %v917_v21, %v919_v37 }
  0x4c   : > { %6619 = vmatmul.mubr.bf16.gmra.mxu0 %v557_v51  ;;  %7006 = vmatprep.subr.bf16.mxu1 %v10243_v1  ;;  %v369_v51 = vld [vmem:[%s7780_s22 + $0x58] sm:$0xf]  ;;  %v601_v16 = vor.u32 %v600_v0, %v597_v62 }
  0x4d   : > { %6703 = vmatmul.mubr.bf16.gmra.mxu1 %v914_v57  ;;  %6622 = vmatprep.mubr.msk.bf16.mxu0 %vm7688_vm0, %v10243_v1  ;;  %v592_v57 = vor.u32 %v591_v45, %v588_v44  ;;  %v5673_v60 = vcombine.low %v369_v51, %v370_v54  ;;  %v622_v45 = vshrl.u32 %v5675_v35, 16  ;;  %v376_v51 = vld [vmem:[%s7780_s22 + $0x74] sm:$0xf]  ;;  %v8084_v0 = vld [vmem:[%s7780_s22 + $0x78] sm:$0xf] }
  0x4e   : > { %6706 = vmatprep.mubr.msk.bf16.mxu1 %vm7688_vm0, %v10243_v1 }
  0x4f   : > { %v593_v3 = vsel %vm504_vm1, %v583_v36, %v592_v57  ;;  %v604_v9 = vshrl.u32 %v5673_v60, 16  ;;  %v607_v10 = vshll.u32 %v5673_v60, 16  ;;  %v602_v24 = vsel %vm504_vm1, %v592_v57, %v601_v16 }
  0x50   : > { %v925_v34 = vrot.slane %v5673_v60, 3  ;;  %v624_v57 = vrot.slane %v622_v45, 3 }
  0x51   : > { %v606_v19 = vrot.slane %v604_v9, 3  ;;  %v609_v21 = vrot.slane %v607_v10, 4  ;;  %v929_v10 = vrot.slane %v5675_v35, 3 }
  0x52   : > { %v926_v44 = vsel %vm903_vm2, %v923_v17, %v925_v34 }
  0x53   : > { %v610_v33 = vor.u32 %v609_v21, %v606_v19 }
  0x54   : > { %6623 = vmatmul.mubr.bf16.gmra.mxu0 %v566_v8  ;;  %v371_v8 = vld [vmem:[%s7780_s22 + $0x60] sm:$0xf] }
  0x55   : > { %6707 = vmatmul.mubr.bf16.gmra.mxu1 %v916_v11  ;;  %6626 = vmatprep.mubr.msk.bf16.mxu0 %vm7688_vm0, %v10243_v1  ;;  %v372_v11 = vld [vmem:[%s7780_s22 + $0x64] sm:$0xf]  ;;  %v611_v41 = vsel %vm504_vm1, %v601_v16, %v610_v33 }
  0x56   : > { %6710 = vmatprep.mubr.msk.bf16.mxu1 %vm7688_vm0, %v10243_v1  ;;  %v5674_v18 = vcombine.low %v371_v8, %v372_v11  ;;  %v378_v8 = vld [vmem:[%s7780_s22 + $0x7c] sm:$0xf] }
  0x57   : > { %v5677_v11 = vcombine.low %v8084_v0, %v378_v8 }
  0x58   : > { %v927_v53 = vrot.slane %v5674_v18, 3 }
  0x59   : > { %v640_v21 = vshrl.u32 %v5677_v11, 16 }
  0x5a   : > { %v928_v62 = vsel %vm903_vm2, %v925_v34, %v927_v53  ;;  %v930_v19 = vsel %vm903_vm2, %v927_v53, %v929_v10 }
  0x5c   : > { %6627 = vmatmul.mubr.bf16.gmra.mxu0 %v575_v30  ;;  %v613_v30 = vshrl.u32 %v5674_v18, 16 }
  0x5d   : > { %6711 = vmatmul.mubr.bf16.gmra.mxu1 %v918_v31  ;;  %6630 = vmatprep.mubr.msk.bf16.mxu0 %vm7688_vm0, %v10243_v1  ;;  %v616_v31 = vshll.u32 %v5674_v18, 16 }
  0x5e   : > { %6714 = vmatprep.mubr.msk.bf16.mxu1 %vm7688_vm0, %v10243_v1  ;;  %v615_v36 = vrot.slane %v613_v30, 3 }
  0x5f   : > { %v618_v37 = vrot.slane %v616_v31, 4 }
  0x61   : > { %v619_v52 = vor.u32 %v618_v37, %v615_v36  ;;  %v8109_v37 = vld [vmem:[%s7780_s22 + $0x88] sm:$0xf] }
  0x63   : > { %v620_v60 = vsel %vm504_vm1, %v610_v33, %v619_v52  ;;  %v642_v33 = vrot.slane %v640_v21, 3 }
  0x64   : > { %6631 = vmatmul.mubr.bf16.gmra.mxu0 %v584_v46  ;;  %v625_v46 = vshll.u32 %v5675_v35, 16 }
  0x65   : > { %6715 = vmatmul.mubr.bf16.gmra.mxu1 %v920_v49  ;;  %6634 = vmatprep.mubr.msk.bf16.mxu0 %vm7688_vm0, %v10243_v1  ;;  %v8073_v49 = vld [vmem:[%s7780_s22 + $0x70] sm:$0xf] }
  0x66   : > { %6718 = vmatprep.mubr.msk.bf16.mxu1 %vm7688_vm0, %v10243_v1  ;;  %v5676_v54 = vcombine.low %v8073_v49, %v376_v51  ;;  %v627_v59 = vrot.slane %v625_v46, 4  ;;  %v1475_v51 = vld [vmem:[%s7780_s22 + $0x8] sm:$0x8] }
  0x68   : > { %v628_v9 = vor.u32 %v627_v59, %v624_v57  ;;  %v931_v31 = vrot.slane %v5676_v54, 3 }
  0x6a   : > { %v629_v18 = vsel %vm504_vm1, %v619_v52, %v628_v9  ;;  %v932_v36 = vsel %vm903_vm2, %v929_v10, %v931_v31  ;;  %v5679_v52 = vcombine.low %v8109_v37, %v8109_v37 }
  0x6c   : > { %6635 = vmatmul.mubr.bf16.gmra.mxu0 %v593_v3  ;;  %v631_v3 = vshrl.u32 %v5676_v54, 16 }
  0x6d   : > { %6719 = vmatmul.mubr.bf16.gmra.mxu1 %v922_v7  ;;  %6638 = vmatprep.mubr.msk.bf16.mxu0 %vm7688_vm0, %v10243_v1  ;;  %v634_v7 = vshll.u32 %v5676_v54, 16 }
  0x6e   : > { %6722 = vmatprep.mubr.msk.bf16.mxu1 %vm7688_vm0, %v10243_v1  ;;  %v633_v16 = vrot.slane %v631_v3, 3  ;;  %v661_v3 = vshll.u32 %v5679_v52, 16 }
  0x6f   : > { %v636_v17 = vrot.slane %v634_v7, 4  ;;  %v8122_v7 = vld [vmem:[%s7780_s22 + $0x14] sm:$0xf] }
  0x71   : > { %v637_v30 = vor.u32 %v636_v17, %v633_v16  ;;  %v5755_v17 = vcombine.low %v7993_v48, %v8122_v7 }
  0x73   : > { %v638_v35 = vsel %vm504_vm1, %v628_v9, %v637_v30  ;;  %v7491_v9 = vld [vmem:[%s7780_s22 + $0x88] ss:$0 sps:$4 sm:$0x77]  }
  0x74   : > { %6639 = vmatmul.mubr.bf16.gmra.mxu0 %v602_v24  ;;  %v643_v24 = vshll.u32 %v5677_v11, 16 }
  0x75   : > { %6723 = vmatmul.mubr.bf16.gmra.mxu1 %v924_v28  ;;  %6642 = vmatprep.mubr.msk.bf16.mxu0 %vm7688_vm0, %v10243_v1  ;;  %v8095_v28 = vld [vmem:[%s7780_s22 + $0x80] sm:$0xf] }
  0x76   : > { %6726 = vmatprep.mubr.msk.bf16.mxu1 %vm7688_vm0, %v10243_v1  ;;  %v5678_v32 = vcombine.low %v8095_v28, %v8098_v29  ;;  %v645_v34 = vrot.slane %v643_v24, 4 }
  0x78   : > { %v652_v45 = vshll.u32 %v5678_v32, 16  ;;  %v646_v46 = vor.u32 %v645_v34, %v642_v33  ;;  %v935_v10 = vrot.slane %v5678_v32, 3  ;;  %v1627_v33 = vshll.u32 %v5755_v17, 16  ;;  %v8136_v34 = vld [vmem:[%s7780_s22 + $0x18] sm:$0xf] }
  0x7a   : > { %v654_v54 = vrot.slane %v652_v45, 4  ;;  %v647_v57 = vsel %vm504_vm1, %v637_v30, %v646_v46  ;;  %v937_v30 = vrot.slane %v7491_v9, 3  ;;  %v1629_v45 = vrot.slane %v1627_v33, 4  ;;  %v7497_v9 = vld [vmem:[%s10235_s1 + $0x178] sm:$0xff]  }
  0x7b   : > { %v5758_v33 = vcombine.low %v8181_v12, %v8184_v13 }
  0x7c   : > { %6643 = vmatmul.mubr.bf16.gmra.mxu0 %v611_v41  ;;  %v933_v41 = vrot.slane %v5677_v11, 3 }
  0x7d   : > { %6727 = vmatmul.mubr.bf16.gmra.mxu1 %v926_v44  ;;  %6646 = vmatprep.mubr.msk.bf16.mxu0 %vm7688_vm0, %v10243_v1  ;;  %v649_v44 = vshrl.u32 %v5678_v32, 16 }
  0x7e   : > { %6730 = vmatprep.mubr.msk.bf16.mxu1 %vm7688_vm0, %v10243_v1  ;;  %v934_v59 = vsel %vm903_vm2, %v931_v31, %v933_v41  ;;  %v936_v24 = vsel %vm903_vm2, %v933_v41, %v935_v10  ;;  %v1624_v31 = vshrl.u32 %v5755_v17, 16  ;;  %v7502_v17 = vld [vmem:[%s10235_s1 + $0x130] sm:$0xff]  }
  0x7f   : > { %v651_v53 = vrot.slane %v649_v44, 3 }
  0x80   : > { %v1626_v44 = vrot.slane %v1624_v31, 3 }
  0x81   : > { %v655_v8 = vor.u32 %v654_v54, %v651_v53 }
  0x82   : > { %v1630_v54 = vor.u32 %v1629_v45, %v1626_v44  ;;  %v1651_v44 = vshrl.u32 %v5758_v33, 16  ;;  %v1654_v45 = vshll.u32 %v5758_v33, 16  ;;  %v8273_v33 = vld [vmem:[%s7780_s22 + $0x40] sm:$0xf] }
  0x83   : > { %v656_v21 = vsel %vm504_vm1, %v646_v46, %v655_v8 }
  0x84   : > { %6647 = vmatmul.mubr.bf16.gmra.mxu0 %v620_v60  ;;  %v5754_v60 = vcombine.low %v1475_v51, %v7988_v47  ;;  %v938_v51 = vsel %vm903_vm2, %v935_v10, %v937_v30 }
  0x85   : > { %6731 = vmatmul.mubr.bf16.gmra.mxu1 %v928_v62  ;;  %6650 = vmatprep.mubr.msk.bf16.mxu0 %vm7688_vm0, %v10243_v1  ;;  %v658_v62 = vshrl.u32 %v5679_v52, 16 }
  0x86   : > { %6734 = vmatprep.mubr.msk.bf16.mxu1 %vm7688_vm0, %v10243_v1  ;;  %v1616_v11 = vshrl.u32 %v5754_v60, 16  ;;  %v1619_v16 = vshll.u32 %v5754_v60, 16  ;;  %v8152_v60 = vld [vmem:[%s7780_s22 + $0x20] sm:$0xf] }
  0x88   : > { %v1621_v41 = vrot.slane %v1619_v16, 4 }
  0x8c   : > { %6651 = vmatmul.mubr.bf16.gmra.mxu0 %v629_v18  ;;  %v660_v18 = vrot.slane %v658_v62, 3  ;;  %v8155_v62 = vld [vmem:[%s7780_s22 + $0x24] sm:$0xf] }
  0x8d   : > { %6735 = vmatmul.mubr.bf16.gmra.mxu1 %v930_v19  ;;  %6654 = vmatprep.mubr.msk.bf16.mxu0 %vm7688_vm0, %v10243_v1  ;;  %v663_v19 = vrot.slane %v661_v3, 4  ;;  %v7496_v3 = vld [vmem:[%s10235_s1 + $0x138] sm:$0xff]   ;;  %v5757_v16 = vcombine.low %v8152_v60, %v8155_v62 }
  0x8e   : > { %6738 = vmatprep.mubr.msk.bf16.mxu1 %vm7688_vm0, %v10243_v1 }
  0x8f   : > { %v664_v32 = vor.u32 %v663_v19, %v660_v18  ;;  %v1642_v19 = vshrl.u32 %v5757_v16, 16 }
  0x91   : > { %v665_v46 = vsel %vm504_vm1, %v655_v8, %v664_v32  ;;  %v1644_v30 = vrot.slane %v1642_v19, 3  ;;  %v7508_v32 = vld [vmem:[%s10235_s1 + $0x128] sm:$0xff]  }
  0x92   : > { %v7532_v19 = vld [vmem:[%s10235_s1 + $0x108] sm:$0xff]  }
  0x94   : > { %6655 = vmatmul.mubr.bf16.gmra.mxu0 %v638_v35  ;;  %v8139_v35 = vld [vmem:[%s7780_s22 + $0x1c] sm:$0xf] }
  0x95   : > { %6739 = vmatmul.mubr.bf16.gmra.mxu1 %v932_v36  ;;  %6658 = vmatprep.mubr.msk.bf16.mxu0 %vm7688_vm0, %v10243_v1  ;;  %v1618_v36 = vrot.slane %v1616_v11, 3  ;;  %v5756_v52 = vcombine.low %v8136_v34, %v8139_v35 }
  0x96   : > { %6742 = vmatprep.mubr.msk.bf16.mxu1 %vm7688_vm0, %v10243_v1 }
  0x97   : > { %v1622_v53 = vor.u32 %v1621_v41, %v1618_v36  ;;  %v7509_v36 = vld [vmem:[%s10235_s1 + $0x168] sm:$0xff]  }
  0x99   : > { %v1631_v8 = vsel %vm504_vm1, %v1622_v53, %v1630_v54  ;;  %v1656_v53 = vrot.slane %v1654_v45, 4 }
  0x9c   : > { %6659 = vmatmul.mubr.bf16.gmra.mxu0 %v647_v57  ;;  %v1633_v57 = vshrl.u32 %v5756_v52, 16 }
  0x9d   : > { %6743 = vmatmul.mubr.bf16.gmra.mxu1 %v934_v59  ;;  %6662 = vmatprep.mubr.msk.bf16.mxu0 %vm7688_vm0, %v10243_v1  ;;  %v1636_v59 = vshll.u32 %v5756_v52, 16  ;;  %v8212_v52 = vld [vmem:[%s7780_s22 + $0x34] sm:$0xf] }
  0x9e   : > { %6746 = vmatprep.mubr.msk.bf16.mxu1 %vm7688_vm0, %v10243_v1  ;;  %v1635_v10 = vrot.slane %v1633_v57, 3  ;;  %v7520_v57 = vld [vmem:[%s10235_s1 + $0x118] sm:$0xff]  }
  0x9f   : > { %v1638_v11 = vrot.slane %v1636_v59, 4  ;;  %v7521_v59 = vld [vmem:[%s10235_s1 + $0x158] sm:$0xff]  }
  0xa1   : > { %v1639_v18 = vor.u32 %v1638_v11, %v1635_v10  ;;  %v7526_v10 = vld [vmem:[%s10235_s1 + $0x110] sm:$0xff]   ;;  %v8241_v11 = vld [vmem:[%s7780_s22 + $0x38] sm:$0xf] }
  0xa4   : > { %6663 = vmatmul.mubr.bf16.gmra.mxu0 %v656_v21  ;;  %v1645_v21 = vshll.u32 %v5757_v16, 16 }
  0xa5   : > { %6747 = vmatmul.mubr.bf16.gmra.mxu1 %v936_v24  ;;  %6666 = vmatprep.mubr.msk.bf16.mxu0 %vm7688_vm0, %v10243_v1  ;;  %v7503_v24 = vld [vmem:[%s10235_s1 + $0x170] sm:$0xff]  }
  0xa6   : > { %6750 = vmatprep.mubr.msk.bf16.mxu1 %vm7688_vm0, %v10243_v1  ;;  %v1647_v31 = vrot.slane %v1645_v21, 4  ;;  %v7535_v21 = vld [vmem:[%s10235_s1 + $0x148] sm:$0xff]  }
  0xa8   : > { %v1648_v41 = vor.u32 %v1647_v31, %v1644_v30  ;;  %v7540_v31 = vld [vmem:[%s10235_s1 + $0x100] sm:$0xff]  }
  0xaa   : > { %v1649_v23 = vsel %vm504_vm1, %v1639_v18, %v1648_v41 }
  0xac   : > { %6667 = vmatmul.mubr.bf16.gmra.mxu0 %v665_v46  ;;  %v7514_v46 = vld [vmem:[%s10235_s1 + $0x120] sm:$0xff]  }
  0xad   : > { %6751 = vmatmul.mubr.bf16.gmra.mxu1 %v938_v51  ;;  %6770 = vmatprep.mubr.msk.bf16.mxu0 %vm7688_vm0, %v10243_v1  ;;  %v8209_v51 = vld [vmem:[%s7780_s22 + $0x30] sm:$0xf] }
  0xae   : > { %6854 = vmatprep.mubr.msk.bf16.mxu1 %vm7688_vm0, %v10243_v1 }
  0xb4   : > { %6771 = vmatmul.mubr.bf16.vlgmr.msra.gmra.mxu0 %v5713_v61  ;;  %v1640_v61 = vsel %vm504_vm1, %v1630_v54, %v1639_v18  ;;  %v5759_v54 = vcombine.low %v8209_v51, %v8212_v52  ;;  %v5760_v18 = vcombine.low %v8241_v11, %v8244_v26 }
  0xb5   : > { %6855 = vmatmul.mubr.bf16.vlgmr.msra.gmra.mxu1 %v1631_v8  ;;  %6923 = vmatpush3.bf16.msra.mxu0 %v7496_v3 }
  0xb6   : > { %7007 = vmatpush3.bf16.msra.mxu1 %v7497_v9  ;;  %6774 = vmatprep.mubr.msk.bf16.mxu0 %vm7688_vm0, %v10243_v1  ;;  %v1660_v8 = vshrl.u32 %v5759_v54, 16  ;;  %v1663_v9 = vshll.u32 %v5759_v54, 16  ;;  %v1672_v30 = vshll.u32 %v5760_v18, 16 }
  0xb7   : > { %6858 = vmatprep.mubr.msk.bf16.mxu1 %vm7688_vm0, %v10243_v1  ;;  %6924 = vmatprep.subr.bf16.mxu0 %v10243_v1 }
  0xb8   : > { %7008 = vmatprep.subr.bf16.mxu1 %v10243_v1  ;;  %v1662_v16 = vrot.slane %v1660_v8, 3 }
  0xb9   : > { %6925 = vmatpush3.bf16.msra.mxu0 %v7502_v17  ;;  %v1665_v17 = vrot.slane %v1663_v9, 4 }
  0xba   : > { %7009 = vmatpush3.bf16.msra.mxu1 %v7503_v24  ;;  %6926 = vmatprep.subr.bf16.mxu0 %v10243_v1 }
  0xbb   : > { %7010 = vmatprep.subr.bf16.mxu1 %v10243_v1  ;;  %v1666_v24 = vor.u32 %v1665_v17, %v1662_v16  ;;  %v8331_v16 = vld [vmem:[%s7780_s22 + $0x5c] sm:$0xf] }
  0xbc   : > { %6775 = vmatmul.mubr.bf16.gmra.mxu0 %v5714_v20  ;;  %v1653_v20 = vrot.slane %v1651_v44, 3 }
  0xbd   : > { %6859 = vmatmul.mubr.bf16.gmra.mxu1 %v1640_v61  ;;  %6778 = vmatprep.mubr.msk.bf16.mxu0 %vm7688_vm0, %v10243_v1  ;;  %v1669_v61 = vshrl.u32 %v5760_v18, 16 }
  0xbe   : > { %6862 = vmatprep.mubr.msk.bf16.mxu1 %vm7688_vm0, %v10243_v1  ;;  %6927 = vmatpush3.bf16.msra.mxu0 %v7508_v32  ;;  %v1657_v3 = vor.u32 %v1656_v53, %v1653_v20 }
  0xbf   : > { %7011 = vmatpush3.bf16.msra.mxu1 %v7509_v36  ;;  %6928 = vmatprep.subr.bf16.mxu0 %v10243_v1  ;;  %v1671_v32 = vrot.slane %v1669_v61, 3  ;;  %v1674_v36 = vrot.slane %v1672_v30, 4 }
  0xc0   : > { %7012 = vmatprep.subr.bf16.mxu1 %v10243_v1 }
  0xc1   : > { %v1675_v44 = vor.u32 %v1674_v36, %v1671_v32  ;;  %v7664_v32 = vld [vmem:[%s7780_s22 + $0x48] sm:$0xf] }
  0xc2   : > { %6929 = vmatpush3.bf16.msra.mxu0 %v7514_v46 }
  0xc3   : > { %7013 = vmatpush3.bf16.msra.mxu1 %v7515_v14  ;;  %6930 = vmatprep.subr.bf16.mxu0 %v10243_v1  ;;  %v8296_v14 = vld [vmem:[%s7780_s22 + $0x48] sm:$0xf]  ;;  %v1676_v56 = vsel %vm504_vm1, %v1666_v24, %v1675_v44 }
  0xc4   : > { %6779 = vmatmul.mubr.bf16.gmra.mxu0 %v5715_v58  ;;  %7014 = vmatprep.subr.bf16.mxu1 %v10243_v1  ;;  %v1658_v58 = vsel %vm504_vm1, %v1648_v41, %v1657_v3  ;;  %v5761_v41 = vcombine.low %v8273_v33, %v8276_v39 }
  0xc5   : > { %6863 = vmatmul.mubr.bf16.gmra.mxu1 %v1649_v23  ;;  %6782 = vmatprep.mubr.msk.bf16.mxu0 %vm7688_vm0, %v10243_v1  ;;  %v8299_v23 = vld [vmem:[%s7780_s22 + $0x4c] sm:$0xf] }
  0xc6   : > { %6866 = vmatprep.mubr.msk.bf16.mxu1 %vm7688_vm0, %v10243_v1  ;;  %6931 = vmatpush3.bf16.msra.mxu0 %v7520_v57  ;;  %v1678_v45 = vshrl.u32 %v5761_v41, 16  ;;  %v1681_v46 = vshll.u32 %v5761_v41, 16  ;;  %v5762_v20 = vcombine.low %v8296_v14, %v8299_v23 }
  0xc7   : > { %7015 = vmatpush3.bf16.msra.mxu1 %v7521_v59  ;;  %6932 = vmatprep.subr.bf16.mxu0 %v10243_v1  ;;  %v8312_v59 = vld [vmem:[%s7780_s22 + $0x50] sm:$0xf] }
  0xc8   : > { %7016 = vmatprep.subr.bf16.mxu1 %v10243_v1  ;;  %v1680_v5 = vrot.slane %v1678_v45, 3  ;;  %v1687_v54 = vshrl.u32 %v5762_v20, 16  ;;  %v1690_v57 = vshll.u32 %v5762_v20, 16 }
  0xca   : > { %6933 = vmatpush3.bf16.msra.mxu0 %v7526_v10  ;;  %v1689_v6 = vrot.slane %v1687_v54, 3  ;;  %v1692_v25 = vrot.slane %v1690_v57, 4 }
  0xcb   : > { %7017 = vmatpush3.bf16.msra.mxu1 %v7529_v38  ;;  %6934 = vmatprep.subr.bf16.mxu0 %v10243_v1 }
  0xcc   : > { %6783 = vmatmul.mubr.bf16.gmra.mxu0 %v5716_v2  ;;  %7018 = vmatprep.subr.bf16.mxu1 %v10243_v1  ;;  %v1667_v2 = vsel %vm504_vm1, %v1657_v3, %v1666_v24  ;;  %v8315_v3 = vld [vmem:[%s7780_s22 + $0x54] sm:$0xf]  ;;  %v1693_v9 = vor.u32 %v1692_v25, %v1689_v6 }
  0xcd   : > { %6867 = vmatmul.mubr.bf16.gmra.mxu1 %v1658_v58  ;;  %6786 = vmatprep.mubr.msk.bf16.mxu0 %vm7688_vm0, %v10243_v1  ;;  %v8328_v58 = vld [vmem:[%s7780_s22 + $0x58] sm:$0xf] }
  0xce   : > { %6870 = vmatprep.mubr.msk.bf16.mxu1 %vm7688_vm0, %v10243_v1  ;;  %6935 = vmatpush3.bf16.msra.mxu0 %v7532_v19 }
  0xcf   : > { %7019 = vmatpush3.bf16.msra.mxu1 %v7535_v21  ;;  %6936 = vmatprep.subr.bf16.mxu0 %v10243_v1 }
  0xd0   : > { %7020 = vmatprep.subr.bf16.mxu1 %v10243_v1 }
  0xd2   : > { %6937 = vmatpush3.bf16.msra.mxu0 %v7540_v31 }
  0xd3   : > { %7021 = vmatpush3.bf16.msra.mxu1 %v7541_v55  ;;  %7090 = vmatprep.subr.bf16.mxu0 %v10243_v1  ;;  %v8346_v55 = vld [vmem:[%s7780_s22 + $0x60] sm:$0xf] }
  0xd4   : > { %6787 = vmatmul.mubr.bf16.gmra.mxu0 %v5717_v4  ;;  %7174 = vmatprep.subr.bf16.mxu1 %v10243_v1  ;;  %v1683_v4 = vrot.slane %v1681_v46, 4 }
  0xd5   : > { %6871 = vmatmul.mubr.bf16.gmra.mxu1 %v1667_v2  ;;  %6790 = vmatprep.mubr.msk.bf16.mxu0 %vm7688_vm0, %v10243_v1  ;;  %v8349_v2 = vld [vmem:[%s7780_s22 + $0x64] sm:$0xf] }
  0xd6   : > { %6874 = vmatprep.mubr.msk.bf16.mxu1 %vm7688_vm0, %v10243_v1  ;;  %v1684_v53 = vor.u32 %v1683_v4, %v1680_v5 }
  0xd8   : > { %v1685_v8 = vsel %vm504_vm1, %v1675_v44, %v1684_v53  ;;  %v1694_v17 = vsel %vm504_vm1, %v1684_v53, %v1693_v9  ;;  %v5765_v44 = vcombine.low %v8346_v55, %v8349_v2 }
  0xda   : > { %v1714_v57 = vshrl.u32 %v5765_v44, 16 }
  0xdc   : > { %6791 = vmatmul.mubr.bf16.gmra.mxu0 %v5718_v22  ;;  %v5763_v22 = vcombine.low %v8312_v59, %v8315_v3 }
  0xdd   : > { %6875 = vmatmul.mubr.bf16.gmra.mxu1 %v1676_v56  ;;  %6794 = vmatprep.mubr.msk.bf16.mxu0 %vm7688_vm0, %v10243_v1 }
  0xde   : > { %6878 = vmatprep.mubr.msk.bf16.mxu1 %vm7688_vm0, %v10243_v1  ;;  %v1696_v10 = vshrl.u32 %v5763_v22, 16  ;;  %v1699_v38 = vshll.u32 %v5763_v22, 16 }
  0xe0   : > { %v1698_v27 = vrot.slane %v1696_v10, 3  ;;  %v1701_v42 = vrot.slane %v1699_v38, 4  ;;  %v8365_v10 = vld [vmem:[%s7780_s22 + $0x68] sm:$0xf]  ;;  %v8368_v38 = vld [vmem:[%s7780_s22 + $0x6c] sm:$0xf] }
  0xe2   : > { %v1702_v61 = vor.u32 %v1701_v42, %v1698_v27  ;;  %v7665_v27 = vld [vmem:[%s7780_s22 + $0x4c] sm:$0xf]  ;;  %v7666_v42 = vld [vmem:[%s7780_s22 + $0x50] sm:$0xf] }
  0xe4   : > { %6795 = vmatmul.mubr.bf16.gmra.mxu0 %v5719_v40  ;;  %v5764_v40 = vcombine.low %v8328_v58, %v8331_v16  ;;  %v1703_v56 = vsel %vm504_vm1, %v1693_v9, %v1702_v61 }
  0xe5   : > { %6879 = vmatmul.mubr.bf16.gmra.mxu1 %v1685_v8  ;;  %6798 = vmatprep.mubr.msk.bf16.mxu0 %vm7688_vm0, %v10243_v1  ;;  %v1717_v8 = vshll.u32 %v5765_v44, 16 }
  0xe6   : > { %6882 = vmatprep.mubr.msk.bf16.mxu1 %vm7688_vm0, %v10243_v1  ;;  %v1705_v30 = vshrl.u32 %v5764_v40, 16  ;;  %v1708_v31 = vshll.u32 %v5764_v40, 16  ;;  %v5722_v40 = vcombine.low %v7665_v27, %v7666_v42 }
  0xe8   : > { %v1707_v5 = vrot.slane %v1705_v30, 3  ;;  %v1710_v4 = vrot.slane %v1708_v31, 4 }
  0xea   : > { %v1711_v22 = vor.u32 %v1710_v4, %v1707_v5  ;;  %v8384_v4 = vld [vmem:[%s7780_s22 + $0x70] sm:$0xf] }
  0xec   : > { %v765_v18 = vpop.f32.mrf.mxu0  ;;  %6799 = vmatmul.mubr.bf16.gmra.mxu0 %v5720_v15  ;;  %v7663_v15 = vld [vmem:[%s7780_s22 + $0x44] sm:$0xf] }
  0xed   : > { %v1038_v19 = vpop.f32.mrf.mxu1  ;;  %6883 = vmatmul.mubr.bf16.gmra.mxu1 %v1694_v17  ;;  %6802 = vmatprep.mubr.msk.bf16.mxu0 %vm7688_vm0, %v10243_v1  ;;  %v5721_v36 = vcombine.low %v7663_v15, %v7664_v32 }
  0xee   : > { %v8341_v21 = vadd.f32 %v1038_v19, %v765_v18  ;;  %v6604_v24 = vpop.f32.mrf.mxu0  ;;  %6886 = vmatprep.mubr.msk.bf16.mxu1 %vm7688_vm0, %v10243_v1  ;;  %v1716_v19 = vrot.slane %v1714_v57, 3  ;;  %v7668_v57 = vld [vmem:[%s7780_s22 + $0x58] sm:$0xf] }
  0xef   : > { %v6688_v43 = vpop.f32.mrf.mxu1  ;;  %v1719_v24 = vrot.slane %v1717_v8, 4 }
  0xf0   : > { %v768_v63 = vpop.f32.mrf.mxu0  ;;  %v1712_v43 = vsel %vm504_vm1, %v1702_v61, %v1711_v22 }
  0xf1   : > { %v1041_v41 = vpop.f32.mrf.mxu1 }
  0xf2   : > { %v8355_v45 = vadd.f32 %v1041_v41, %v768_v63  ;;  %v6605_v46 = vpop.f32.mrf.mxu0  ;;  %v5766_v63 = vcombine.low %v8365_v10, %v8368_v38  ;;  %v1720_v41 = vor.u32 %v1719_v24, %v1716_v19 }
  0xf3   : > { %v6689_v20 = vpop.f32.mrf.mxu1 }
  0xf4   : > { %v773_v53 = vpop.f32.mrf.mxu0  ;;  %6803 = vmatmul.mubr.bf16.gmra.mxu0 %v5721_v36  ;;  %v1723_v61 = vshrl.u32 %v5766_v63, 16  ;;  %v8387_v20 = vld [vmem:[%s7780_s22 + $0x74] sm:$0xf] }
  0xf5   : > { %v1046_v54 = vpop.f32.mrf.mxu1  ;;  %6887 = vmatmul.mubr.bf16.gmra.mxu1 %v1703_v56  ;;  %6806 = vmatprep.mubr.msk.bf16.mxu0 %vm7688_vm0, %v10243_v1  ;;  %v1726_v56 = vshll.u32 %v5766_v63, 16 }
  0xf6   : > { %v8360_v6 = vadd.f32 %v1046_v54, %v773_v53  ;;  %v6608_v25 = vpop.f32.mrf.mxu0  ;;  %6890 = vmatprep.mubr.msk.bf16.mxu1 %vm7688_vm0, %v10243_v1  ;;  %v7667_v54 = vld [vmem:[%s7780_s22 + $0x54] sm:$0xf]  ;;  %v1725_v42 = vrot.slane %v1723_v61, 3 }
  0xf7   : > { %v6692_v9 = vpop.f32.mrf.mxu1  ;;  %v5723_v8 = vcombine.low %v7667_v54, %v7668_v57 }
  0xf8   : > { %v776_v17 = vpop.f32.mrf.mxu0  ;;  %v1721_v9 = vsel %vm504_vm1, %v1711_v22, %v1720_v41 }
  0xf9   : > { %v1049_v18 = vpop.f32.mrf.mxu1 }
  0xfa   : > { %v8372_v30 = vadd.f32 %v1049_v18, %v776_v17  ;;  %v6609_v31 = vpop.f32.mrf.mxu0  ;;  %v5767_v18 = vcombine.low %v8384_v4, %v8387_v20 }
  0xfb   : > { %v6693_v15 = vpop.f32.mrf.mxu1 }
  0xfc   : > { %v781_v32 = vpop.f32.mrf.mxu0  ;;  %6807 = vmatmul.mubr.bf16.gmra.mxu0 %v5722_v40  ;;  %v1728_v40 = vrot.slane %v1726_v56, 4  ;;  %v1732_v15 = vshrl.u32 %v5767_v18, 16 }
  0xfd   : > { %v1054_v36 = vpop.f32.mrf.mxu1  ;;  %6891 = vmatmul.mubr.bf16.gmra.mxu1 %v1712_v43  ;;  %6810 = vmatprep.mubr.msk.bf16.mxu0 %vm7688_vm0, %v10243_v1 }
  0xfe   : > { %v8379_v44 = vadd.f32 %v1054_v36, %v781_v32  ;;  %v6612_v46 = vpop.f32.mrf.mxu0  ;;  %6894 = vmatprep.mubr.msk.bf16.mxu1 %vm7688_vm0, %v10243_v1  ;;  %v1729_v63 = vor.u32 %v1728_v40, %v1725_v42  ;;  %v1735_v32 = vshll.u32 %v5767_v18, 16  ;;  %v8403_v36 = vld [vmem:[%s7780_s22 + $0x78] sm:$0xf]  ;;  %v1734_v42 = vrot.slane %v1732_v15, 3 }
  0xff   : > { %v6696_v5 = vpop.f32.mrf.mxu1  ;;  %v8406_v46 = vld [vmem:[%s7780_s22 + $0x7c] sm:$0xf] }
 0x100   : > { %v784_v53 = vpop.f32.mrf.mxu0  ;;  %10319 = vst [vmem:[#allocation2_spill] sm:$0xff] %v8406_v46  ;;  %v7669_v5 = vld [vmem:[%s7780_s22 + $0x5c] sm:$0xf]  ;;  %v1737_v40 = vrot.slane %v1735_v32, 4  ;;  %v8422_v32 = vld [vmem:[%s7780_s22 + $0x80] sm:$0xf] }
 0x101   : > { %v1057_v25 = vpop.f32.mrf.mxu1  ;;  %10320 = vst [vmem:[#allocation3_spill] sm:$0xff] %v8422_v32 }
 0x102   : > { %v8392_v17 = vadd.f32 %v1057_v25, %v784_v53  ;;  %v6613_v27 = vpop.f32.mrf.mxu0  ;;  %v7670_v53 = vld [vmem:[%s7780_s22 + $0x60] sm:$0xf] }
 0x103   : > { %v6697_v19 = vpop.f32.mrf.mxu1  ;;  %v5724_v54 = vcombine.low %v7669_v5, %v7670_v53  ;;  %v1730_v27 = vsel %vm504_vm1, %v1720_v41, %v1729_v63  ;;  %v1738_v41 = vor.u32 %v1737_v40, %v1734_v42  ;;  %v8425_v5 = vld [vmem:[%s7780_s22 + $0x84] sm:$0xf] }
 0x104   : > { %v789_v24 = vpop.f32.mrf.mxu0  ;;  %6811 = vmatmul.mubr.bf16.gmra.mxu0 %v5723_v8  ;;  %v5768_v8 = vcombine.low %v8403_v36, %v8406_v46  ;;  %10321 = vst [vmem:[#allocation4_spill] sm:$0xff] %v8425_v5  ;;  %v5769_v42 = vcombine.low %v8422_v32, %v8425_v5  ;;  %v10324_v32 = vmov 0.0  }
 0x105   : > { %v1062_v31 = vpop.f32.mrf.mxu1  ;;  %6895 = vmatmul.mubr.bf16.gmra.mxu1 %v1721_v9  ;;  %6814 = vmatprep.mubr.msk.bf16.mxu0 %vm7688_vm0, %v10243_v1 }
 0x106   : > { %v8398_v22 = vadd.f32 %v1062_v31, %v789_v24  ;;  %v6616_v43 = vpop.f32.mrf.mxu0  ;;  %6898 = vmatprep.mubr.msk.bf16.mxu1 %vm7688_vm0, %v10243_v1  ;;  %v1741_v31 = vshrl.u32 %v5768_v8, 16 }
 0x107   : > { %v6700_v61 = vpop.f32.mrf.mxu1  ;;  %v1744_v43 = vshll.u32 %v5768_v8, 16 }
 0x108   : > { %v792_v56 = vpop.f32.mrf.mxu0 }
 0x109   : > { %v1065_v57 = vpop.f32.mrf.mxu1  ;;  %v1746_v50 = vrot.slane %v1744_v43, 4 }
 0x10a   : > { %v8412_v25 = vadd.f32 %v1065_v57, %v792_v56  ;;  %v6617_v9 = vpop.f32.mrf.mxu0  ;;  %v7672_v57 = vld [vmem:[%s7780_s22 + $0x68] sm:$0xf] }
 0x10b   : > { %v6701_v18 = vpop.f32.mrf.mxu1 }
 0x10c   : > { %v797_v19 = vpop.f32.mrf.mxu0  ;;  %6815 = vmatmul.mubr.bf16.gmra.mxu0 %v5724_v54  ;;  %v7671_v54 = vld [vmem:[%s7780_s22 + $0x64] sm:$0xf]  ;;  %v1743_v18 = vrot.slane %v1741_v31, 3 }
 0x10d   : > { %v1070_v24 = vpop.f32.mrf.mxu1  ;;  %6899 = vmatmul.mubr.bf16.gmra.mxu1 %v1730_v27  ;;  %6818 = vmatprep.mubr.msk.bf16.mxu0 %vm7688_vm0, %v10243_v1  ;;  %v5725_v9 = vcombine.low %v7671_v54, %v7672_v57  ;;  %v1753_v54 = vshll.u32 %v5769_v42, 16 }
 0x10e   : > { %v8417_v61 = vadd.f32 %v1070_v24, %v797_v19  ;;  %v6620_v56 = vpop.f32.mrf.mxu0  ;;  %6902 = vmatprep.mubr.msk.bf16.mxu1 %vm7688_vm0, %v10243_v1  ;;  %v1739_v24 = vsel %vm504_vm1, %v1729_v63, %v1738_v41  ;;  %v1747_v31 = vor.u32 %v1746_v50, %v1743_v18  ;;  %v1750_v63 = vshrl.u32 %v5769_v42, 16 }
 0x10f   : > { %v6704_v15 = vpop.f32.mrf.mxu1 }
 0x110   : > { %v800_v53 = vpop.f32.mrf.mxu0  ;;  %v1748_v50 = vsel %vm504_vm1, %v1738_v41, %v1747_v31 }
 0x111   : > { %v1073_v27 = vpop.f32.mrf.mxu1 }
 0x112   : > { %v8429_v8 = vadd.f32 %v1073_v27, %v800_v53  ;;  %v6621_v19 = vpop.f32.mrf.mxu0  ;;  %v8441_v27 = vld [vmem:[%s7780_s22 + $0x88] sm:$0xf] }
 0x113   : > { %v6705_v40 = vpop.f32.mrf.mxu1  ;;  %10322 = vst [vmem:[#allocation5_spill] sm:$0xff] %v8441_v27  ;;  %v8444_v19 = vld [vmem:[%s7780_s22 + $0x8c] sm:$0xf] }
 0x114   : > { %v805_v56 = vpop.f32.mrf.mxu0  ;;  %6819 = vmatmul.mubr.bf16.gmra.mxu0 %v5725_v9  ;;  %10323 = vst [vmem:[#allocation6_spill] sm:$0xff] %v8444_v19  ;;  %v7673_v40 = vld [vmem:[%s7780_s22 + $0x6c] sm:$0xf]  ;;  %v5770_v42 = vcombine.low %v8441_v27, %v8444_v19 }
 0x115   : > { %v1078_v15 = vpop.f32.mrf.mxu1  ;;  %6903 = vmatmul.mubr.bf16.gmra.mxu1 %v1739_v24  ;;  %6822 = vmatprep.mubr.msk.bf16.mxu0 %vm7688_vm0, %v10243_v1  ;;  %v5726_v24 = vcombine.low %v7673_v40, %v8073_v49 }
 0x116   : > { %v8436_v43 = vadd.f32 %v1078_v15, %v805_v56  ;;  %v6624_v53 = vpop.f32.mrf.mxu0  ;;  %6906 = vmatprep.mubr.msk.bf16.mxu1 %vm7688_vm0, %v10243_v1  ;;  %v1752_v15 = vrot.slane %v1750_v63, 3  ;;  %v1759_v63 = vshrl.u32 %v5770_v42, 16 }
 0x117   : > { %v6708_v57 = vpop.f32.mrf.mxu1  ;;  %v1755_v53 = vrot.slane %v1753_v54, 4  ;;  %v1762_v54 = vshll.u32 %v5770_v42, 16 }
 0x118   : > { %v808_v9 = vpop.f32.mrf.mxu0  ;;  %v1761_v27 = vrot.slane %v1759_v63, 3 }
 0x119   : > { %v1081_v5 = vpop.f32.mrf.mxu1 }
 0x11a   : > { %v8449_v18 = vadd.f32 %v1081_v5, %v808_v9  ;;  %v6625_v56 = vpop.f32.mrf.mxu0  ;;  %v1756_v5 = vor.u32 %v1755_v53, %v1752_v15  ;;  %v8460_v9 = vld [vmem:[%s7780_s22 + $0x90] sm:$0xf]  ;;  %v1764_v15 = vrot.slane %v1762_v54, 4 }
 0x11b   : > { %v6709_v57 = vpop.f32.mrf.mxu1  ;;  %10326 = vst [vmem:[#allocation8_spill] sm:$0xff] %v8460_v9  ;;  %v5771_v19 = vcombine.low %v8460_v9, %v8460_v9 }
 0x11c   : > { %v813_v1 = vpop.f32.mrf.mxu0  ;;  %6823 = vmatmul.mubr.bf16.gmra.mxu0 %v5726_v24  ;;  %v7674_v57 = vld [vmem:[%s7780_s22 + $0x74] sm:$0xf] }
 0x11d   : > { %v1086_v46 = vpop.f32.mrf.mxu1  ;;  %6907 = vmatmul.mubr.bf16.gmra.mxu1 %v1748_v50  ;;  %6826 = vmatprep.mubr.msk.bf16.mxu0 %vm7688_vm0, %v10324_v32  ;;  %v5727_v24 = vcombine.low %v7674_v57, %v8084_v0  ;;  %v1768_v0 = vshrl.u32 %v5771_v19, 16  ;;  %v1771_v57 = vshll.u32 %v5771_v19, 16 }
 0x11e   : > { %v8455_v49 = vadd.f32 %v1086_v46, %v813_v1  ;;  %v6628_v41 = vpop.f32.mrf.mxu0  ;;  %6910 = vmatprep.mubr.msk.bf16.mxu1 %vm7688_vm0, %v10324_v32 }
 0x11f   : > { %v6712_v40 = vpop.f32.mrf.mxu1  ;;  %v1757_v41 = vsel %vm504_vm1, %v1747_v31, %v1756_v5  ;;  %v1765_v31 = vor.u32 %v1764_v15, %v1761_v27 }
 0x120   : > { %10325 = vst [vmem:[#allocation7_spill] sm:$0xff] %v8455_v49  ;;  %v816_v56 = vpop.f32.mrf.mxu0 }
 0x121   : > { %v1089_v50 = vpop.f32.mrf.mxu1  ;;  %v1766_v19 = vsel %vm504_vm1, %v1756_v5, %v1765_v31 }
 0x122   : > { %v8466_v1 = vadd.f32 %v1089_v50, %v816_v56  ;;  %v6629_v46 = vpop.f32.mrf.mxu0  ;;  %v7675_v50 = vld [vmem:[%s7780_s22 + $0x7c] sm:$0xf] }
 0x123   : > { %v6713_v53 = vpop.f32.mrf.mxu1 }
 0x124   : > { %10327 = vst [vmem:[#allocation9_spill] sm:$0xff] %v8466_v1  ;;  %v821_v42 = vpop.f32.mrf.mxu0  ;;  %6827 = vmatmul.mubr.bf16.gmra.mxu0 %v5727_v24  ;;  %v5728_v24 = vcombine.low %v7675_v50, %v8095_v28  ;;  %v1773_v53 = vrot.slane %v1771_v57, 4 }
 0x125   : > { %v1094_v40 = vpop.f32.mrf.mxu1  ;;  %6911 = vmatmul.mubr.bf16.gmra.mxu1 %v1757_v41  ;;  %6830 = vmatprep.mubr.msk.bf16.mxu0 %vm7688_vm0, %v10324_v32  ;;  %v1770_v41 = vrot.slane %v1768_v0, 3  ;;  %v7545_v0 = vld [vmem:[%s7780_s22 + $0x14] sm:$0xff]  }
 0x126   : > { %v8471_v9 = vadd.f32 %v1094_v40, %v821_v42  ;;  %v6632_v56 = vpop.f32.mrf.mxu0  ;;  %6914 = vmatprep.mubr.msk.bf16.mxu1 %vm7688_vm0, %v10324_v32  ;;  %v7544_v42 = vld [vmem:[%s7780_s22 + $0xc] sm:$0xff]  }
 0x127   : > { %v6716_v63 = vpop.f32.mrf.mxu1  ;;  %v1774_v27 = vor.u32 %v1773_v53, %v1770_v41  ;;  %v2495_v53 = vshll.u32 %v7545_v0, 16 }
 0x128   : > { %10328 = vst [vmem:[#allocation10_spill] sm:$0xff] %v8471_v9  ;;  %v824_v54 = vpop.f32.mrf.mxu0  ;;  %v5729_v63 = vcombine.low %v8098_v29, %v8109_v37 }
 0x129   : > { %v1097_v46 = vpop.f32.mrf.mxu1  ;;  %v1775_v50 = vsel %vm504_vm1, %v1765_v31, %v1774_v27  ;;  %v2497_v31 = vrot.slane %v2495_v53, 1  ;;  %v7549_v27 = vld [vmem:[%s7780_s22 + $0x1c] sm:$0xff]  }
 0x12a   : > { %v8477_v1 = vadd.f32 %v1097_v46, %v824_v54  ;;  %v6633_v49 = vpop.f32.mrf.mxu0 }
 0x12b   : > { %v6717_v40 = vpop.f32.mrf.mxu1  ;;  %v2490_v49 = vshll.u32 %v7544_v42, 16 }
 0x12c   : > { %v829_v56 = vpop.f32.mrf.mxu0  ;;  %6831 = vmatmul.mubr.bf16.gmra.mxu0 %v5728_v24 }
 0x12d   : > { %v1102_v9 = vpop.f32.mrf.mxu1  ;;  %6915 = vmatmul.mubr.bf16.gmra.mxu1 %v1766_v19  ;;  %6834 = vmatprep.mubr.msk.bf16.mxu0 %vm7688_vm0, %v10324_v32  ;;  %v2492_v41 = vrot.slane %v2490_v49, 1 }
 0x12e   : > { %v8483_v28 = vadd.f32 %v1102_v9, %v829_v56  ;;  %v6636_v15 = vpop.f32.mrf.mxu0  ;;  %6918 = vmatprep.mubr.msk.bf16.mxu1 %vm7688_vm0, %v10324_v32  ;;  %v2488_v9 = vshrl.u32 %v7544_v42, 16 }
 0x12f   : > { %v6720_v57 = vpop.f32.mrf.mxu1 }
 0x130   : > { %v832_v5 = vpop.f32.mrf.mxu0  ;;  %v2493_v37 = vor.u32 %v2492_v41, %v2488_v9  ;;  %v2499_v9 = vshrl.u32 %v7545_v0, 16  ;;  %v2503_v41 = vshll.u32 %v7549_v27, 16 }
 0x131   : > { %v1105_v54 = vpop.f32.mrf.mxu1 }
 0x132   : > { %v8491_v24 = vadd.f32 %v1105_v54, %v832_v5  ;;  %v6637_v46 = vpop.f32.mrf.mxu0  ;;  %v7546_v5 = vld [vmem:[%s10235_s1 + $0x1b8] sm:$0xff]   ;;  %v2501_v0 = vor.u32 %v2499_v9, %v2497_v31 }
 0x133   : > { %v6721_v19 = vpop.f32.mrf.mxu1  ;;  %v7547_v46 = vld [vmem:[%s10235_s1 + $0x1f8] sm:$0xff]  }
 0x134   : > { %v837_v40 = vpop.f32.mrf.mxu0  ;;  %6835 = vmatmul.mubr.bf16.gmra.mxu0 %v5729_v63 }
 0x135   : > { %v1110_v56 = vpop.f32.mrf.mxu1  ;;  %6919 = vmatmul.mubr.bf16.gmra.mxu1 %v1775_v50  ;;  %6938 = vmatprep.mubr.msk.bf16.mxu0 %vm7688_vm0, %v10324_v32  ;;  %v2498_v50 = vsel %vm2486_vm3, %v2493_v37, %v2497_v31 }
 0x136   : > { %v8495_v15 = vadd.f32 %v1110_v56, %v837_v40  ;;  %v6640_v29 = vpop.f32.mrf.mxu0  ;;  %7022 = vmatprep.mubr.msk.bf16.mxu1 %vm7688_vm0, %v10324_v32  ;;  %v10329_v40 = vcombine.low %v7988_v47, %v7993_v48  ;;  %v7553_v47 = vld [vmem:[%s10235_s1 + $0x1f0] sm:$0xff]  }
 0x137   : > { %v6724_v42 = vpop.f32.mrf.mxu1  ;;  %v7552_v29 = vld [vmem:[%s10235_s1 + $0x1b0] sm:$0xff]  }
 0x138   : > { %v840_v49 = vpop.f32.mrf.mxu0 }
 0x139   : > { %v1113_v57 = vpop.f32.mrf.mxu1 }
 0x13a   : > { %v8503_v63 = vadd.f32 %v1113_v57, %v840_v49  ;;  %v6641_v54 = vpop.f32.mrf.mxu0  ;;  %v2505_v49 = vrot.slane %v2503_v41, 1  ;;  %v8520_v57 = vld [vmem:[%s7780_s22 + $0x24] sm:$0xff]   ;;  %v2507_v41 = vshrl.u32 %v7549_v27, 16 }
 0x13b   : > { %v6725_v53 = vpop.f32.mrf.mxu1  ;;  %v5797_v54 = vcombine.low %v8122_v7, %v8136_v34  ;;  %v7558_v7 = vld [vmem:[%s10235_s1 + $0x1a8] sm:$0xff]  }
 0x13c   : > { %v845_v19 = vpop.f32.mrf.mxu0  ;;  %6939 = vmatmul.mubr.bf16.vlgmr.msra.gmra.mxu0 %v10329_v40  ;;  %v2506_v9 = vsel %vm2486_vm3, %v2501_v0, %v2505_v49  ;;  %v2511_v53 = vshll.u32 %v8520_v57, 16 }
 0x13d   : > { %v1118_v56 = vpop.f32.mrf.mxu1  ;;  %7023 = vmatmul.mubr.bf16.vlgmr.msra.gmra.mxu1 %v2498_v50  ;;  %7091 = vmatpush3.bf16.msra.mxu0 %v7546_v5 }
 0x13e   : > { %v8515_v37 = vadd.f32 %v1118_v56, %v845_v19  ;;  %v6644_v42 = vpop.f32.mrf.mxu0  ;;  %7175 = vmatpush3.bf16.msra.mxu1 %v7547_v46  ;;  %6942 = vmatprep.mubr.msk.bf16.mxu0 %vm7688_vm0, %v10324_v32  ;;  %v7559_v19 = vld [vmem:[%s10235_s1 + $0x1e8] sm:$0xff]   ;;  %v2513_v0 = vrot.slane %v2511_v53, 1 }
 0x13f   : > { %v6728_v48 = vpop.f32.mrf.mxu1  ;;  %7026 = vmatprep.mubr.msk.bf16.mxu1 %vm7688_vm0, %v10324_v32  ;;  %7092 = vmatprep.subr.bf16.mxu0 %v10324_v32  ;;  %v2509_v42 = vor.u32 %v2507_v41, %v2505_v49  ;;  %v5798_v49 = vcombine.low %v8139_v35, %v8152_v60  ;;  %v7571_v35 = vld [vmem:[%s10235_s1 + $0x1d8] sm:$0xff]  }
 0x140   : > { %v848_v5 = vpop.f32.mrf.mxu0  ;;  %7176 = vmatprep.subr.bf16.mxu1 %v10324_v32  ;;  %v7564_v48 = vld [vmem:[%s10235_s1 + $0x1a0] sm:$0xff]  }
 0x141   : > { %v1121_v31 = vpop.f32.mrf.mxu1  ;;  %7093 = vmatpush3.bf16.msra.mxu0 %v7552_v29  ;;  %v2514_v53 = vsel %vm2486_vm3, %v2509_v42, %v2513_v0 }
 0x142   : > { %v8531_v50 = vadd.f32 %v1121_v31, %v848_v5  ;;  %v6645_v46 = vpop.f32.mrf.mxu0  ;;  %7177 = vmatpush3.bf16.msra.mxu1 %v7553_v47  ;;  %7094 = vmatprep.subr.bf16.mxu0 %v10324_v32  ;;  %v8550_v47 = vld [vmem:[%s7780_s22 + $0x2c] sm:$0xff]  }
 0x143   : > { %v6729_v34 = vpop.f32.mrf.mxu1  ;;  %7178 = vmatprep.subr.bf16.mxu1 %v10324_v32 }
 0x144   : > { %v853_v40 = vpop.f32.mrf.mxu0  ;;  %6943 = vmatmul.mubr.bf16.gmra.mxu0 %v5797_v54  ;;  %v7565_v54 = vld [vmem:[%s10235_s1 + $0x1e0] sm:$0xff]   ;;  %v2519_v34 = vshll.u32 %v8550_v47, 16 }
 0x145   : > { %v1126_v27 = vpop.f32.mrf.mxu1  ;;  %7027 = vmatmul.mubr.bf16.gmra.mxu1 %v2506_v9  ;;  %6946 = vmatprep.mubr.msk.bf16.mxu0 %vm7688_vm0, %v10324_v32 }
 0x146   : > { %v8545_v56 = vadd.f32 %v1126_v27, %v853_v40  ;;  %v6648_v29 = vpop.f32.mrf.mxu0  ;;  %7030 = vmatprep.mubr.msk.bf16.mxu1 %vm7688_vm0, %v10324_v32  ;;  %7095 = vmatpush3.bf16.msra.mxu0 %v7558_v7  ;;  %v2515_v7 = vshrl.u32 %v8520_v57, 16 }
 0x147   : > { %v6732_v5 = vpop.f32.mrf.mxu1  ;;  %7179 = vmatpush3.bf16.msra.mxu1 %v7559_v19  ;;  %7096 = vmatprep.subr.bf16.mxu0 %v10324_v32  ;;  %v7570_v19 = vld [vmem:[%s10235_s1 + $0x198] sm:$0xff]  }
 0x148   : > { %v856_v31 = vpop.f32.mrf.mxu0  ;;  %7180 = vmatprep.subr.bf16.mxu1 %v10324_v32  ;;  %v2517_v42 = vor.u32 %v2515_v7, %v2513_v0  ;;  %v8582_v5 = vld [vmem:[%s7780_s22 + $0x34] sm:$0xff]   ;;  %v5799_v0 = vcombine.low %v8155_v62, %v8181_v12  ;;  %v7585_v62 = vld [vmem:[%s10235_s1 + $0x1c8] sm:$0xff]  }
 0x149   : > { %v1129_v46 = vpop.f32.mrf.mxu1 }
 0x14a   : > { %v8562_v9 = vadd.f32 %v1129_v46, %v856_v31  ;;  %v6649_v41 = vpop.f32.mrf.mxu0  ;;  %7097 = vmatpush3.bf16.msra.mxu0 %v7564_v48  ;;  %v2521_v48 = vrot.slane %v2519_v34, 1 }
 0x14b   : > { %v6733_v40 = vpop.f32.mrf.mxu1  ;;  %7181 = vmatpush3.bf16.msra.mxu1 %v7565_v54  ;;  %7098 = vmatprep.subr.bf16.mxu0 %v10324_v32  ;;  %v7576_v54 = vld [vmem:[%s10235_s1 + $0x190] sm:$0xff]  }
 0x14c   : > { %v861_v60 = vpop.f32.mrf.mxu0  ;;  %6947 = vmatmul.mubr.bf16.gmra.mxu0 %v5798_v49  ;;  %7182 = vmatprep.subr.bf16.mxu1 %v10324_v32  ;;  %v7579_v49 = vld [vmem:[%s10235_s1 + $0x1d0] sm:$0xff]   ;;  %v2522_v34 = vsel %vm2486_vm3, %v2517_v42, %v2521_v48  ;;  %v2527_v40 = vshll.u32 %v8582_v5, 16 }
 0x14d   : > { %v1134_v57 = vpop.f32.mrf.mxu1  ;;  %7031 = vmatmul.mubr.bf16.gmra.mxu1 %v2514_v53  ;;  %6950 = vmatprep.mubr.msk.bf16.mxu0 %vm7688_vm0, %v10324_v32 }
 0x14e   : > { %v8577_v27 = vadd.f32 %v1134_v57, %v861_v60  ;;  %v6652_v29 = vpop.f32.mrf.mxu0  ;;  %7034 = vmatprep.mubr.msk.bf16.mxu1 %vm7688_vm0, %v10324_v32  ;;  %7099 = vmatpush3.bf16.msra.mxu0 %v7570_v19  ;;  %v2523_v19 = vshrl.u32 %v8550_v47, 16 }
 0x14f   : > { %v6736_v31 = vpop.f32.mrf.mxu1  ;;  %7183 = vmatpush3.bf16.msra.mxu1 %v7571_v35  ;;  %7100 = vmatprep.subr.bf16.mxu0 %v10324_v32  ;;  %v7582_v35 = vld [vmem:[%s10235_s1 + $0x188] sm:$0xff]  }
 0x150   : > { %v864_v46 = vpop.f32.mrf.mxu0  ;;  %7184 = vmatprep.subr.bf16.mxu1 %v10324_v32  ;;  %v2525_v42 = vor.u32 %v2523_v19, %v2521_v48  ;;  %v7561_v31 = vld [vmem:[%s7780_s22 + $0x3c] sm:$0xff]  }
 0x151   : > { %v1137_v41 = vpop.f32.mrf.mxu1 }
 0x152   : > { %v8594_v53 = vadd.f32 %v1137_v41, %v864_v46  ;;  %v6653_v7 = vpop.f32.mrf.mxu0  ;;  %7101 = vmatpush3.bf16.msra.mxu0 %v7576_v54  ;;  %v2529_v54 = vrot.slane %v2527_v40, 1 }
 0x153   : > { %v6737_v60 = vpop.f32.mrf.mxu1  ;;  %7185 = vmatpush3.bf16.msra.mxu1 %v7579_v49  ;;  %7102 = vmatprep.subr.bf16.mxu0 %v10324_v32  ;;  %v7590_v49 = vld [vmem:[%s10235_s1 + $0x180] sm:$0xff]   ;;  %v5800_v7 = vcombine.low %v8184_v13, %v8209_v51 }
 0x154   : > { %v869_v12 = vpop.f32.mrf.mxu0  ;;  %6951 = vmatmul.mubr.bf16.gmra.mxu0 %v5799_v0  ;;  %7186 = vmatprep.subr.bf16.mxu1 %v10324_v32  ;;  %v7591_v0 = vld [vmem:[%s10235_s1 + $0x1c0] sm:$0xff]   ;;  %v2530_v40 = vsel %vm2486_vm3, %v2525_v42, %v2529_v54  ;;  %v2535_v60 = vshll.u32 %v7561_v31, 16 }
 0x155   : > { %v1142_v47 = vpop.f32.mrf.mxu1  ;;  %7035 = vmatmul.mubr.bf16.gmra.mxu1 %v2522_v34  ;;  %6954 = vmatprep.mubr.msk.bf16.mxu0 %vm7688_vm0, %v10324_v32  ;;  %v7563_v42 = vld [vmem:[%s7780_s22 + $0x44] sm:$0xff]  }
 0x156   : > { %v8609_v57 = vadd.f32 %v1142_v47, %v869_v12  ;;  %v6656_v29 = vpop.f32.mrf.mxu0  ;;  %7038 = vmatprep.mubr.msk.bf16.mxu1 %vm7688_vm0, %v10324_v32  ;;  %7103 = vmatpush3.bf16.msra.mxu0 %v7582_v35  ;;  %v2531_v35 = vshrl.u32 %v8582_v5, 16 }
 0x157   : > { %v6740_v46 = vpop.f32.mrf.mxu1  ;;  %7187 = vmatpush3.bf16.msra.mxu1 %v7585_v62  ;;  %7104 = vmatprep.subr.bf16.mxu0 %v10324_v32  ;;  %v2537_v29 = vrot.slane %v2535_v60, 1 }
 0x158   : > { %v872_v41 = vpop.f32.mrf.mxu0  ;;  %7188 = vmatprep.subr.bf16.mxu1 %v10324_v32  ;;  %v2533_v5 = vor.u32 %v2531_v35, %v2529_v54 }
 0x159   : > { %v1145_v48 = vpop.f32.mrf.mxu1 }
 0x15a   : > { %v8624_v34 = vadd.f32 %v1145_v48, %v872_v41  ;;  %v6657_v19 = vpop.f32.mrf.mxu0  ;;  %7105 = vmatpush3.bf16.msra.mxu0 %v7590_v49 }
 0x15b   : > { %v6741_v62 = vpop.f32.mrf.mxu1  ;;  %7189 = vmatpush3.bf16.msra.mxu1 %v7591_v0  ;;  %7258 = vmatprep.subr.bf16.mxu0 %v10324_v32  ;;  %v5801_v0 = vcombine.low %v8212_v52, %v8241_v11  ;;  %v2538_v19 = vsel %vm2486_vm3, %v2533_v5, %v2537_v29 }
 0x15c   : > { %v877_v12 = vpop.f32.mrf.mxu0  ;;  %6955 = vmatmul.mubr.bf16.gmra.mxu0 %v5800_v7  ;;  %7342 = vmatprep.subr.bf16.mxu1 %v10324_v32  ;;  %v2543_v62 = vshll.u32 %v7563_v42, 16 }
 0x15d   : > { %v1150_v13 = vpop.f32.mrf.mxu1  ;;  %7039 = vmatmul.mubr.bf16.gmra.mxu1 %v2530_v40  ;;  %6958 = vmatprep.mubr.msk.bf16.mxu0 %vm7688_vm0, %v10324_v32  ;;  %v2539_v40 = vshrl.u32 %v7561_v31, 16 }
 0x15e   : > { %v8632_v51 = vadd.f32 %v1150_v13, %v877_v12  ;;  %v6660_v47 = vpop.f32.mrf.mxu0  ;;  %7042 = vmatprep.mubr.msk.bf16.mxu1 %vm7688_vm0, %v10324_v32  ;;  %v2545_v60 = vrot.slane %v2543_v62, 1 }
 0x15f   : > { %v6744_v49 = vpop.f32.mrf.mxu1  ;;  %v2541_v11 = vor.u32 %v2539_v40, %v2537_v29  ;;  %v7567_v47 = vld [vmem:[%s7780_s22 + $0x4c] sm:$0xff]  }
 0x160   : > { %v880_v46 = vpop.f32.mrf.mxu0  ;;  %v5802_v49 = vcombine.low %v8244_v26, %v8273_v33 }
 0x161   : > { %v1153_v41 = vpop.f32.mrf.mxu1 }
 0x162   : > { %v8639_v7 = vadd.f32 %v1153_v41, %v880_v46  ;;  %v6661_v48 = vpop.f32.mrf.mxu0 }
 0x163   : > { %v6745_v12 = vpop.f32.mrf.mxu1  ;;  %v2546_v48 = vsel %vm2486_vm3, %v2541_v11, %v2545_v60 }
 0x164   : > { %v885_v13 = vpop.f32.mrf.mxu0  ;;  %6959 = vmatmul.mubr.bf16.gmra.mxu0 %v5801_v0  ;;  %v2551_v12 = vshll.u32 %v7567_v47, 16 }
 0x165   : > { %v1158_v54 = vpop.f32.mrf.mxu1  ;;  %7043 = vmatmul.mubr.bf16.gmra.mxu1 %v2538_v19  ;;  %6962 = vmatprep.mubr.msk.bf16.mxu0 %vm7688_vm0, %v10324_v32  ;;  %v2547_v19 = vshrl.u32 %v7563_v42, 16 }
 0x166   : > { %v8644_v35 = vadd.f32 %v1158_v54, %v885_v13  ;;  %v6664_v52 = vpop.f32.mrf.mxu0  ;;  %7046 = vmatprep.mubr.msk.bf16.mxu1 %vm7688_vm0, %v10324_v32  ;;  %v2553_v62 = vrot.slane %v2551_v12, 1 }
 0x167   : > { %v6748_v5 = vpop.f32.mrf.mxu1  ;;  %v2549_v33 = vor.u32 %v2547_v19, %v2545_v60  ;;  %v7569_v52 = vld [vmem:[%s7780_s22 + $0x54] sm:$0xff]  }
 0x168   : > { %v888_v31 = vpop.f32.mrf.mxu0  ;;  %v5803_v5 = vcombine.low %v8276_v39, %v8296_v14 }
 0x169   : > { %v1161_v46 = vpop.f32.mrf.mxu1 }
 0x16a   : > { %v8651_v0 = vadd.f32 %v1161_v46, %v888_v31  ;;  %v6665_v41 = vpop.f32.mrf.mxu0 }
 0x16b   : > { %v6749_v13 = vpop.f32.mrf.mxu1  ;;  %v2554_v41 = vsel %vm2486_vm3, %v2549_v33, %v2553_v62 }
 0x16c   : > { %v893_v54 = vpop.f32.mrf.mxu0  ;;  %6963 = vmatmul.mubr.bf16.gmra.mxu0 %v5802_v49  ;;  %v2559_v13 = vshll.u32 %v7569_v52, 16 }
 0x16d   : > { %v1166_v29 = vpop.f32.mrf.mxu1  ;;  %7047 = vmatmul.mubr.bf16.gmra.mxu1 %v2546_v48  ;;  %6966 = vmatprep.mubr.msk.bf16.mxu0 %vm7688_vm0, %v10324_v32  ;;  %v2555_v48 = vshrl.u32 %v7567_v47, 16 }
 0x16e   : > { %v8656_v40 = vadd.f32 %v1166_v29, %v893_v54  ;;  %v6668_v26 = vpop.f32.mrf.mxu0  ;;  %7050 = vmatprep.mubr.msk.bf16.mxu1 %vm7688_vm0, %v10324_v32  ;;  %v2561_v12 = vrot.slane %v2559_v13, 1 }
 0x16f   : > { %v6752_v11 = vpop.f32.mrf.mxu1  ;;  %v2557_v14 = vor.u32 %v2555_v48, %v2553_v62  ;;  %v7573_v26 = vld [vmem:[%s7780_s22 + $0x5c] sm:$0xff]  }
 0x170   : > { %v896_v42 = vpop.f32.mrf.mxu0 }
 0x171   : > { %v1169_v31 = vpop.f32.mrf.mxu1 }
 0x172   : > { %v8663_v49 = vadd.f32 %v1169_v31, %v896_v42  ;;  %v6669_v46 = vpop.f32.mrf.mxu0  ;;  %v5804_v42 = vcombine.low %v8299_v23, %v8312_v59 }
 0x173   : > { %v6753_v54 = vpop.f32.mrf.mxu1  ;;  %v2562_v46 = vsel %vm2486_vm3, %v2557_v14, %v2561_v12 }
 0x174   : > { %v1306_v29 = vpop.f32.mrf.mxu0  ;;  %6967 = vmatmul.mubr.bf16.gmra.mxu0 %v5803_v5  ;;  %v2567_v54 = vshll.u32 %v7573_v26, 16 }
 0x175   : > { %v1441_v60 = vadd.f32 %v1306_v29, %v8341_v21  ;;  %v1875_v19 = vpop.f32.mrf.mxu1  ;;  %7051 = vmatmul.mubr.bf16.gmra.mxu1 %v2554_v41  ;;  %6970 = vmatprep.mubr.msk.bf16.mxu0 %vm7688_vm0, %v10324_v32  ;;  %v2563_v41 = vshrl.u32 %v7569_v52, 16  ;;  %v7575_v52 = vld [vmem:[%s7780_s22 + $0x64] sm:$0xff]  }
 0x176   : > { %v6772_v39 = vpop.f32.mrf.mxu0  ;;  %7054 = vmatprep.mubr.msk.bf16.mxu1 %vm7688_vm0, %v10324_v32 }
 0x177   : > { %v8672_v33 = vadd.f32 %v1875_v19, %v1441_v60  ;;  %v6856_v47 = vpop.f32.mrf.mxu1  ;;  %v2565_v59 = vor.u32 %v2563_v41, %v2561_v12 }
 0x178   : > { %v1309_v11 = vpop.f32.mrf.mxu0  ;;  %v5805_v47 = vcombine.low %v8315_v3, %v8328_v58 }
 0x179   : > { %v1442_v21 = vadd.f32 %v1309_v11, %v8355_v45  ;;  %v1878_v5 = vpop.f32.mrf.mxu1  ;;  %v2569_v45 = vrot.slane %v2567_v54, 1 }
 0x17a   : > { %v6773_v31 = vpop.f32.mrf.mxu0 }
 0x17b   : > { %v8678_v29 = vadd.f32 %v1878_v5, %v1442_v21  ;;  %v6857_v62 = vpop.f32.mrf.mxu1  ;;  %v2570_v21 = vsel %vm2486_vm3, %v2565_v59, %v2569_v45  ;;  %v2571_v5 = vshrl.u32 %v7573_v26, 16  ;;  %v2575_v31 = vshll.u32 %v7575_v52, 16  ;;  %v7578_v26 = vld [vmem:[%s7780_s22 + $0x6c] sm:$0xff]  }
 0x17c   : > { %v1314_v48 = vpop.f32.mrf.mxu0  ;;  %6971 = vmatmul.mubr.bf16.gmra.mxu0 %v5804_v42 }
 0x17d   : > { %v1443_v13 = vadd.f32 %v1314_v48, %v8360_v6  ;;  %v1883_v60 = vpop.f32.mrf.mxu1  ;;  %7055 = vmatmul.mubr.bf16.gmra.mxu1 %v2562_v46  ;;  %6974 = vmatprep.mubr.msk.bf16.mxu0 %vm7688_vm0, %v10324_v32  ;;  %v2573_v58 = vor.u32 %v2571_v5, %v2569_v45 }
 0x17e   : > { %v6776_v23 = vpop.f32.mrf.mxu0  ;;  %7058 = vmatprep.mubr.msk.bf16.mxu1 %vm7688_vm0, %v10324_v32 }
 0x17f   : > { %v8686_v19 = vadd.f32 %v1883_v60, %v1443_v13  ;;  %v6860_v39 = vpop.f32.mrf.mxu1  ;;  %v5806_v23 = vcombine.low %v8331_v16, %v8346_v55 }
 0x180   : > { %v1317_v14 = vpop.f32.mrf.mxu0 }
 0x181   : > { %v1444_v6 = vadd.f32 %v1317_v14, %v8372_v30  ;;  %v1886_v11 = vpop.f32.mrf.mxu1  ;;  %v2577_v30 = vrot.slane %v2575_v31, 1 }
 0x182   : > { %v6777_v42 = vpop.f32.mrf.mxu0 }
 0x183   : > { %v8692_v46 = vadd.f32 %v1886_v11, %v1444_v6  ;;  %v6861_v12 = vpop.f32.mrf.mxu1  ;;  %v2578_v14 = vsel %vm2486_vm3, %v2573_v58, %v2577_v30  ;;  %v2583_v6 = vshll.u32 %v7578_v26, 16 }
 0x184   : > { %v1322_v41 = vpop.f32.mrf.mxu0  ;;  %6975 = vmatmul.mubr.bf16.gmra.mxu0 %v5805_v47  ;;  %v2579_v47 = vshrl.u32 %v7575_v52, 16  ;;  %v7581_v52 = vld [vmem:[%s7780_s22 + $0x74] sm:$0xff]  }
 0x185   : > { %v1445_v54 = vadd.f32 %v1322_v41, %v8379_v44  ;;  %v1891_v62 = vpop.f32.mrf.mxu1  ;;  %7059 = vmatmul.mubr.bf16.gmra.mxu1 %v2570_v21  ;;  %6978 = vmatprep.mubr.msk.bf16.mxu0 %vm7688_vm0, %v10324_v32 }
 0x186   : > { %v6780_v3 = vpop.f32.mrf.mxu0  ;;  %7062 = vmatprep.mubr.msk.bf16.mxu1 %vm7688_vm0, %v10324_v32  ;;  %v2581_v55 = vor.u32 %v2579_v47, %v2577_v30 }
 0x187   : > { %v8700_v48 = vadd.f32 %v1891_v62, %v1445_v54  ;;  %v6864_v13 = vpop.f32.mrf.mxu1  ;;  %v5807_v54 = vcombine.low %v8349_v2, %v8365_v10 }
 0x188   : > { %v1325_v60 = vpop.f32.mrf.mxu0  ;;  %v2587_v13 = vshrl.u32 %v7578_v26, 16  ;;  %v7584_v26 = vld [vmem:[%s7780_s22 + $0x7c] sm:$0xff]  }
 0x189   : > { %v1446_v44 = vadd.f32 %v1325_v60, %v8392_v17  ;;  %v1894_v59 = vpop.f32.mrf.mxu1  ;;  %v2585_v17 = vrot.slane %v2583_v6, 1  ;;  %v2591_v60 = vshll.u32 %v7581_v52, 16 }
 0x18a   : > { %v6781_v39 = vpop.f32.mrf.mxu0 }
 0x18b   : > { %v8706_v11 = vadd.f32 %v1894_v59, %v1446_v44  ;;  %v6865_v45 = vpop.f32.mrf.mxu1  ;;  %v2586_v58 = vsel %vm2486_vm3, %v2581_v55, %v2585_v17  ;;  %v2589_v10 = vor.u32 %v2587_v13, %v2585_v17  ;;  %v2599_v55 = vshll.u32 %v7584_v26, 16 }
 0x18c   : > { %v1330_v42 = vpop.f32.mrf.mxu0  ;;  %6979 = vmatmul.mubr.bf16.gmra.mxu0 %v5806_v23  ;;  %v5808_v45 = vcombine.low %v8368_v38, %v8384_v4  ;;  %v5809_v13 = vcombine.low %v8387_v20, %v8403_v36 }
 0x18d   : > { %v1447_v21 = vadd.f32 %v1330_v42, %v8398_v22  ;;  %v1899_v5 = vpop.f32.mrf.mxu1  ;;  %7063 = vmatmul.mubr.bf16.gmra.mxu1 %v2578_v14  ;;  %6982 = vmatprep.mubr.msk.bf16.mxu0 %vm7688_vm0, %v10324_v32 }
 0x18e   : > { %v6784_v16 = vpop.f32.mrf.mxu0  ;;  %7066 = vmatprep.mubr.msk.bf16.mxu1 %vm7688_vm0, %v10324_v32 }
 0x18f   : > { %v8714_v31 = vadd.f32 %v1899_v5, %v1447_v21  ;;  %v6868_v12 = vpop.f32.mrf.mxu1  ;;  %v2595_v16 = vshrl.u32 %v7581_v52, 16  ;;  %v7587_v52 = vld [vmem:[%s7780_s22 + $0x84] sm:$0xff]  }
 0x190   : > { %v1333_v41 = vpop.f32.mrf.mxu0 }
 0x191   : > { %v1448_v22 = vadd.f32 %v1333_v41, %v8412_v25  ;;  %v1902_v62 = vpop.f32.mrf.mxu1  ;;  %v2593_v25 = vrot.slane %v2591_v60, 1 }
 0x192   : > { %v6785_v3 = vpop.f32.mrf.mxu0 }
 0x193   : > { %v8720_v23 = vadd.f32 %v1902_v62, %v1448_v22  ;;  %v6869_v30 = vpop.f32.mrf.mxu1  ;;  %v2594_v5 = vsel %vm2486_vm3, %v2589_v10, %v2593_v25  ;;  %v2597_v4 = vor.u32 %v2595_v16, %v2593_v25  ;;  %v10332_v16 = vld [vmem:[#allocation2_spill] sm:$0xff] }
 0x194   : > { %v1338_v44 = vpop.f32.mrf.mxu0  ;;  %6983 = vmatmul.mubr.bf16.gmra.mxu0 %v5807_v54 }
 0x195   : > { %v1449_v59 = vadd.f32 %v1338_v44, %v8417_v61  ;;  %v1907_v39 = vpop.f32.mrf.mxu1  ;;  %7067 = vmatmul.mubr.bf16.gmra.mxu1 %v2586_v58  ;;  %6986 = vmatprep.mubr.msk.bf16.mxu0 %vm7688_vm0, %v10324_v32 }
 0x196   : > { %v6788_v2 = vpop.f32.mrf.mxu0  ;;  %7070 = vmatprep.mubr.msk.bf16.mxu1 %vm7688_vm0, %v10324_v32 }
 0x197   : > { %v8728_v14 = vadd.f32 %v1907_v39, %v1449_v59  ;;  %v6872_v47 = vpop.f32.mrf.mxu1  ;;  %v2603_v59 = vshrl.u32 %v7584_v26, 16  ;;  %v2607_v39 = vshll.u32 %v7587_v52, 16  ;;  %v7589_v26 = vld [vmem:[%s7780_s22 + $0x8c] sm:$0xff]  }
 0x198   : > { %v1341_v6 = vpop.f32.mrf.mxu0  ;;  %v10330_v47 = vld [vmem:[#allocation7_spill] sm:$0xff] }
 0x199   : > { %v1450_v61 = vadd.f32 %v1341_v6, %v8429_v8  ;;  %v1910_v42 = vpop.f32.mrf.mxu1  ;;  %v2601_v8 = vrot.slane %v2599_v55, 1 }
 0x19a   : > { %v6789_v21 = vpop.f32.mrf.mxu0 }
 0x19b   : > { %v8734_v12 = vadd.f32 %v1910_v42, %v1450_v61  ;;  %v6873_v17 = vpop.f32.mrf.mxu1  ;;  %v2602_v44 = vsel %vm2486_vm3, %v2597_v4, %v2601_v8  ;;  %v2605_v36 = vor.u32 %v2603_v59, %v2601_v8  ;;  %v2611_v4 = vshrl.u32 %v7587_v52, 16 }
 0x19c   : > { %v1346_v41 = vpop.f32.mrf.mxu0  ;;  %6987 = vmatmul.mubr.bf16.gmra.mxu0 %v5808_v45  ;;  %v10333_v17 = vld [vmem:[#allocation9_spill] sm:$0xff] }
 0x19d   : > { %v1451_v54 = vadd.f32 %v1346_v41, %v8436_v43  ;;  %v1915_v22 = vpop.f32.mrf.mxu1  ;;  %7071 = vmatmul.mubr.bf16.gmra.mxu1 %v2594_v5  ;;  %6990 = vmatprep.mubr.msk.bf16.mxu0 %vm7688_vm0, %v10324_v32  ;;  %v10331_v5 = vld [vmem:[#allocation3_spill] sm:$0xff] }
 0x19e   : > { %v6792_v38 = vpop.f32.mrf.mxu0  ;;  %7074 = vmatprep.mubr.msk.bf16.mxu1 %vm7688_vm0, %v10324_v32  ;;  %v5810_v55 = vcombine.low %v10332_v16, %v10331_v5 }
 0x19f   : > { %v8742_v62 = vadd.f32 %v1915_v22, %v1451_v54  ;;  %v6876_v3 = vpop.f32.mrf.mxu1 }
 0x1a0   : > { %v1349_v58 = vpop.f32.mrf.mxu0  ;;  %v2615_v3 = vshll.u32 %v7589_v26, 16 }
 0x1a1   : > { %v1452_v43 = vadd.f32 %v1349_v58, %v8449_v18  ;;  %v1918_v60 = vpop.f32.mrf.mxu1  ;;  %v2609_v18 = vrot.slane %v2607_v39, 1  ;;  %v7593_v39 = vld [vmem:[%s7780_s22 + $0x94] ss:$0 sps:$4 sm:$0x11]  }
 0x1a2   : > { %v6793_v30 = vpop.f32.mrf.mxu0  ;;  %v2617_v59 = vrot.slane %v2615_v3, 1 }
 0x1a3   : > { %v8748_v2 = vadd.f32 %v1918_v60, %v1452_v43  ;;  %v6877_v10 = vpop.f32.mrf.mxu1  ;;  %v2610_v38 = vsel %vm2486_vm3, %v2605_v36, %v2609_v18  ;;  %v10334_v43 = vld [vmem:[#allocation10_spill] sm:$0xff]  ;;  %v2613_v52 = vor.u32 %v2611_v4, %v2609_v18  ;;  %v10336_v36 = vld [vmem:[#allocation4_spill] sm:$0xff]  ;;  %v2623_v18 = vshll.u32 %v7593_v39, 16 }
 0x1a4   : > { %v1354_v25 = vpop.f32.mrf.mxu0  ;;  %6991 = vmatmul.mubr.bf16.gmra.mxu0 %v5809_v13 }
 0x1a5   : > { %v1453_v6 = vadd.f32 %v1354_v25, %v10330_v47  ;;  %v1923_v45 = vpop.f32.mrf.mxu1  ;;  %7075 = vmatmul.mubr.bf16.gmra.mxu1 %v2602_v44  ;;  %6994 = vmatprep.mubr.msk.bf16.mxu0 %vm7688_vm0, %v10324_v32  ;;  %v3299_v47 = vld [vmem:[%s7780_s22 + $0x14] sm:$0xf] }
 0x1a6   : > { %v6796_v20 = vpop.f32.mrf.mxu0  ;;  %7078 = vmatprep.mubr.msk.bf16.mxu1 %vm7688_vm0, %v10324_v32 }
 0x1a7   : > { %v8756_v61 = vadd.f32 %v1923_v45, %v1453_v6  ;;  %v6880_v42 = vpop.f32.mrf.mxu1  ;;  %v3300_v6 = vld [vmem:[%s7780_s22 + $0x18] sm:$0xf] }
 0x1a8   : > { %v1357_v21 = vpop.f32.mrf.mxu0  ;;  %v10335_v20 = vld [vmem:[#allocation5_spill] sm:$0xff] }
 0x1a9   : > { %v1454_v41 = vadd.f32 %v1357_v21, %v10333_v17  ;;  %v1926_v54 = vpop.f32.mrf.mxu1  ;;  %v5811_v42 = vcombine.low %v10336_v36, %v10335_v20  ;;  %v2619_v17 = vshrl.u32 %v7589_v26, 16  ;;  %v2625_v26 = vrot.slane %v2623_v18, 1 }
 0x1aa   : > { %v6797_v22 = vpop.f32.mrf.mxu0 }
 0x1ab   : > { %v8762_v8 = vadd.f32 %v1926_v54, %v1454_v41  ;;  %v6881_v58 = vpop.f32.mrf.mxu1  ;;  %v5920_v41 = vcombine.low %v3299_v47, %v3300_v6 }
 0x1ac   : > { %v1362_v13 = vpop.f32.mrf.mxu0  ;;  %6995 = vmatmul.mubr.bf16.gmra.mxu0 %v5810_v55  ;;  %v2618_v55 = vsel %vm2486_vm3, %v2613_v52, %v2617_v59  ;;  %v2621_v58 = vor.u32 %v2619_v17, %v2617_v59  ;;  %v10337_v52 = vld [vmem:[#allocation8_spill] sm:$0xff] }
 0x1ad   : > { %v1455_v60 = vadd.f32 %v1362_v13, %v10334_v43  ;;  %v1931_v30 = vpop.f32.mrf.mxu1  ;;  %7079 = vmatmul.mubr.bf16.gmra.mxu1 %v2610_v38  ;;  %6998 = vmatprep.mubr.msk.bf16.mxu0 %vm7688_vm0, %v10324_v32  ;;  %v8786_v13 = vld [vmem:[%s7780_s22 + $0x1c] sm:$0xff]   ;;  %v3442_v43 = vshll.u32 %v5920_v41, 16  ;;  %v3440_v20 = vshrl.u32 %v5920_v41, 16  ;;  %v7600_v41 = vld [vmem:[%s7780_s22 + $0x24] sm:$0xff]  }
 0x1ae   : > { %v6800_v44 = vpop.f32.mrf.mxu0  ;;  %7082 = vmatprep.mubr.msk.bf16.mxu1 %vm7688_vm0, %v10324_v32  ;;  %v3447_v36 = vshll.u32 %v8786_v13, 16 }
 0x1af   : > { %v8770_v10 = vadd.f32 %v1931_v30, %v1455_v60  ;;  %v6884_v25 = vpop.f32.mrf.mxu1  ;;  %v3444_v59 = vrot.slane %v3442_v43, 1 }
 0x1b0   : > { %v1365_v45 = vpop.f32.mrf.mxu0  ;;  %v3449_v18 = vrot.slane %v3447_v36, 1  ;;  %v8824_v36 = vld [vmem:[%s7780_s22 + $0x2c] sm:$0xff]  }
 0x1b1   : > { %v1456_v21 = vadd.f32 %v1365_v45, %v8477_v1  ;;  %v1934_v5 = vpop.f32.mrf.mxu1  ;;  %v2626_v45 = vsel %vm2486_vm3, %v2621_v58, %v2625_v26  ;;  %v3445_v17 = vor.u32 %v3444_v59, %v3440_v20  ;;  %v7597_v58 = vld [vmem:[%s10235_s1 + $0x238] sm:$0xff]  }
 0x1b2   : > { %v6801_v16 = vpop.f32.mrf.mxu0 }
 0x1b3   : > { %v8778_v54 = vadd.f32 %v1934_v5, %v1456_v21  ;;  %v6885_v22 = vpop.f32.mrf.mxu1  ;;  %v3450_v43 = vsel %vm2486_vm3, %v3445_v17, %v3449_v18 }
 0x1b4   : > { %v1370_v38 = vpop.f32.mrf.mxu0  ;;  %6999 = vmatmul.mubr.bf16.gmra.mxu0 %v5811_v42 }
 0x1b5   : > { %v1457_v4 = vadd.f32 %v1370_v38, %v8483_v28  ;;  %v1939_v3 = vpop.f32.mrf.mxu1  ;;  %7083 = vmatmul.mubr.bf16.gmra.mxu1 %v2618_v55  ;;  %7002 = vmatprep.mubr.msk.bf16.mxu0 %vm7688_vm0, %v10324_v32  ;;  %v10338_v28 = vld [vmem:[#allocation6_spill] sm:$0xff] }
 0x1b6   : > { %v6804_v1 = vpop.f32.mrf.mxu0  ;;  %7086 = vmatprep.mubr.msk.bf16.mxu1 %vm7688_vm0, %v10324_v32  ;;  %v5812_v39 = vcombine.low %v10338_v28, %v10337_v52  ;;  %v3455_v52 = vshll.u32 %v7600_v41, 16 }
 0x1b7   : > { %v8788_v60 = vadd.f32 %v1939_v3, %v1457_v4  ;;  %v6888_v30 = vpop.f32.mrf.mxu1  ;;  %v7594_v3 = vld [vmem:[%s7780_s22 + $0x14] sm:$0xff]  }
 0x1b8   : > { %v1373_v44 = vpop.f32.mrf.mxu0  ;;  %v7598_v30 = vld [vmem:[%s10236_s2 + $0x38] sm:$0xff]   ;;  %v3457_v59 = vrot.slane %v3455_v52, 1 }
 0x1b9   : > { %v1458_v25 = vadd.f32 %v1373_v44, %v8491_v24  ;;  %v1942_v47 = vpop.f32.mrf.mxu1  ;;  %v3451_v44 = vshrl.u32 %v8786_v13, 16 }
 0x1ba   : > { %v6805_v6 = vpop.f32.mrf.mxu0 }
 0x1bb   : > { %v8795_v42 = vadd.f32 %v1942_v47, %v1458_v25  ;;  %v6889_v21 = vpop.f32.mrf.mxu1  ;;  %v7603_v6 = vld [vmem:[%s10235_s1 + $0x230] sm:$0xff]   ;;  %v3453_v20 = vor.u32 %v3451_v44, %v3449_v18 }
 0x1bc   : > { %v1378_v5 = vpop.f32.mrf.mxu0  ;;  %7003 = vmatmul.mubr.bf16.gmra.mxu0 %v5812_v39 }
 0x1bd   : > { %v1459_v16 = vadd.f32 %v1378_v5, %v8495_v15  ;;  %v1947_v55 = vpop.f32.mrf.mxu1  ;;  %7087 = vmatmul.mubr.bf16.gmra.mxu1 %v2626_v45  ;;  %7106 = vmatprep.mubr.msk.bf16.mxu0 %vm7688_vm0, %v10324_v32 }
 0x1be   : > { %v6808_v24 = vpop.f32.mrf.mxu0  ;;  %7190 = vmatprep.mubr.msk.bf16.mxu1 %vm7688_vm0, %v10324_v32 }
 0x1bf   : > { %v8803_v22 = vadd.f32 %v1947_v55, %v1459_v16  ;;  %v6892_v38 = vpop.f32.mrf.mxu1  ;;  %v7599_v55 = vld [vmem:[%s7780_s22 + $0x1c] sm:$0xff]  }
 0x1c0   : > { %v1381_v4 = vpop.f32.mrf.mxu0  ;;  %v3458_v38 = vsel %vm2486_vm3, %v3453_v20, %v3457_v59 }
 0x1c1   : > { %v1460_v1 = vadd.f32 %v1381_v4, %v8503_v63  ;;  %v1950_v15 = vpop.f32.mrf.mxu1  ;;  %v3459_v4 = vshrl.u32 %v7600_v41, 16 }
 0x1c2   : > { %v6809_v26 = vpop.f32.mrf.mxu0 }
 0x1c3   : > { %v8815_v28 = vadd.f32 %v1950_v15, %v1460_v1  ;;  %v6893_v39 = vpop.f32.mrf.mxu1  ;;  %v7609_v1 = vld [vmem:[%s10235_s1 + $0x228] sm:$0xff]   ;;  %v3461_v44 = vor.u32 %v3459_v4, %v3457_v59 }
 0x1c4   : > { %v1386_v63 = vpop.f32.mrf.mxu0  ;;  %7107 = vmatmul.mubr.bf16.vlgmr.msra.gmra.mxu0 %v7594_v3  ;;  %v3463_v3 = vshll.u32 %v8824_v36, 16  ;;  %v8855_v39 = vld [vmem:[%s7780_s22 + $0x34] sm:$0xff]  }
 0x1c5   : > { %v1461_v25 = vadd.f32 %v1386_v63, %v8515_v37  ;;  %v1955_v47 = vpop.f32.mrf.mxu1  ;;  %7191 = vmatmul.mubr.bf16.vlgmr.msra.gmra.mxu1 %v3450_v43  ;;  %7259 = vmatpush3.bf16.msra.mxu0 %v7597_v58  ;;  %v7604_v37 = vld [vmem:[%s10236_s2 + $0x30] sm:$0xff]   ;;  %v7615_v63 = vld [vmem:[%s10235_s1 + $0x220] sm:$0xff]  }
 0x1c6   : > { %v6812_v45 = vpop.f32.mrf.mxu0  ;;  %7343 = vmatpush3.bf16.msra.mxu1 %v7598_v30  ;;  %7110 = vmatprep.mubr.msk.bf16.mxu0 %vm7688_vm0, %v10324_v32  ;;  %v3465_v52 = vrot.slane %v3463_v3, 1 }
 0x1c7   : > { %v8829_v21 = vadd.f32 %v1955_v47, %v1461_v25  ;;  %v6896_v5 = vpop.f32.mrf.mxu1  ;;  %7194 = vmatprep.mubr.msk.bf16.mxu1 %vm7688_vm0, %v10324_v32  ;;  %7260 = vmatprep.subr.bf16.mxu0 %v10324_v32  ;;  %v7616_v47 = vld [vmem:[%s10236_s2 + $0x20] sm:$0xff]  }
 0x1c8   : > { %v1389_v16 = vpop.f32.mrf.mxu0  ;;  %7344 = vmatprep.subr.bf16.mxu1 %v10324_v32  ;;  %v7601_v45 = vld [vmem:[%s7780_s22 + $0x24] sm:$0xff]   ;;  %v3466_v5 = vsel %vm2486_vm3, %v3461_v44, %v3465_v52  ;;  %v7605_v44 = vld [vmem:[%s7780_s22 + $0x2c] sm:$0xff]  }
 0x1c9   : > { %v1462_v24 = vadd.f32 %v1389_v16, %v8531_v50  ;;  %v1958_v17 = vpop.f32.mrf.mxu1  ;;  %7261 = vmatpush3.bf16.msra.mxu0 %v7603_v6  ;;  %v7610_v50 = vld [vmem:[%s10236_s2 + $0x28] sm:$0xff]   ;;  %v3467_v16 = vshrl.u32 %v8824_v36, 16 }
 0x1ca   : > { %v6813_v18 = vpop.f32.mrf.mxu0  ;;  %7345 = vmatpush3.bf16.msra.mxu1 %v7604_v37  ;;  %7262 = vmatprep.subr.bf16.mxu0 %v10324_v32 }
 0x1cb   : > { %v8843_v15 = vadd.f32 %v1958_v17, %v1462_v24  ;;  %v6897_v58 = vpop.f32.mrf.mxu1  ;;  %7346 = vmatprep.subr.bf16.mxu1 %v10324_v32  ;;  %v7621_v24 = vld [vmem:[%s10235_s1 + $0x218] sm:$0xff]  }
 0x1cc   : > { %v1394_v41 = vpop.f32.mrf.mxu0  ;;  %7111 = vmatmul.mubr.bf16.gmra.mxu0 %v7599_v55  ;;  %v3471_v55 = vshll.u32 %v8855_v39, 16 }
 0x1cd   : > { %v1463_v26 = vadd.f32 %v1394_v41, %v8545_v56  ;;  %v1963_v43 = vpop.f32.mrf.mxu1  ;;  %7195 = vmatmul.mubr.bf16.gmra.mxu1 %v3458_v38  ;;  %7114 = vmatprep.mubr.msk.bf16.mxu0 %vm7688_vm0, %v10324_v32  ;;  %v7627_v41 = vld [vmem:[%s10235_s1 + $0x210] sm:$0xff]  }
 0x1ce   : > { %v6816_v30 = vpop.f32.mrf.mxu0  ;;  %7198 = vmatprep.mubr.msk.bf16.mxu1 %vm7688_vm0, %v10324_v32  ;;  %7263 = vmatpush3.bf16.msra.mxu0 %v7609_v1  ;;  %v3469_v1 = vor.u32 %v3467_v16, %v3465_v52  ;;  %v3473_v58 = vrot.slane %v3471_v55, 1 }
 0x1cf   : > { %v8860_v56 = vadd.f32 %v1963_v43, %v1463_v26  ;;  %v6900_v25 = vpop.f32.mrf.mxu1  ;;  %7347 = vmatpush3.bf16.msra.mxu1 %v7610_v50  ;;  %7264 = vmatprep.subr.bf16.mxu0 %v10324_v32  ;;  %v8888_v50 = vld [vmem:[%s7780_s22 + $0x3c] sm:$0xff]   ;;  %v7630_v43 = vld [vmem:[%s10236_s2 + $0x10] sm:$0xff]  }
 0x1d0   : > { %v1397_v6 = vpop.f32.mrf.mxu0  ;;  %7348 = vmatprep.subr.bf16.mxu1 %v10324_v32 }
 0x1d1   : > { %v1464_v20 = vadd.f32 %v1397_v6, %v8562_v9  ;;  %v1966_v59 = vpop.f32.mrf.mxu1  ;;  %v7622_v9 = vld [vmem:[%s10236_s2 + $0x18] sm:$0xff]   ;;  %v3475_v6 = vshrl.u32 %v8855_v39, 16 }
 0x1d2   : > { %v6817_v37 = vpop.f32.mrf.mxu0  ;;  %7265 = vmatpush3.bf16.msra.mxu0 %v7615_v63 }
 0x1d3   : > { %v8875_v17 = vadd.f32 %v1966_v59, %v1464_v20  ;;  %v6901_v18 = vpop.f32.mrf.mxu1  ;;  %7349 = vmatpush3.bf16.msra.mxu1 %v7616_v47  ;;  %7266 = vmatprep.subr.bf16.mxu0 %v10324_v32  ;;  %v3474_v47 = vsel %vm2486_vm3, %v3469_v1, %v3473_v58  ;;  %v7633_v20 = vld [vmem:[%s10235_s1 + $0x208] sm:$0xff]  }
 0x1d4   : > { %v1402_v38 = vpop.f32.mrf.mxu0  ;;  %7115 = vmatmul.mubr.bf16.gmra.mxu0 %v7601_v45  ;;  %7350 = vmatprep.subr.bf16.mxu1 %v10324_v32  ;;  %v3479_v45 = vshll.u32 %v8888_v50, 16  ;;  %v3477_v18 = vor.u32 %v3475_v6, %v3473_v58  ;;  %v7607_v58 = vld [vmem:[%s7780_s22 + $0x34] sm:$0xff]  }
 0x1d5   : > { %v1465_v36 = vadd.f32 %v1402_v38, %v8577_v27  ;;  %v1971_v4 = vpop.f32.mrf.mxu1  ;;  %7199 = vmatmul.mubr.bf16.gmra.mxu1 %v3466_v5  ;;  %7118 = vmatprep.mubr.msk.bf16.mxu0 %vm7688_vm0, %v10324_v32  ;;  %v8921_v38 = vld [vmem:[%s7780_s22 + $0x44] sm:$0xff]  }
 0x1d6   : > { %v6820_v3 = vpop.f32.mrf.mxu0  ;;  %7202 = vmatprep.mubr.msk.bf16.mxu1 %vm7688_vm0, %v10324_v32  ;;  %7267 = vmatpush3.bf16.msra.mxu0 %v7621_v24 }
 0x1d7   : > { %v8893_v27 = vadd.f32 %v1971_v4, %v1465_v36  ;;  %v6904_v26 = vpop.f32.mrf.mxu1  ;;  %7351 = vmatpush3.bf16.msra.mxu1 %v7622_v9  ;;  %7268 = vmatprep.subr.bf16.mxu0 %v10324_v32  ;;  %v3481_v9 = vrot.slane %v3479_v45, 1  ;;  %v7641_v36 = vld [vmem:[%s10235_s1 + $0x200] sm:$0xff]  }
 0x1d8   : > { %v1405_v30 = vpop.f32.mrf.mxu0  ;;  %7352 = vmatprep.subr.bf16.mxu1 %v10324_v32  ;;  %v7642_v3 = vld [vmem:[%s10236_s2] sm:$0xff]  }
 0x1d9   : > { %v1466_v52 = vadd.f32 %v1405_v30, %v8594_v53  ;;  %v1974_v63 = vpop.f32.mrf.mxu1  ;;  %v7636_v53 = vld [vmem:[%s10236_s2 + $0x8] sm:$0xff]   ;;  %v3482_v30 = vsel %vm2486_vm3, %v3477_v18, %v3481_v9 }
 0x1da   : > { %v6821_v25 = vpop.f32.mrf.mxu0  ;;  %7269 = vmatpush3.bf16.msra.mxu0 %v7627_v41 }
 0x1db   : > { %v8908_v59 = vadd.f32 %v1974_v63, %v1466_v52  ;;  %v6905_v37 = vpop.f32.mrf.mxu1  ;;  %7353 = vmatpush3.bf16.msra.mxu1 %v7630_v43  ;;  %7270 = vmatprep.subr.bf16.mxu0 %v10324_v32  ;;  %v3487_v52 = vshll.u32 %v8921_v38, 16 }
 0x1dc   : > { %v1410_v5 = vpop.f32.mrf.mxu0  ;;  %7119 = vmatmul.mubr.bf16.gmra.mxu0 %v7605_v44  ;;  %7354 = vmatprep.subr.bf16.mxu1 %v10324_v32  ;;  %v3483_v44 = vshrl.u32 %v8888_v50, 16 }
 0x1dd   : > { %v1467_v16 = vadd.f32 %v1410_v5, %v8609_v57  ;;  %v1979_v55 = vpop.f32.mrf.mxu1  ;;  %7203 = vmatmul.mubr.bf16.gmra.mxu1 %v3474_v47  ;;  %7122 = vmatprep.mubr.msk.bf16.mxu0 %vm7688_vm0, %v10324_v32  ;;  %v3489_v37 = vrot.slane %v3487_v52, 1  ;;  %v8963_v52 = vld [vmem:[%s7780_s22 + $0x54] sm:$0xff]  }
 0x1de   : > { %v6824_v24 = vpop.f32.mrf.mxu0  ;;  %7206 = vmatprep.mubr.msk.bf16.mxu1 %vm7688_vm0, %v10324_v32  ;;  %7271 = vmatpush3.bf16.msra.mxu0 %v7633_v20  ;;  %v3485_v20 = vor.u32 %v3483_v44, %v3481_v9 }
 0x1df   : > { %v8926_v57 = vadd.f32 %v1979_v55, %v1467_v16  ;;  %v6908_v4 = vpop.f32.mrf.mxu1  ;;  %7355 = vmatpush3.bf16.msra.mxu1 %v7636_v53  ;;  %7272 = vmatprep.subr.bf16.mxu0 %v10324_v32  ;;  %v8946_v53 = vld [vmem:[%s7780_s22 + $0x4c] sm:$0xff]   ;;  %v7611_v24 = vld [vmem:[%s7780_s22 + $0x3c] sm:$0xff]  }
 0x1e0   : > { %v1413_v1 = vpop.f32.mrf.mxu0  ;;  %7356 = vmatprep.subr.bf16.mxu1 %v10324_v32  ;;  %v3490_v4 = vsel %vm2486_vm3, %v3485_v20, %v3489_v37 }
 0x1e1   : > { %v1468_v41 = vadd.f32 %v1413_v1, %v8624_v34  ;;  %v1982_v26 = vpop.f32.mrf.mxu1  ;;  %v3495_v1 = vshll.u32 %v8946_v53, 16 }
 0x1e2   : > { %v6825_v43 = vpop.f32.mrf.mxu0  ;;  %7273 = vmatpush3.bf16.msra.mxu0 %v7641_v36 }
 0x1e3   : > { %v8938_v63 = vadd.f32 %v1982_v26, %v1468_v41  ;;  %v6909_v25 = vpop.f32.mrf.mxu1  ;;  %7357 = vmatpush3.bf16.msra.mxu1 %v7642_v3  ;;  %v3491_v3 = vshrl.u32 %v8921_v38, 16  ;;  %v3497_v44 = vrot.slane %v3495_v1, 1 }
 0x1e4   : > { %v1418_v47 = vpop.f32.mrf.mxu0  ;;  %7123 = vmatmul.mubr.bf16.gmra.mxu0 %v7607_v58 }
 0x1e5   : > { %v1469_v6 = vadd.f32 %v1418_v47, %v8632_v51  ;;  %v1987_v34 = vpop.f32.mrf.mxu1  ;;  %7207 = vmatmul.mubr.bf16.gmra.mxu1 %v3482_v30  ;;  %7126 = vmatprep.mubr.msk.bf16.mxu0 %vm7688_vm0, %v10324_v32  ;;  %v3493_v30 = vor.u32 %v3491_v3, %v3489_v37 }
 0x1e6   : > { %v6828_v45 = vpop.f32.mrf.mxu0  ;;  %7210 = vmatprep.mubr.msk.bf16.mxu1 %vm7688_vm0, %v10324_v32 }
 0x1e7   : > { %v8948_v5 = vadd.f32 %v1987_v34, %v1469_v6  ;;  %v6912_v16 = vpop.f32.mrf.mxu1  ;;  %v7613_v34 = vld [vmem:[%s7780_s22 + $0x44] sm:$0xff]  }
 0x1e8   : > { %v1421_v55 = vpop.f32.mrf.mxu0  ;;  %v3498_v16 = vsel %vm2486_vm3, %v3493_v30, %v3497_v44 }
 0x1e9   : > { %v1470_v51 = vadd.f32 %v1421_v55, %v8639_v7  ;;  %v1990_v18 = vpop.f32.mrf.mxu1  ;;  %v3499_v55 = vshrl.u32 %v8946_v53, 16 }
 0x1ea   : > { %v6829_v36 = vpop.f32.mrf.mxu0 }
 0x1eb   : > { %v8955_v9 = vadd.f32 %v1990_v18, %v1470_v51  ;;  %v6913_v58 = vpop.f32.mrf.mxu1  ;;  %v3501_v3 = vor.u32 %v3499_v55, %v3497_v44 }
 0x1ec   : > { %v1426_v41 = vpop.f32.mrf.mxu0  ;;  %7127 = vmatmul.mubr.bf16.gmra.mxu0 %v7611_v24  ;;  %v3503_v24 = vshll.u32 %v8963_v52, 16  ;;  %v8980_v58 = vld [vmem:[%s7780_s22 + $0x5c] sm:$0xff]  }
 0x1ed   : > { %v1471_v26 = vadd.f32 %v1426_v41, %v8644_v35  ;;  %v1995_v43 = vpop.f32.mrf.mxu1  ;;  %7211 = vmatmul.mubr.bf16.gmra.mxu1 %v3490_v4  ;;  %7130 = vmatprep.mubr.msk.bf16.mxu0 %vm7688_vm0, %v10324_v32 }
 0x1ee   : > { %v6832_v7 = vpop.f32.mrf.mxu0  ;;  %7214 = vmatprep.mubr.msk.bf16.mxu1 %vm7688_vm0, %v10324_v32  ;;  %v3505_v1 = vrot.slane %v3503_v24, 1 }
 0x1ef   : > { %v8965_v25 = vadd.f32 %v1995_v43, %v1471_v26  ;;  %v6916_v47 = vpop.f32.mrf.mxu1  ;;  %v7617_v7 = vld [vmem:[%s7780_s22 + $0x4c] sm:$0xff]  }
 0x1f0   : > { %v1429_v6 = vpop.f32.mrf.mxu0 }
 0x1f1   : > { %v1472_v35 = vadd.f32 %v1429_v6, %v8651_v0  ;;  %v1998_v45 = vpop.f32.mrf.mxu1  ;;  %v3506_v6 = vsel %vm2486_vm3, %v3501_v3, %v3505_v1  ;;  %v7619_v3 = vld [vmem:[%s7780_s22 + $0x54] sm:$0xff]  }
 0x1f2   : > { %v6833_v20 = vpop.f32.mrf.mxu0 }
 0x1f3   : > { %v8972_v37 = vadd.f32 %v1998_v45, %v1472_v35  ;;  %v6917_v51 = vpop.f32.mrf.mxu1  ;;  %v3511_v35 = vshll.u32 %v8980_v58, 16 }
 0x1f4   : > { %v1434_v18 = vpop.f32.mrf.mxu0  ;;  %7131 = vmatmul.mubr.bf16.gmra.mxu0 %v7613_v34  ;;  %v3507_v34 = vshrl.u32 %v8963_v52, 16 }
 0x1f5   : > { %v1473_v36 = vadd.f32 %v1434_v18, %v8656_v40  ;;  %v2003_v4 = vpop.f32.mrf.mxu1  ;;  %7215 = vmatmul.mubr.bf16.gmra.mxu1 %v3498_v16  ;;  %7134 = vmatprep.mubr.msk.bf16.mxu0 %vm7688_vm0, %v10324_v32  ;;  %v3513_v51 = vrot.slane %v3511_v35, 1  ;;  %v8997_v18 = vld [vmem:[%s7780_s22 + $0x64] sm:$0xff]  }
 0x1f6   : > { %v6836_v0 = vpop.f32.mrf.mxu0  ;;  %7218 = vmatprep.mubr.msk.bf16.mxu1 %vm7688_vm0, %v10324_v32  ;;  %v3509_v24 = vor.u32 %v3507_v34, %v3505_v1 }
 0x1f7   : > { %v8982_v41 = vadd.f32 %v2003_v4, %v1473_v36  ;;  %v6920_v26 = vpop.f32.mrf.mxu1 }
 0x1f8   : > { %v1437_v43 = vpop.f32.mrf.mxu0 }
 0x1f9   : > { %v1474_v40 = vadd.f32 %v1437_v43, %v8663_v49  ;;  %v2006_v30 = vpop.f32.mrf.mxu1 }
 0x1fa   : > { %v6837_v47 = vpop.f32.mrf.mxu0 }
 0x1fb   : > { %v8989_v44 = vadd.f32 %v2006_v30, %v1474_v40  ;;  %v6921_v45 = vpop.f32.mrf.mxu1  ;;  %v3515_v40 = vshrl.u32 %v8980_v58, 16  ;;  %v3519_v30 = vshll.u32 %v8997_v18, 16 }
 0x1fc   : > { %v2177_v20 = vpop.f32.mrf.mxu0  ;;  %7135 = vmatmul.mubr.bf16.gmra.mxu0 %v7617_v7  ;;  %v3514_v7 = vsel %vm2486_vm3, %v3509_v24, %v3513_v51 }
 0x1fd   : > { %v2312_v16 = vadd.f32 %v2177_v20, %v8672_v33  ;;  %v2726_v55 = vpop.f32.mrf.mxu1  ;;  %7219 = vmatmul.mubr.bf16.gmra.mxu1 %v3506_v6  ;;  %7138 = vmatprep.mubr.msk.bf16.mxu0 %vm7688_vm0, %v10324_v32  ;;  %v3517_v45 = vor.u32 %v3515_v40, %v3513_v51  ;;  %v3521_v20 = vrot.slane %v3519_v30, 1 }
 0x1fe   : > { %v6940_v49 = vpop.f32.mrf.mxu0  ;;  %7222 = vmatprep.mubr.msk.bf16.mxu1 %vm7688_vm0, %v10324_v32 }
 0x1ff   : > { %v8999_v36 = vadd.f32 %v2726_v55, %v2312_v16  ;;  %v7024_v4 = vpop.f32.mrf.mxu1  ;;  %v9014_v16 = vld [vmem:[%s7780_s22 + $0x6c] sm:$0xff]  }
 0x200   : > { %v2180_v0 = vpop.f32.mrf.mxu0  ;;  %v7623_v4 = vld [vmem:[%s7780_s22 + $0x5c] sm:$0xff]  }
 0x201   : > { %v2313_v33 = vadd.f32 %v2180_v0, %v8678_v29  ;;  %v2729_v26 = vpop.f32.mrf.mxu1 }
 0x202   : > { %v6941_v43 = vpop.f32.mrf.mxu0 }
 0x203   : > { %v9006_v1 = vadd.f32 %v2729_v26, %v2313_v33  ;;  %v7025_v47 = vpop.f32.mrf.mxu1  ;;  %v3522_v33 = vsel %vm2486_vm3, %v3517_v45, %v3521_v20  ;;  %v3523_v26 = vshrl.u32 %v8997_v18, 16  ;;  %v3527_v43 = vshll.u32 %v9014_v16, 16 }
 0x204   : > { %v2185_v6 = vpop.f32.mrf.mxu0  ;;  %7139 = vmatmul.mubr.bf16.gmra.mxu0 %v7619_v3 }
 0x205   : > { %v2314_v34 = vadd.f32 %v2185_v6, %v8686_v19  ;;  %v2734_v35 = vpop.f32.mrf.mxu1  ;;  %7223 = vmatmul.mubr.bf16.gmra.mxu1 %v3514_v7  ;;  %7142 = vmatprep.mubr.msk.bf16.mxu0 %vm7688_vm0, %v10324_v32  ;;  %v3525_v6 = vor.u32 %v3523_v26, %v3521_v20 }
 0x206   : > { %v6944_v29 = vpop.f32.mrf.mxu0  ;;  %7226 = vmatprep.mubr.msk.bf16.mxu1 %vm7688_vm0, %v10324_v32 }
 0x207   : > { %v9016_v55 = vadd.f32 %v2734_v35, %v2314_v34  ;;  %v7028_v49 = vpop.f32.mrf.mxu1  ;;  %v3529_v34 = vrot.slane %v3527_v43, 1  ;;  %v9031_v35 = vld [vmem:[%s7780_s22 + $0x74] sm:$0xff]  }
 0x208   : > { %v2188_v24 = vpop.f32.mrf.mxu0  ;;  %v3535_v26 = vshll.u32 %v9031_v35, 16 }
 0x209   : > { %v2315_v19 = vadd.f32 %v2188_v24, %v8692_v46  ;;  %v2737_v0 = vpop.f32.mrf.mxu1  ;;  %v7625_v24 = vld [vmem:[%s7780_s22 + $0x64] sm:$0xff]   ;;  %v3530_v20 = vsel %vm2486_vm3, %v3525_v6, %v3529_v34 }
 0x20a   : > { %v6945_v3 = vpop.f32.mrf.mxu0 }
 0x20b   : > { %v9023_v51 = vadd.f32 %v2737_v0, %v2315_v19  ;;  %v7029_v7 = vpop.f32.mrf.mxu1  ;;  %v313_v0 = vld [vmem:[%s10237_s3] sm:$0xff] }
 0x20c   : > { %v2193_v40 = vpop.f32.mrf.mxu0  ;;  %7143 = vmatmul.mubr.bf16.gmra.mxu0 %v7623_v4  ;;  %v7689_v4 = vmov 0  }
 0x20d   : > { %v2316_v30 = vadd.f32 %v2193_v40, %v8700_v48  ;;  %v2742_v47 = vpop.f32.mrf.mxu1  ;;  %7227 = vmatmul.mubr.bf16.gmra.mxu1 %v3522_v33  ;;  %7146 = vmatprep.mubr.msk.bf16.mxu0 %vm7688_vm0, %v10324_v32  ;;  %v3531_v33 = vshrl.u32 %v9014_v16, 16 }
 0x20e   : > { %v6948_v46 = vpop.f32.mrf.mxu0  ;;  %7230 = vmatprep.mubr.msk.bf16.mxu1 %vm7688_vm0, %v10324_v32  ;;  %7439 = vset.pattern.permute.xlu0 %v7689_v4 }
 0x20f   : > { %v9033_v29 = vadd.f32 %v2742_v47, %v2316_v30  ;;  %v7032_v45 = vpop.f32.mrf.mxu1  ;;  %7440 = vset.pattern.permute.xlu1 %v7689_v4  ;;  %4344 = vperm.xlu0 %7439, %v313_v0   ;;  %v314_v47 = vld [vmem:[%s10237_s3 + $0x8] sm:$0xff]  ;;  %v3533_v6 = vor.u32 %v3531_v33, %v3529_v34  ;;  %v315_v4 = vld [vmem:[%s10237_s3 + $0x10] sm:$0xff]  ;;  %v3539_v33 = vshrl.u32 %v9031_v35, 16 }
 0x210   : > { %v2196_v49 = vpop.f32.mrf.mxu0  ;;  %v3537_v45 = vrot.slane %v3535_v26, 1  ;;  %4354 = vperm.xlu1 %7440, %v315_v4  }
 0x211   : > { %v2317_v48 = vadd.f32 %v2196_v49, %v8706_v11  ;;  %v2745_v19 = vpop.f32.mrf.mxu1  ;;  %v9054_v49 = vld [vmem:[%s7780_s22 + $0x7c] sm:$0xff]  }
 0x212   : > { %v6949_v3 = vpop.f32.mrf.mxu0  ;;  %v3538_v34 = vsel %vm2486_vm3, %v3533_v6, %v3537_v45  ;;  %v3543_v26 = vshll.u32 %v9054_v49, 16 }
 0x213   : > { %v9043_v43 = vadd.f32 %v2745_v19, %v2317_v48  ;;  %v7033_v7 = vpop.f32.mrf.mxu1  ;;  %4349 = vperm.xlu0 %7439, %v314_v47   ;;  %v7628_v19 = vld [vmem:[%s7780_s22 + $0x6c] sm:$0xff]  }
 0x214   : > { %v2201_v40 = vpop.f32.mrf.mxu0  ;;  %7147 = vmatmul.mubr.bf16.gmra.mxu0 %v7625_v24  ;;  %v3545_v4 = vrot.slane %v3543_v26, 1 }
 0x215   : > { %v2318_v11 = vadd.f32 %v2201_v40, %v8714_v31  ;;  %v2750_v30 = vpop.f32.mrf.mxu1  ;;  %7231 = vmatmul.mubr.bf16.gmra.mxu1 %v3530_v20  ;;  %7150 = vmatprep.mubr.msk.bf16.mxu0 %vm7688_vm0, %v10324_v32 }
 0x216   : > { %v6952_v46 = vpop.f32.mrf.mxu0  ;;  %7234 = vmatprep.mubr.msk.bf16.mxu1 %vm7688_vm0, %v10324_v32 }
 0x217   : > { %v9056_v24 = vadd.f32 %v2750_v30, %v2318_v11  ;;  %v7036_v31 = vpop.f32.mrf.mxu1  ;;  %v316_v11 = vld [vmem:[%s10237_s3 + $0x18] sm:$0xff] }
 0x218   : > { %v2204_v48 = vpop.f32.mrf.mxu0  ;;  %4359 = vperm.xlu1 %7440, %v316_v11   ;;  %v3541_v31 = vor.u32 %v3539_v33, %v3537_v45  ;;  %v3547_v11 = vshrl.u32 %v9054_v49, 16 }
 0x219   : > { %v2319_v0 = vadd.f32 %v2204_v48, %v8720_v23  ;;  %v2753_v3 = vpop.f32.mrf.mxu1  ;;  %v317_v23 = vld [vmem:[%s10237_s3 + $0x20] sm:$0xff] }
 0x21a   : > { %v6953_v20 = vpop.f32.mrf.mxu0  ;;  %v9080_v48 = vld [vmem:[%s7780_s22 + $0x84] sm:$0xff]   ;;  %4364 = vperm.xlu0 %7439, %v317_v23  }
 0x21b   : > { %v9066_v7 = vadd.f32 %v2753_v3, %v2319_v0  ;;  %v7037_v40 = vpop.f32.mrf.mxu1  ;;  %v319_v3 = vld [vmem:[%s10237_s3 + $0x30] sm:$0xff]  ;;  %v3551_v23 = vshll.u32 %v9080_v48, 16 }
 0x21c   : > { %v2209_v30 = vpop.f32.mrf.mxu0  ;;  %7151 = vmatmul.mubr.bf16.gmra.mxu0 %v7628_v19  ;;  %v3546_v40 = vsel %vm2486_vm3, %v3541_v31, %v3545_v4 }
 0x21d   : > { %v2320_v47 = vadd.f32 %v2209_v30, %v8728_v14  ;;  %v2758_v46 = vpop.f32.mrf.mxu1  ;;  %7235 = vmatmul.mubr.bf16.gmra.mxu1 %v3538_v34  ;;  %7154 = vmatprep.mubr.msk.bf16.mxu0 %vm7688_vm0, %v10324_v32  ;;  %v318_v14 = vld [vmem:[%s10237_s3 + $0x28] sm:$0xff]  ;;  %v7631_v34 = vld [vmem:[%s7780_s22 + $0x74] sm:$0xff]  }
 0x21e   : > { %v6956_v6 = vpop.f32.mrf.mxu0  ;;  %7238 = vmatprep.mubr.msk.bf16.mxu1 %vm7688_vm0, %v10324_v32  ;;  %4369 = vperm.xlu1 %7440, %v318_v14  }
 0x21f   : > { %v9082_v0 = vadd.f32 %v2758_v46, %v2320_v47  ;;  %v7040_v19 = vpop.f32.mrf.mxu1  ;;  %4374 = vperm.xlu0 %7439, %v319_v3   ;;  %v320_v46 = vld [vmem:[%s10237_s3 + $0x38] sm:$0xff]  ;;  %v3549_v3 = vor.u32 %v3547_v11, %v3545_v4 }
 0x220   : > { %v2212_v20 = vpop.f32.mrf.mxu0 }
 0x221   : > { %v2321_v45 = vadd.f32 %v2212_v20, %v8734_v12  ;;  %v2761_v33 = vpop.f32.mrf.mxu1  ;;  %v321_v12 = vld [vmem:[%s10237_s3 + $0x40] sm:$0xff]  ;;  %v3553_v20 = vrot.slane %v3551_v23, 1 }
 0x222   : > { %v6957_v26 = vpop.f32.mrf.mxu0  ;;  %4379 = vperm.xlu1 %7440, %v320_v46  }
 0x223   : > { %v9095_v30 = vadd.f32 %v2761_v33, %v2321_v45  ;;  %v7041_v47 = vpop.f32.mrf.mxu1  ;;  %v9109_v45 = vld [vmem:[%s7780_s22 + $0x8c] sm:$0xff]   ;;  %4384 = vperm.xlu0 %7439, %v321_v12   ;;  %v3554_v46 = vsel %vm2486_vm3, %v3549_v3, %v3553_v20  ;;  %v3555_v12 = vshrl.u32 %v9080_v48, 16 }
 0x224   : > { %v2217_v6 = vpop.f32.mrf.mxu0  ;;  %7155 = vmatmul.mubr.bf16.gmra.mxu0 %v7631_v34  ;;  %v323_v26 = vld [vmem:[%s10237_s3 + $0x50] sm:$0xff]  ;;  %v7634_v47 = vld [vmem:[%s7780_s22 + $0x7c] sm:$0xff]  }
 0x225   : > { %v2322_v31 = vadd.f32 %v2217_v6, %v8742_v62  ;;  %v2766_v19 = vpop.f32.mrf.mxu1  ;;  %7239 = vmatmul.mubr.bf16.gmra.mxu1 %v3546_v40  ;;  %7158 = vmatprep.mubr.msk.bf16.mxu0 %vm7688_vm0, %v10324_v32  ;;  %v322_v62 = vld [vmem:[%s10237_s3 + $0x48] sm:$0xff]  ;;  %v3559_v6 = vshll.u32 %v9109_v45, 16 }
 0x226   : > { %v6960_v14 = vpop.f32.mrf.mxu0  ;;  %7242 = vmatprep.mubr.msk.bf16.mxu1 %vm7688_vm0, %v10324_v32  ;;  %4389 = vperm.xlu1 %7440, %v322_v62  }
 0x227   : > { %v9111_v33 = vadd.f32 %v2766_v19, %v2322_v31  ;;  %v7044_v34 = vpop.f32.mrf.mxu1  ;;  %4394 = vperm.xlu0 %7439, %v323_v26   ;;  %v324_v14 = vld [vmem:[%s10237_s3 + $0x58] sm:$0xff] }
 0x228   : > { %v2220_v40 = vpop.f32.mrf.mxu0 }
 0x229   : > { %v2323_v4 = vadd.f32 %v2220_v40, %v8748_v2  ;;  %v2769_v11 = vpop.f32.mrf.mxu1  ;;  %v325_v2 = vld [vmem:[%s10237_s3 + $0x60] sm:$0xff]  ;;  %v3557_v40 = vor.u32 %v3555_v12, %v3553_v20 }
 0x22a   : > { %v6961_v23 = vpop.f32.mrf.mxu0  ;;  %4399 = vperm.xlu1 %7440, %v324_v14   ;;  %v7637_v14 = vld [vmem:[%s7780_s22 + $0x84] sm:$0xff]  }
 0x22b   : > { %v9124_v31 = vadd.f32 %v2769_v11, %v2323_v4  ;;  %v7045_v19 = vpop.f32.mrf.mxu1  ;;  %v3561_v4 = vrot.slane %v3559_v6, 1  ;;  %v9138_v11 = vld [vmem:[%s7780_s22 + $0x94] sm:$0xff]   ;;  %4404 = vperm.xlu0 %7439, %v325_v2  }
 0x22c   : > { %v2225_v34 = vpop.f32.mrf.mxu0  ;;  %7159 = vmatmul.mubr.bf16.gmra.mxu0 %v7634_v47 }
 0x22d   : > { %v2324_v3 = vadd.f32 %v2225_v34, %v8756_v61  ;;  %v2774_v62 = vpop.f32.mrf.mxu1  ;;  %7243 = vmatmul.mubr.bf16.gmra.mxu1 %v3554_v46  ;;  %7162 = vmatprep.mubr.msk.bf16.mxu0 %vm7688_vm0, %v10324_v32  ;;  %v326_v61 = vld [vmem:[%s10237_s3 + $0x68] sm:$0xff]  ;;  %v327_v46 = vld [vmem:[%s10237_s3 + $0x70] sm:$0xff]  ;;  %v3562_v2 = vsel %vm2486_vm3, %v3557_v40, %v3561_v4  ;;  %v3563_v34 = vshrl.u32 %v9109_v45, 16 }
 0x22e   : > { %v6964_v26 = vpop.f32.mrf.mxu0  ;;  %7246 = vmatprep.mubr.msk.bf16.mxu1 %vm7688_vm0, %v10324_v32  ;;  %4409 = vperm.xlu1 %7440, %v326_v61  }
 0x22f   : > { %v9140_v23 = vadd.f32 %v2774_v62, %v2324_v3  ;;  %v7048_v47 = vpop.f32.mrf.mxu1  ;;  %v3567_v3 = vshll.u32 %v9138_v11, 16  ;;  %4414 = vperm.xlu0 %7439, %v327_v46  }
 0x230   : > { %v2228_v19 = vpop.f32.mrf.mxu0  ;;  %v328_v47 = vld [vmem:[%s10237_s3 + $0x78] sm:$0xff] }
 0x231   : > { %v2325_v20 = vadd.f32 %v2228_v19, %v8762_v8  ;;  %v2777_v12 = vpop.f32.mrf.mxu1  ;;  %v329_v8 = vld [vmem:[%s10237_s3 + $0x80] sm:$0xff] }
 0x232   : > { %v6965_v6 = vpop.f32.mrf.mxu0  ;;  %4419 = vperm.xlu1 %7440, %v328_v47  }
 0x233   : > { %v9153_v62 = vadd.f32 %v2777_v12, %v2325_v20  ;;  %v7049_v26 = vpop.f32.mrf.mxu1  ;;  %v3565_v20 = vor.u32 %v3563_v34, %v3561_v4  ;;  %v3569_v12 = vrot.slane %v3567_v3, 1  ;;  %v9167_v6 = vld [vmem:[%s7780_s22 + $0x9c] ss:$0 sps:$4 sm:$0x11]   ;;  %4424 = vperm.xlu0 %7439, %v329_v8  }
 0x234   : > { %v2233_v61 = vpop.f32.mrf.mxu0  ;;  %7163 = vmatmul.mubr.bf16.gmra.mxu0 %v7637_v14  ;;  %10339 = vst [vmem:[#allocation7_spill] sm:$0xff] %v9167_v6 }
 0x235   : > { %v2326_v40 = vadd.f32 %v2233_v61, %v8770_v10  ;;  %v2782_v19 = vpop.f32.mrf.mxu1  ;;  %7247 = vmatmul.mubr.bf16.gmra.mxu1 %v3562_v2  ;;  %7166 = vmatprep.mubr.msk.bf16.mxu0 %vm7688_vm0, %v10324_v32  ;;  %v330_v10 = vld [vmem:[%s10237_s3 + $0x88] sm:$0xff]  ;;  %v331_v2 = vld [vmem:[%s10237_s3 + $0x90] sm:$0xff]  ;;  %v3570_v8 = vsel %vm2486_vm3, %v3565_v20, %v3569_v12 }
 0x236   : > { %v6968_v46 = vpop.f32.mrf.mxu0  ;;  %7250 = vmatprep.mubr.msk.bf16.mxu1 %vm7688_vm0, %v10324_v32  ;;  %v7639_v61 = vld [vmem:[%s7780_s22 + $0x8c] sm:$0xff]   ;;  %4429 = vperm.xlu1 %7440, %v330_v10  }
 0x237   : > { %v9169_v26 = vadd.f32 %v2782_v19, %v2326_v40  ;;  %v7052_v14 = vpop.f32.mrf.mxu1  ;;  %v3571_v40 = vshrl.u32 %v9138_v11, 16  ;;  %v3575_v19 = vshll.u32 %v9167_v6, 16  ;;  %4434 = vperm.xlu0 %7439, %v331_v2   ;;  %v336_v6 = vld [vmem:[%s10237_s3 + $0xb8] sm:$0xff] }
 0x238   : > { %v2236_v47 = vpop.f32.mrf.mxu0 }
 0x239   : > { %10340 = vst [vmem:[#allocation3_spill] sm:$0xff] %v9169_v26  ;;  %v2327_v4 = vadd.f32 %v2236_v47, %v8778_v54  ;;  %v2785_v34 = vpop.f32.mrf.mxu1  ;;  %v332_v26 = vld [vmem:[%s10237_s3 + $0x98] sm:$0xff]  ;;  %v333_v54 = vld [vmem:[%s10237_s3 + $0xa0] sm:$0xff] }
 0x23a   : > { %v6969_v3 = vpop.f32.mrf.mxu0  ;;  %4439 = vperm.xlu1 %7440, %v332_v26  }
 0x23b   : > { %v9182_v46 = vadd.f32 %v2785_v34, %v2327_v4  ;;  %v7053_v14 = vpop.f32.mrf.mxu1  ;;  %v3573_v4 = vor.u32 %v3571_v40, %v3569_v12  ;;  %v3577_v34 = vrot.slane %v3575_v19, 1  ;;  %v3847_v3 = vld [vmem:[%s7780_s22 + $0x14] sm:$0xe]  ;;  %4444 = vperm.xlu0 %7439, %v333_v54   ;;  %v7676_v40 = vld [vmem:[%s7780_s22 + $0x18] sm:$0xf] }
 0x23c   : > { %v2241_v10 = vpop.f32.mrf.mxu0  ;;  %7167 = vmatmul.mubr.bf16.gmra.mxu0 %v7639_v61  ;;  %v335_v61 = vld [vmem:[%s10237_s3 + $0xb0] sm:$0xff]  ;;  %v5962_v19 = vcombine.low %v3847_v3, %v7676_v40 }
 0x23d   : > { %v2328_v20 = vadd.f32 %v2241_v10, %v8788_v60  ;;  %v2790_v47 = vpop.f32.mrf.mxu1  ;;  %7251 = vmatmul.mubr.bf16.gmra.mxu1 %v3570_v8  ;;  %7170 = vmatprep.mubr.msk.bf16.mxu0 %vm7688_vm0, %v10324_v32  ;;  %v334_v60 = vld [vmem:[%s10237_s3 + $0xa8] sm:$0xff]  ;;  %v7643_v10 = vld [vmem:[%s7780_s22 + $0x94] sm:$0xff]  }
 0x23e   : > { %v6972_v2 = vpop.f32.mrf.mxu0  ;;  %7254 = vmatprep.mubr.msk.bf16.mxu1 %vm7688_vm0, %v10324_v32  ;;  %4449 = vperm.xlu1 %7440, %v334_v60   ;;  %v337_v60 = vld [vmem:[%s10237_s3 + $0xc0] sm:$0xff]  ;;  %v7646_v40 = vld [vmem:[%s7780_s22 + $0xc] sm:$0xff]  }
 0x23f   : > { %v9196_v14 = vadd.f32 %v2790_v47, %v2328_v20  ;;  %v7056_v26 = vpop.f32.mrf.mxu1  ;;  %v3578_v20 = vsel %vm2486_vm3, %v3573_v4, %v3577_v34  ;;  %4454 = vperm.xlu0 %7439, %v335_v61   ;;  %v3869_v4 = vrot.slane %v5962_v19, 1  ;;  %v3870_v34 = vrot.slane %v8786_v13, 1 }
 0x240   : > { %v2244_v8 = vpop.f32.mrf.mxu0 }
 0x241   : > { %10341 = vst [vmem:[#allocation2_spill] sm:$0xff] %v9196_v14  ;;  %v2329_v2 = vadd.f32 %v2244_v8, %v8795_v42  ;;  %v2793_v12 = vpop.f32.mrf.mxu1 }
 0x242   : > { %v6973_v54 = vpop.f32.mrf.mxu0  ;;  %4459 = vperm.xlu1 %7440, %v336_v6  }
 0x243   : > { %v9208_v47 = vadd.f32 %v2793_v12, %v2329_v2  ;;  %v7057_v26 = vpop.f32.mrf.mxu1  ;;  %4464 = vperm.xlu0 %7439, %v337_v60   ;;  %v3871_v12 = vsel %vm3868_vm4, %v3869_v4, %v3870_v34  ;;  %v341_v60 = vld [vmem:[%s10237_s3 + $0xe0] sm:$0xff] }
 0x244   : > { %v2249_v14 = vpop.f32.mrf.mxu0  ;;  %7171 = vmatmul.mubr.bf16.gmra.mxu0 %v7643_v10  ;;  %v340_v26 = vld [vmem:[%s10237_s3 + $0xd8] sm:$0xff]  ;;  %v7677_v4 = vld [vmem:[%s7780_s22 + $0x24] sm:$0xff]  }
 0x245   : > { %v2330_v42 = vadd.f32 %v2249_v14, %v8803_v22  ;;  %v2798_v3 = vpop.f32.mrf.mxu1  ;;  %7255 = vmatmul.mubr.bf16.gmra.mxu1 %v3578_v20  ;;  %7274 = vmatprep.mubr.msk.bf16.mxu0 %vm7688_vm0, %v10324_v32  ;;  %v338_v22 = vld [vmem:[%s10237_s3 + $0xc8] sm:$0xff]  ;;  %v339_v14 = vld [vmem:[%s10237_s3 + $0xd0] sm:$0xff] }
 0x246   : > { %v6976_v61 = vpop.f32.mrf.mxu0  ;;  %7358 = vmatprep.mubr.msk.bf16.mxu1 %vm7688_vm0, %v10324_v32  ;;  %4469 = vperm.xlu1 %7440, %v338_v22  }
 0x247   : > { %v9222_v8 = vadd.f32 %v2798_v3, %v2330_v42  ;;  %v7060_v6 = vpop.f32.mrf.mxu1  ;;  %4474 = vperm.xlu0 %7439, %v339_v14   ;;  %v3872_v61 = vrot.slane %v7677_v4, 1  ;;  %v7678_v4 = vld [vmem:[%s7780_s22 + $0x2c] sm:$0xff]  }
 0x248   : > { %v2252_v10 = vpop.f32.mrf.mxu0 }
 0x249   : > { %v2331_v13 = vadd.f32 %v2252_v10, %v8815_v28  ;;  %v2801_v2 = vpop.f32.mrf.mxu1  ;;  %v343_v10 = vld [vmem:[%s10237_s3 + $0xf0] sm:$0xff] }
 0x24a   : > { %v6977_v19 = vpop.f32.mrf.mxu0  ;;  %4479 = vperm.xlu1 %7440, %v340_v26  }
 0x24b   : > { %v9233_v54 = vadd.f32 %v2801_v2, %v2331_v13  ;;  %v7061_v20 = vpop.f32.mrf.mxu1  ;;  %4484 = vperm.xlu0 %7439, %v341_v60   ;;  %v7647_v19 = vld [vmem:[%s7780_s22 + $0x14] sm:$0xff]  }
 0x24c   : > { %v2257_v42 = vpop.f32.mrf.mxu0  ;;  %7275 = vmatmul.mubr.bf16.vlgmr.msra.gmra.mxu0 %v3871_v12 }
 0x24d   : > { %v2332_v28 = vadd.f32 %v2257_v42, %v8829_v21  ;;  %v2806_v3 = vpop.f32.mrf.mxu1  ;;  %7359 = vmatmul.mubr.bf16.vlgmr.msra.gmra.mxu1 %v7646_v40  ;;  %7278 = vmatprep.mubr.msk.bf16.mxu0 %vm7688_vm0, %v10324_v32  ;;  %v342_v21 = vld [vmem:[%s10237_s3 + $0xe8] sm:$0xff]  ;;  %v3873_v40 = vsel %vm3868_vm4, %v3870_v34, %v3872_v61  ;;  %v344_v42 = vld [vmem:[%s10237_s3 + $0xf8] sm:$0xff] }
 0x24e   : > { %v6980_v6 = vpop.f32.mrf.mxu0  ;;  %7362 = vmatprep.mubr.msk.bf16.mxu1 %vm7688_vm0, %v10324_v32  ;;  %4489 = vperm.xlu1 %7440, %v342_v21  }
 0x24f   : > { %v9247_v22 = vadd.f32 %v2806_v3, %v2332_v28  ;;  %v7064_v14 = vpop.f32.mrf.mxu1  ;;  %4494 = vperm.xlu0 %7439, %v343_v10   ;;  %v345_v28 = vld [vmem:[%s10237_s3 + $0x100] sm:$0xff]  ;;  %v3874_v6 = vrot.slane %v7678_v4, 1 }
 0x250   : > { %v2260_v13 = vpop.f32.mrf.mxu0 }
 0x251   : > { %v2333_v2 = vadd.f32 %v2260_v13, %v8843_v15  ;;  %v2809_v12 = vpop.f32.mrf.mxu1 }
 0x252   : > { %v6981_v20 = vpop.f32.mrf.mxu0  ;;  %4499 = vperm.xlu1 %7440, %v344_v42  }
 0x253   : > { %v9258_v26 = vadd.f32 %v2809_v12, %v2333_v2  ;;  %v7065_v60 = vpop.f32.mrf.mxu1  ;;  %4504 = vperm.xlu0 %7439, %v345_v28  }
 0x254   : > { %v2265_v3 = vpop.f32.mrf.mxu0  ;;  %7279 = vmatmul.mubr.bf16.gmra.mxu0 %v3873_v40  ;;  %v3875_v40 = vsel %vm3868_vm4, %v3872_v61, %v3874_v6 }
 0x255   : > { %v2334_v15 = vadd.f32 %v2265_v3, %v8860_v56  ;;  %v2814_v34 = vpop.f32.mrf.mxu1  ;;  %7363 = vmatmul.mubr.bf16.gmra.mxu1 %v7647_v19  ;;  %7282 = vmatprep.mubr.msk.bf16.mxu0 %vm7688_vm0, %v10324_v32  ;;  %v346_v56 = vld [vmem:[%s10237_s3 + $0x108] sm:$0xff]  ;;  %v7648_v19 = vld [vmem:[%s7780_s22 + $0x1c] sm:$0xff]  }
 0x256   : > { %v6984_v14 = vpop.f32.mrf.mxu0  ;;  %7366 = vmatprep.mubr.msk.bf16.mxu1 %vm7688_vm0, %v10324_v32  ;;  %4509 = vperm.xlu1 %7440, %v346_v56  }
 0x257   : > { %v9272_v21 = vadd.f32 %v2814_v34, %v2334_v15  ;;  %v7068_v10 = vpop.f32.mrf.mxu1 }
 0x258   : > { %v2268_v13 = vpop.f32.mrf.mxu0 }
 0x259   : > { %v2335_v2 = vadd.f32 %v2268_v13, %v8875_v17  ;;  %v2817_v12 = vpop.f32.mrf.mxu1  ;;  %v3876_v17 = vrot.slane %v8855_v39, 1  ;;  %v7649_v13 = vld [vmem:[%s7780_s22 + $0x24] sm:$0xff]  }
 0x25a   : > { %v6985_v20 = vpop.f32.mrf.mxu0 }
 0x25b   : > { %v9280_v60 = vadd.f32 %v2817_v12, %v2335_v2  ;;  %v7069_v42 = vpop.f32.mrf.mxu1 }
 0x25c   : > { %v2273_v28 = vpop.f32.mrf.mxu0  ;;  %7283 = vmatmul.mubr.bf16.gmra.mxu0 %v3875_v40 }
 0x25d   : > { %v2336_v3 = vadd.f32 %v2273_v28, %v8893_v27  ;;  %v2822_v15 = vpop.f32.mrf.mxu1  ;;  %7367 = vmatmul.mubr.bf16.gmra.mxu1 %v7648_v19  ;;  %7286 = vmatprep.mubr.msk.bf16.mxu0 %vm7688_vm0, %v10324_v32  ;;  %v3877_v27 = vsel %vm3868_vm4, %v3874_v6, %v3876_v17 }
 0x25e   : > { %v6988_v34 = vpop.f32.mrf.mxu0  ;;  %7370 = vmatprep.mubr.msk.bf16.mxu1 %vm7688_vm0, %v10324_v32 }
 0x25f   : > { %v9288_v61 = vadd.f32 %v2822_v15, %v2336_v3  ;;  %v7072_v4 = vpop.f32.mrf.mxu1 }
 0x260   : > { %v2276_v14 = vpop.f32.mrf.mxu0  ;;  %v7650_v4 = vld [vmem:[%s7780_s22 + $0x2c] sm:$0xff]  }
 0x261   : > { %v2337_v10 = vadd.f32 %v2276_v14, %v8908_v59  ;;  %v2825_v56 = vpop.f32.mrf.mxu1  ;;  %v3878_v59 = vrot.slane %v8888_v50, 1 }
 0x262   : > { %v6989_v2 = vpop.f32.mrf.mxu0 }
 0x263   : > { %v9293_v12 = vadd.f32 %v2825_v56, %v2337_v10  ;;  %v7073_v40 = vpop.f32.mrf.mxu1 }
 0x264   : > { %v2281_v39 = vpop.f32.mrf.mxu0  ;;  %7287 = vmatmul.mubr.bf16.gmra.mxu0 %v3877_v27 }
 0x265   : > { %v2338_v19 = vadd.f32 %v2281_v39, %v8926_v57  ;;  %v2830_v20 = vpop.f32.mrf.mxu1  ;;  %7371 = vmatmul.mubr.bf16.gmra.mxu1 %v7649_v13  ;;  %7290 = vmatprep.mubr.msk.bf16.mxu0 %vm7688_vm0, %v10324_v32  ;;  %v3879_v57 = vsel %vm3868_vm4, %v3876_v17, %v3878_v59 }
 0x266   : > { %v6992_v42 = vpop.f32.mrf.mxu0  ;;  %7374 = vmatprep.mubr.msk.bf16.mxu1 %vm7688_vm0, %v10324_v32 }
 0x267   : > { %v9301_v6 = vadd.f32 %v2830_v20, %v2338_v19  ;;  %v7076_v28 = vpop.f32.mrf.mxu1  ;;  %v7651_v42 = vld [vmem:[%s7780_s22 + $0x34] sm:$0xff]  }
 0x268   : > { %v2284_v3 = vpop.f32.mrf.mxu0 }
 0x269   : > { %v2339_v15 = vadd.f32 %v2284_v3, %v8938_v63  ;;  %v2833_v34 = vpop.f32.mrf.mxu1  ;;  %v3880_v63 = vrot.slane %v8921_v38, 1 }
 0x26a   : > { %v6993_v14 = vpop.f32.mrf.mxu0 }
 0x26b   : > { %v9306_v10 = vadd.f32 %v2833_v34, %v2339_v15  ;;  %v7077_v56 = vpop.f32.mrf.mxu1 }
 0x26c   : > { %v2289_v50 = vpop.f32.mrf.mxu0  ;;  %7291 = vmatmul.mubr.bf16.gmra.mxu0 %v3879_v57 }
 0x26d   : > { %v2340_v27 = vadd.f32 %v2289_v50, %v8948_v5  ;;  %v2838_v13 = vpop.f32.mrf.mxu1  ;;  %7375 = vmatmul.mubr.bf16.gmra.mxu1 %v7650_v4  ;;  %7294 = vmatprep.mubr.msk.bf16.mxu0 %vm7688_vm0, %v10324_v32  ;;  %v3881_v5 = vsel %vm3868_vm4, %v3878_v59, %v3880_v63 }
 0x26e   : > { %v6996_v2 = vpop.f32.mrf.mxu0  ;;  %7378 = vmatprep.mubr.msk.bf16.mxu1 %vm7688_vm0, %v10324_v32 }
 0x26f   : > { %v9314_v17 = vadd.f32 %v2838_v13, %v2340_v27  ;;  %v7080_v40 = vpop.f32.mrf.mxu1  ;;  %v7652_v13 = vld [vmem:[%s7780_s22 + $0x3c] sm:$0xff]  }
 0x270   : > { %v2292_v39 = vpop.f32.mrf.mxu0 }
 0x271   : > { %v2341_v19 = vadd.f32 %v2292_v39, %v8955_v9  ;;  %v2841_v20 = vpop.f32.mrf.mxu1  ;;  %v3882_v9 = vrot.slane %v8946_v53, 1 }
 0x272   : > { %v6997_v28 = vpop.f32.mrf.mxu0 }
 0x273   : > { %v9319_v3 = vadd.f32 %v2841_v20, %v2341_v19  ;;  %v7081_v15 = vpop.f32.mrf.mxu1 }
 0x274   : > { %v2297_v38 = vpop.f32.mrf.mxu0  ;;  %7295 = vmatmul.mubr.bf16.gmra.mxu0 %v3881_v5 }
 0x275   : > { %v2342_v34 = vadd.f32 %v2297_v38, %v8965_v25  ;;  %v2846_v57 = vpop.f32.mrf.mxu1  ;;  %7379 = vmatmul.mubr.bf16.gmra.mxu1 %v7651_v42  ;;  %7298 = vmatprep.mubr.msk.bf16.mxu0 %vm7688_vm0, %v10324_v32  ;;  %v3883_v25 = vsel %vm3868_vm4, %v3880_v63, %v3882_v9 }
 0x276   : > { %v7000_v4 = vpop.f32.mrf.mxu0  ;;  %7382 = vmatprep.mubr.msk.bf16.mxu1 %vm7688_vm0, %v10324_v32 }
 0x277   : > { %v9327_v59 = vadd.f32 %v2846_v57, %v2342_v34  ;;  %v7084_v14 = vpop.f32.mrf.mxu1  ;;  %v7653_v34 = vld [vmem:[%s7780_s22 + $0x44] sm:$0xff]  }
 0x278   : > { %v2300_v56 = vpop.f32.mrf.mxu0 }
 0x279   : > { %v2343_v50 = vadd.f32 %v2300_v56, %v8972_v37  ;;  %v2849_v27 = vpop.f32.mrf.mxu1  ;;  %v3884_v37 = vrot.slane %v8963_v52, 1 }
 0x27a   : > { %v7001_v2 = vpop.f32.mrf.mxu0 }
 0x27b   : > { %v9332_v40 = vadd.f32 %v2849_v27, %v2343_v50  ;;  %v7085_v39 = vpop.f32.mrf.mxu1 }
 0x27c   : > { %v2305_v53 = vpop.f32.mrf.mxu0  ;;  %7299 = vmatmul.mubr.bf16.gmra.mxu0 %v3883_v25 }
 0x27d   : > { %v2344_v19 = vadd.f32 %v2305_v53, %v8982_v41  ;;  %v2854_v20 = vpop.f32.mrf.mxu1  ;;  %7383 = vmatmul.mubr.bf16.gmra.mxu1 %v7652_v13  ;;  %7302 = vmatprep.mubr.msk.bf16.mxu0 %vm7688_vm0, %v10324_v32  ;;  %v3885_v41 = vsel %vm3868_vm4, %v3882_v9, %v3884_v37  ;;  %v7654_v53 = vld [vmem:[%s7780_s22 + $0x4c] sm:$0xff]  }
 0x27e   : > { %v7004_v5 = vpop.f32.mrf.mxu0  ;;  %7386 = vmatprep.mubr.msk.bf16.mxu1 %vm7688_vm0, %v10324_v32 }
 0x27f   : > { %v9340_v63 = vadd.f32 %v2854_v20, %v2344_v19  ;;  %v7088_v42 = vpop.f32.mrf.mxu1 }
 0x280   : > { %v2308_v28 = vpop.f32.mrf.mxu0 }
 0x281   : > { %v2345_v15 = vadd.f32 %v2308_v28, %v8989_v44  ;;  %v2857_v38 = vpop.f32.mrf.mxu1  ;;  %v3886_v44 = vrot.slane %v8980_v58, 1 }
 0x282   : > { %v7005_v57 = vpop.f32.mrf.mxu0 }
 0x283   : > { %v9345_v4 = vadd.f32 %v2857_v38, %v2345_v15  ;;  %v7089_v14 = vpop.f32.mrf.mxu1 }
 0x284   : > { %v3130_v52 = vpop.f32.mrf.mxu0  ;;  %7303 = vmatmul.mubr.bf16.gmra.mxu0 %v3885_v41  ;;  %v7655_v14 = vld [vmem:[%s7780_s22 + $0x54] sm:$0xff]  }
 0x285   : > { %v3265_v56 = vadd.f32 %v3130_v52, %v8999_v36  ;;  %v3678_v50 = vpop.f32.mrf.mxu1  ;;  %7387 = vmatmul.mubr.bf16.gmra.mxu1 %v7653_v34  ;;  %7306 = vmatprep.mubr.msk.bf16.mxu0 %vm7688_vm0, %v10324_v32  ;;  %v3887_v36 = vsel %vm3868_vm4, %v3884_v37, %v3886_v44 }
 0x286   : > { %v7108_v27 = vpop.f32.mrf.mxu0  ;;  %7390 = vmatprep.mubr.msk.bf16.mxu1 %vm7688_vm0, %v10324_v32 }
 0x287   : > { %v9353_v9 = vadd.f32 %v3678_v50, %v3265_v56  ;;  %v7192_v25 = vpop.f32.mrf.mxu1 }
 0x288   : > { %v3133_v13 = vpop.f32.mrf.mxu0 }
 0x289   : > { %v3266_v2 = vadd.f32 %v3133_v13, %v9006_v1  ;;  %v3681_v39 = vpop.f32.mrf.mxu1  ;;  %v3888_v1 = vrot.slane %v8997_v18, 1 }
 0x28a   : > { %v7109_v19 = vpop.f32.mrf.mxu0 }
 0x28b   : > { %v9358_v20 = vadd.f32 %v3681_v39, %v3266_v2  ;;  %v7193_v5 = vpop.f32.mrf.mxu1  ;;  %v7656_v19 = vld [vmem:[%s7780_s22 + $0x5c] sm:$0xff]  }
 0x28c   : > { %v3138_v58 = vpop.f32.mrf.mxu0  ;;  %7307 = vmatmul.mubr.bf16.gmra.mxu0 %v3887_v36 }
 0x28d   : > { %v3267_v42 = vadd.f32 %v3138_v58, %v9016_v55  ;;  %v3686_v28 = vpop.f32.mrf.mxu1  ;;  %7391 = vmatmul.mubr.bf16.gmra.mxu1 %v7654_v53  ;;  %7310 = vmatprep.mubr.msk.bf16.mxu0 %vm7688_vm0, %v10324_v32  ;;  %v3889_v55 = vsel %vm3868_vm4, %v3886_v44, %v3888_v1 }
 0x28e   : > { %v7112_v15 = vpop.f32.mrf.mxu0  ;;  %7394 = vmatprep.mubr.msk.bf16.mxu1 %vm7688_vm0, %v10324_v32 }
 0x28f   : > { %v9366_v37 = vadd.f32 %v3686_v28, %v3267_v42  ;;  %v7196_v38 = vpop.f32.mrf.mxu1 }
 0x290   : > { %v3141_v41 = vpop.f32.mrf.mxu0 }
 0x291   : > { %v3268_v34 = vadd.f32 %v3141_v41, %v9023_v51  ;;  %v3689_v57 = vpop.f32.mrf.mxu1  ;;  %v3890_v51 = vrot.slane %v9014_v16, 1 }
 0x292   : > { %v7113_v52 = vpop.f32.mrf.mxu0 }
 0x293   : > { %v9371_v56 = vadd.f32 %v3689_v57, %v3268_v34  ;;  %v7197_v50 = vpop.f32.mrf.mxu1 }
 0x294   : > { %v3146_v18 = vpop.f32.mrf.mxu0  ;;  %7311 = vmatmul.mubr.bf16.gmra.mxu0 %v3889_v55 }
 0x295   : > { %v3269_v27 = vadd.f32 %v3146_v18, %v9033_v29  ;;  %v3694_v25 = vpop.f32.mrf.mxu1  ;;  %7395 = vmatmul.mubr.bf16.gmra.mxu1 %v7655_v14  ;;  %7314 = vmatprep.mubr.msk.bf16.mxu0 %vm7688_vm0, %v10324_v32  ;;  %v3891_v29 = vsel %vm3868_vm4, %v3888_v1, %v3890_v51  ;;  %v7657_v14 = vld [vmem:[%s7780_s22 + $0x64] sm:$0xff]  }
 0x296   : > { %v7116_v13 = vpop.f32.mrf.mxu0  ;;  %7398 = vmatprep.mubr.msk.bf16.mxu1 %vm7688_vm0, %v10324_v32 }
 0x297   : > { %v9379_v44 = vadd.f32 %v3694_v25, %v3269_v27  ;;  %v7200_v2 = vpop.f32.mrf.mxu1 }
 0x298   : > { %v3149_v39 = vpop.f32.mrf.mxu0 }
 0x299   : > { %v3270_v36 = vadd.f32 %v3149_v39, %v9043_v43  ;;  %v3697_v53 = vpop.f32.mrf.mxu1  ;;  %v3892_v43 = vrot.slane %v9031_v35, 1 }
 0x29a   : > { %v7117_v5 = vpop.f32.mrf.mxu0 }
 0x29b   : > { %v9384_v58 = vadd.f32 %v3697_v53, %v3270_v36  ;;  %v7201_v42 = vpop.f32.mrf.mxu1 }
 0x29c   : > { %v3154_v16 = vpop.f32.mrf.mxu0  ;;  %7315 = vmatmul.mubr.bf16.gmra.mxu0 %v3891_v29  ;;  %v7658_v29 = vld [vmem:[%s7780_s22 + $0x6c] sm:$0xff]  }
 0x29d   : > { %v3271_v28 = vadd.f32 %v3154_v16, %v9056_v24  ;;  %v3702_v15 = vpop.f32.mrf.mxu1  ;;  %7399 = vmatmul.mubr.bf16.gmra.mxu1 %v7656_v19  ;;  %7318 = vmatprep.mubr.msk.bf16.mxu0 %vm7688_vm0, %v10324_v32  ;;  %v3893_v24 = vsel %vm3868_vm4, %v3890_v51, %v3892_v43 }
 0x29e   : > { %v7120_v38 = vpop.f32.mrf.mxu0  ;;  %7402 = vmatprep.mubr.msk.bf16.mxu1 %vm7688_vm0, %v10324_v32 }
 0x29f   : > { %v9392_v1 = vadd.f32 %v3702_v15, %v3271_v28  ;;  %v7204_v41 = vpop.f32.mrf.mxu1 }
 0x2a0   : > { %v3157_v34 = vpop.f32.mrf.mxu0 }
 0x2a1   : > { %v3272_v57 = vadd.f32 %v3157_v34, %v9066_v7  ;;  %v3705_v55 = vpop.f32.mrf.mxu1  ;;  %v3894_v7 = vrot.slane %v9054_v49, 1 }
 0x2a2   : > { %v7121_v52 = vpop.f32.mrf.mxu0 }
 0x2a3   : > { %v9397_v50 = vadd.f32 %v3705_v55, %v3272_v57  ;;  %v7205_v18 = vpop.f32.mrf.mxu1  ;;  %v7659_v55 = vld [vmem:[%s7780_s22 + $0x74] sm:$0xff]  }
 0x2a4   : > { %v3162_v35 = vpop.f32.mrf.mxu0  ;;  %7319 = vmatmul.mubr.bf16.gmra.mxu0 %v3893_v24 }
 0x2a5   : > { %v3273_v27 = vadd.f32 %v3162_v35, %v9082_v0  ;;  %v3710_v25 = vpop.f32.mrf.mxu1  ;;  %7403 = vmatmul.mubr.bf16.gmra.mxu1 %v7657_v14  ;;  %7322 = vmatprep.mubr.msk.bf16.mxu0 %vm7688_vm0, %v10324_v32  ;;  %v3895_v0 = vsel %vm3868_vm4, %v3892_v43, %v3894_v7 }
 0x2a6   : > { %v7124_v13 = vpop.f32.mrf.mxu0  ;;  %7406 = vmatprep.mubr.msk.bf16.mxu1 %vm7688_vm0, %v10324_v32 }
 0x2a7   : > { %v9405_v51 = vadd.f32 %v3710_v25, %v3273_v27  ;;  %v7208_v2 = vpop.f32.mrf.mxu1 }
 0x2a8   : > { %v3165_v39 = vpop.f32.mrf.mxu0 }
 0x2a9   : > { %v3274_v36 = vadd.f32 %v3165_v39, %v9095_v30  ;;  %v3713_v53 = vpop.f32.mrf.mxu1  ;;  %v3896_v30 = vrot.slane %v9080_v48, 1 }
 0x2aa   : > { %v7125_v19 = vpop.f32.mrf.mxu0 }
 0x2ab   : > { %v9410_v5 = vadd.f32 %v3713_v53, %v3274_v36  ;;  %v7209_v42 = vpop.f32.mrf.mxu1  ;;  %v7660_v36 = vld [vmem:[%s7780_s22 + $0x7c] sm:$0xff]   ;;  %v10342_v19 = vld [vmem:[#allocation3_spill] sm:$0xff] }
 0x2ac   : > { %v3170_v49 = vpop.f32.mrf.mxu0  ;;  %7323 = vmatmul.mubr.bf16.gmra.mxu0 %v3895_v0 }
 0x2ad   : > { %v3275_v16 = vadd.f32 %v3170_v49, %v9111_v33  ;;  %v3718_v28 = vpop.f32.mrf.mxu1  ;;  %7407 = vmatmul.mubr.bf16.gmra.mxu1 %v7658_v29  ;;  %7326 = vmatprep.mubr.msk.bf16.mxu0 %vm7688_vm0, %v10324_v32  ;;  %v3897_v33 = vsel %vm3868_vm4, %v3894_v7, %v3896_v30 }
 0x2ae   : > { %v7128_v15 = vpop.f32.mrf.mxu0  ;;  %7410 = vmatprep.mubr.msk.bf16.mxu1 %vm7688_vm0, %v10324_v32 }
 0x2af   : > { %v9418_v43 = vadd.f32 %v3718_v28, %v3275_v16  ;;  %v7212_v38 = vpop.f32.mrf.mxu1 }
 0x2b0   : > { %v3173_v41 = vpop.f32.mrf.mxu0 }
 0x2b1   : > { %v3276_v34 = vadd.f32 %v3173_v41, %v9124_v31  ;;  %v3721_v57 = vpop.f32.mrf.mxu1  ;;  %v3898_v31 = vrot.slane %v9109_v45, 1 }
 0x2b2   : > { %v7129_v24 = vpop.f32.mrf.mxu0 }
 0x2b3   : > { %v9423_v14 = vadd.f32 %v3721_v57, %v3276_v34  ;;  %v7213_v52 = vpop.f32.mrf.mxu1  ;;  %v7661_v57 = vld [vmem:[%s7780_s22 + $0x84] sm:$0xff]  }
 0x2b4   : > { %v3178_v48 = vpop.f32.mrf.mxu0  ;;  %7327 = vmatmul.mubr.bf16.gmra.mxu0 %v3897_v33  ;;  %v10343_v52 = vld [vmem:[#allocation2_spill] sm:$0xff] }
 0x2b5   : > { %v3277_v18 = vadd.f32 %v3178_v48, %v9140_v23  ;;  %v3726_v35 = vpop.f32.mrf.mxu1  ;;  %7411 = vmatmul.mubr.bf16.gmra.mxu1 %v7659_v55  ;;  %7330 = vmatprep.mubr.msk.bf16.mxu0 %vm7688_vm0, %v10324_v32  ;;  %v3899_v23 = vsel %vm3868_vm4, %v3896_v30, %v3898_v31 }
 0x2b6   : > { %v7132_v27 = vpop.f32.mrf.mxu0  ;;  %7414 = vmatprep.mubr.msk.bf16.mxu1 %vm7688_vm0, %v10324_v32 }
 0x2b7   : > { %v9431_v25 = vadd.f32 %v3726_v35, %v3277_v18  ;;  %v7216_v7 = vpop.f32.mrf.mxu1  ;;  %v10344_v35 = vld [vmem:[#allocation7_spill] sm:$0xff] }
 0x2b8   : > { %v3181_v13 = vpop.f32.mrf.mxu0 }
 0x2b9   : > { %v3278_v2 = vadd.f32 %v3181_v13, %v9153_v62  ;;  %v3729_v39 = vpop.f32.mrf.mxu1  ;;  %v3900_v62 = vrot.slane %v9138_v11, 1 }
 0x2ba   : > { %v7133_v53 = vpop.f32.mrf.mxu0 }
 0x2bb   : > { %v9436_v0 = vadd.f32 %v3729_v39, %v3278_v2  ;;  %v7217_v29 = vpop.f32.mrf.mxu1  ;;  %v3901_v34 = vsel %vm3868_vm4, %v3898_v31, %v3900_v62 }
 0x2bc   : > { %v3186_v45 = vpop.f32.mrf.mxu0  ;;  %7331 = vmatmul.mubr.bf16.gmra.mxu0 %v3899_v23 }
 0x2bd   : > { %v3279_v42 = vadd.f32 %v3186_v45, %v10342_v19  ;;  %v3734_v49 = vpop.f32.mrf.mxu1  ;;  %7415 = vmatmul.mubr.bf16.gmra.mxu1 %v7660_v36  ;;  %7334 = vmatprep.mubr.msk.bf16.mxu0 %vm7688_vm0, %v10324_v32  ;;  %v7662_v36 = vld [vmem:[%s7780_s22 + $0x8c] sm:$0xff]   ;;  %s7427_s22 = smul.u32 136, %s10489_s25 }
 0x2be   : > { %v7136_v16 = vpop.f32.mrf.mxu0  ;;  %7418 = vmatprep.mubr.msk.bf16.mxu1 %vm7688_vm0, %v10324_v32 }
 0x2bf   : > { %v9444_v28 = vadd.f32 %v3734_v49, %v3279_v42  ;;  %v7220_v30 = vpop.f32.mrf.mxu1  ;;  %s9524_s16 = scalar_lea.vmem %s10239_s5, %s7427_s22  ;;  %s9531_s19 = scalar_lea.vmem %s10238_s4, %s7427_s22 }
 0x2c0   : > { %v3189_v15 = vpop.f32.mrf.mxu0 }
 0x2c1   : > { %v3280_v38 = vadd.f32 %v3189_v15, %v9182_v46  ;;  %v3737_v41 = vpop.f32.mrf.mxu1  ;;  %v3902_v46 = vrot.slane %v10344_v35, 1 }
 0x2c2   : > { %v7137_v33 = vpop.f32.mrf.mxu0 }
 0x2c3   : > { %v9449_v55 = vadd.f32 %v3737_v41, %v3280_v38  ;;  %v7221_v24 = vpop.f32.mrf.mxu1  ;;  %v3903_v23 = vsel %vm3868_vm4, %v3900_v62, %v3902_v46 }
 0x2c4   : > { %v3194_v11 = vpop.f32.mrf.mxu0  ;;  %7335 = vmatmul.mubr.bf16.gmra.mxu0 %v3901_v34 }
 0x2c5   : > { %v3281_v48 = vadd.f32 %v3194_v11, %v10343_v52  ;;  %v3742_v18 = vpop.f32.mrf.mxu1  ;;  %7419 = vmatmul.mubr.bf16.gmra.mxu1 %v7661_v57  ;;  %7338 = vmatprep.mubr.msk.bf16.mxu0 %vm7688_vm0, %v10324_v32 }
 0x2c6   : > { %v7140_v27 = vpop.f32.mrf.mxu0  ;;  %7422 = vmatprep.mubr.msk.bf16.mxu1 %vm7688_vm0, %v10324_v32 }
 0x2c7   : > { %v9457_v31 = vadd.f32 %v3742_v18, %v3281_v48  ;;  %v7224_v7 = vpop.f32.mrf.mxu1 }
 0x2c8   : > { %v3197_v13 = vpop.f32.mrf.mxu0 }
 0x2c9   : > { %v3282_v2 = vadd.f32 %v3197_v13, %v9208_v47  ;;  %v3745_v39 = vpop.f32.mrf.mxu1 }
 0x2ca   : > { %v7141_v53 = vpop.f32.mrf.mxu0 }
 0x2cb   : > { %v9462_v29 = vadd.f32 %v3745_v39, %v3282_v2  ;;  %v7225_v45 = vpop.f32.mrf.mxu1 }
 0x2cc   : > { %v3202_v19 = vpop.f32.mrf.mxu0  ;;  %7339 = vmatmul.mubr.bf16.gmra.mxu0 %v3903_v23 }
 0x2cd   : > { %v3283_v42 = vadd.f32 %v3202_v19, %v9222_v8  ;;  %v3750_v49 = vpop.f32.mrf.mxu1  ;;  %7423 = vmatmul.mubr.bf16.gmra.mxu1 %v7662_v36 }
 0x2ce   : > { %v7144_v32 = vpop.f32.mrf.mxu0 }
 0x2cf   : > { %v9465_v16 = vadd.f32 %v3750_v49, %v3283_v42  ;;  %v7228_v30 = vpop.f32.mrf.mxu1 }
 0x2d0   : > { %v3205_v15 = vpop.f32.mrf.mxu0 }
 0x2d1   : > { %v3284_v47 = vadd.f32 %v3205_v15, %v9233_v54  ;;  %v3753_v38 = vpop.f32.mrf.mxu1 }
 0x2d2   : > { %v7145_v62 = vpop.f32.mrf.mxu0 }
 0x2d3   : > { %v9468_v41 = vadd.f32 %v3753_v38, %v3284_v47  ;;  %v7229_v34 = vpop.f32.mrf.mxu1 }
 0x2d4   : > { %v3210_v57 = vpop.f32.mrf.mxu0 }
 0x2d5   : > { %v3285_v33 = vadd.f32 %v3210_v57, %v9247_v22  ;;  %v3758_v24 = vpop.f32.mrf.mxu1 }
 0x2d6   : > { %v7148_v11 = vpop.f32.mrf.mxu0 }
 0x2d7   : > { %v9471_v8 = vadd.f32 %v3758_v24, %v3285_v33  ;;  %v7232_v52 = vpop.f32.mrf.mxu1 }
 0x2d8   : > { %v3213_v48 = vpop.f32.mrf.mxu0 }
 0x2d9   : > { %v3286_v18 = vadd.f32 %v3213_v48, %v9258_v26  ;;  %v3761_v35 = vpop.f32.mrf.mxu1 }
 0x2da   : > { %v7149_v46 = vpop.f32.mrf.mxu0 }
 0x2db   : > { %v9474_v27 = vadd.f32 %v3761_v35, %v3286_v18  ;;  %v7233_v54 = vpop.f32.mrf.mxu1 }
 0x2dc   : > { %v3218_v7 = vpop.f32.mrf.mxu0 }
 0x2dd   : > { %v3287_v13 = vadd.f32 %v3218_v7, %v9272_v21  ;;  %v3766_v2 = vpop.f32.mrf.mxu1 }
 0x2de   : > { %v7152_v39 = vpop.f32.mrf.mxu0 }
 0x2df   : > { %v9477_v23 = vadd.f32 %v3766_v2, %v3287_v13  ;;  %v7236_v22 = vpop.f32.mrf.mxu1 }
 0x2e0   : > { %v3221_v36 = vpop.f32.mrf.mxu0 }
 0x2e1   : > { %v3288_v53 = vadd.f32 %v3221_v36, %v9280_v60  ;;  %v3769_v45 = vpop.f32.mrf.mxu1 }
 0x2e2   : > { %v7153_v19 = vpop.f32.mrf.mxu0 }
 0x2e3   : > { %v9480_v42 = vadd.f32 %v3769_v45, %v3288_v53  ;;  %v7237_v26 = vpop.f32.mrf.mxu1 }
 0x2e4   : > { %v3226_v49 = vpop.f32.mrf.mxu0 }
 0x2e5   : > { %v3289_v32 = vadd.f32 %v3226_v49, %v9288_v61  ;;  %v3774_v30 = vpop.f32.mrf.mxu1 }
 0x2e6   : > { %v7156_v15 = vpop.f32.mrf.mxu0 }
 0x2e7   : > { %v9483_v47 = vadd.f32 %v3774_v30, %v3289_v32  ;;  %v7240_v21 = vpop.f32.mrf.mxu1 }
 0x2e8   : > { %v3229_v38 = vpop.f32.mrf.mxu0 }
 0x2e9   : > { %v3290_v62 = vadd.f32 %v3229_v38, %v9293_v12  ;;  %v3777_v34 = vpop.f32.mrf.mxu1 }
 0x2ea   : > { %v7157_v57 = vpop.f32.mrf.mxu0 }
 0x2eb   : > { %v9486_v33 = vadd.f32 %v3777_v34, %v3290_v62  ;;  %v7241_v60 = vpop.f32.mrf.mxu1 }
 0x2ec   : > { %v3234_v24 = vpop.f32.mrf.mxu0 }
 0x2ed   : > { %v3291_v11 = vadd.f32 %v3234_v24, %v9301_v6  ;;  %v3782_v52 = vpop.f32.mrf.mxu1 }
 0x2ee   : > { %v7160_v48 = vpop.f32.mrf.mxu0 }
 0x2ef   : > { %v9489_v18 = vadd.f32 %v3782_v52, %v3291_v11  ;;  %v7244_v61 = vpop.f32.mrf.mxu1 }
 0x2f0   : > { %v3237_v35 = vpop.f32.mrf.mxu0 }
 0x2f1   : > { %v3292_v46 = vadd.f32 %v3237_v35, %v9306_v10  ;;  %v3785_v54 = vpop.f32.mrf.mxu1 }
 0x2f2   : > { %v7161_v7 = vpop.f32.mrf.mxu0 }
 0x2f3   : > { %v9492_v13 = vadd.f32 %v3785_v54, %v3292_v46  ;;  %v7245_v12 = vpop.f32.mrf.mxu1 }
 0x2f4   : > { %v3242_v2 = vpop.f32.mrf.mxu0 }
 0x2f5   : > { %v3293_v39 = vadd.f32 %v3242_v2, %v9314_v17  ;;  %v3790_v22 = vpop.f32.mrf.mxu1 }
 0x2f6   : > { %v7164_v36 = vpop.f32.mrf.mxu0 }
 0x2f7   : > { %v9495_v53 = vadd.f32 %v3790_v22, %v3293_v39  ;;  %v7248_v6 = vpop.f32.mrf.mxu1 }
 0x2f8   : > { %v3245_v45 = vpop.f32.mrf.mxu0 }
 0x2f9   : > { %10345 = vst [vmem:[#allocation9_spill] sm:$0xff] %v9495_v53  ;;  %v3294_v19 = vadd.f32 %v3245_v45, %v9319_v3  ;;  %v3793_v26 = vpop.f32.mrf.mxu1 }
 0x2fa   : > { %v7165_v49 = vpop.f32.mrf.mxu0 }
 0x2fb   : > { %v9498_v32 = vadd.f32 %v3793_v26, %v3294_v19  ;;  %v7249_v10 = vpop.f32.mrf.mxu1 }
 0x2fc   : > { %v3250_v30 = vpop.f32.mrf.mxu0 }
 0x2fd   : > { %10346 = vst [vmem:[#allocation10_spill] sm:$0xff] %v9498_v32  ;;  %v3295_v15 = vadd.f32 %v3250_v30, %v9327_v59  ;;  %v3798_v21 = vpop.f32.mrf.mxu1 }
 0x2fe   : > { %v7168_v38 = vpop.f32.mrf.mxu0 }
 0x2ff   : > { %v9501_v62 = vadd.f32 %v3798_v21, %v3295_v15  ;;  %v7252_v17 = vpop.f32.mrf.mxu1 }
 0x300   : > { %v3253_v34 = vpop.f32.mrf.mxu0 }
 0x301   : > { %10347 = vst [vmem:[#allocation5_spill] sm:$0xff] %v9501_v62  ;;  %v3296_v57 = vadd.f32 %v3253_v34, %v9332_v40  ;;  %v3801_v60 = vpop.f32.mrf.mxu1 }
 0x302   : > { %v7169_v24 = vpop.f32.mrf.mxu0 }
 0x303   : > { %v9504_v11 = vadd.f32 %v3801_v60, %v3296_v57  ;;  %v7253_v3 = vpop.f32.mrf.mxu1 }
 0x304   : > { %v3258_v52 = vpop.f32.mrf.mxu0 }
 0x305   : > { %10348 = vst [vmem:[#allocation4_spill] sm:$0xff] %v9504_v11  ;;  %v3297_v48 = vadd.f32 %v3258_v52, %v9340_v63  ;;  %v3806_v61 = vpop.f32.mrf.mxu1 }
 0x306   : > { %v7172_v35 = vpop.f32.mrf.mxu0 }
 0x307   : > { %v9507_v59 = vadd.f32 %v3806_v61, %v3297_v48  ;;  %v7256_v46 = vpop.f32.mrf.mxu1 }
 0x308   : > { %v3261_v54 = vpop.f32.mrf.mxu0 }
 0x309   : > { %10349 = vst [vmem:[#allocation8_spill] sm:$0xff] %v9507_v59  ;;  %v3298_v7 = vadd.f32 %v3261_v54, %v9345_v4  ;;  %v3809_v12 = vpop.f32.mrf.mxu1 }
 0x30a   : > { %v7173_v2 = vpop.f32.mrf.mxu0 }
 0x30b   : > { %v9510_v40 = vadd.f32 %v3809_v12, %v3298_v7  ;;  %v7257_v39 = vpop.f32.mrf.mxu1 }
 0x30c   : > { %v4003_v22 = vpop.f32.mrf.mxu0 }
 0x30d   : > { %10350 = vst [vmem:[#allocation6_spill] sm:$0xff] %v9510_v40  ;;  %v9512_v36 = vpop.f32.mrf.mxu1  ;;  %v9516_v19 = vadd.f32 %v4003_v22, %v9353_v9 }
 0x30e   : > { %10351 = vst [vmem:[#allocation3_spill] sm:$0xff] %v9512_v36  ;;  %v7276_v6 = vpop.f32.mrf.mxu0 }
 0x30f   : > { %v7360_v45 = vpop.f32.mrf.mxu1  ;;  %10352 = vst [vmem:[#allocation2_spill] sm:$0xff] %v9516_v19 }
 0x310   : > { %v4006_v63 = vpop.f32.mrf.mxu0 }
 0x311   : > { %v9519_v26 = vadd.f32 %v4006_v63, %v9358_v20  ;;  %v9526_v4 = vpop.f32.mrf.mxu1 }
 0x312   : > { %10354 = vst [vmem:[#allocation11_spill] sm:$0xff] %v9526_v4  ;;  %v6222_v9 = vpack.c.bf16 %v9526_v4, %v9512_v36  ;;  %v7277_v49 = vpop.f32.mrf.mxu0 }
 0x313   : > { %10353 = vst [vmem:[#allocation7_spill] sm:$0xff] %v9519_v26  ;;  %v6137_v20 = vpack.c.bf16 %v9519_v26, %v9516_v19  ;;  %v7361_v10 = vpop.f32.mrf.mxu1  ;;  %v9575_v49 = vpop.permute.xlu1 %4354 }
 0x314   : > { %6223 = vst [vmem:[%s9524_s16] sm:$0xff] %v6222_v9   ;;  %v4011_v30 = vpop.f32.mrf.mxu0 }
 0x315   : > { %6138 = vst [vmem:[%s9531_s19] sm:$0xff] %v6137_v20   ;;  %v9539_v15 = vpop.f32.mrf.mxu1  ;;  %v9542_v34 = vadd.f32 %v4011_v30, %v9366_v37 }
 0x316   : > { %10355 = vst [vmem:[#allocation12_spill] sm:$0xff] %v9539_v15  ;;  %v7280_v21 = vpop.f32.mrf.mxu0 }
 0x317   : > { %v7364_v38 = vpop.f32.mrf.mxu1  ;;  %10356 = vst [vmem:[#allocation13_spill] sm:$0xff] %v9542_v34 }
 0x318   : > { %v4014_v17 = vpop.f32.mrf.mxu0 }
 0x319   : > { %v9545_v57 = vadd.f32 %v4014_v17, %v9371_v56  ;;  %v9547_v60 = vpop.f32.mrf.mxu1 }
 0x31a   : > { %v6227_v24 = vpack.c.bf16 %v9547_v60, %v9539_v15  ;;  %v7281_v3 = vpop.f32.mrf.mxu0 }
 0x31b   : > { %10357 = vst [vmem:[#allocation14_spill] sm:$0xff] %v9545_v57  ;;  %v6142_v52 = vpack.c.bf16 %v9545_v57, %v9542_v34  ;;  %v7365_v48 = vpop.f32.mrf.mxu1 }
 0x31c   : > { %6320 = vst [vmem:[%s9524_s16 + $0x8] sm:$0xff] %v6227_v24   ;;  %v4019_v61 = vpop.f32.mrf.mxu0 }
 0x31d   : > { %6304 = vst [vmem:[%s9531_s19 + $0x8] sm:$0xff] %v6142_v52   ;;  %v9555_v37 = vpop.f32.mrf.mxu1  ;;  %v9558_v54 = vadd.f32 %v4019_v61, %v9379_v44 }
 0x31e   : > { %v7284_v35 = vpop.f32.mrf.mxu0 }
 0x31f   : > { %v7368_v56 = vpop.f32.mrf.mxu1  ;;  %10358 = vst [vmem:[#allocation15_spill] sm:$0xff] %v9558_v54 }
 0x320   : > { %v4022_v46 = vpop.f32.mrf.mxu0 }
 0x321   : > { %v9561_v7 = vadd.f32 %v4022_v46, %v9384_v58  ;;  %v9563_v12 = vpop.f32.mrf.mxu1  ;;  %v9573_v58 = vpop.permute.xlu0 %4344 }
 0x322   : > { %10360 = vst [vmem:[#allocation17_spill] sm:$0xff] %v9563_v12  ;;  %v6232_v2 = vpack.c.bf16 %v9563_v12, %v9555_v37  ;;  %v7285_v39 = vpop.f32.mrf.mxu0  ;;  %v4512_v59 = vmul.f32 %v9573_v58, %v9516_v19 }
 0x323   : > { %10359 = vst [vmem:[#allocation16_spill] sm:$0xff] %v9561_v7  ;;  %v6147_v22 = vpack.c.bf16 %v9561_v7, %v9558_v54  ;;  %v7369_v6 = vpop.f32.mrf.mxu1 }
 0x324   : > { %6321 = vst [vmem:[%s9524_s16 + $0x10] sm:$0xff] %v6232_v2   ;;  %v4027_v45 = vpop.f32.mrf.mxu0 }
 0x325   : > { %6305 = vst [vmem:[%s9531_s19 + $0x10] sm:$0xff] %v6147_v22   ;;  %v9571_v63 = vpop.f32.mrf.mxu1  ;;  %v9578_v10 = vadd.f32 %v4027_v45, %v9392_v1  ;;  %v9590_v48 = vpop.permute.xlu0 %4349 }
 0x326   : > { %v7288_v44 = vpop.f32.mrf.mxu0 }
 0x327   : > { %v7372_v9 = vpop.f32.mrf.mxu1  ;;  %10361 = vst [vmem:[#allocation18_spill] sm:$0xff] %v9578_v10 }
 0x328   : > { %v4030_v20 = vpop.f32.mrf.mxu0 }
 0x329   : > { %v9581_v30 = vadd.f32 %v4030_v20, %v9397_v50  ;;  %v9583_v21 = vpop.f32.mrf.mxu1  ;;  %v9595_v50 = vpop.permute.xlu1 %4359 }
 0x32a   : > { %v6237_v38 = vpack.c.bf16 %v9583_v21, %v9571_v63  ;;  %v7289_v17 = vpop.f32.mrf.mxu0  ;;  %v9605_v22 = vpop.permute.xlu0 %4364  ;;  %v4515_v19 = vmul.f32 %v9595_v50, %v9545_v57 }
 0x32b   : > { %10362 = vst [vmem:[#allocation19_spill] sm:$0xff] %v9581_v30  ;;  %v6152_v24 = vpack.c.bf16 %v9581_v30, %v9578_v10  ;;  %v7373_v3 = vpop.f32.mrf.mxu1 }
 0x32c   : > { %6322 = vst [vmem:[%s9524_s16 + $0x18] sm:$0xff] %v6237_v38   ;;  %v4035_v52 = vpop.f32.mrf.mxu0 }
 0x32d   : > { %6306 = vst [vmem:[%s9531_s19 + $0x18] sm:$0xff] %v6152_v24   ;;  %v9593_v1 = vpop.f32.mrf.mxu1  ;;  %v9598_v46 = vadd.f32 %v4035_v52, %v9405_v51  ;;  %v9611_v20 = vpop.permute.xlu1 %4369 }
 0x32e   : > { %10363 = vst [vmem:[#allocation20_spill] sm:$0xff] %v9593_v1  ;;  %v7292_v61 = vpop.f32.mrf.mxu0  ;;  %v9617_v24 = vpop.permute.xlu0 %4374  ;;  %v4517_v57 = vmul.f32 %v9611_v20, %v9561_v7 }
 0x32f   : > { %v7376_v35 = vpop.f32.mrf.mxu1  ;;  %10364 = vst [vmem:[#allocation21_spill] sm:$0xff] %v9598_v46 }
 0x330   : > { %v4038_v56 = vpop.f32.mrf.mxu0 }
 0x331   : > { %v9601_v2 = vadd.f32 %v4038_v56, %v9410_v5  ;;  %v9603_v39 = vpop.f32.mrf.mxu1  ;;  %v9627_v56 = vpop.permute.xlu1 %4379 }
 0x332   : > { %10366 = vst [vmem:[#allocation23_spill] sm:$0xff] %v9603_v39  ;;  %v6242_v6 = vpack.c.bf16 %v9603_v39, %v9593_v1  ;;  %v7293_v45 = vpop.f32.mrf.mxu0 }
 0x333   : > { %10365 = vst [vmem:[#allocation22_spill] sm:$0xff] %v9601_v2  ;;  %v6157_v44 = vpack.c.bf16 %v9601_v2, %v9598_v46  ;;  %v7377_v9 = vpop.f32.mrf.mxu1 }
 0x334   : > { %6323 = vst [vmem:[%s9524_s16 + $0x20] sm:$0xff] %v6242_v6   ;;  %v4043_v51 = vpop.f32.mrf.mxu0 }
 0x335   : > { %6307 = vst [vmem:[%s9531_s19 + $0x20] sm:$0xff] %v6157_v44   ;;  %v9615_v5 = vpop.f32.mrf.mxu1  ;;  %v9620_v52 = vadd.f32 %v4043_v51, %v9418_v43  ;;  %v9637_v51 = vpop.permute.xlu0 %4384 }
 0x336   : > { %10367 = vst [vmem:[#allocation24_spill] sm:$0xff] %v9615_v5  ;;  %v7296_v38 = vpop.f32.mrf.mxu0  ;;  %v9641_v40 = vpop.permute.xlu1 %4389 }
 0x337   : > { %v7380_v17 = vpop.f32.mrf.mxu1  ;;  %10368 = vst [vmem:[#allocation25_spill] sm:$0xff] %v9620_v52 }
 0x338   : > { %v4046_v3 = vpop.f32.mrf.mxu0  ;;  %v4513_v17 = vmul.f32 %v9590_v48, %v9519_v26 }
 0x339   : > { %v9623_v61 = vadd.f32 %v4046_v3, %v9423_v14  ;;  %v9625_v35 = vpop.f32.mrf.mxu1  ;;  %v9661_v32 = vpop.permute.xlu0 %4394 }
 0x33a   : > { %10370 = vst [vmem:[#allocation27_spill] sm:$0xff] %v9625_v35  ;;  %v6247_v6 = vpack.c.bf16 %v9625_v35, %v9615_v5  ;;  %v7297_v45 = vpop.f32.mrf.mxu0  ;;  %v4546_v11 = vadd.f32 %v4513_v17, %v4512_v59 }
 0x33b   : > { %10369 = vst [vmem:[#allocation26_spill] sm:$0xff] %v9623_v61  ;;  %v6162_v44 = vpack.c.bf16 %v9623_v61, %v9620_v52  ;;  %v7381_v9 = vpop.f32.mrf.mxu1 }
 0x33c   : > { %6324 = vst [vmem:[%s9524_s16 + $0x28] sm:$0xff] %v6247_v6   ;;  %v4051_v38 = vpop.f32.mrf.mxu0  ;;  %v4514_v6 = vmul.f32 %v9575_v49, %v9542_v34 }
 0x33d   : > { %6308 = vst [vmem:[%s9531_s19 + $0x28] sm:$0xff] %v6162_v44   ;;  %v9635_v43 = vpop.f32.mrf.mxu1  ;;  %v9648_v44 = vadd.f32 %v4051_v38, %v9431_v25  ;;  %v4516_v38 = vmul.f32 %v9605_v22, %v9558_v54 }
 0x33e   : > { %10371 = vst [vmem:[#allocation28_spill] sm:$0xff] %v9635_v43  ;;  %v7300_v14 = vpop.f32.mrf.mxu0 }
 0x33f   : > { %v7384_v3 = vpop.f32.mrf.mxu1  ;;  %10372 = vst [vmem:[#allocation29_spill] sm:$0xff] %v9648_v44 }
 0x340   : > { %v4054_v45 = vpop.f32.mrf.mxu0 }
 0x341   : > { %v9651_v9 = vadd.f32 %v4054_v45, %v9436_v0  ;;  %v9653_v14 = vpop.f32.mrf.mxu1  ;;  %v4547_v0 = vadd.f32 %v4546_v11, %v4514_v6  ;;  %v4518_v11 = vmul.f32 %v9617_v24, %v9578_v10  ;;  %v4520_v10 = vmul.f32 %v9637_v51, %v9598_v46 }
 0x342   : > { %10374 = vst [vmem:[#allocation31_spill] sm:$0xff] %v9653_v14  ;;  %v6252_v3 = vpack.c.bf16 %v9653_v14, %v9635_v43  ;;  %v7301_v26 = vpop.f32.mrf.mxu0 }
 0x343   : > { %10373 = vst [vmem:[#allocation30_spill] sm:$0xff] %v9651_v9  ;;  %v6167_v62 = vpack.c.bf16 %v9651_v9, %v9648_v44  ;;  %v7385_v34 = vpop.f32.mrf.mxu1  ;;  %v9669_v26 = vpop.permute.xlu1 %4399  ;;  %v4548_v17 = vadd.f32 %v4547_v0, %v4515_v19 }
 0x344   : > { %6325 = vst [vmem:[%s9524_s16 + $0x30] sm:$0xff] %v6252_v3   ;;  %v4059_v25 = vpop.f32.mrf.mxu0  ;;  %v9683_v19 = vpop.permute.xlu0 %4404 }
 0x345   : > { %6309 = vst [vmem:[%s9531_s19 + $0x30] sm:$0xff] %v6167_v62   ;;  %v9667_v45 = vpop.f32.mrf.mxu1  ;;  %v4549_v14 = vadd.f32 %v4548_v17, %v4516_v38  ;;  %v9676_v6 = vadd.f32 %v4059_v25, %v9444_v28  ;;  %v4519_v38 = vmul.f32 %v9627_v56, %v9581_v30 }
 0x346   : > { %10375 = vst [vmem:[#allocation32_spill] sm:$0xff] %v9667_v45  ;;  %v7304_v59 = vpop.f32.mrf.mxu0 }
 0x347   : > { %v7388_v34 = vpop.f32.mrf.mxu1  ;;  %10376 = vst [vmem:[#allocation33_spill] sm:$0xff] %v9676_v6  ;;  %v9691_v25 = vpop.permute.xlu1 %4409 }
 0x348   : > { %v4062_v53 = vpop.f32.mrf.mxu0  ;;  %v4550_v34 = vadd.f32 %v4549_v14, %v4517_v57  ;;  %v4521_v14 = vmul.f32 %v9641_v40, %v9601_v2  ;;  %v9701_v54 = vpop.permute.xlu0 %4414 }
 0x349   : > { %v9679_v62 = vadd.f32 %v4062_v53, %v9449_v55  ;;  %v9681_v3 = vpop.f32.mrf.mxu1 }
 0x34a   : > { %10378 = vst [vmem:[#allocation35_spill] sm:$0xff] %v9681_v3  ;;  %v6257_v0 = vpack.c.bf16 %v9681_v3, %v9667_v45  ;;  %v7305_v59 = vpop.f32.mrf.mxu0  ;;  %v4551_v53 = vadd.f32 %v4550_v34, %v4518_v11  ;;  %v4522_v11 = vmul.f32 %v9661_v32, %v9620_v52 }
 0x34b   : > { %10377 = vst [vmem:[#allocation34_spill] sm:$0xff] %v9679_v62  ;;  %v6172_v17 = vpack.c.bf16 %v9679_v62, %v9676_v6  ;;  %v7389_v28 = vpop.f32.mrf.mxu1 }
 0x34c   : > { %6326 = vst [vmem:[%s9524_s16 + $0x38] sm:$0xff] %v6257_v0   ;;  %v4067_v55 = vpop.f32.mrf.mxu0  ;;  %v4552_v57 = vadd.f32 %v4551_v53, %v4519_v38  ;;  %v9727_v2 = vpop.permute.xlu0 %4424 }
 0x34d   : > { %6310 = vst [vmem:[%s9531_s19 + $0x38] sm:$0xff] %v6172_v17   ;;  %v9697_v7 = vpop.f32.mrf.mxu1  ;;  %v9706_v0 = vadd.f32 %v4067_v55, %v9457_v31  ;;  %v9713_v17 = vpop.permute.xlu1 %4419 }
 0x34e   : > { %10379 = vst [vmem:[#allocation36_spill] sm:$0xff] %v9697_v7  ;;  %v7308_v59 = vpop.f32.mrf.mxu0  ;;  %v4553_v3 = vadd.f32 %v4552_v57, %v4520_v10  ;;  %v4523_v10 = vmul.f32 %v9669_v26, %v9623_v61 }
 0x34f   : > { %v7392_v30 = vpop.f32.mrf.mxu1  ;;  %10380 = vst [vmem:[#allocation37_spill] sm:$0xff] %v9706_v0 }
 0x350   : > { %v4070_v28 = vpop.f32.mrf.mxu0  ;;  %v4554_v59 = vadd.f32 %v4553_v3, %v4521_v14  ;;  %v4525_v14 = vmul.f32 %v9691_v25, %v9651_v9  ;;  %v9749_v9 = vpop.permute.xlu0 %4434 }
 0x351   : > { %v9709_v34 = vadd.f32 %v4070_v28, %v9462_v29  ;;  %v9711_v38 = vpop.f32.mrf.mxu1  ;;  %v4524_v28 = vmul.f32 %v9683_v19, %v9648_v44  ;;  %v9731_v46 = vpop.permute.xlu1 %4429 }
 0x352   : > { %10382 = vst [vmem:[#allocation39_spill] sm:$0xff] %v9711_v38  ;;  %v6262_v30 = vpack.c.bf16 %v9711_v38, %v9697_v7  ;;  %v7309_v53 = vpop.f32.mrf.mxu0  ;;  %v4555_v29 = vadd.f32 %v4554_v59, %v4522_v11  ;;  %v4526_v11 = vmul.f32 %v9701_v54, %v9676_v6 }
 0x353   : > { %10381 = vst [vmem:[#allocation38_spill] sm:$0xff] %v9709_v34  ;;  %v6177_v57 = vpack.c.bf16 %v9709_v34, %v9706_v0  ;;  %v7393_v31 = vpop.f32.mrf.mxu1 }
 0x354   : > { %6327 = vst [vmem:[%s9524_s16 + $0x40] sm:$0xff] %v6262_v30   ;;  %v4075_v55 = vpop.f32.mrf.mxu0  ;;  %v4556_v3 = vadd.f32 %v4555_v29, %v4523_v10 }
 0x355   : > { %6311 = vst [vmem:[%s9531_s19 + $0x40] sm:$0xff] %v6177_v57   ;;  %v9725_v52 = vpop.f32.mrf.mxu1  ;;  %v9736_v59 = vadd.f32 %v4075_v55, %v9465_v16  ;;  %v4528_v55 = vmul.f32 %v9727_v2, %v9706_v0 }
 0x356   : > { %10383 = vst [vmem:[#allocation40_spill] sm:$0xff] %v9725_v52  ;;  %v7312_v53 = vpop.f32.mrf.mxu0  ;;  %v4557_v31 = vadd.f32 %v4556_v3, %v4524_v28  ;;  %v4527_v28 = vmul.f32 %v9713_v17, %v9679_v62  ;;  %v4529_v62 = vmul.f32 %v9731_v46, %v9709_v34 }
 0x357   : > { %v7396_v61 = vpop.f32.mrf.mxu1  ;;  %10384 = vst [vmem:[#allocation41_spill] sm:$0xff] %v9736_v59 }
 0x358   : > { %v4078_v30 = vpop.f32.mrf.mxu0  ;;  %v4558_v53 = vadd.f32 %v4557_v31, %v4525_v14 }
 0x359   : > { %v9739_v57 = vadd.f32 %v4078_v30, %v9468_v41  ;;  %v9741_v10 = vpop.f32.mrf.mxu1 }
 0x35a   : > { %10386 = vst [vmem:[#allocation43_spill] sm:$0xff] %v9741_v10  ;;  %v6267_v29 = vpack.c.bf16 %v9741_v10, %v9725_v52  ;;  %v7313_v61 = vpop.f32.mrf.mxu0  ;;  %v4559_v41 = vadd.f32 %v4558_v53, %v4526_v11  ;;  %v4530_v11 = vmul.f32 %v9749_v9, %v9736_v59 }
 0x35b   : > { %10385 = vst [vmem:[#allocation42_spill] sm:$0xff] %v9739_v57  ;;  %v6182_v3 = vpack.c.bf16 %v9739_v57, %v9736_v59  ;;  %v7397_v6 = vpop.f32.mrf.mxu1  ;;  %v9757_v61 = vpop.permute.xlu1 %4439 }
 0x35c   : > { %6328 = vst [vmem:[%s9524_s16 + $0x48] sm:$0xff] %v6267_v29   ;;  %v4083_v16 = vpop.f32.mrf.mxu0  ;;  %v4560_v31 = vadd.f32 %v4559_v41, %v4527_v28  ;;  %v5270_v28 = vmul.f32 %v9526_v4, %v9590_v48  ;;  %v9773_v41 = vpop.permute.xlu0 %4444 }
 0x35d   : > { %6312 = vst [vmem:[%s9531_s19 + $0x48] sm:$0xff] %v6182_v3   ;;  %v9755_v30 = vpop.f32.mrf.mxu1  ;;  %v9764_v29 = vadd.f32 %v4083_v16, %v9471_v8  ;;  %v4531_v8 = vmul.f32 %v9757_v61, %v9739_v57  ;;  %v5272_v57 = vmul.f32 %v9547_v60, %v9595_v50 }
 0x35e   : > { %10387 = vst [vmem:[#allocation44_spill] sm:$0xff] %v9755_v30  ;;  %v7316_v14 = vpop.f32.mrf.mxu0  ;;  %v4561_v10 = vadd.f32 %v4560_v31, %v4528_v55  ;;  %v5269_v31 = vmul.f32 %v9512_v36, %v9573_v58 }
 0x35f   : > { %v7400_v44 = vpop.f32.mrf.mxu1  ;;  %10388 = vst [vmem:[#allocation45_spill] sm:$0xff] %v9764_v29  ;;  %v9785_v59 = vpop.permute.xlu1 %4449 }
 0x360   : > { %v4086_v6 = vpop.f32.mrf.mxu0  ;;  %v4562_v14 = vadd.f32 %v4561_v10, %v4529_v62  ;;  %10391 = vst [vmem:[#allocation48_spill] sm:$0xff] %v9785_v59  ;;  %v4532_v62 = vmul.f32 %v9773_v41, %v9764_v29 }
 0x361   : > { %v9767_v53 = vadd.f32 %v4086_v6, %v9474_v27  ;;  %v9769_v3 = vpop.f32.mrf.mxu1  ;;  %v5271_v6 = vmul.f32 %v9539_v15, %v9575_v49 }
 0x362   : > { %10390 = vst [vmem:[#allocation47_spill] sm:$0xff] %v9769_v3  ;;  %v6272_v44 = vpack.c.bf16 %v9769_v3, %v9755_v30  ;;  %v7317_v55 = vpop.f32.mrf.mxu0  ;;  %v4563_v0 = vadd.f32 %v4562_v14, %v4530_v11  ;;  %v9800_v14 = vpop.permute.xlu0 %4454 }
 0x363   : > { %10389 = vst [vmem:[#allocation46_spill] sm:$0xff] %v9767_v53  ;;  %v6187_v27 = vpack.c.bf16 %v9767_v53, %v9764_v29  ;;  %v7401_v16 = vpop.f32.mrf.mxu1 }
 0x364   : > { %6329 = vst [vmem:[%s9524_s16 + $0x50] sm:$0xff] %v6272_v44   ;;  %v4091_v34 = vpop.f32.mrf.mxu0  ;;  %v5303_v16 = vadd.f32 %v5270_v28, %v5269_v31  ;;  %v4564_v15 = vadd.f32 %v4563_v0, %v4531_v8  ;;  %v4533_v44 = vmul.f32 %v9785_v59, %v9767_v53 }
 0x365   : > { %6313 = vst [vmem:[%s9531_s19 + $0x50] sm:$0xff] %v6187_v27   ;;  %v9792_v10 = vadd.f32 %v4091_v34, %v9477_v23  ;;  %v9794_v55 = vpop.f32.mrf.mxu1  ;;  %v5273_v23 = vmul.f32 %v9555_v37, %v9605_v22 }
 0x366   : > { %10393 = vst [vmem:[#allocation50_spill] sm:$0xff] %v9794_v55  ;;  %v7320_v4 = vpop.f32.mrf.mxu0  ;;  %v5304_v11 = vadd.f32 %v5303_v16, %v5271_v6  ;;  %v4565_v34 = vadd.f32 %v4564_v15, %v4532_v62  ;;  %v5274_v16 = vmul.f32 %v9563_v12, %v9611_v20 }
 0x367   : > { %10392 = vst [vmem:[#allocation49_spill] sm:$0xff] %v9792_v10  ;;  %v7404_v36 = vpop.f32.mrf.mxu1  ;;  %v4534_v28 = vmul.f32 %v9800_v14, %v9792_v10 }
 0x368   : > { %v4094_v27 = vpop.f32.mrf.mxu0  ;;  %v5305_v0 = vadd.f32 %v5304_v11, %v5272_v57  ;;  %v9811_v36 = vpop.permute.xlu1 %4459  ;;  %v4566_v15 = vadd.f32 %v4565_v34, %v4533_v44  ;;  %v5275_v11 = vmul.f32 %v9571_v63, %v9617_v24 }
 0x369   : > { %v9807_v31 = vadd.f32 %v4094_v27, %v9480_v42  ;;  %v9809_v4 = vpop.f32.mrf.mxu1  ;;  %v9830_v44 = vpop.permute.xlu0 %4464 }
 0x36a   : > { %10395 = vst [vmem:[#allocation52_spill] sm:$0xff] %v9809_v4  ;;  %v6277_v8 = vpack.c.bf16 %v9809_v4, %v9794_v55  ;;  %v7321_v6 = vpop.f32.mrf.mxu0  ;;  %v5306_v57 = vadd.f32 %v5305_v0, %v5273_v23  ;;  %v4567_v29 = vadd.f32 %v4566_v15, %v4534_v28 }
 0x36b   : > { %10394 = vst [vmem:[#allocation51_spill] sm:$0xff] %v9807_v31  ;;  %v6192_v62 = vpack.c.bf16 %v9807_v31, %v9792_v10  ;;  %v4535_v42 = vmul.f32 %v9811_v36, %v9807_v31  ;;  %v7405_v27 = vpop.f32.mrf.mxu1 }
 0x36c   : > { %6330 = vst [vmem:[%s9524_s16 + $0x58] sm:$0xff] %v6277_v8   ;;  %v4099_v53 = vpop.f32.mrf.mxu0  ;;  %v5307_v10 = vadd.f32 %v5306_v57, %v5274_v16  ;;  %v5276_v27 = vmul.f32 %v9583_v21, %v9627_v56  ;;  %v9843_v57 = vpop.permute.xlu1 %4469 }
 0x36d   : > { %6314 = vst [vmem:[%s9531_s19 + $0x58] sm:$0xff] %v6192_v62   ;;  %v9826_v6 = vadd.f32 %v4099_v53, %v9483_v47  ;;  %v9828_v12 = vpop.f32.mrf.mxu1  ;;  %v4568_v8 = vadd.f32 %v4567_v29, %v4535_v42  ;;  %v5277_v47 = vmul.f32 %v9593_v1, %v9637_v51 }
 0x36e   : > { %10397 = vst [vmem:[#allocation54_spill] sm:$0xff] %v9828_v12  ;;  %v7324_v34 = vpop.f32.mrf.mxu0  ;;  %v5308_v15 = vadd.f32 %v5307_v10, %v5275_v11  ;;  %v5278_v10 = vmul.f32 %v9603_v39, %v9641_v40 }
 0x36f   : > { %10396 = vst [vmem:[#allocation53_spill] sm:$0xff] %v9826_v6  ;;  %v4536_v23 = vmul.f32 %v9830_v44, %v9826_v6  ;;  %v7408_v0 = vpop.f32.mrf.mxu1 }
 0x370   : > { %v4102_v28 = vpop.f32.mrf.mxu0  ;;  %v5309_v34 = vadd.f32 %v5308_v15, %v5276_v27 }
 0x371   : > { %v4569_v53 = vadd.f32 %v4568_v8, %v4536_v23  ;;  %v9839_v62 = vadd.f32 %v4102_v28, %v9486_v33  ;;  %v9841_v16 = vpop.f32.mrf.mxu1  ;;  %v5279_v28 = vmul.f32 %v9615_v5, %v9661_v32 }
 0x372   : > { %10399 = vst [vmem:[#allocation56_spill] sm:$0xff] %v9841_v16  ;;  %v6282_v29 = vpack.c.bf16 %v9841_v16, %v9828_v12  ;;  %v7325_v42 = vpop.f32.mrf.mxu0  ;;  %v5310_v0 = vadd.f32 %v5309_v34, %v5277_v47 }
 0x373   : > { %10398 = vst [vmem:[#allocation55_spill] sm:$0xff] %v9839_v62  ;;  %v6197_v11 = vpack.c.bf16 %v9839_v62, %v9826_v6  ;;  %v4537_v8 = vmul.f32 %v9843_v57, %v9839_v62  ;;  %v7409_v33 = vpop.f32.mrf.mxu1  ;;  %v9862_v42 = vpop.permute.xlu0 %4474 }
 0x374   : > { %6331 = vst [vmem:[%s9524_s16 + $0x60] sm:$0xff] %v6282_v29   ;;  %v4107_v23 = vpop.f32.mrf.mxu0  ;;  %v5311_v39 = vadd.f32 %v5310_v0, %v5278_v10  ;;  %v5280_v33 = vmul.f32 %v9625_v35, %v9669_v26  ;;  %v9875_v10 = vpop.permute.xlu1 %4479 }
 0x375   : > { %6315 = vst [vmem:[%s9531_s19 + $0x60] sm:$0xff] %v6197_v11   ;;  %v4570_v31 = vadd.f32 %v4569_v53, %v4537_v8  ;;  %v9858_v27 = vadd.f32 %v4107_v23, %v9489_v18  ;;  %v9860_v15 = vpop.f32.mrf.mxu1  ;;  %v5281_v18 = vmul.f32 %v9635_v43, %v9683_v19  ;;  %v5283_v43 = vmul.f32 %v9667_v45, %v9701_v54 }
 0x376   : > { %v7328_v6 = vpop.f32.mrf.mxu0  ;;  %v5312_v11 = vadd.f32 %v5311_v39, %v5279_v28 }
 0x377   : > { %10400 = vst [vmem:[#allocation57_spill] sm:$0xff] %v9858_v27  ;;  %v4538_v47 = vmul.f32 %v9862_v42, %v9858_v27  ;;  %v7412_v29 = vpop.f32.mrf.mxu1 }
 0x378   : > { %v4110_v34 = vpop.f32.mrf.mxu0  ;;  %v5313_v35 = vadd.f32 %v5312_v11, %v5280_v33  ;;  %v10403_v29 = vld [vmem:[#allocation31_spill] sm:$0xff] }
 0x379   : > { %v4571_v53 = vadd.f32 %v4570_v31, %v4538_v47  ;;  %v9871_v8 = vadd.f32 %v4110_v34, %v9492_v13  ;;  %v9873_v6 = vpop.f32.mrf.mxu1  ;;  %v5282_v39 = vmul.f32 %v10403_v29, %v9691_v25  ;;  %v9894_v29 = vpop.permute.xlu0 %4484 }
 0x37a   : > { %10402 = vst [vmem:[#allocation59_spill] sm:$0xff] %v9873_v6  ;;  %v6287_v23 = vpack.c.bf16 %v9873_v6, %v9860_v15  ;;  %v7329_v0 = vpop.f32.mrf.mxu0  ;;  %v5314_v34 = vadd.f32 %v5313_v35, %v5281_v18 }
 0x37b   : > { %10401 = vst [vmem:[#allocation58_spill] sm:$0xff] %v9871_v8  ;;  %v6202_v28 = vpack.c.bf16 %v9871_v8, %v9858_v27  ;;  %v4539_v31 = vmul.f32 %v9875_v10, %v9871_v8  ;;  %v7413_v13 = vpop.f32.mrf.mxu1  ;;  %v10404_v0 = vld [vmem:[#allocation9_spill] sm:$0xff]  ;;  %v10407_v8 = vld [vmem:[#allocation35_spill] sm:$0xff] }
 0x37c   : > { %6332 = vst [vmem:[%s9524_s16 + $0x68] sm:$0xff] %v6287_v23   ;;  %v4115_v47 = vpop.f32.mrf.mxu0  ;;  %v5315_v5 = vadd.f32 %v5314_v34, %v5282_v39  ;;  %v5284_v13 = vmul.f32 %v10407_v8, %v9713_v17  ;;  %v9907_v39 = vpop.permute.xlu1 %4489 }
 0x37d   : > { %6316 = vst [vmem:[%s9531_s19 + $0x68] sm:$0xff] %v6202_v28   ;;  %v4572_v62 = vadd.f32 %v4571_v53, %v4539_v31  ;;  %v9890_v33 = vadd.f32 %v4115_v47, %v10404_v0  ;;  %v9892_v11 = vpop.f32.mrf.mxu1  ;;  %v5285_v53 = vmul.f32 %v9697_v7, %v9727_v2  ;;  %v10408_v47 = vld [vmem:[#allocation10_spill] sm:$0xff] }
 0x37e   : > { %10406 = vst [vmem:[#allocation60_spill] sm:$0xff] %v9892_v11  ;;  %v7332_v27 = vpop.f32.mrf.mxu0  ;;  %v5316_v28 = vadd.f32 %v5315_v5, %v5283_v43  ;;  %v5286_v5 = vmul.f32 %v9711_v38, %v9731_v46  ;;  %v9926_v38 = vpop.permute.xlu0 %4494 }
 0x37f   : > { %10405 = vst [vmem:[#allocation9_spill] sm:$0xff] %v9890_v33  ;;  %v4540_v35 = vmul.f32 %v9894_v29, %v9890_v33  ;;  %v7416_v18 = vpop.f32.mrf.mxu1 }
 0x380   : > { %v4118_v23 = vpop.f32.mrf.mxu0  ;;  %v5317_v45 = vadd.f32 %v5316_v28, %v5284_v13 }
 0x381   : > { %v4573_v31 = vadd.f32 %v4572_v62, %v4540_v35  ;;  %v9903_v0 = vadd.f32 %v4118_v23, %v10408_v47  ;;  %v9905_v27 = vpop.f32.mrf.mxu1  ;;  %v5287_v47 = vmul.f32 %v9725_v52, %v9749_v9 }
 0x382   : > { %10410 = vst [vmem:[#allocation61_spill] sm:$0xff] %v9905_v27  ;;  %v6292_v34 = vpack.c.bf16 %v9905_v27, %v9892_v11  ;;  %v7333_v8 = vpop.f32.mrf.mxu0  ;;  %v5318_v23 = vadd.f32 %v5317_v45, %v5285_v53 }
 0x383   : > { %10409 = vst [vmem:[#allocation10_spill] sm:$0xff] %v9903_v0  ;;  %v6207_v43 = vpack.c.bf16 %v9903_v0, %v9890_v33  ;;  %v4541_v62 = vmul.f32 %v9907_v39, %v9903_v0  ;;  %v7417_v35 = vpop.f32.mrf.mxu1  ;;  %v10411_v8 = vld [vmem:[#allocation5_spill] sm:$0xff]  ;;  %v10414_v0 = vld [vmem:[#allocation43_spill] sm:$0xff] }
 0x384   : > { %6333 = vst [vmem:[%s9524_s16 + $0x70] sm:$0xff] %v6292_v34   ;;  %v4123_v18 = vpop.f32.mrf.mxu0  ;;  %v5319_v1 = vadd.f32 %v5318_v23, %v5286_v5  ;;  %v5288_v35 = vmul.f32 %v10414_v0, %v9757_v61  ;;  %v9939_v5 = vpop.permute.xlu1 %4499 }
 0x385   : > { %6317 = vst [vmem:[%s9531_s19 + $0x70] sm:$0xff] %v6207_v43   ;;  %v4574_v7 = vadd.f32 %v4573_v31, %v4541_v62  ;;  %v9922_v13 = vadd.f32 %v4123_v18, %v10411_v8  ;;  %v9924_v28 = vpop.f32.mrf.mxu1  ;;  %v5289_v31 = vmul.f32 %v9755_v30, %v9773_v41  ;;  %v10415_v18 = vld [vmem:[#allocation4_spill] sm:$0xff] }
 0x386   : > { %10413 = vst [vmem:[#allocation62_spill] sm:$0xff] %v9924_v28  ;;  %v7336_v33 = vpop.f32.mrf.mxu0  ;;  %v5320_v43 = vadd.f32 %v5319_v1, %v5287_v47  ;;  %v5290_v1 = vmul.f32 %v9769_v3, %v9785_v59  ;;  %v9958_v3 = vpop.permute.xlu0 %4504 }
 0x387   : > { %10412 = vst [vmem:[#allocation5_spill] sm:$0xff] %v9922_v13  ;;  %v4542_v45 = vmul.f32 %v9926_v38, %v9922_v13  ;;  %v7420_v53 = vpop.f32.mrf.mxu1 }
 0x388   : > { %v4126_v34 = vpop.f32.mrf.mxu0  ;;  %v5321_v52 = vadd.f32 %v5320_v43, %v5288_v35 }
 0x389   : > { %v4575_v62 = vadd.f32 %v4574_v7, %v4542_v45  ;;  %v9935_v8 = vadd.f32 %v4126_v34, %v10415_v18  ;;  %v9937_v33 = vpop.f32.mrf.mxu1  ;;  %v5291_v18 = vmul.f32 %v9794_v55, %v9800_v14 }
 0x38a   : > { %10417 = vst [vmem:[#allocation63_spill] sm:$0xff] %v9937_v33  ;;  %v6297_v23 = vpack.c.bf16 %v9937_v33, %v9924_v28  ;;  %v7337_v0 = vpop.f32.mrf.mxu0  ;;  %v5322_v34 = vadd.f32 %v5321_v52, %v5289_v31 }
 0x38b   : > { %10416 = vst [vmem:[#allocation4_spill] sm:$0xff] %v9935_v8  ;;  %v6212_v47 = vpack.c.bf16 %v9935_v8, %v9922_v13  ;;  %v4543_v7 = vmul.f32 %v9939_v5, %v9935_v8  ;;  %v7421_v45 = vpop.f32.mrf.mxu1  ;;  %v10418_v0 = vld [vmem:[#allocation8_spill] sm:$0xff] }
 0x38c   : > { %6334 = vst [vmem:[%s9524_s16 + $0x78] sm:$0xff] %v6297_v23   ;;  %v4131_v53 = vpop.f32.mrf.mxu0  ;;  %v5323_v59 = vadd.f32 %v5322_v34, %v5290_v1  ;;  %v5292_v45 = vmul.f32 %v9809_v4, %v9811_v36 }
 0x38d   : > { %6318 = vst [vmem:[%s9531_s19 + $0x78] sm:$0xff] %v6212_v47   ;;  %v4576_v30 = vadd.f32 %v4575_v62, %v4543_v7  ;;  %v9954_v35 = vadd.f32 %v4131_v53, %v10418_v0  ;;  %v9956_v43 = vpop.f32.mrf.mxu1  ;;  %v5293_v62 = vmul.f32 %v9828_v12, %v9830_v44  ;;  %v10421_v53 = vld [vmem:[#allocation6_spill] sm:$0xff] }
 0x38e   : > { %10420 = vst [vmem:[#allocation64_spill] sm:$0xff] %v9956_v43  ;;  %v7340_v13 = vpop.f32.mrf.mxu0  ;;  %v5324_v47 = vadd.f32 %v5323_v59, %v5291_v18 }
 0x38f   : > { %10419 = vst [vmem:[#allocation8_spill] sm:$0xff] %v9954_v35  ;;  %v4544_v52 = vmul.f32 %v9958_v3, %v9954_v35  ;;  %v7424_v31 = vpop.f32.mrf.mxu1  ;;  %v9969_v13 = vpop.permute.xlu1 %4509 }
 0x390   : > { %v4134_v23 = vpop.f32.mrf.mxu0  ;;  %v5325_v4 = vadd.f32 %v5324_v47, %v5292_v45  ;;  %v5294_v31 = vmul.f32 %v9841_v16, %v9843_v57  ;;  %v5297_v16 = vmul.f32 %v9892_v11, %v9894_v29 }
 0x391   : > { %v4577_v7 = vadd.f32 %v4576_v30, %v4544_v52  ;;  %v4171_v0 = vadd.f32 %v4134_v23, %v10421_v53  ;;  %v9967_v55 = vpop.f32.mrf.mxu1  ;;  %v5295_v52 = vmul.f32 %v9860_v15, %v9862_v42 }
 0x392   : > { %v6302_v1 = vpack.c.bf16 %v9967_v55, %v9956_v43  ;;  %v7341_v34 = vpop.f32.mrf.mxu0  ;;  %v5326_v30 = vadd.f32 %v5325_v4, %v5293_v62 }
 0x393   : > { %v6217_v59 = vpack.c.bf16 %v4171_v0, %v9954_v35  ;;  %v4545_v18 = vmul.f32 %v9969_v13, %v4171_v0  ;;  %v7425_v12 = vpop.f32.mrf.mxu1  ;;  %v5296_v34 = vmul.f32 %v9873_v6, %v9875_v10 }
 0x394   : > { %6335 = vst [vmem:[%s9524_s16 + $0x80] sm:$0xff] %v6302_v1   ;;  %v5327_v53 = vadd.f32 %v5326_v30, %v5294_v31  ;;  %v5298_v12 = vmul.f32 %v9905_v27, %v9907_v39  ;;  %v5299_v1 = vmul.f32 %v9924_v28, %v9926_v38  ;;  %v5301_v30 = vmul.f32 %v9956_v43, %v9958_v3 }
 0x395   : > { %6319 = vst [vmem:[%s9531_s19 + $0x80] sm:$0xff] %v6217_v59   ;;  %v4578_v23 = vadd.f32 %v4577_v7, %v4545_v18  ;;  %v5300_v59 = vmul.f32 %v9937_v33, %v9939_v5 }
 0x396   : > { %v5328_v47 = vadd.f32 %v5327_v53, %v5295_v52  ;;  %v5302_v53 = vmul.f32 %v9967_v55, %v9969_v13 }
 0x397   : > { %v4579_v45 = vrot.slane %v4578_v23, 4 }
 0x398   : > { %v5329_v8 = vadd.f32 %v5328_v47, %v5296_v34 }
 0x399   : > { %v4580_v35 = vadd.f32 %v4579_v45, %v4578_v23 }
 0x39a   : > { %v5330_v62 = vadd.f32 %v5329_v8, %v5297_v16 }
 0x39b   : > { %v4581_v4 = vrot.slane %v4580_v35, 2 }
 0x39c   : > { %v5331_v31 = vadd.f32 %v5330_v62, %v5298_v12 }
 0x39d   : > { %v4582_v7 = vadd.f32 %v4581_v4, %v4580_v35  ;;  %v10423_v4 = vld [vmem:[#allocation2_spill] sm:$0xff] }
 0x39e   : > { %v5332_v18 = vadd.f32 %v5331_v31, %v5299_v1  ;;  %v10424_v1 = vld [vmem:[#allocation7_spill] sm:$0xff] }
 0x39f   : > { %v4583_v52 = vrot.slane %v4582_v7, 1 }
 0x3a0   : > { %v5333_v23 = vadd.f32 %v5332_v18, %v5300_v59 }
 0x3a1   : > { %v9995_v45 = vadd.f32 %v4583_v52, %v4582_v7  ;;  %v10425_v7 = vld [vmem:[#allocation13_spill] sm:$0xff] }
 0x3a2   : > { %v5334_v34 = vadd.f32 %v5333_v23, %v5301_v30 }
 0x3a3   : > { %10422 = vst [vmem:[#allocation6_spill] sm:$0xff] %v9995_v45  ;;  %v9998_v8 = vmul.f32 0.00390625, %v9995_v45  ;;  %v10428_v45 = vld [vmem:[#allocation16_spill] sm:$0xff] }
 0x3a4   : > { %v5335_v16 = vadd.f32 %v5334_v34, %v5302_v53 }
 0x3a5   : > { %v4619_v47 = vsub.f32 %v4171_v0, %v9998_v8  ;;  %v4586_v62 = vsub.f32 %v10423_v4, %v9998_v8  ;;  %v4587_v31 = vsub.f32 %v10424_v1, %v9998_v8  ;;  %v4588_v30 = vsub.f32 %v10425_v7, %v9998_v8  ;;  %v10426_v0 = vld [vmem:[#allocation14_spill] sm:$0xff] }
 0x3a6   : > { %v5336_v35 = vrot.slane %v5335_v16, 4  ;;  %v4589_v34 = vsub.f32 %v10426_v0, %v9998_v8  ;;  %v4591_v33 = vsub.f32 %v10428_v45, %v9998_v8  ;;  %v10432_v45 = vld [vmem:[#allocation21_spill] sm:$0xff] }
 0x3a7   : > { %v10006_v18 = vmul.f32 %v4619_v47, %v9969_v13  ;;  %v4620_v52 = vmul.f32 %v4586_v62, %v9573_v58  ;;  %v4621_v23 = vmul.f32 %v4587_v31, %v9590_v48  ;;  %v4622_v4 = vmul.f32 %v4588_v30, %v9575_v49  ;;  %v10429_v62 = vld [vmem:[#allocation18_spill] sm:$0xff] }
 0x3a8   : > { %v5337_v12 = vadd.f32 %v5336_v35, %v5335_v16  ;;  %v10427_v16 = vld [vmem:[#allocation15_spill] sm:$0xff]  ;;  %v4623_v7 = vmul.f32 %v4589_v34, %v9595_v50  ;;  %v4592_v31 = vsub.f32 %v10429_v62, %v9998_v8  ;;  %v4594_v11 = vsub.f32 %v10432_v45, %v9998_v8 }
 0x3a9   : > { %v4590_v35 = vsub.f32 %v10427_v16, %v9998_v8  ;;  %v4654_v1 = vmul.f32 %v4620_v52, %v4620_v52  ;;  %v4655_v43 = vmul.f32 %v4621_v23, %v4621_v23  ;;  %v10431_v16 = vld [vmem:[#allocation19_spill] sm:$0xff]  ;;  %v4625_v52 = vmul.f32 %v4591_v33, %v9611_v20  ;;  %v10434_v33 = vld [vmem:[#allocation25_spill] sm:$0xff] }
 0x3aa   : > { %v5338_v59 = vrot.slane %v5337_v12, 2  ;;  %v4593_v30 = vsub.f32 %v10431_v16, %v9998_v8  ;;  %v4657_v23 = vmul.f32 %v4623_v7, %v4623_v7  ;;  %v4626_v34 = vmul.f32 %v4592_v31, %v9617_v24  ;;  %v10435_v31 = vld [vmem:[#allocation26_spill] sm:$0xff] }
 0x3ab   : > { %v4688_v0 = vadd.f32 %v4655_v43, %v4654_v1  ;;  %v10433_v43 = vld [vmem:[#allocation22_spill] sm:$0xff]  ;;  %v4659_v1 = vmul.f32 %v4625_v52, %v4625_v52  ;;  %v4596_v7 = vsub.f32 %v10434_v33, %v9998_v8 }
 0x3ac   : > { %v5339_v53 = vadd.f32 %v5338_v59, %v5337_v12  ;;  %v4624_v12 = vmul.f32 %v4590_v35, %v9605_v22  ;;  %v4656_v59 = vmul.f32 %v4622_v4, %v4622_v4  ;;  %v4627_v4 = vmul.f32 %v4593_v30, %v9627_v56  ;;  %v10436_v30 = vld [vmem:[#allocation29_spill] sm:$0xff] }
 0x3ad   : > { %v4630_v52 = vmul.f32 %v4596_v7, %v9661_v32  ;;  %v10440_v7 = vld [vmem:[#allocation11_spill] sm:$0xff] }
 0x3ae   : > { %v5340_v47 = vrot.slane %v5339_v53, 1  ;;  %v4689_v27 = vadd.f32 %v4688_v0, %v4656_v59  ;;  %v4658_v6 = vmul.f32 %v4624_v12, %v4624_v12  ;;  %v4628_v59 = vmul.f32 %v4594_v11, %v9637_v51  ;;  %v10437_v11 = vld [vmem:[#allocation30_spill] sm:$0xff] }
 0x3af   : > { %v4660_v0 = vmul.f32 %v4626_v34, %v4626_v34  ;;  %v4597_v12 = vsub.f32 %v10435_v31, %v9998_v8  ;;  %v4661_v45 = vmul.f32 %v4627_v4, %v4627_v4  ;;  %v4599_v34 = vsub.f32 %v10437_v11, %v9998_v8  ;;  %v10438_v31 = vld [vmem:[#allocation33_spill] sm:$0xff] }
 0x3b0   : > { %v10023_v28 = vadd.f32 %v5340_v47, %v5339_v53  ;;  %v4690_v62 = vadd.f32 %v4689_v27, %v4657_v23  ;;  %v4595_v53 = vsub.f32 %v10433_v43, %v9998_v8  ;;  %v10442_v11 = vld [vmem:[#allocation37_spill] sm:$0xff] }
 0x3b2   : > { %10430 = vst [vmem:[#allocation2_spill] sm:$0xff] %v10023_v28  ;;  %v10032_v35 = vmul.f32 0.00390625, %v10023_v28  ;;  %v4691_v47 = vadd.f32 %v4690_v62, %v4658_v6  ;;  %v4629_v23 = vmul.f32 %v4595_v53, %v9641_v40  ;;  %v4598_v6 = vsub.f32 %v10436_v30, %v9998_v8  ;;  %v10439_v53 = vld [vmem:[#allocation3_spill] sm:$0xff] }
 0x3b3   : > { %v4662_v62 = vmul.f32 %v4628_v59, %v4628_v59  ;;  %v4600_v28 = vsub.f32 %v10438_v31, %v9998_v8  ;;  %v4602_v31 = vsub.f32 %v10442_v11, %v9998_v8 }
 0x3b4   : > { %v4692_v16 = vadd.f32 %v4691_v47, %v4659_v1  ;;  %v5376_v27 = vsub.f32 %v9967_v55, %v10032_v35  ;;  %v4631_v1 = vmul.f32 %v4597_v12, %v9669_v26  ;;  %v4663_v55 = vmul.f32 %v4629_v23, %v4629_v23 }
 0x3b5   : > { %v5343_v4 = vsub.f32 %v10439_v53, %v10032_v35  ;;  %v5344_v59 = vsub.f32 %v10440_v7, %v10032_v35  ;;  %v4633_v12 = vmul.f32 %v4599_v34, %v9691_v25  ;;  %v10444_v34 = vld [vmem:[#allocation38_spill] sm:$0xff] }
 0x3b6   : > { %v4693_v43 = vadd.f32 %v4692_v16, %v4660_v0  ;;  %v4632_v0 = vmul.f32 %v4598_v6, %v9683_v19  ;;  %v4664_v16 = vmul.f32 %v4630_v52, %v4630_v52  ;;  %v4665_v23 = vmul.f32 %v4631_v1, %v4631_v1  ;;  %v10443_v52 = vld [vmem:[#allocation12_spill] sm:$0xff] }
 0x3b7   : > { %v4634_v6 = vmul.f32 %v4600_v28, %v9701_v54  ;;  %v5377_v7 = vmul.f32 %v5343_v4, %v9573_v58  ;;  %v4603_v1 = vsub.f32 %v10444_v34, %v9998_v8  ;;  %v10445_v28 = vld [vmem:[#allocation41_spill] sm:$0xff]  ;;  %v5347_v58 = vsub.f32 %v9555_v37, %v10032_v35 }
 0x3b8   : > { %v4694_v33 = vadd.f32 %v4693_v43, %v4661_v45  ;;  %v10441_v45 = vld [vmem:[#allocation34_spill] sm:$0xff]  ;;  %v4604_v11 = vsub.f32 %v10445_v28, %v9998_v8 }
 0x3b9   : > { %v4601_v43 = vsub.f32 %v10441_v45, %v9998_v8  ;;  %v5378_v45 = vmul.f32 %v5344_v59, %v9590_v48  ;;  %v5411_v59 = vmul.f32 %v5377_v7, %v5377_v7 }
 0x3ba   : > { %v4695_v47 = vadd.f32 %v4694_v33, %v4662_v62  ;;  %v10062_v33 = vmul.f32 %v5376_v27, %v9969_v13  ;;  %v4667_v27 = vmul.f32 %v4633_v12, %v4633_v12 }
 0x3bb   : > { %v4635_v13 = vmul.f32 %v4601_v43, %v9713_v17  ;;  %v10446_v43 = vld [vmem:[#allocation42_spill] sm:$0xff] }
 0x3bc   : > { %v4696_v30 = vadd.f32 %v4695_v47, %v4663_v55  ;;  %v5345_v55 = vsub.f32 %v10443_v52, %v10032_v35  ;;  %v4666_v47 = vmul.f32 %v4632_v0, %v4632_v0  ;;  %v4636_v0 = vmul.f32 %v4602_v31, %v9727_v2 }
 0x3bd   : > { %v4605_v12 = vsub.f32 %v10446_v43, %v9998_v8  ;;  %v4637_v52 = vmul.f32 %v4603_v1, %v9731_v46 }
 0x3be   : > { %v4697_v62 = vadd.f32 %v4696_v30, %v4664_v16  ;;  %v5346_v30 = vsub.f32 %v9547_v60, %v10032_v35  ;;  %v5379_v4 = vmul.f32 %v5345_v55, %v9575_v49  ;;  %v4669_v60 = vmul.f32 %v4635_v13, %v4635_v13 }
 0x3bf   : > { %v4670_v49 = vmul.f32 %v4636_v0, %v4636_v0  ;;  %v5349_v55 = vsub.f32 %v9571_v63, %v10032_v35  ;;  %v10450_v63 = vld [vmem:[#allocation49_spill] sm:$0xff] }
 0x3c0   : > { %v4698_v53 = vadd.f32 %v4697_v62, %v4665_v23  ;;  %v4668_v23 = vmul.f32 %v4634_v6, %v4634_v6  ;;  %v5412_v62 = vmul.f32 %v5378_v45, %v5378_v45  ;;  %v5380_v31 = vmul.f32 %v5346_v30, %v9595_v50  ;;  %v10448_v6 = vld [vmem:[#allocation45_spill] sm:$0xff] }
 0x3c1   : > { %v4606_v37 = vsub.f32 %v10448_v6, %v9998_v8  ;;  %v5381_v45 = vmul.f32 %v5347_v58, %v9605_v22  ;;  %v5413_v1 = vmul.f32 %v5379_v4, %v5379_v4  ;;  %v4671_v50 = vmul.f32 %v4637_v52, %v4637_v52  ;;  %v10451_v4 = vld [vmem:[#allocation20_spill] sm:$0xff]  ;;  %v10454_v6 = vld [vmem:[#allocation23_spill] sm:$0xff] }
 0x3c2   : > { %v4699_v16 = vadd.f32 %v4698_v53, %v4666_v47  ;;  %v10447_v53 = vld [vmem:[#allocation17_spill] sm:$0xff]  ;;  %v5445_v13 = vadd.f32 %v5412_v62, %v5411_v59  ;;  %v5350_v30 = vsub.f32 %v9583_v21, %v10032_v35  ;;  %v5414_v0 = vmul.f32 %v5380_v31, %v5380_v31  ;;  %v10452_v21 = vld [vmem:[#allocation51_spill] sm:$0xff] }
 0x3c3   : > { %v5348_v34 = vsub.f32 %v10447_v53, %v10032_v35  ;;  %v4640_v22 = vmul.f32 %v4606_v37, %v9773_v41  ;;  %v5351_v59 = vsub.f32 %v10451_v4, %v10032_v35  ;;  %v5415_v52 = vmul.f32 %v5381_v45, %v5381_v45  ;;  %v10456_v45 = vld [vmem:[#allocation24_spill] sm:$0xff] }
 0x3c4   : > { %v4700_v48 = vadd.f32 %v4699_v16, %v4667_v27  ;;  %v4638_v27 = vmul.f32 %v4604_v11, %v9749_v9  ;;  %v10449_v16 = vld [vmem:[#allocation46_spill] sm:$0xff]  ;;  %v5446_v43 = vadd.f32 %v5445_v13, %v5413_v1  ;;  %v4609_v53 = vsub.f32 %v10452_v21, %v9998_v8  ;;  %v10455_v13 = vld [vmem:[#allocation53_spill] sm:$0xff] }
 0x3c5   : > { %v4607_v28 = vsub.f32 %v10449_v16, %v9998_v8  ;;  %v5382_v11 = vmul.f32 %v5348_v34, %v9611_v20  ;;  %v10453_v20 = vld [vmem:[#allocation48_spill] sm:$0xff]  ;;  %v5384_v37 = vmul.f32 %v5350_v30, %v9627_v56  ;;  %v4610_v16 = vsub.f32 %v10455_v13, %v9998_v8 }
 0x3c6   : > { %v4701_v47 = vadd.f32 %v4700_v48, %v4668_v23  ;;  %v4639_v23 = vmul.f32 %v4605_v12, %v9757_v61  ;;  %v4672_v58 = vmul.f32 %v4638_v27, %v4638_v27  ;;  %v5383_v12 = vmul.f32 %v5349_v55, %v9617_v24 }
 0x3c7   : > { %v4641_v34 = vmul.f32 %v4607_v28, %v10453_v20  ;;  %v5416_v27 = vmul.f32 %v5382_v11, %v5382_v11  ;;  %v4674_v55 = vmul.f32 %v4640_v22, %v4640_v22  ;;  %v5385_v28 = vmul.f32 %v5351_v59, %v9637_v51  ;;  %v10458_v11 = vld [vmem:[#allocation27_spill] sm:$0xff] }
 0x3c8   : > { %v4702_v7 = vadd.f32 %v4701_v47, %v4669_v60  ;;  %v4608_v60 = vsub.f32 %v10450_v63, %v9998_v8  ;;  %v5447_v47 = vadd.f32 %v5446_v43, %v5414_v0  ;;  %v4673_v31 = vmul.f32 %v4639_v23, %v4639_v23  ;;  %v10457_v43 = vld [vmem:[#allocation55_spill] sm:$0xff] }
 0x3c9   : > { %v5417_v23 = vmul.f32 %v5383_v12, %v5383_v12  ;;  %v4611_v63 = vsub.f32 %v10457_v43, %v9998_v8  ;;  %v4643_v56 = vmul.f32 %v4609_v53, %v9811_v36  ;;  %v4675_v30 = vmul.f32 %v4641_v34, %v4641_v34  ;;  %v10460_v12 = vld [vmem:[#allocation28_spill] sm:$0xff] }
 0x3ca   : > { %v4703_v48 = vadd.f32 %v4702_v7, %v4670_v49  ;;  %v5352_v49 = vsub.f32 %v10454_v6, %v10032_v35  ;;  %v5448_v1 = vadd.f32 %v5447_v47, %v5415_v52  ;;  %v4642_v24 = vmul.f32 %v4608_v60, %v9800_v14  ;;  %v10459_v52 = vld [vmem:[#allocation57_spill] sm:$0xff] }
 0x3cb   : > { %v5418_v22 = vmul.f32 %v5384_v37, %v5384_v37  ;;  %v4612_v47 = vsub.f32 %v10459_v52, %v9998_v8  ;;  %v4644_v51 = vmul.f32 %v4610_v16, %v9830_v44  ;;  %v5355_v21 = vsub.f32 %v10460_v12, %v10032_v35  ;;  %v10462_v37 = vld [vmem:[#allocation31_spill] sm:$0xff] }
 0x3cc   : > { %v4704_v62 = vadd.f32 %v4703_v48, %v4671_v50  ;;  %v5353_v50 = vsub.f32 %v10456_v45, %v10032_v35  ;;  %v5449_v0 = vadd.f32 %v5448_v1, %v5416_v27  ;;  %v5386_v60 = vmul.f32 %v5352_v49, %v9641_v40  ;;  %v10463_v45 = vld [vmem:[#allocation9_spill] sm:$0xff] }
 0x3cd   : > { %v4676_v59 = vmul.f32 %v4642_v24, %v4642_v24  ;;  %v5419_v34 = vmul.f32 %v5385_v28, %v5385_v28  ;;  %v4645_v40 = vmul.f32 %v4611_v63, %v9843_v57  ;;  %v4677_v49 = vmul.f32 %v4643_v56, %v4643_v56  ;;  %v10464_v28 = vld [vmem:[#allocation32_spill] sm:$0xff] }
 0x3ce   : > { %v4705_v7 = vadd.f32 %v4704_v62, %v4672_v58  ;;  %v5354_v58 = vsub.f32 %v10458_v11, %v10032_v35  ;;  %v5450_v62 = vadd.f32 %v5449_v0, %v5417_v23  ;;  %v5387_v53 = vmul.f32 %v5353_v50, %v9661_v32 }
 0x3cf   : > { %v5356_v1 = vsub.f32 %v10462_v37, %v10032_v35  ;;  %v5420_v24 = vmul.f32 %v5386_v60, %v5386_v60  ;;  %v4646_v32 = vmul.f32 %v4612_v47, %v9862_v42  ;;  %v4678_v50 = vmul.f32 %v4644_v51, %v4644_v51  ;;  %v10467_v51 = vld [vmem:[#allocation5_spill] sm:$0xff]  ;;  %v10470_v37 = vld [vmem:[#allocation39_spill] sm:$0xff] }
 0x3d0   : > { %v4706_v48 = vadd.f32 %v4705_v7, %v4673_v31  ;;  %v5451_v6 = vadd.f32 %v5450_v62, %v5418_v22  ;;  %v10461_v7 = vld [vmem:[#allocation58_spill] sm:$0xff]  ;;  %v5388_v16 = vmul.f32 %v5354_v58, %v9669_v26  ;;  %v5357_v23 = vsub.f32 %v10464_v28, %v10032_v35 }
 0x3d1   : > { %v4613_v27 = vsub.f32 %v10461_v7, %v9998_v8  ;;  %v5389_v43 = vmul.f32 %v5355_v21, %v9683_v19  ;;  %v5421_v63 = vmul.f32 %v5387_v53, %v5387_v53  ;;  %v4679_v58 = vmul.f32 %v4645_v40, %v4645_v40  ;;  %v10468_v21 = vld [vmem:[#allocation36_spill] sm:$0xff] }
 0x3d2   : > { %v4707_v4 = vadd.f32 %v4706_v48, %v4674_v55  ;;  %v5452_v55 = vadd.f32 %v5451_v6, %v5419_v34  ;;  %v4614_v48 = vsub.f32 %v10463_v45, %v9998_v8  ;;  %v5390_v62 = vmul.f32 %v5356_v1, %v9691_v25  ;;  %v10471_v45 = vld [vmem:[#allocation8_spill] sm:$0xff] }
 0x3d3   : > { %v4647_v26 = vmul.f32 %v4613_v27, %v9875_v10  ;;  %v5422_v52 = vmul.f32 %v5388_v16, %v5388_v16  ;;  %v4680_v12 = vmul.f32 %v4646_v32, %v4646_v32  ;;  %v5391_v34 = vmul.f32 %v5357_v23, %v9701_v54  ;;  %v10469_v27 = vld [vmem:[#allocation4_spill] sm:$0xff] }
 0x3d4   : > { %v4708_v31 = vadd.f32 %v4707_v4, %v4675_v30  ;;  %v5453_v56 = vadd.f32 %v5452_v55, %v5420_v24  ;;  %v10465_v30 = vld [vmem:[#allocation10_spill] sm:$0xff]  ;;  %v10466_v4 = vld [vmem:[#allocation35_spill] sm:$0xff]  ;;  %v4648_v19 = vmul.f32 %v4614_v48, %v9894_v29  ;;  %v5423_v6 = vmul.f32 %v5389_v43, %v5389_v43 }
 0x3d5   : > { %v4615_v11 = vsub.f32 %v10465_v30, %v9998_v8  ;;  %v5358_v60 = vsub.f32 %v10466_v4, %v10032_v35  ;;  %v4617_v40 = vsub.f32 %v10469_v27, %v9998_v8  ;;  %v5360_v1 = vsub.f32 %v10470_v37, %v10032_v35 }
 0x3d6   : > { %v4709_v13 = vadd.f32 %v4708_v31, %v4676_v59  ;;  %v5454_v47 = vadd.f32 %v5453_v56, %v5421_v63  ;;  %v4616_v59 = vsub.f32 %v10467_v51, %v9998_v8  ;;  %v5359_v31 = vsub.f32 %v10468_v21, %v10032_v35 }
 0x3d7   : > { %v4649_v25 = vmul.f32 %v4615_v11, %v9907_v39  ;;  %v5392_v16 = vmul.f32 %v5358_v60, %v9713_v17  ;;  %v5424_v24 = vmul.f32 %v5390_v62, %v5390_v62  ;;  %v4618_v48 = vsub.f32 %v10471_v45, %v9998_v8  ;;  %v10473_v17 = vld [vmem:[#allocation43_spill] sm:$0xff]  ;;  %v10474_v62 = vld [vmem:[#allocation44_spill] sm:$0xff]  ;;  %v10478_v45 = vld [vmem:[#allocation54_spill] sm:$0xff] }
 0x3d8   : > { %v4710_v0 = vadd.f32 %v4709_v13, %v4677_v49  ;;  %v5455_v7 = vadd.f32 %v5454_v47, %v5422_v52  ;;  %v4681_v49 = vmul.f32 %v4647_v26, %v4647_v26  ;;  %v4650_v54 = vmul.f32 %v4616_v59, %v9926_v38 }
 0x3d9   : > { %v4682_v32 = vmul.f32 %v4648_v19, %v4648_v19  ;;  %v5425_v43 = vmul.f32 %v5391_v34, %v5391_v34  ;;  %v4651_v56 = vmul.f32 %v4617_v40, %v9939_v5  ;;  %v4683_v30 = vmul.f32 %v4649_v25, %v4649_v25 }
 0x3da   : > { %v4711_v22 = vadd.f32 %v4710_v0, %v4678_v50  ;;  %v5456_v55 = vadd.f32 %v5455_v7, %v5423_v6  ;;  %v10472_v50 = vld [vmem:[#allocation40_spill] sm:$0xff]  ;;  %v5393_v0 = vmul.f32 %v5359_v31, %v9727_v2  ;;  %v5362_v11 = vsub.f32 %v10473_v17, %v10032_v35  ;;  %v10476_v7 = vld [vmem:[#allocation50_spill] sm:$0xff] }
 0x3db   : > { %v5361_v28 = vsub.f32 %v10472_v50, %v10032_v35  ;;  %v5394_v8 = vmul.f32 %v5360_v1, %v9731_v46  ;;  %v4652_v60 = vmul.f32 %v4618_v48, %v9958_v3  ;;  %v5363_v52 = vsub.f32 %v10474_v62, %v10032_v35  ;;  %v10477_v1 = vld [vmem:[#allocation52_spill] sm:$0xff] }
 0x3dc   : > { %v4712_v53 = vadd.f32 %v4711_v22, %v4679_v58  ;;  %v5457_v63 = vadd.f32 %v5456_v55, %v5424_v24  ;;  %v5426_v58 = vmul.f32 %v5392_v16, %v5392_v16  ;;  %v4684_v22 = vmul.f32 %v4650_v54, %v4650_v54 }
 0x3dd   : > { %v5395_v47 = vmul.f32 %v5361_v28, %v9749_v9  ;;  %v5427_v51 = vmul.f32 %v5393_v0, %v5393_v0  ;;  %v4685_v19 = vmul.f32 %v4651_v56, %v4651_v56  ;;  %v5396_v46 = vmul.f32 %v5362_v11, %v9757_v61  ;;  %v10479_v28 = vld [vmem:[#allocation56_spill] sm:$0xff] }
 0x3de   : > { %v4713_v13 = vadd.f32 %v4712_v53, %v4680_v12  ;;  %v5458_v4 = vadd.f32 %v5457_v63, %v5425_v43  ;;  %v10475_v12 = vld [vmem:[#allocation47_spill] sm:$0xff]  ;;  %v5428_v53 = vmul.f32 %v5394_v8, %v5394_v8  ;;  %v4686_v6 = vmul.f32 %v4652_v60, %v4652_v60  ;;  %v10481_v60 = vld [vmem:[#allocation60_spill] sm:$0xff] }
 0x3df   : > { %v5364_v21 = vsub.f32 %v10475_v12, %v10032_v35  ;;  %v5365_v27 = vsub.f32 %v10476_v7, %v10032_v35  ;;  %v5397_v25 = vmul.f32 %v5363_v52, %v9773_v41  ;;  %v4687_v37 = vmul.f32 %v10006_v18, %v10006_v18 }
 0x3e0   : > { %v4714_v23 = vadd.f32 %v4713_v13, %v4681_v49  ;;  %v5459_v59 = vadd.f32 %v5458_v4, %v5426_v58  ;;  %v5429_v49 = vmul.f32 %v5395_v47, %v5395_v47  ;;  %v5366_v13 = vsub.f32 %v10477_v1, %v10032_v35 }
 0x3e1   : > { %v5398_v61 = vmul.f32 %v5364_v21, %v10453_v20  ;;  %v5430_v24 = vmul.f32 %v5396_v46, %v5396_v46  ;;  %v5367_v48 = vsub.f32 %v10478_v45, %v10032_v35  ;;  %v5431_v41 = vmul.f32 %v5397_v25, %v5397_v25 }
 0x3e2   : > { %v4715_v26 = vadd.f32 %v4714_v23, %v4682_v32  ;;  %v5460_v34 = vadd.f32 %v5459_v59, %v5427_v51  ;;  %v5399_v32 = vmul.f32 %v5365_v27, %v9800_v14  ;;  %v5368_v23 = vsub.f32 %v10479_v28, %v10032_v35  ;;  %v10480_v14 = vld [vmem:[#allocation59_spill] sm:$0xff] }
 0x3e3   : > { %v5400_v0 = vmul.f32 %v5366_v13, %v9811_v36  ;;  %v5432_v43 = vmul.f32 %v5398_v61, %v5398_v61  ;;  %v5369_v20 = vsub.f32 %v9860_v15, %v10032_v35 }
 0x3e4   : > { %v4716_v2 = vadd.f32 %v4715_v26, %v4683_v30  ;;  %v5461_v9 = vadd.f32 %v5460_v34, %v5428_v53  ;;  %v5401_v30 = vmul.f32 %v5367_v48, %v9830_v44  ;;  %v5433_v17 = vmul.f32 %v5399_v32, %v5399_v32  ;;  %v10484_v34 = vld [vmem:[#allocation63_spill] sm:$0xff] }
 0x3e5   : > { %v5370_v26 = vsub.f32 %v10480_v14, %v10032_v35  ;;  %v5402_v58 = vmul.f32 %v5368_v23, %v9843_v57  ;;  %v5434_v4 = vmul.f32 %v5400_v0, %v5400_v0  ;;  %v5403_v15 = vmul.f32 %v5369_v20, %v9862_v42  ;;  %v10483_v57 = vld [vmem:[#allocation62_spill] sm:$0xff] }
 0x3e6   : > { %v4717_v31 = vadd.f32 %v4716_v2, %v4684_v22  ;;  %v5462_v55 = vadd.f32 %v5461_v9, %v5429_v49  ;;  %v5371_v22 = vsub.f32 %v10481_v60, %v10032_v35  ;;  %v5435_v52 = vmul.f32 %v5401_v30, %v5401_v30  ;;  %v10482_v2 = vld [vmem:[#allocation61_spill] sm:$0xff]  ;;  %v10486_v49 = vld [vmem:[#allocation64_spill] sm:$0xff]  ;;  %v10487_v0 = vld [vmem:[#allocation2_spill] sm:$0xff] }
 0x3e7   : > { %v5372_v47 = vsub.f32 %v10482_v2, %v10032_v35  ;;  %v5404_v59 = vmul.f32 %v5370_v26, %v9875_v10  ;;  %v5373_v21 = vsub.f32 %v10483_v57, %v10032_v35  ;;  %v5437_v46 = vmul.f32 %v5403_v15, %v5403_v15 }
 0x3e8   : > { %v4718_v40 = vadd.f32 %v4717_v31, %v4685_v19  ;;  %v5463_v50 = vadd.f32 %v5462_v55, %v5430_v24  ;;  %v5436_v19 = vmul.f32 %v5402_v58, %v5402_v58  ;;  %v5405_v31 = vmul.f32 %v5371_v22, %v9894_v29 }
 0x3e9   : > { %v5374_v10 = vsub.f32 %v10484_v34, %v10032_v35  ;;  %v5406_v27 = vmul.f32 %v5372_v47, %v9907_v39  ;;  %v5375_v9 = vsub.f32 %v10486_v49, %v10032_v35  ;;  %v5444_v35 = vmul.f32 %v10062_v33, %v10062_v33 }
 0x3ea   : > { %v4719_v16 = vadd.f32 %v4718_v40, %v4686_v6  ;;  %v5464_v63 = vadd.f32 %v5463_v50, %v5431_v41  ;;  %v10485_v6 = vld [vmem:[#allocation6_spill] sm:$0xff]  ;;  %v5438_v40 = vmul.f32 %v5404_v59, %v5404_v59  ;;  %v5439_v29 = vmul.f32 %v5405_v31, %v5405_v31 }
 0x3eb   : > { %v5408_v13 = vmul.f32 %v5374_v10, %v9939_v5  ;;  %v5409_v24 = vmul.f32 %v5375_v9, %v9958_v3 }
 0x3ec   : > { %v4720_v54 = vadd.f32 %v4719_v16, %v4687_v37  ;;  %v5465_v11 = vadd.f32 %v5464_v63, %v5432_v43  ;;  %v5407_v37 = vmul.f32 %v5373_v21, %v9926_v38  ;;  %v5440_v16 = vmul.f32 %v5406_v27, %v5406_v27 }
 0x3ed   : > { %v5442_v39 = vmul.f32 %v5408_v13, %v5408_v13 }
 0x3ee   : > { %v4721_v18 = vrot.slane %v4720_v54, 4  ;;  %v5466_v36 = vadd.f32 %v5465_v11, %v5433_v17  ;;  %v5441_v55 = vmul.f32 %v5407_v37, %v5407_v37 }
 0x3f0   : > { %v4722_v56 = vadd.f32 %v4721_v18, %v4720_v54  ;;  %v5467_v44 = vadd.f32 %v5466_v36, %v5434_v4  ;;  %v5443_v54 = vmul.f32 %v5409_v24, %v5409_v24 }
 0x3f2   : > { %v4723_v8 = vrot.slane %v4722_v56, 2  ;;  %v5468_v12 = vadd.f32 %v5467_v44, %v5435_v52 }
 0x3f4   : > { %v4724_v62 = vadd.f32 %v4723_v8, %v4722_v56  ;;  %v5469_v53 = vadd.f32 %v5468_v12, %v5436_v19 }
 0x3f6   : > { %v4725_v51 = vrot.slane %v4724_v62, 1  ;;  %v5470_v25 = vadd.f32 %v5469_v53, %v5437_v46 }
 0x3f8   : > { %v4726_v42 = vadd.f32 %v4725_v51, %v4724_v62  ;;  %v5471_v1 = vadd.f32 %v5470_v25, %v5438_v40 }
 0x3fa   : > { %v4728_v7 = vsel %vm4727_vm5, %v10485_v6, %v4726_v42  ;;  %v5472_v61 = vadd.f32 %v5471_v1, %v5439_v29 }
 0x3fb   : > { %4729 = vst [vmem:[%s307_s26] sm:$0x3] %v4728_v7 }
 0x3fc   : > { %v5473_v45 = vadd.f32 %v5472_v61, %v5440_v16 }
 0x3fe   : > { %v5474_v48 = vadd.f32 %v5473_v45, %v5441_v55 }
 0x400   : > { %v5475_v32 = vadd.f32 %v5474_v48, %v5442_v39 }
 0x402   : > { %v5476_v41 = vadd.f32 %v5475_v32, %v5443_v54 }
 0x404   : > { %v5477_v38 = vadd.f32 %v5476_v41, %v5444_v35 }
 0x406   : > { %v5478_v50 = vrot.slane %v5477_v38, 4 }
 0x408   : > { %v5479_v28 = vadd.f32 %v5478_v50, %v5477_v38 }
 0x40a   : > { %v5480_v23 = vrot.slane %v5479_v28, 2 }
 0x40c   : > { %v5481_v5 = vadd.f32 %v5480_v23, %v5479_v28 }
 0x40e   : > { %v5482_v18 = vrot.slane %v5481_v5, 1 }
 0x410   : > { %v5483_v3 = vadd.f32 %v5482_v18, %v5481_v5 }
 0x412   : > { %v5484_v43 = vsel %vm4727_vm5, %v10487_v0, %v5483_v3 }
 0x413   : > { %5485 = vst [vmem:[%s311_s29] sm:$0x3] %v5484_v43 }
 0x414 PF: > { %s18_s24 = sadd.s32 1, %s7685_s24  }
 0x415   : > { %p15_p4 = scmp.ge.s32.totalorder %s18_s24, 4  }
 0x417   :  { %17 = sbr.rel (!%p15_p4) target bundleno = 1 (0x1), region = 110 }

</bundles_post_ra>
